<compile_context>
chip_gen: v7x
topology: tpu7x:2x2x1
jax: 0.10.0
libtpu: 0.0.40
codegen_flags: <defaults>
</compile_context>

<pallas_src>
import jax
import jax.numpy as jnp
from jax.experimental import pallas as pl
from jax.experimental.pallas import tpu as pltpu


# ---------------------------------------------------------------------------
# Helpers
# ---------------------------------------------------------------------------
def _round_up(x, m):
    return ((x + m - 1) // m) * m


def _choose_tile(n, unit, max_tile):
    """Largest multiple of `unit` <= max_tile that does not exceed n; when
    n < unit the caller pads the array up to `unit`."""
    if n < unit:
        return unit
    return min(max_tile, (n // unit) * unit)


# ---------------------------------------------------------------------------
# Pallas kernels
# ---------------------------------------------------------------------------
def _conv_gemm_relu_kernel(w_ref, x_ref, b_ref, o_ref):
    # (Cout, K) bf16 @ (K, TN) bf16 -> f32 accumulation; + bias, ReLU; bf16 out
    y = jnp.dot(w_ref[...], x_ref[...], preferred_element_type=jnp.float32)
    y = jnp.maximum(y + b_ref[...], 0.0)
    o_ref[...] = y.astype(o_ref.dtype)


def _fc_stack_softmax_kernel(x_ref, w1_ref, b1_ref, w2_ref, b2_ref,
                             w3_ref, b3_ref, o_ref):
    # fc1 + ReLU
    h = jnp.dot(x_ref[...], w1_ref[...], preferred_element_type=jnp.float32)
    h = jnp.maximum(h + b1_ref[...], 0.0)
    # fc2 + ReLU
    h = jnp.dot(h.astype(w2_ref.dtype), w2_ref[...],
                preferred_element_type=jnp.float32)
    h = jnp.maximum(h + b2_ref[...], 0.0)
    # fc3 (lane-padded to 128; padded lanes carry a -1e30 bias)
    y = jnp.dot(h.astype(w3_ref.dtype), w3_ref[...],
                preferred_element_type=jnp.float32)
    y = y + b3_ref[...]
    # row-wise, numerically stable softmax in f32
    m = jnp.max(y, axis=-1, keepdims=True)
    e = jnp.exp(y - m)
    denom = jnp.sum(e, axis=-1, keepdims=True)
    o_ref[...] = (e * pl.reciprocal(denom, approx=True)).astype(o_ref.dtype)


# ---------------------------------------------------------------------------
# pallas_call wrappers
# ---------------------------------------------------------------------------
def conv_gemm_relu(w2d, patches, b_col, *, max_tn=1024):
    """(Cout, K) @ (K, N) + bias, ReLU.  Lane-dense output, tiled over N."""
    cout, K = w2d.shape
    K2, N = patches.shape
    assert K == K2
    tn = _choose_tile(N, 128, max_tn)
    if N < tn:                                       # tiny spatial extents
        patches = jnp.pad(patches, ((0, 0), (0, tn - N)))
    Np = patches.shape[1]
    grid = (pl.cdiv(Np, tn),)

    out = pl.pallas_call(
        _conv_gemm_relu_kernel,
        out_shape=jax.ShapeDtypeStruct((cout, Np), jnp.bfloat16),
        grid=grid,
        in_specs=[
            pl.BlockSpec((cout, K), lambda i: (0, 0)),   # weight resident
            pl.BlockSpec((K, tn), lambda i: (0, i)),     # patches tiled over N
            pl.BlockSpec((cout, 1), lambda i: (0, 0)),   # bias column
        ],
        out_specs=pl.BlockSpec((cout, tn), lambda i: (0, i)),
        compiler_params=pltpu.CompilerParams(
            dimension_semantics=("parallel",),
            vmem_limit_bytes=32 * 1024 * 1024),
        cost_estimate=pl.CostEstimate(
            flops=2 * cout * K * Np,
            transcendentals=0,
            bytes_accessed=cout * K * 2 + K * Np * 2 + cout * 4
                           + cout * Np * 2),
    )(w2d, patches, b_col)
    return out[:, :N] if Np != N else out


def fc_stack_softmax(x, w1, b1, w2, b2, w3, b3, *, n_actions, max_tm=256):
    """Fused fc1+ReLU, fc2+ReLU, fc3, softmax.  Tiled over batch rows."""
    B, K1 = x.shape
    F1 = w1.shape[1]
    F2 = w2.shape[1]
    n_pad = _round_up(max(n_actions, 1), 128)

    # Pad fc3 to a lane-dense width; padded logits get a -1e30 bias so the
    # softmax gives them probability exactly 0.
    w3p = jnp.zeros((F2, n_pad), w3.dtype).at[:, :n_actions].set(w3)
    b3p = jnp.full((1, n_pad), -1e30, jnp.float32).at[:, :n_actions].set(
        b3.reshape(1, n_actions).astype(jnp.float32))

    tm = _choose_tile(B, 16, max_tm)
    if B < tm:
        x = jnp.pad(x, ((0, tm - B), (0, 0)))
    Bp = x.shape[0]
    grid = (pl.cdiv(Bp, tm),)

    probs = pl.pallas_call(
        _fc_stack_softmax_kernel,
        out_shape=jax.ShapeDtypeStruct((Bp, n_pad), jnp.float32),
        grid=grid,
        in_specs=[
            pl.BlockSpec((tm, K1), lambda i: (i, 0)),    # activations tiled
            pl.BlockSpec((K1, F1), lambda i: (0, 0)),    # fc1 weight resident
            pl.BlockSpec((1, F1), lambda i: (0, 0)),
            pl.BlockSpec((F1, F2), lambda i: (0, 0)),    # fc2 weight resident
            pl.BlockSpec((1, F2), lambda i: (0, 0)),
            pl.BlockSpec((F2, n_pad), lambda i: (0, 0)), # fc3 weight resident
            pl.BlockSpec((1, n_pad), lambda i: (0, 0)),
        ],
        out_specs=pl.BlockSpec((tm, n_pad), lambda i: (i, 0)),
        compiler_params=pltpu.CompilerParams(
            dimension_semantics=("parallel",),
            vmem_limit_bytes=32 * 1024 * 1024),
        cost_estimate=pl.CostEstimate(
            flops=2 * Bp * (K1 * F1 + F1 * F2 + F2 * n_pad),
            transcendentals=Bp * n_pad,
            bytes_accessed=(Bp * K1 + K1 * F1 + F1 * F2 + F2 * n_pad) * 2
                           + (F1 + F2 + n_pad) * 4 + Bp * n_pad * 4),
    )(x, w1, b1, w2, b2, w3p, b3p)
    return probs[:B, :n_actions]


# ---------------------------------------------------------------------------
# Glue: im2col patch extraction in the (C, B, H, W) activation layout
# ---------------------------------------------------------------------------
def _im2col_cbhw(x, k, stride):
    # x: (C, B, H, W)  ->  (C*k*k, B*OH*OW), rows ordered (c, kh, kw) to match
    # torch_weight.reshape(C_out, -1).
    C, B, H, W = x.shape
    oh = (H - k) // stride + 1
    ow = (W - k) // stride + 1
    rows = (jnp.arange(oh) * stride)[:, None] + jnp.arange(k)[None, :]  # (oh,k)
    cols = (jnp.arange(ow) * stride)[:, None] + jnp.arange(k)[None, :]  # (ow,k)
    p = x[:, :, rows, :]                        # (C, B, oh, k, W)
    p = p[:, :, :, :, cols]                     # (C, B, oh, k, ow, k)
    p = jnp.transpose(p, (0, 3, 5, 1, 2, 4))    # (C, kh, kw, B, oh, ow)
    return p.reshape(C * k * k, B * oh * ow), oh, ow


def conv2d_relu(x, w, b, *, stride):
    # x: (Cin, B, H, W) bf16; w: (Cout, Cin, k, k) f32; b: (Cout,) f32
    # returns (Cout, B, OH, OW) bf16
    # TODO(synk): im2col patch extraction still runs as XLA glue; fusing it
    # into the conv GEMM pipeline (manual DMA gather) would remove this HBM
    # round trip of the patch matrix.
    cout, cin, k, _ = w.shape
    B = x.shape[1]
    patches, oh, ow = _im2col_cbhw(x, k, stride)            # (Cin*k*k, B*oh*ow)
    w2d = w.reshape(cout, cin * k * k).astype(jnp.bfloat16)
    b_col = b.reshape(cout, 1).astype(jnp.float32)
    y = conv_gemm_relu(w2d, patches, b_col)                 # (Cout, B*oh*ow)
    return y.reshape(cout, B, oh, ow)


# ---------------------------------------------------------------------------
# Parameters (deterministic synthetic init: He-normal weights, zero bias)
# ---------------------------------------------------------------------------
def init_params(key, c, n_actions, fc1_dims=512, fc2_dims=512):
    ks = jax.random.split(key, 6)

    def he(k, shape, fan_in):
        return (jax.random.normal(k, shape, jnp.float32)
                * jnp.sqrt(2.0 / fan_in)).astype(jnp.float32)

    return {
        "conv1_w": he(ks[0], (32, c, 8, 8), c * 8 * 8),
        "conv1_b": jnp.zeros((32,), jnp.float32),
        "conv2_w": he(ks[1], (64, 32, 4, 4), 32 * 4 * 4),
        "conv2_b": jnp.zeros((64,), jnp.float32),
        "conv3_w": he(ks[2], (64, 64, 3, 3), 64 * 3 * 3),
        "conv3_b": jnp.zeros((64,), jnp.float32),
        "fc1_w": he(ks[3], (3136, fc1_dims), 3136),
        "fc1_b": jnp.zeros((1, fc1_dims), jnp.float32),
        "fc2_w": he(ks[4], (fc1_dims, fc2_dims), fc1_dims),
        "fc2_b": jnp.zeros((1, fc2_dims), jnp.float32),
        "fc3_w": he(ks[5], (fc2_dims, n_actions), fc2_dims),
        "fc3_b": jnp.zeros((1, n_actions), jnp.float32),
    }


# ---------------------------------------------------------------------------
# Forward pass (returns Categorical probs, i.e. the parameters of `dist`)
# ---------------------------------------------------------------------------
@jax.jit
def actor_forward(params, state):
    # state: (B, C, 84, 84) NCHW float32
    B, C, H, W = state.shape
    if H != 84 or W != 84:
        raise ValueError(f"Expecting input 84x84, got {H}x{W}")

    # (C, B, H, W) activation layout -> no per-layer NCHW transposes.
    x = jnp.transpose(state, (1, 0, 2, 3)).astype(jnp.bfloat16)
    x = conv2d_relu(x, params["conv1_w"], params["conv1_b"], stride=4)  # (32,B,20,20)
    x = conv2d_relu(x, params["conv2_w"], params["conv2_b"], stride=2)  # (64,B, 9, 9)
    x = conv2d_relu(x, params["conv3_w"], params["conv3_b"], stride=1)  # (64,B, 7, 7)

    # nn.Flatten: (B, C*H*W) in (C, H, W) order.
    x = jnp.transpose(x, (1, 0, 2, 3)).reshape(B, -1)                   # (B, 3136) bf16

    probs = fc_stack_softmax(
        x,
        params["fc1_w"].astype(jnp.bfloat16), params["fc1_b"],
        params["fc2_w"].astype(jnp.bfloat16), params["fc2_b"],
        params["fc3_w"].astype(jnp.bfloat16), params["fc3_b"],
        n_actions=params["fc3_w"].shape[1])
    # TODO(synk): torch.distributions.Categorical wrapper has no Pallas
    # equivalent; we return its parameterizing probabilities.
    return probs


if __name__ == "__main__":
    key = jax.random.PRNGKey(0)
    k_param, k_input = jax.random.split(key)

    batch, channels, n_actions = 2, 4, 6
    # The module hard-requires 84x84 spatial input.
    state = jax.random.uniform(k_input, (batch, channels, 84, 84), jnp.float32)
    params = init_params(k_param, channels, n_actions)

    probs = jax.block_until_ready(actor_forward(params, state))

    assert probs.shape == (batch, n_actions)
    assert bool(jnp.all(jnp.isfinite(probs)))
    assert bool(jnp.all(probs >= 0.0))
    # approx reciprocal in the softmax -> sums match 1 to ~1e-3
    assert bool(jnp.allclose(jnp.sum(probs, axis=-1), 1.0, atol=5e-3))
    print("KERNEL_OK")
</pallas_src>

<mosaic_0001>
module attributes {stable_mosaic.version = 11 : i64} {
  func.func @_conv_gemm_relu_kernel(%arg0: i32, %arg1: memref<32x256xbf16, #tpu.memory_space<vmem>>, %arg2: memref<256x768xbf16, #tpu.memory_space<vmem>>, %arg3: memref<32x1xf32, #tpu.memory_space<vmem>>, %arg4: memref<32x768xbf16, #tpu.memory_space<vmem>>) attributes {dimension_semantics = [#tpu.dimension_semantics<parallel>], iteration_bounds = array<i64: 2>, scalar_prefetch = 0 : i64, scratch_operands = 0 : i64, tpu.core_type = #tpu.core_type<tc>, window_params = [{pipeline_mode = #tpu.pipeline_mode<synchronous>, transform_indices = @transform_0, window_bounds = array<i64: 32, 256>}, {transform_indices = @transform_1, window_bounds = array<i64: 256, 768>}, {pipeline_mode = #tpu.pipeline_mode<synchronous>, transform_indices = @transform_2, window_bounds = array<i64: 32, 1>}, {transform_indices = @transform_3, window_bounds = array<i64: 32, 768>}]} {
    %c0 = arith.constant 0 : index
    %c0_0 = arith.constant 0 : index
    %0 = vector.load %arg1[%c0, %c0_0] : memref<32x256xbf16, #tpu.memory_space<vmem>>, vector<32x256xbf16>
    %c0_1 = arith.constant 0 : index
    %c0_2 = arith.constant 0 : index
    %1 = vector.load %arg2[%c0_1, %c0_2] : memref<256x768xbf16, #tpu.memory_space<vmem>>, vector<256x768xbf16>
    %cst = arith.constant dense<0.000000e+00> : vector<32x768xf32>
    %2 = tpu.matmul %0, %1, %cst {dimension_numbers = #tpu.dot_dimension_numbers<[1], [0], [0], [1], [0, 0, 1, 1], [], []>} : vector<32x256xbf16>, vector<256x768xbf16>, vector<32x768xf32> -> vector<32x768xf32>
    %c0_3 = arith.constant 0 : index
    %c0_4 = arith.constant 0 : index
    %3 = vector.load %arg3[%c0_3, %c0_4] : memref<32x1xf32, #tpu.memory_space<vmem>>, vector<32x1xf32>
    %4 = vector.broadcast %3 : vector<32x1xf32> to vector<32x768xf32>
    %5 = arith.addf %2, %4 : vector<32x768xf32>
    %cst_5 = arith.constant 0.000000e+00 : f32
    %6 = vector.broadcast %cst_5 : f32 to vector<32x768xf32>
    %7 = arith.maximumf %5, %6 : vector<32x768xf32>
    %8 = arith.truncf %7 : vector<32x768xf32> to vector<32x768xbf16>
    %c0_6 = arith.constant 0 : index
    %c0_7 = arith.constant 0 : index
    %9 = vector.load %arg4[%c0_6, %c0_7] : memref<32x768xbf16, #tpu.memory_space<vmem>>, vector<32x768xbf16>
    tpu.vector_store %arg4[%c0_6, %c0_7], %8 {strides = array<i32>} : memref<32x768xbf16, #tpu.memory_space<vmem>>, vector<32x768xbf16>,
    return
  }
  func.func @transform_0(%arg0: i32) -> (i32, i32) {
    %c0_i32 = arith.constant 0 : i32
    %c0_i32_0 = arith.constant 0 : i32
    %c0_i32_1 = arith.constant 0 : i32
    return %c0_i32, %c0_i32_0 : i32, i32
  }
  func.func @transform_1(%arg0: i32) -> (i32, i32) {
    %c0_i32 = arith.constant 0 : i32
    %c0_i32_0 = arith.constant 0 : i32
    return %c0_i32, %arg0 : i32, i32
  }
  func.func @transform_2(%arg0: i32) -> (i32, i32) {
    %c0_i32 = arith.constant 0 : i32
    %c0_i32_0 = arith.constant 0 : i32
    %c0_i32_1 = arith.constant 0 : i32
    return %c0_i32, %c0_i32_0 : i32, i32
  }
  func.func @transform_3(%arg0: i32) -> (i32, i32) {
    %c0_i32 = arith.constant 0 : i32
    %c0_i32_0 = arith.constant 0 : i32
    return %c0_i32, %arg0 : i32, i32
  }
}

module attributes {stable_mosaic.version = 11 : i64} {
  func.func @_conv_gemm_relu_kernel(%arg0: i32, %arg1: memref<64x512xbf16, #tpu.memory_space<vmem>>, %arg2: memref<512x128xbf16, #tpu.memory_space<vmem>>, %arg3: memref<64x1xf32, #tpu.memory_space<vmem>>, %arg4: memref<64x128xbf16, #tpu.memory_space<vmem>>) attributes {dimension_semantics = [#tpu.dimension_semantics<parallel>], iteration_bounds = array<i64: 2>, scalar_prefetch = 0 : i64, scratch_operands = 0 : i64, tpu.core_type = #tpu.core_type<tc>, window_params = [{pipeline_mode = #tpu.pipeline_mode<synchronous>, transform_indices = @transform_0, window_bounds = array<i64: 64, 512>}, {transform_indices = @transform_1, window_bounds = array<i64: 512, 128>}, {pipeline_mode = #tpu.pipeline_mode<synchronous>, transform_indices = @transform_2, window_bounds = array<i64: 64, 1>}, {transform_indices = @transform_3, window_bounds = array<i64: 64, 128>}]} {
    %c0 = arith.constant 0 : index
    %c0_0 = arith.constant 0 : index
    %0 = vector.load %arg1[%c0, %c0_0] : memref<64x512xbf16, #tpu.memory_space<vmem>>, vector<64x512xbf16>
    %c0_1 = arith.constant 0 : index
    %c0_2 = arith.constant 0 : index
    %1 = vector.load %arg2[%c0_1, %c0_2] : memref<512x128xbf16, #tpu.memory_space<vmem>>, vector<512x128xbf16>
    %cst = arith.constant dense<0.000000e+00> : vector<64x128xf32>
    %2 = tpu.matmul %0, %1, %cst {dimension_numbers = #tpu.dot_dimension_numbers<[1], [0], [0], [1], [0, 0, 1, 1], [], []>} : vector<64x512xbf16>, vector<512x128xbf16>, vector<64x128xf32> -> vector<64x128xf32>
    %c0_3 = arith.constant 0 : index
    %c0_4 = arith.constant 0 : index
    %3 = vector.load %arg3[%c0_3, %c0_4] : memref<64x1xf32, #tpu.memory_space<vmem>>, vector<64x1xf32>
    %4 = vector.broadcast %3 : vector<64x1xf32> to vector<64x128xf32>
    %5 = arith.addf %2, %4 : vector<64x128xf32>
    %cst_5 = arith.constant 0.000000e+00 : f32
    %6 = vector.broadcast %cst_5 : f32 to vector<64x128xf32>
    %7 = arith.maximumf %5, %6 : vector<64x128xf32>
    %8 = arith.truncf %7 : vector<64x128xf32> to vector<64x128xbf16>
    %c0_6 = arith.constant 0 : index
    %c0_7 = arith.constant 0 : index
    %9 = vector.load %arg4[%c0_6, %c0_7] : memref<64x128xbf16, #tpu.memory_space<vmem>>, vector<64x128xbf16>
    tpu.vector_store %arg4[%c0_6, %c0_7], %8 {strides = array<i32>} : memref<64x128xbf16, #tpu.memory_space<vmem>>, vector<64x128xbf16>,
    return
  }
  func.func @transform_0(%arg0: i32) -> (i32, i32) {
    %c0_i32 = arith.constant 0 : i32
    %c0_i32_0 = arith.constant 0 : i32
    %c0_i32_1 = arith.constant 0 : i32
    return %c0_i32, %c0_i32_0 : i32, i32
  }
  func.func @transform_1(%arg0: i32) -> (i32, i32) {
    %c0_i32 = arith.constant 0 : i32
    %c0_i32_0 = arith.constant 0 : i32
    return %c0_i32, %arg0 : i32, i32
  }
  func.func @transform_2(%arg0: i32) -> (i32, i32) {
    %c0_i32 = arith.constant 0 : i32
    %c0_i32_0 = arith.constant 0 : i32
    %c0_i32_1 = arith.constant 0 : i32
    return %c0_i32, %c0_i32_0 : i32, i32
  }
  func.func @transform_3(%arg0: i32) -> (i32, i32) {
    %c0_i32 = arith.constant 0 : i32
    %c0_i32_0 = arith.constant 0 : i32
    return %c0_i32, %arg0 : i32, i32
  }
}

module attributes {stable_mosaic.version = 11 : i64} {
  func.func @_conv_gemm_relu_kernel(%arg0: i32, %arg1: memref<64x576xbf16, #tpu.memory_space<vmem>>, %arg2: memref<576x128xbf16, #tpu.memory_space<vmem>>, %arg3: memref<64x1xf32, #tpu.memory_space<vmem>>, %arg4: memref<64x128xbf16, #tpu.memory_space<vmem>>) attributes {dimension_semantics = [#tpu.dimension_semantics<parallel>], iteration_bounds = array<i64: 1>, scalar_prefetch = 0 : i64, scratch_operands = 0 : i64, tpu.core_type = #tpu.core_type<tc>, window_params = [{pipeline_mode = #tpu.pipeline_mode<synchronous>, transform_indices = @transform_0, window_bounds = array<i64: 64, 576>}, {transform_indices = @transform_1, window_bounds = array<i64: 576, 128>}, {pipeline_mode = #tpu.pipeline_mode<synchronous>, transform_indices = @transform_2, window_bounds = array<i64: 64, 1>}, {transform_indices = @transform_3, window_bounds = array<i64: 64, 128>}]} {
    %c0 = arith.constant 0 : index
    %c0_0 = arith.constant 0 : index
    %0 = vector.load %arg1[%c0, %c0_0] : memref<64x576xbf16, #tpu.memory_space<vmem>>, vector<64x576xbf16>
    %c0_1 = arith.constant 0 : index
    %c0_2 = arith.constant 0 : index
    %1 = vector.load %arg2[%c0_1, %c0_2] : memref<576x128xbf16, #tpu.memory_space<vmem>>, vector<576x128xbf16>
    %cst = arith.constant dense<0.000000e+00> : vector<64x128xf32>
    %2 = tpu.matmul %0, %1, %cst {dimension_numbers = #tpu.dot_dimension_numbers<[1], [0], [0], [1], [0, 0, 1, 1], [], []>} : vector<64x576xbf16>, vector<576x128xbf16>, vector<64x128xf32> -> vector<64x128xf32>
    %c0_3 = arith.constant 0 : index
    %c0_4 = arith.constant 0 : index
    %3 = vector.load %arg3[%c0_3, %c0_4] : memref<64x1xf32, #tpu.memory_space<vmem>>, vector<64x1xf32>
    %4 = vector.broadcast %3 : vector<64x1xf32> to vector<64x128xf32>
    %5 = arith.addf %2, %4 : vector<64x128xf32>
    %cst_5 = arith.constant 0.000000e+00 : f32
    %6 = vector.broadcast %cst_5 : f32 to vector<64x128xf32>
    %7 = arith.maximumf %5, %6 : vector<64x128xf32>
    %8 = arith.truncf %7 : vector<64x128xf32> to vector<64x128xbf16>
    %c0_6 = arith.constant 0 : index
    %c0_7 = arith.constant 0 : index
    %9 = vector.load %arg4[%c0_6, %c0_7] : memref<64x128xbf16, #tpu.memory_space<vmem>>, vector<64x128xbf16>
    tpu.vector_store %arg4[%c0_6, %c0_7], %8 {strides = array<i32>} : memref<64x128xbf16, #tpu.memory_space<vmem>>, vector<64x128xbf16>,
    return
  }
  func.func @transform_0(%arg0: i32) -> (i32, i32) {
    %c0_i32 = arith.constant 0 : i32
    %c0_i32_0 = arith.constant 0 : i32
    %c0_i32_1 = arith.constant 0 : i32
    return %c0_i32, %c0_i32_0 : i32, i32
  }
  func.func @transform_1(%arg0: i32) -> (i32, i32) {
    %c0_i32 = arith.constant 0 : i32
    %c0_i32_0 = arith.constant 0 : i32
    return %c0_i32, %arg0 : i32, i32
  }
  func.func @transform_2(%arg0: i32) -> (i32, i32) {
    %c0_i32 = arith.constant 0 : i32
    %c0_i32_0 = arith.constant 0 : i32
    %c0_i32_1 = arith.constant 0 : i32
    return %c0_i32, %c0_i32_0 : i32, i32
  }
  func.func @transform_3(%arg0: i32) -> (i32, i32) {
    %c0_i32 = arith.constant 0 : i32
    %c0_i32_0 = arith.constant 0 : i32
    return %c0_i32, %arg0 : i32, i32
  }
}

module attributes {stable_mosaic.version = 11 : i64} {
  func.func @_fc_stack_softmax_kernel(%arg0: i32, %arg1: memref<16x3136xbf16, #tpu.memory_space<vmem>>, %arg2: memref<3136x512xbf16, #tpu.memory_space<vmem>>, %arg3: memref<1x512xf32, #tpu.memory_space<vmem>>, %arg4: memref<512x512xbf16, #tpu.memory_space<vmem>>, %arg5: memref<1x512xf32, #tpu.memory_space<vmem>>, %arg6: memref<512x128xbf16, #tpu.memory_space<vmem>>, %arg7: memref<1x128xf32, #tpu.memory_space<vmem>>, %arg8: memref<16x128xf32, #tpu.memory_space<vmem>>) attributes {dimension_semantics = [#tpu.dimension_semantics<parallel>], iteration_bounds = array<i64: 1>, scalar_prefetch = 0 : i64, scratch_operands = 0 : i64, tpu.core_type = #tpu.core_type<tc>, window_params = [{transform_indices = @transform_0, window_bounds = array<i64: 16, 3136>}, {pipeline_mode = #tpu.pipeline_mode<synchronous>, transform_indices = @transform_1, window_bounds = array<i64: 3136, 512>}, {pipeline_mode = #tpu.pipeline_mode<synchronous>, transform_indices = @transform_2, window_bounds = array<i64: 1, 512>}, {pipeline_mode = #tpu.pipeline_mode<synchronous>, transform_indices = @transform_3, window_bounds = array<i64: 512, 512>}, {pipeline_mode = #tpu.pipeline_mode<synchronous>, transform_indices = @transform_4, window_bounds = array<i64: 1, 512>}, {pipeline_mode = #tpu.pipeline_mode<synchronous>, transform_indices = @transform_5, window_bounds = array<i64: 512, 128>}, {pipeline_mode = #tpu.pipeline_mode<synchronous>, transform_indices = @transform_6, window_bounds = array<i64: 1, 128>}, {transform_indices = @transform_7, window_bounds = array<i64: 16, 128>}]} {
    %c0 = arith.constant 0 : index
    %c0_0 = arith.constant 0 : index
    %0 = vector.load %arg1[%c0, %c0_0] : memref<16x3136xbf16, #tpu.memory_space<vmem>>, vector<16x3136xbf16>
    %c0_1 = arith.constant 0 : index
    %c0_2 = arith.constant 0 : index
    %1 = vector.load %arg2[%c0_1, %c0_2] : memref<3136x512xbf16, #tpu.memory_space<vmem>>, vector<3136x512xbf16>
    %cst = arith.constant dense<0.000000e+00> : vector<16x512xf32>
    %2 = tpu.matmul %0, %1, %cst {dimension_numbers = #tpu.dot_dimension_numbers<[1], [0], [0], [1], [0, 0, 1, 1], [], []>} : vector<16x3136xbf16>, vector<3136x512xbf16>, vector<16x512xf32> -> vector<16x512xf32>
    %c0_3 = arith.constant 0 : index
    %c0_4 = arith.constant 0 : index
    %3 = vector.load %arg3[%c0_3, %c0_4] : memref<1x512xf32, #tpu.memory_space<vmem>>, vector<1x512xf32>
    %4 = vector.broadcast %3 : vector<1x512xf32> to vector<16x512xf32>
    %5 = arith.addf %2, %4 : vector<16x512xf32>
    %cst_5 = arith.constant 0.000000e+00 : f32
    %6 = vector.broadcast %cst_5 : f32 to vector<16x512xf32>
    %7 = arith.maximumf %5, %6 : vector<16x512xf32>
    %8 = arith.truncf %7 : vector<16x512xf32> to vector<16x512xbf16>
    %c0_6 = arith.constant 0 : index
    %c0_7 = arith.constant 0 : index
    %9 = vector.load %arg4[%c0_6, %c0_7] : memref<512x512xbf16, #tpu.memory_space<vmem>>, vector<512x512xbf16>
    %cst_8 = arith.constant dense<0.000000e+00> : vector<16x512xf32>
    %10 = tpu.matmul %8, %9, %cst_8 {dimension_numbers = #tpu.dot_dimension_numbers<[1], [0], [0], [1], [0, 0, 1, 1], [], []>} : vector<16x512xbf16>, vector<512x512xbf16>, vector<16x512xf32> -> vector<16x512xf32>
    %c0_9 = arith.constant 0 : index
    %c0_10 = arith.constant 0 : index
    %11 = vector.load %arg5[%c0_9, %c0_10] : memref<1x512xf32, #tpu.memory_space<vmem>>, vector<1x512xf32>
    %12 = vector.broadcast %11 : vector<1x512xf32> to vector<16x512xf32>
    %13 = arith.addf %10, %12 : vector<16x512xf32>
    %cst_11 = arith.constant 0.000000e+00 : f32
    %14 = vector.broadcast %cst_11 : f32 to vector<16x512xf32>
    %15 = arith.maximumf %13, %14 : vector<16x512xf32>
    %16 = arith.truncf %15 : vector<16x512xf32> to vector<16x512xbf16>
    %c0_12 = arith.constant 0 : index
    %c0_13 = arith.constant 0 : index
    %17 = vector.load %arg6[%c0_12, %c0_13] : memref<512x128xbf16, #tpu.memory_space<vmem>>, vector<512x128xbf16>
    %cst_14 = arith.constant dense<0.000000e+00> : vector<16x128xf32>
    %18 = tpu.matmul %16, %17, %cst_14 {dimension_numbers = #tpu.dot_dimension_numbers<[1], [0], [0], [1], [0, 0, 1, 1], [], []>} : vector<16x512xbf16>, vector<512x128xbf16>, vector<16x128xf32> -> vector<16x128xf32>
    %c0_15 = arith.constant 0 : index
    %c0_16 = arith.constant 0 : index
    %19 = vector.load %arg7[%c0_15, %c0_16] : memref<1x128xf32, #tpu.memory_space<vmem>>, vector<1x128xf32>
    %20 = vector.broadcast %19 : vector<1x128xf32> to vector<16x128xf32>
    %21 = arith.addf %18, %20 : vector<16x128xf32>
    %cst_17 = arith.constant dense<0xFF800000> : vector<16xf32>
    %22 = vector.multi_reduction <maximumf>, %21, %cst_17 [1] : vector<16x128xf32> to vector<16xf32>
    %23 = vector.shape_cast %22 : vector<16xf32> to vector<16x1xf32>
    %24 = vector.broadcast %23 : vector<16x1xf32> to vector<16x128xf32>
    %25 = arith.subf %21, %24 : vector<16x128xf32>
    %26 = math.exp %25 : vector<16x128xf32>
    %cst_18 = arith.constant dense<0.000000e+00> : vector<16xf32>
    %27 = vector.multi_reduction <add>, %26, %cst_18 [1] : vector<16x128xf32> to vector<16xf32>
    %28 = vector.shape_cast %27 : vector<16xf32> to vector<16x1xf32>
    %29 = tpu.reciprocal %28 {approx = true} : vector<16x1xf32> -> vector<16x1xf32>
    %30 = vector.broadcast %29 : vector<16x1xf32> to vector<16x128xf32>
    %31 = arith.mulf %26, %30 : vector<16x128xf32>
    %c0_19 = arith.constant 0 : index
    %c0_20 = arith.constant 0 : index
    %32 = vector.load %arg8[%c0_19, %c0_20] : memref<16x128xf32, #tpu.memory_space<vmem>>, vector<16x128xf32>
    tpu.vector_store %arg8[%c0_19, %c0_20], %31 {strides = array<i32>} : memref<16x128xf32, #tpu.memory_space<vmem>>, vector<16x128xf32>,
    return
  }
  func.func @transform_0(%arg0: i32) -> (i32, i32) {
    %c0_i32 = arith.constant 0 : i32
    %c0_i32_0 = arith.constant 0 : i32
    return %arg0, %c0_i32 : i32, i32
  }
  func.func @transform_1(%arg0: i32) -> (i32, i32) {
    %c0_i32 = arith.constant 0 : i32
    %c0_i32_0 = arith.constant 0 : i32
    %c0_i32_1 = arith.constant 0 : i32
    return %c0_i32, %c0_i32_0 : i32, i32
  }
  func.func @transform_2(%arg0: i32) -> (i32, i32) {
    %c0_i32 = arith.constant 0 : i32
    %c0_i32_0 = arith.constant 0 : i32
    %c0_i32_1 = arith.constant 0 : i32
    return %c0_i32, %c0_i32_0 : i32, i32
  }
  func.func @transform_3(%arg0: i32) -> (i32, i32) {
    %c0_i32 = arith.constant 0 : i32
    %c0_i32_0 = arith.constant 0 : i32
    %c0_i32_1 = arith.constant 0 : i32
    return %c0_i32, %c0_i32_0 : i32, i32
  }
  func.func @transform_4(%arg0: i32) -> (i32, i32) {
    %c0_i32 = arith.constant 0 : i32
    %c0_i32_0 = arith.constant 0 : i32
    %c0_i32_1 = arith.constant 0 : i32
    return %c0_i32, %c0_i32_0 : i32, i32
  }
  func.func @transform_5(%arg0: i32) -> (i32, i32) {
    %c0_i32 = arith.constant 0 : i32
    %c0_i32_0 = arith.constant 0 : i32
    %c0_i32_1 = arith.constant 0 : i32
    return %c0_i32, %c0_i32_0 : i32, i32
  }
  func.func @transform_6(%arg0: i32) -> (i32, i32) {
    %c0_i32 = arith.constant 0 : i32
    %c0_i32_0 = arith.constant 0 : i32
    %c0_i32_1 = arith.constant 0 : i32
    return %c0_i32, %c0_i32_0 : i32, i32
  }
  func.func @transform_7(%arg0: i32) -> (i32, i32) {
    %c0_i32 = arith.constant 0 : i32
    %c0_i32_0 = arith.constant 0 : i32
    return %arg0, %c0_i32 : i32, i32
  }
}

</mosaic_0001>

<bundles_post_ra>
// kernel: actor_forward.4
= control target key start
LH: loop header
LB: loop body
LE: loop exit
PB: predicated region body
PF: predicated region fallthrough
CT: control target
= control target key end

     0   :  { %s3351_s12 = smov 0   ;;  %s3353_s13 = smov 0   ;;  %s4858_s0 = inlined_call_operand.vmem [shape: bf16[32,256], index: 0, kind: input, shape index: {}]   ;;  %s4859_s1 = inlined_call_operand.vmem [shape: bf16[256,800], index: 1, kind: input, shape index: {}]   ;;  %s4860_s2 = inlined_call_operand.vmem [shape: f32[32,1], index: 2, kind: input, shape index: {}]   ;;  %s4861_s3 = inlined_call_operand.vmem [shape: bf16[32,800], index: 3, kind: output, shape index: {}]  }
   0x1   :  { %s3355_s14 = smov 0  }
   0x2 LB: > { %s3367_s15 = sadd.s32 4294967295, %s3196_s14   ;;  %s3370_s16 = sadd.s32 1, %s3196_s14   ;;  %s3196_s14 = sphi %s3355_s14, %s4901_s14   ;;  %s3192_s13 = sphi %s3353_s13, %s4900_s13   ;;  %s3188_s12 = sphi %s3351_s12, %s4899_s12  }
   0x3   : > { %s38_s17 = ssub.s32 %s3196_s14, %s3370_s16  ;;  %s41_s18 = sadd.s32 1, %s3192_s13 }
   0x4   : > { %p39_p0 = scmp.eq.s32.totalorder %s38_s17, 0  ;;  %p48_p1 = scmp.ne.s32.totalorder %s3192_s13, %s3188_s12 }
   0x5   : > { %p49_p2 = scmp.eq.s32.totalorder %s3196_s14, 0  ;;  %p99_p3 = scmp.eq.s32.totalorder %s3367_s15, 1 }
   0x6   : > { %s3380_s19 = scalar_select %p39_p0, %s3192_s13, %s41_s18  }
   0x7   : > { %p50_p4 = por %p49_p2, %p48_p1  ;;  %p3382_p5 = por %p99_p3, %p48_p1 }
   0x8   : > { %p2386_p6 = scmp.ge.s32.totalorder %s3196_s14, 2 }
   0xa   : > { %127 = sbr.rel (%p2386_p6) target bundleno = 259 (0x103), region = 24 }
  0x11   : > { %130 = sbr.rel (!%p50_p4) target bundleno = 259 (0x103), region = 28  ;;  %s132_s21 = sand.u32 (%p50_p4), 1, %s3192_s13  }
  0x12   : > { %s135_s22 = smul.u32 (%p50_p4), 6, %s3196_s14 }
  0x13   : > { %s2606_s23 = smul.u32 (%p50_p4), 768, %s132_s21 }
  0x14   : > { %s136_s24 = ssub.s32 (%p50_p4), 7, %s135_s22  ;;  %s2552_s25 = smul.u32 (%p50_p4), 24, %s3196_s14 }
  0x15   : > { %p137_p7 = scmp.lt.s32.totalorder (%p50_p4), %s136_s24, 6  ;;  %s3397_s4 = scalar_lea.vmem (%p50_p4), [#allocation2], %s2606_s23  }
  0x16   : > { %s3393_s28 = scalar_lea.vmem (%p50_p4), %s4859_s1, %s2552_s25  }
  0x18   : > { %s4903_s24 = smov (!%p137_p7, %s136_s24), 6 }
  0x19   : > { %s2387_s29 = sshll.u32 %s4903_s24, 11  ;;  %s3395_s30 = sshll.u32 %s4903_s24, 2 }
  0x1a   : > { %p2391_p8 = scmp.eq.s32.totalorder %s2387_s29, 0 }
  0x1b   : > { %p147_p9 = scmp.lt.u32.totalorder (!%p2391_p8), %s3395_s30, 8 }
  0x1c   : > { %146 = sbr.rel (%p2391_p8) target bundleno = 259 (0x103), region = 32 }
  0x23   : > { %150 = sbr.rel (%p147_p9) target bundleno = 224 (0xe0), region = 36  ;;  %s3401_s5 = sand.u32 (!%p147_p9), 7, %s3395_s30  }
  0x24   : > { %p228_p10 = scmp.eq.s32.totalorder (!%p147_p9), %s3401_s5, 0  ;;  %p2392_p11 = scmp.ne.s32.totalorder (!%p147_p9), %s3401_s5, 0 }
  0x2a   : > { %231 = sbr.rel (%p2392_p11) target bundleno = 116 (0x74), region = 51  ;;  %s232_s6 = sshrl.u32 (!%p2392_p11), %s3395_s30, 3 }
  0x2b   : > { %s3408_s7 = sshrl.u32 (!%p2392_p11), %s232_s6, 1 }
  0x2c   : > { %p2393_p12 = scmp.le.s32.totalorder (!%p2392_p11), %s3408_s7, 0 }
  0x31   : > { %2256 = sbr.rel (%p2393_p12) target bundleno = 89 (0x59), region = 229  ;;  %s4863_s8 = smov (!%p2393_p12), %s3397_s4 }
  0x32   : > { %s4864_s9 = smov (!%p2393_p12), %s3393_s28  ;;  %s3417_s10 = smov (!%p2393_p12), 0  }
  0x33   : > { %s3419_s11 = smov (!%p2393_p12), 0  }
  0x38 LB: >> { %v245_v0 = vld [vmem:[%s3204_s9] sm:$0xff]  ;;  %v247_v1 = vld [vmem:[%s3204_s9 + $0x8] sm:$0xff]  ;;  %s373_s17 = sadd.s32 1, %s3208_s10  ;;  %v253_v4 = vld [vmem:[%s3204_s9 + $0x38] sm:$0xff]  ;;  %s239_s11 = sadd.s32 1, %s3212_s11   ;;  %s3212_s11 = sphi %s3419_s11, %s239_s11   ;;  %s3208_s10 = sphi %s3417_s10, %s4867_s10   ;;  %s3204_s9 = sphi %s4864_s9, %s4866_s9   ;;  %s3200_s8 = sphi %s4863_s8, %s4865_s8  }
  0x39   : >> { %v249_v2 = vld [vmem:[%s3204_s9 + $0x1c] sm:$0xff]  ;;  %246 = vst [vmem:[%s3200_s8] sm:$0xff] %v245_v0  ;;  %248 = vst [vmem:[%s3200_s8 + $0x8] sm:$0xff] %v247_v1  ;;  %v251_v3 = vld [vmem:[%s3204_s9 + $0x24] sm:$0xff]  ;;  %p374_p13 = scmp.ge.s32.totalorder %s373_s17, %s3408_s7  ;;  %p238_p0 = scmp.ge.s32.totalorder %s239_s11, %s3408_s7 }
  0x3a   : >> { %250 = vst [vmem:[%s3200_s8 + $0x18] sm:$0xff] %v249_v2  ;;  %v255_v5 = vld [vmem:[%s3204_s9 + $0x40] sm:$0xff]  ;;  %252 = vst [vmem:[%s3200_s8 + $0x20] sm:$0xff] %v251_v3  ;;  %v257_v6 = vld [vmem:[%s3204_s9 + $0x54] sm:$0xff] }
  0x3b   : >> { %254 = vst [vmem:[%s3200_s8 + $0x30] sm:$0xff] %v253_v4  ;;  %256 = vst [vmem:[%s3200_s8 + $0x38] sm:$0xff] %v255_v5  ;;  %v259_v7 = vld [vmem:[%s3204_s9 + $0x5c] sm:$0xff]  ;;  %v261_v8 = vld [vmem:[%s3204_s9 + $0x70] sm:$0xff]  ;;  %s4905_s17 = smov (%p374_p13, %s373_s17), 0 }
  0x3c   : >> { %258 = vst [vmem:[%s3200_s8 + $0x48] sm:$0xff] %v257_v6  ;;  %260 = vst [vmem:[%s3200_s8 + $0x50] sm:$0xff] %v259_v7  ;;  %v263_v9 = vld [vmem:[%s3204_s9 + $0x78] sm:$0xff]  ;;  %v265_v10 = vld [vmem:[%s3204_s9 + $0x8c] sm:$0xff]  ;;  %s2394_s18 = sshll.u32 %s4905_s17, 4  ;;  %s4867_s10 = smov %s4905_s17 }
  0x3d   : >> { %262 = vst [vmem:[%s3200_s8 + $0x60] sm:$0xff] %v261_v8  ;;  %v267_v11 = vld [vmem:[%s3204_s9 + $0x94] sm:$0xff]  ;;  %264 = vst [vmem:[%s3200_s8 + $0x68] sm:$0xff] %v263_v9  ;;  %v269_v12 = vld [vmem:[%s3204_s9 + $0xa8] sm:$0xff]  ;;  %s3475_s21 = scalar_lea.vmem %s3393_s28, %s2394_s18   ;;  %s3478_s22 = scalar_lea.vmem %s3397_s4, %s2394_s18 [#allocation2]  }
  0x3e   : >> { %266 = vst [vmem:[%s3200_s8 + $0x78] sm:$0xff] %v265_v10  ;;  %268 = vst [vmem:[%s3200_s8 + $0x80] sm:$0xff] %v267_v11  ;;  %v271_v13 = vld [vmem:[%s3204_s9 + $0xb0] sm:$0xff]  ;;  %v273_v14 = vld [vmem:[%s3204_s9 + $0xc4] sm:$0xff] }
  0x3f   : >> { %270 = vst [vmem:[%s3200_s8 + $0x90] sm:$0xff] %v269_v12  ;;  %272 = vst [vmem:[%s3200_s8 + $0x98] sm:$0xff] %v271_v13  ;;  %v275_v15 = vld [vmem:[%s3204_s9 + $0xcc] sm:$0xff]  ;;  %v277_v16 = vld [vmem:[%s3204_s9 + $0xe0] sm:$0xff] }
  0x40   : >> { %274 = vst [vmem:[%s3200_s8 + $0xa8] sm:$0xff] %v273_v14  ;;  %v279_v17 = vld [vmem:[%s3204_s9 + $0xe8] sm:$0xff]  ;;  %276 = vst [vmem:[%s3200_s8 + $0xb0] sm:$0xff] %v275_v15  ;;  %v281_v18 = vld [vmem:[%s3204_s9 + $0xfc] sm:$0xff] }
  0x41   : >> { %278 = vst [vmem:[%s3200_s8 + $0xc0] sm:$0xff] %v277_v16  ;;  %280 = vst [vmem:[%s3200_s8 + $0xc8] sm:$0xff] %v279_v17  ;;  %v283_v19 = vld [vmem:[%s3204_s9 + $0x104] sm:$0xff]  ;;  %v285_v20 = vld [vmem:[%s3204_s9 + $0x118] sm:$0xff] }
  0x42   : >> { %282 = vst [vmem:[%s3200_s8 + $0xd8] sm:$0xff] %v281_v18  ;;  %284 = vst [vmem:[%s3200_s8 + $0xe0] sm:$0xff] %v283_v19  ;;  %v287_v21 = vld [vmem:[%s3204_s9 + $0x120] sm:$0xff]  ;;  %v289_v22 = vld [vmem:[%s3204_s9 + $0x134] sm:$0xff] }
  0x43   : >> { %286 = vst [vmem:[%s3200_s8 + $0xf0] sm:$0xff] %v285_v20  ;;  %v291_v23 = vld [vmem:[%s3204_s9 + $0x13c] sm:$0xff]  ;;  %288 = vst [vmem:[%s3200_s8 + $0xf8] sm:$0xff] %v287_v21  ;;  %v293_v24 = vld [vmem:[%s3204_s9 + $0x150] sm:$0xff] }
  0x44   : >> { %290 = vst [vmem:[%s3200_s8 + $0x108] sm:$0xff] %v289_v22  ;;  %292 = vst [vmem:[%s3200_s8 + $0x110] sm:$0xff] %v291_v23  ;;  %v295_v25 = vld [vmem:[%s3204_s9 + $0x158] sm:$0xff]  ;;  %v297_v26 = vld [vmem:[%s3204_s9 + $0x16c] sm:$0xff] }
  0x45   : >> { %294 = vst [vmem:[%s3200_s8 + $0x120] sm:$0xff] %v293_v24  ;;  %296 = vst [vmem:[%s3200_s8 + $0x128] sm:$0xff] %v295_v25  ;;  %v299_v27 = vld [vmem:[%s3204_s9 + $0x174] sm:$0xff]  ;;  %v301_v28 = vld [vmem:[%s3204_s9 + $0x188] sm:$0xff] }
  0x46   : >> { %298 = vst [vmem:[%s3200_s8 + $0x138] sm:$0xff] %v297_v26  ;;  %v303_v29 = vld [vmem:[%s3204_s9 + $0x190] sm:$0xff]  ;;  %300 = vst [vmem:[%s3200_s8 + $0x140] sm:$0xff] %v299_v27  ;;  %v305_v30 = vld [vmem:[%s3204_s9 + $0x1a4] sm:$0xff] }
  0x47   : >> { %302 = vst [vmem:[%s3200_s8 + $0x150] sm:$0xff] %v301_v28  ;;  %304 = vst [vmem:[%s3200_s8 + $0x158] sm:$0xff] %v303_v29  ;;  %v307_v31 = vld [vmem:[%s3204_s9 + $0x1ac] sm:$0xff]  ;;  %v309_v32 = vld [vmem:[%s3204_s9 + $0x1c0] sm:$0xff] }
  0x48   : >> { %306 = vst [vmem:[%s3200_s8 + $0x168] sm:$0xff] %v305_v30  ;;  %308 = vst [vmem:[%s3200_s8 + $0x170] sm:$0xff] %v307_v31  ;;  %v311_v33 = vld [vmem:[%s3204_s9 + $0x1c8] sm:$0xff]  ;;  %v313_v34 = vld [vmem:[%s3204_s9 + $0x1dc] sm:$0xff] }
  0x49   : >> { %310 = vst [vmem:[%s3200_s8 + $0x180] sm:$0xff] %v309_v32  ;;  %v315_v35 = vld [vmem:[%s3204_s9 + $0x1e4] sm:$0xff]  ;;  %312 = vst [vmem:[%s3200_s8 + $0x188] sm:$0xff] %v311_v33  ;;  %v317_v36 = vld [vmem:[%s3204_s9 + $0x1f8] sm:$0xff] }
  0x4a   : >> { %314 = vst [vmem:[%s3200_s8 + $0x198] sm:$0xff] %v313_v34  ;;  %316 = vst [vmem:[%s3200_s8 + $0x1a0] sm:$0xff] %v315_v35  ;;  %v319_v37 = vld [vmem:[%s3204_s9 + $0x200] sm:$0xff]  ;;  %v321_v38 = vld [vmem:[%s3204_s9 + $0x214] sm:$0xff] }
  0x4b   : >> { %318 = vst [vmem:[%s3200_s8 + $0x1b0] sm:$0xff] %v317_v36  ;;  %320 = vst [vmem:[%s3200_s8 + $0x1b8] sm:$0xff] %v319_v37  ;;  %v323_v39 = vld [vmem:[%s3204_s9 + $0x21c] sm:$0xff]  ;;  %v325_v40 = vld [vmem:[%s3204_s9 + $0x230] sm:$0xff] }
  0x4c   : >> { %322 = vst [vmem:[%s3200_s8 + $0x1c8] sm:$0xff] %v321_v38  ;;  %v327_v41 = vld [vmem:[%s3204_s9 + $0x238] sm:$0xff]  ;;  %324 = vst [vmem:[%s3200_s8 + $0x1d0] sm:$0xff] %v323_v39  ;;  %v329_v42 = vld [vmem:[%s3204_s9 + $0x24c] sm:$0xff] }
  0x4d   : >> { %326 = vst [vmem:[%s3200_s8 + $0x1e0] sm:$0xff] %v325_v40  ;;  %328 = vst [vmem:[%s3200_s8 + $0x1e8] sm:$0xff] %v327_v41  ;;  %v331_v43 = vld [vmem:[%s3204_s9 + $0x254] sm:$0xff]  ;;  %v333_v44 = vld [vmem:[%s3204_s9 + $0x268] sm:$0xff] }
  0x4e   : >> { %330 = vst [vmem:[%s3200_s8 + $0x1f8] sm:$0xff] %v329_v42  ;;  %332 = vst [vmem:[%s3200_s8 + $0x200] sm:$0xff] %v331_v43  ;;  %v335_v45 = vld [vmem:[%s3204_s9 + $0x270] sm:$0xff]  ;;  %v337_v46 = vld [vmem:[%s3204_s9 + $0x284] sm:$0xff] }
  0x4f   : >> { %334 = vst [vmem:[%s3200_s8 + $0x210] sm:$0xff] %v333_v44  ;;  %v339_v47 = vld [vmem:[%s3204_s9 + $0x28c] sm:$0xff]  ;;  %336 = vst [vmem:[%s3200_s8 + $0x218] sm:$0xff] %v335_v45  ;;  %v341_v48 = vld [vmem:[%s3204_s9 + $0x2a0] sm:$0xff] }
  0x50   : >> { %338 = vst [vmem:[%s3200_s8 + $0x228] sm:$0xff] %v337_v46  ;;  %340 = vst [vmem:[%s3200_s8 + $0x230] sm:$0xff] %v339_v47  ;;  %v343_v49 = vld [vmem:[%s3204_s9 + $0x2a8] sm:$0xff]  ;;  %v345_v50 = vld [vmem:[%s3204_s9 + $0x2bc] sm:$0xff] }
  0x51   : >> { %342 = vst [vmem:[%s3200_s8 + $0x240] sm:$0xff] %v341_v48  ;;  %344 = vst [vmem:[%s3200_s8 + $0x248] sm:$0xff] %v343_v49  ;;  %v347_v51 = vld [vmem:[%s3204_s9 + $0x2c4] sm:$0xff]  ;;  %v349_v52 = vld [vmem:[%s3204_s9 + $0x2d8] sm:$0xff] }
  0x52   : >> { %346 = vst [vmem:[%s3200_s8 + $0x258] sm:$0xff] %v345_v50  ;;  %v351_v53 = vld [vmem:[%s3204_s9 + $0x2e0] sm:$0xff]  ;;  %348 = vst [vmem:[%s3200_s8 + $0x260] sm:$0xff] %v347_v51  ;;  %v353_v54 = vld [vmem:[%s3204_s9 + $0x2f4] sm:$0xff]  ;;  %241 = sbr.rel (!%p238_p0) target bundleno = 56 (0x38), region = 235 }
  0x53   : >> { %350 = vst [vmem:[%s3200_s8 + $0x270] sm:$0xff] %v349_v52  ;;  %352 = vst [vmem:[%s3200_s8 + $0x278] sm:$0xff] %v351_v53  ;;  %v355_v55 = vld [vmem:[%s3204_s9 + $0x2fc] sm:$0xff]  ;;  %v357_v56 = vld [vmem:[%s3204_s9 + $0x310] sm:$0xff] }
  0x54   : >> { %354 = vst [vmem:[%s3200_s8 + $0x288] sm:$0xff] %v353_v54  ;;  %356 = vst [vmem:[%s3200_s8 + $0x290] sm:$0xff] %v355_v55  ;;  %v359_v57 = vld [vmem:[%s3204_s9 + $0x318] sm:$0xff]  ;;  %v361_v58 = vld [vmem:[%s3204_s9 + $0x32c] sm:$0xff] }
  0x55   : >> { %358 = vst [vmem:[%s3200_s8 + $0x2a0] sm:$0xff] %v357_v56  ;;  %v363_v59 = vld [vmem:[%s3204_s9 + $0x334] sm:$0xff]  ;;  %360 = vst [vmem:[%s3200_s8 + $0x2a8] sm:$0xff] %v359_v57  ;;  %v365_v60 = vld [vmem:[%s3204_s9 + $0x348] sm:$0xff] }
  0x56   : >> { %362 = vst [vmem:[%s3200_s8 + $0x2b8] sm:$0xff] %v361_v58  ;;  %364 = vst [vmem:[%s3200_s8 + $0x2c0] sm:$0xff] %v363_v59  ;;  %v367_v61 = vld [vmem:[%s3204_s9 + $0x350] sm:$0xff]  ;;  %v369_v62 = vld [vmem:[%s3204_s9 + $0x364] sm:$0xff] }
  0x57   : >> { %366 = vst [vmem:[%s3200_s8 + $0x2d0] sm:$0xff] %v365_v60  ;;  %368 = vst [vmem:[%s3200_s8 + $0x2d8] sm:$0xff] %v367_v61  ;;  %v371_v63 = vld [vmem:[%s3204_s9 + $0x36c] sm:$0xff]  ;;  %s4866_s9 = smov %s3475_s21 }
  0x58   : >> { %370 = vst [vmem:[%s3200_s8 + $0x2e8] sm:$0xff] %v369_v62  ;;  %372 = vst [vmem:[%s3200_s8 + $0x2f0] sm:$0xff] %v371_v63  ;;  %s4865_s8 = smov %s3478_s22 }
  0x59 PF: > { %s3584_s23 = sand.u32 1, %s232_s6   ;;  %s2553_s24 = sshll.u32 %s3408_s7, 8 }
  0x5a   : > { %s384_s25 = sshra.s32 %s2553_s24, 4  ;;  %p2399_p1 = scmp.le.s32.totalorder %s3584_s23, 0 }
  0x5b   : > { %s3588_s26 = scalar_lea.vmem %s3393_s28, %s384_s25   ;;  %s3591_s27 = scalar_lea.vmem %s3397_s4, %s384_s25 [#allocation2]  }
  0x5c   : > { %2270 = sbr.rel (%p2399_p1) target bundleno = 116 (0x74), region = 240  ;;  %s4868_s29 = smov (!%p2399_p1), %s3591_s27 }
  0x5d   : > { %s4869_s8 = smov (!%p2399_p1), %s3588_s26  ;;  %s3600_s9 = smov (!%p2399_p1), 0  }
  0x5e   : > { %s3602_s10 = smov (!%p2399_p1), 0  }
  0x63 LB: >> { %v400_v0 = vld [vmem:[%s3220_s8] sm:$0xff]  ;;  %v404_v2 = vld [vmem:[%s3220_s8 + $0x38] sm:$0xff]  ;;  %s464_s6 = sadd.s32 1, %s3224_s9  ;;  %v408_v4 = vld [vmem:[%s3220_s8 + $0x70] sm:$0xff]  ;;  %s394_s10 = sadd.s32 1, %s3228_s10   ;;  %s3228_s10 = sphi %s3602_s10, %s394_s10   ;;  %s3224_s9 = sphi %s3600_s9, %s4872_s9   ;;  %s3220_s8 = sphi %s4869_s8, %s4871_s8   ;;  %s3216_s29 = sphi %s4868_s29, %s4870_s29  }
  0x64   : >> { %v402_v1 = vld [vmem:[%s3220_s8 + $0x1c] sm:$0xff]  ;;  %401 = vst [vmem:[%s3216_s29] sm:$0xff] %v400_v0  ;;  %405 = vst [vmem:[%s3216_s29 + $0x30] sm:$0xff] %v404_v2  ;;  %v406_v3 = vld [vmem:[%s3220_s8 + $0x54] sm:$0xff]  ;;  %p465_p2 = scmp.ge.s32.totalorder %s464_s6, %s3584_s23  ;;  %p393_p3 = scmp.ge.s32.totalorder %s394_s10, %s3584_s23 }
  0x65   : >> { %403 = vst [vmem:[%s3216_s29 + $0x18] sm:$0xff] %v402_v1  ;;  %v410_v5 = vld [vmem:[%s3220_s8 + $0x8c] sm:$0xff]  ;;  %407 = vst [vmem:[%s3216_s29 + $0x48] sm:$0xff] %v406_v3  ;;  %v414_v7 = vld [vmem:[%s3220_s8 + $0xc4] sm:$0xff] }
  0x66   : >> { %409 = vst [vmem:[%s3216_s29 + $0x60] sm:$0xff] %v408_v4  ;;  %411 = vst [vmem:[%s3216_s29 + $0x78] sm:$0xff] %v410_v5  ;;  %v412_v6 = vld [vmem:[%s3220_s8 + $0xa8] sm:$0xff]  ;;  %v416_v8 = vld [vmem:[%s3220_s8 + $0xe0] sm:$0xff]  ;;  %s4907_s6 = smov (%p465_p2, %s464_s6), 0 }
  0x67   : >> { %413 = vst [vmem:[%s3216_s29 + $0x90] sm:$0xff] %v412_v6  ;;  %415 = vst [vmem:[%s3216_s29 + $0xa8] sm:$0xff] %v414_v7  ;;  %v418_v9 = vld [vmem:[%s3220_s8 + $0xfc] sm:$0xff]  ;;  %v422_v11 = vld [vmem:[%s3220_s8 + $0x134] sm:$0xff]  ;;  %s2400_s7 = sshll.u32 %s4907_s6, 3  ;;  %s4872_s9 = smov %s4907_s6 }
  0x68   : >> { %417 = vst [vmem:[%s3216_s29 + $0xc0] sm:$0xff] %v416_v8  ;;  %v420_v10 = vld [vmem:[%s3220_s8 + $0x118] sm:$0xff]  ;;  %419 = vst [vmem:[%s3216_s29 + $0xd8] sm:$0xff] %v418_v9  ;;  %v424_v12 = vld [vmem:[%s3220_s8 + $0x150] sm:$0xff]  ;;  %s3658_s11 = scalar_lea.vmem %s3588_s26, %s2400_s7   ;;  %s470_s17 = scalar_lea.vmem %s3591_s27, %s2400_s7 [#allocation2]  }
  0x69   : >> { %421 = vst [vmem:[%s3216_s29 + $0xf0] sm:$0xff] %v420_v10  ;;  %423 = vst [vmem:[%s3216_s29 + $0x108] sm:$0xff] %v422_v11  ;;  %v426_v13 = vld [vmem:[%s3220_s8 + $0x16c] sm:$0xff]  ;;  %v430_v15 = vld [vmem:[%s3220_s8 + $0x1a4] sm:$0xff] }
  0x6a   : >> { %v428_v14 = vld [vmem:[%s3220_s8 + $0x188] sm:$0xff]  ;;  %425 = vst [vmem:[%s3216_s29 + $0x120] sm:$0xff] %v424_v12  ;;  %427 = vst [vmem:[%s3216_s29 + $0x138] sm:$0xff] %v426_v13  ;;  %v432_v16 = vld [vmem:[%s3220_s8 + $0x1c0] sm:$0xff] }
  0x6b   : >> { %429 = vst [vmem:[%s3216_s29 + $0x150] sm:$0xff] %v428_v14  ;;  %v434_v17 = vld [vmem:[%s3220_s8 + $0x1dc] sm:$0xff]  ;;  %431 = vst [vmem:[%s3216_s29 + $0x168] sm:$0xff] %v430_v15  ;;  %v438_v19 = vld [vmem:[%s3220_s8 + $0x214] sm:$0xff] }
  0x6c   : >> { %433 = vst [vmem:[%s3216_s29 + $0x180] sm:$0xff] %v432_v16  ;;  %435 = vst [vmem:[%s3216_s29 + $0x198] sm:$0xff] %v434_v17  ;;  %v436_v18 = vld [vmem:[%s3220_s8 + $0x1f8] sm:$0xff]  ;;  %v440_v20 = vld [vmem:[%s3220_s8 + $0x230] sm:$0xff] }
  0x6d   : >> { %437 = vst [vmem:[%s3216_s29 + $0x1b0] sm:$0xff] %v436_v18  ;;  %439 = vst [vmem:[%s3216_s29 + $0x1c8] sm:$0xff] %v438_v19  ;;  %v442_v21 = vld [vmem:[%s3220_s8 + $0x24c] sm:$0xff]  ;;  %v446_v23 = vld [vmem:[%s3220_s8 + $0x284] sm:$0xff]  ;;  %396 = sbr.rel (!%p393_p3) target bundleno = 99 (0x63), region = 246 }
  0x6e   : >> { %441 = vst [vmem:[%s3216_s29 + $0x1e0] sm:$0xff] %v440_v20  ;;  %v444_v22 = vld [vmem:[%s3220_s8 + $0x268] sm:$0xff]  ;;  %443 = vst [vmem:[%s3216_s29 + $0x1f8] sm:$0xff] %v442_v21  ;;  %v448_v24 = vld [vmem:[%s3220_s8 + $0x2a0] sm:$0xff] }
  0x6f   : >> { %445 = vst [vmem:[%s3216_s29 + $0x210] sm:$0xff] %v444_v22  ;;  %447 = vst [vmem:[%s3216_s29 + $0x228] sm:$0xff] %v446_v23  ;;  %v450_v25 = vld [vmem:[%s3220_s8 + $0x2bc] sm:$0xff]  ;;  %v454_v27 = vld [vmem:[%s3220_s8 + $0x2f4] sm:$0xff] }
  0x70   : >> { %v452_v26 = vld [vmem:[%s3220_s8 + $0x2d8] sm:$0xff]  ;;  %449 = vst [vmem:[%s3216_s29 + $0x240] sm:$0xff] %v448_v24  ;;  %451 = vst [vmem:[%s3216_s29 + $0x258] sm:$0xff] %v450_v25  ;;  %v456_v28 = vld [vmem:[%s3220_s8 + $0x310] sm:$0xff] }
  0x71   : >> { %453 = vst [vmem:[%s3216_s29 + $0x270] sm:$0xff] %v452_v26  ;;  %v458_v29 = vld [vmem:[%s3220_s8 + $0x32c] sm:$0xff]  ;;  %455 = vst [vmem:[%s3216_s29 + $0x288] sm:$0xff] %v454_v27  ;;  %v462_v31 = vld [vmem:[%s3220_s8 + $0x364] sm:$0xff] }
  0x72   : >> { %457 = vst [vmem:[%s3216_s29 + $0x2a0] sm:$0xff] %v456_v28  ;;  %459 = vst [vmem:[%s3216_s29 + $0x2b8] sm:$0xff] %v458_v29  ;;  %v460_v30 = vld [vmem:[%s3220_s8 + $0x348] sm:$0xff]  ;;  %s4871_s8 = smov %s3658_s11 }
  0x73   : >> { %461 = vst [vmem:[%s3216_s29 + $0x2d0] sm:$0xff] %v460_v30  ;;  %463 = vst [vmem:[%s3216_s29 + $0x2e8] sm:$0xff] %v462_v31  ;;  %s4870_s29 = smov %s470_s17 }
  0x74 PF: > { %473 = sbr.rel (%p228_p10) target bundleno = 224 (0xe0), region = 69  ;;  %s475_s18 = ssub.s32 (!%p228_p10), %s3395_s30, %s3401_s5 }
  0x75   : > { %s479_s21 = sshrl.u32 (!%p228_p10), %s3395_s30, 3  ;;  %s3704_s22 = scalar_lea.vmem (!%p228_p10), %s3393_s28, %s475_s18 }
  0x76   : > { %s3707_s24 = scalar_lea.vmem (!%p228_p10), %s3397_s4, %s475_s18 [#allocation2]  ;;  %s3711_s25 = sshrl.u32 (!%p228_p10), %s479_s21, 1 }
  0x77   : > { %p2402_p4 = scmp.le.s32.totalorder (!%p228_p10), %s3711_s25, 0 }
  0x7b   : > { %2284 = sbr.rel (%p2402_p4) target bundleno = 163 (0xa3), region = 251  ;;  %s4873_s23 = smov (!%p2402_p4), %s3397_s4 }
  0x7c   : > { %s4874_s26 = smov (!%p2402_p4), %s3393_s28  ;;  %s3720_s27 = smov (!%p2402_p4), 0  }
  0x7d   : > { %s3722_s29 = smov (!%p2402_p4), 0  }
  0x82 LB: >> { %v492_v32 = vld [vmem:[%s3236_s26] sm:$0xff]  ;;  %v494_v33 = vld [vmem:[%s3236_s26 + $0x8] sm:$0xff]  ;;  %s620_s8 = sadd.s32 1, %s3240_s27  ;;  %v500_v36 = vld [vmem:[%s3236_s26 + $0x38] sm:$0xff]  ;;  %s486_s29 = sadd.s32 1, %s3244_s29   ;;  %s3244_s29 = sphi %s3722_s29, %s486_s29   ;;  %s3240_s27 = sphi %s3720_s27, %s4877_s27   ;;  %s3236_s26 = sphi %s4874_s26, %s4876_s26   ;;  %s3232_s23 = sphi %s4873_s23, %s4875_s23  }
  0x83   : >> { %v496_v34 = vld [vmem:[%s3236_s26 + $0x1c] sm:$0xff]  ;;  %493 = vst [vmem:[%s3232_s23] sm:$0xff] %v492_v32  ;;  %495 = vst [vmem:[%s3232_s23 + $0x8] sm:$0xff] %v494_v33  ;;  %v498_v35 = vld [vmem:[%s3236_s26 + $0x24] sm:$0xff]  ;;  %p621_p6 = scmp.ge.s32.totalorder %s620_s8, %s3711_s25  ;;  %p485_p7 = scmp.ge.s32.totalorder %s486_s29, %s3711_s25 }
  0x84   : >> { %497 = vst [vmem:[%s3232_s23 + $0x18] sm:$0xff] %v496_v34  ;;  %v502_v37 = vld [vmem:[%s3236_s26 + $0x40] sm:$0xff]  ;;  %499 = vst [vmem:[%s3232_s23 + $0x20] sm:$0xff] %v498_v35  ;;  %v504_v38 = vld [vmem:[%s3236_s26 + $0x54] sm:$0xff] }
  0x85   : >> { %501 = vst [vmem:[%s3232_s23 + $0x30] sm:$0xff] %v500_v36  ;;  %503 = vst [vmem:[%s3232_s23 + $0x38] sm:$0xff] %v502_v37  ;;  %v506_v39 = vld [vmem:[%s3236_s26 + $0x5c] sm:$0xff]  ;;  %v508_v40 = vld [vmem:[%s3236_s26 + $0x70] sm:$0xff]  ;;  %s4909_s8 = smov (%p621_p6, %s620_s8), 0 }
  0x86   : >> { %505 = vst [vmem:[%s3232_s23 + $0x48] sm:$0xff] %v504_v38  ;;  %507 = vst [vmem:[%s3232_s23 + $0x50] sm:$0xff] %v506_v39  ;;  %v510_v41 = vld [vmem:[%s3236_s26 + $0x78] sm:$0xff]  ;;  %v512_v42 = vld [vmem:[%s3236_s26 + $0x8c] sm:$0xff]  ;;  %s2403_s9 = sshll.u32 %s4909_s8, 4  ;;  %s4877_s27 = smov %s4909_s8 }
  0x87   : >> { %509 = vst [vmem:[%s3232_s23 + $0x60] sm:$0xff] %v508_v40  ;;  %v514_v43 = vld [vmem:[%s3236_s26 + $0x94] sm:$0xff]  ;;  %511 = vst [vmem:[%s3232_s23 + $0x68] sm:$0xff] %v510_v41  ;;  %v516_v44 = vld [vmem:[%s3236_s26 + $0xa8] sm:$0xff]  ;;  %s3778_s10 = scalar_lea.vmem %s3393_s28, %s2403_s9   ;;  %s3781_s6 = scalar_lea.vmem %s3397_s4, %s2403_s9 [#allocation2]  }
  0x88   : >> { %513 = vst [vmem:[%s3232_s23 + $0x78] sm:$0xff] %v512_v42  ;;  %515 = vst [vmem:[%s3232_s23 + $0x80] sm:$0xff] %v514_v43  ;;  %v518_v45 = vld [vmem:[%s3236_s26 + $0xb0] sm:$0xff]  ;;  %v520_v46 = vld [vmem:[%s3236_s26 + $0xc4] sm:$0xff] }
  0x89   : >> { %517 = vst [vmem:[%s3232_s23 + $0x90] sm:$0xff] %v516_v44  ;;  %519 = vst [vmem:[%s3232_s23 + $0x98] sm:$0xff] %v518_v45  ;;  %v522_v47 = vld [vmem:[%s3236_s26 + $0xcc] sm:$0xff]  ;;  %v524_v48 = vld [vmem:[%s3236_s26 + $0xe0] sm:$0xff] }
  0x8a   : >> { %521 = vst [vmem:[%s3232_s23 + $0xa8] sm:$0xff] %v520_v46  ;;  %v526_v49 = vld [vmem:[%s3236_s26 + $0xe8] sm:$0xff]  ;;  %523 = vst [vmem:[%s3232_s23 + $0xb0] sm:$0xff] %v522_v47  ;;  %v528_v50 = vld [vmem:[%s3236_s26 + $0xfc] sm:$0xff] }
  0x8b   : >> { %525 = vst [vmem:[%s3232_s23 + $0xc0] sm:$0xff] %v524_v48  ;;  %527 = vst [vmem:[%s3232_s23 + $0xc8] sm:$0xff] %v526_v49  ;;  %v530_v51 = vld [vmem:[%s3236_s26 + $0x104] sm:$0xff]  ;;  %v532_v52 = vld [vmem:[%s3236_s26 + $0x118] sm:$0xff] }
  0x8c   : >> { %529 = vst [vmem:[%s3232_s23 + $0xd8] sm:$0xff] %v528_v50  ;;  %531 = vst [vmem:[%s3232_s23 + $0xe0] sm:$0xff] %v530_v51  ;;  %v534_v53 = vld [vmem:[%s3236_s26 + $0x120] sm:$0xff]  ;;  %v536_v54 = vld [vmem:[%s3236_s26 + $0x134] sm:$0xff] }
  0x8d   : >> { %533 = vst [vmem:[%s3232_s23 + $0xf0] sm:$0xff] %v532_v52  ;;  %v538_v55 = vld [vmem:[%s3236_s26 + $0x13c] sm:$0xff]  ;;  %535 = vst [vmem:[%s3232_s23 + $0xf8] sm:$0xff] %v534_v53  ;;  %v540_v56 = vld [vmem:[%s3236_s26 + $0x150] sm:$0xff] }
  0x8e   : >> { %537 = vst [vmem:[%s3232_s23 + $0x108] sm:$0xff] %v536_v54  ;;  %539 = vst [vmem:[%s3232_s23 + $0x110] sm:$0xff] %v538_v55  ;;  %v542_v57 = vld [vmem:[%s3236_s26 + $0x158] sm:$0xff]  ;;  %v544_v58 = vld [vmem:[%s3236_s26 + $0x16c] sm:$0xff] }
  0x8f   : >> { %541 = vst [vmem:[%s3232_s23 + $0x120] sm:$0xff] %v540_v56  ;;  %543 = vst [vmem:[%s3232_s23 + $0x128] sm:$0xff] %v542_v57  ;;  %v546_v59 = vld [vmem:[%s3236_s26 + $0x174] sm:$0xff]  ;;  %v548_v60 = vld [vmem:[%s3236_s26 + $0x188] sm:$0xff] }
  0x90   : >> { %545 = vst [vmem:[%s3232_s23 + $0x138] sm:$0xff] %v544_v58  ;;  %v550_v61 = vld [vmem:[%s3236_s26 + $0x190] sm:$0xff]  ;;  %547 = vst [vmem:[%s3232_s23 + $0x140] sm:$0xff] %v546_v59  ;;  %v552_v62 = vld [vmem:[%s3236_s26 + $0x1a4] sm:$0xff] }
  0x91   : >> { %549 = vst [vmem:[%s3232_s23 + $0x150] sm:$0xff] %v548_v60  ;;  %551 = vst [vmem:[%s3232_s23 + $0x158] sm:$0xff] %v550_v61  ;;  %v554_v63 = vld [vmem:[%s3236_s26 + $0x1ac] sm:$0xff]  ;;  %v556_v0 = vld [vmem:[%s3236_s26 + $0x1c0] sm:$0xff] }
  0x92   : >> { %553 = vst [vmem:[%s3232_s23 + $0x168] sm:$0xff] %v552_v62  ;;  %555 = vst [vmem:[%s3232_s23 + $0x170] sm:$0xff] %v554_v63  ;;  %v558_v1 = vld [vmem:[%s3236_s26 + $0x1c8] sm:$0xff]  ;;  %v560_v2 = vld [vmem:[%s3236_s26 + $0x1dc] sm:$0xff] }
  0x93   : >> { %557 = vst [vmem:[%s3232_s23 + $0x180] sm:$0xff] %v556_v0  ;;  %v562_v3 = vld [vmem:[%s3236_s26 + $0x1e4] sm:$0xff]  ;;  %559 = vst [vmem:[%s3232_s23 + $0x188] sm:$0xff] %v558_v1  ;;  %v564_v4 = vld [vmem:[%s3236_s26 + $0x1f8] sm:$0xff] }
  0x94   : >> { %561 = vst [vmem:[%s3232_s23 + $0x198] sm:$0xff] %v560_v2  ;;  %563 = vst [vmem:[%s3232_s23 + $0x1a0] sm:$0xff] %v562_v3  ;;  %v566_v5 = vld [vmem:[%s3236_s26 + $0x200] sm:$0xff]  ;;  %v568_v6 = vld [vmem:[%s3236_s26 + $0x214] sm:$0xff] }
  0x95   : >> { %565 = vst [vmem:[%s3232_s23 + $0x1b0] sm:$0xff] %v564_v4  ;;  %567 = vst [vmem:[%s3232_s23 + $0x1b8] sm:$0xff] %v566_v5  ;;  %v570_v7 = vld [vmem:[%s3236_s26 + $0x21c] sm:$0xff]  ;;  %v572_v8 = vld [vmem:[%s3236_s26 + $0x230] sm:$0xff] }
  0x96   : >> { %569 = vst [vmem:[%s3232_s23 + $0x1c8] sm:$0xff] %v568_v6  ;;  %v574_v9 = vld [vmem:[%s3236_s26 + $0x238] sm:$0xff]  ;;  %571 = vst [vmem:[%s3232_s23 + $0x1d0] sm:$0xff] %v570_v7  ;;  %v576_v10 = vld [vmem:[%s3236_s26 + $0x24c] sm:$0xff] }
  0x97   : >> { %573 = vst [vmem:[%s3232_s23 + $0x1e0] sm:$0xff] %v572_v8  ;;  %575 = vst [vmem:[%s3232_s23 + $0x1e8] sm:$0xff] %v574_v9  ;;  %v578_v11 = vld [vmem:[%s3236_s26 + $0x254] sm:$0xff]  ;;  %v580_v12 = vld [vmem:[%s3236_s26 + $0x268] sm:$0xff] }
  0x98   : >> { %577 = vst [vmem:[%s3232_s23 + $0x1f8] sm:$0xff] %v576_v10  ;;  %579 = vst [vmem:[%s3232_s23 + $0x200] sm:$0xff] %v578_v11  ;;  %v582_v13 = vld [vmem:[%s3236_s26 + $0x270] sm:$0xff]  ;;  %v584_v14 = vld [vmem:[%s3236_s26 + $0x284] sm:$0xff] }
  0x99   : >> { %581 = vst [vmem:[%s3232_s23 + $0x210] sm:$0xff] %v580_v12  ;;  %v586_v15 = vld [vmem:[%s3236_s26 + $0x28c] sm:$0xff]  ;;  %583 = vst [vmem:[%s3232_s23 + $0x218] sm:$0xff] %v582_v13  ;;  %v588_v16 = vld [vmem:[%s3236_s26 + $0x2a0] sm:$0xff] }
  0x9a   : >> { %585 = vst [vmem:[%s3232_s23 + $0x228] sm:$0xff] %v584_v14  ;;  %587 = vst [vmem:[%s3232_s23 + $0x230] sm:$0xff] %v586_v15  ;;  %v590_v17 = vld [vmem:[%s3236_s26 + $0x2a8] sm:$0xff]  ;;  %v592_v18 = vld [vmem:[%s3236_s26 + $0x2bc] sm:$0xff] }
  0x9b   : >> { %589 = vst [vmem:[%s3232_s23 + $0x240] sm:$0xff] %v588_v16  ;;  %591 = vst [vmem:[%s3232_s23 + $0x248] sm:$0xff] %v590_v17  ;;  %v594_v19 = vld [vmem:[%s3236_s26 + $0x2c4] sm:$0xff]  ;;  %v596_v20 = vld [vmem:[%s3236_s26 + $0x2d8] sm:$0xff] }
  0x9c   : >> { %593 = vst [vmem:[%s3232_s23 + $0x258] sm:$0xff] %v592_v18  ;;  %v598_v21 = vld [vmem:[%s3236_s26 + $0x2e0] sm:$0xff]  ;;  %595 = vst [vmem:[%s3232_s23 + $0x260] sm:$0xff] %v594_v19  ;;  %v600_v22 = vld [vmem:[%s3236_s26 + $0x2f4] sm:$0xff]  ;;  %488 = sbr.rel (!%p485_p7) target bundleno = 130 (0x82), region = 257 }
  0x9d   : >> { %597 = vst [vmem:[%s3232_s23 + $0x270] sm:$0xff] %v596_v20  ;;  %599 = vst [vmem:[%s3232_s23 + $0x278] sm:$0xff] %v598_v21  ;;  %v602_v23 = vld [vmem:[%s3236_s26 + $0x2fc] sm:$0xff]  ;;  %v604_v24 = vld [vmem:[%s3236_s26 + $0x310] sm:$0xff] }
  0x9e   : >> { %601 = vst [vmem:[%s3232_s23 + $0x288] sm:$0xff] %v600_v22  ;;  %603 = vst [vmem:[%s3232_s23 + $0x290] sm:$0xff] %v602_v23  ;;  %v606_v25 = vld [vmem:[%s3236_s26 + $0x318] sm:$0xff]  ;;  %v608_v26 = vld [vmem:[%s3236_s26 + $0x32c] sm:$0xff] }
  0x9f   : >> { %605 = vst [vmem:[%s3232_s23 + $0x2a0] sm:$0xff] %v604_v24  ;;  %v610_v27 = vld [vmem:[%s3236_s26 + $0x334] sm:$0xff]  ;;  %607 = vst [vmem:[%s3232_s23 + $0x2a8] sm:$0xff] %v606_v25  ;;  %v612_v28 = vld [vmem:[%s3236_s26 + $0x348] sm:$0xff] }
  0xa0   : >> { %609 = vst [vmem:[%s3232_s23 + $0x2b8] sm:$0xff] %v608_v26  ;;  %611 = vst [vmem:[%s3232_s23 + $0x2c0] sm:$0xff] %v610_v27  ;;  %v614_v29 = vld [vmem:[%s3236_s26 + $0x350] sm:$0xff]  ;;  %v616_v30 = vld [vmem:[%s3236_s26 + $0x364] sm:$0xff] }
  0xa1   : >> { %613 = vst [vmem:[%s3232_s23 + $0x2d0] sm:$0xff] %v612_v28  ;;  %615 = vst [vmem:[%s3232_s23 + $0x2d8] sm:$0xff] %v614_v29  ;;  %v618_v31 = vld [vmem:[%s3236_s26 + $0x36c] sm:$0xff]  ;;  %s4876_s26 = smov %s3778_s10 }
  0xa2   : >> { %617 = vst [vmem:[%s3232_s23 + $0x2e8] sm:$0xff] %v616_v30  ;;  %619 = vst [vmem:[%s3232_s23 + $0x2f0] sm:$0xff] %v618_v31  ;;  %s4875_s23 = smov %s3781_s6 }
  0xa3 PF: > { %s3887_s7 = sand.u32 1, %s479_s21   ;;  %s2555_s11 = sshll.u32 %s3711_s25, 8 }
  0xa4   : > { %s631_s17 = sshra.s32 %s2555_s11, 4  ;;  %p2408_p8 = scmp.le.s32.totalorder %s3887_s7, 0 }
  0xa5   : > { %s3891_s18 = scalar_lea.vmem %s3393_s28, %s631_s17   ;;  %s3894_s9 = scalar_lea.vmem %s3397_s4, %s631_s17 [#allocation2]  }
  0xa6   : > { %2298 = sbr.rel (%p2408_p8) target bundleno = 190 (0xbe), region = 262  ;;  %s4878_s23 = smov (!%p2408_p8), %s3894_s9 }
  0xa7   : > { %s4879_s26 = smov (!%p2408_p8), %s3891_s18  ;;  %s3903_s27 = smov (!%p2408_p8), 0  }
  0xa8   : > { %s3905_s29 = smov (!%p2408_p8), 0  }
  0xad LB: >> { %v647_v32 = vld [vmem:[%s3252_s26] sm:$0xff]  ;;  %v651_v34 = vld [vmem:[%s3252_s26 + $0x38] sm:$0xff]  ;;  %s711_s21 = sadd.s32 1, %s3256_s27  ;;  %v655_v36 = vld [vmem:[%s3252_s26 + $0x70] sm:$0xff]  ;;  %s641_s29 = sadd.s32 1, %s3260_s29   ;;  %s3260_s29 = sphi %s3905_s29, %s641_s29   ;;  %s3256_s27 = sphi %s3903_s27, %s4882_s27   ;;  %s3252_s26 = sphi %s4879_s26, %s4881_s26   ;;  %s3248_s23 = sphi %s4878_s23, %s4880_s23  }
  0xae   : >> { %v649_v33 = vld [vmem:[%s3252_s26 + $0x1c] sm:$0xff]  ;;  %648 = vst [vmem:[%s3248_s23] sm:$0xff] %v647_v32  ;;  %652 = vst [vmem:[%s3248_s23 + $0x30] sm:$0xff] %v651_v34  ;;  %v653_v35 = vld [vmem:[%s3252_s26 + $0x54] sm:$0xff]  ;;  %p712_p9 = scmp.ge.s32.totalorder %s711_s21, %s3887_s7  ;;  %p640_p10 = scmp.ge.s32.totalorder %s641_s29, %s3887_s7 }
  0xaf   : >> { %650 = vst [vmem:[%s3248_s23 + $0x18] sm:$0xff] %v649_v33  ;;  %v657_v37 = vld [vmem:[%s3252_s26 + $0x8c] sm:$0xff]  ;;  %654 = vst [vmem:[%s3248_s23 + $0x48] sm:$0xff] %v653_v35  ;;  %v661_v39 = vld [vmem:[%s3252_s26 + $0xc4] sm:$0xff] }
  0xb0   : >> { %656 = vst [vmem:[%s3248_s23 + $0x60] sm:$0xff] %v655_v36  ;;  %658 = vst [vmem:[%s3248_s23 + $0x78] sm:$0xff] %v657_v37  ;;  %v659_v38 = vld [vmem:[%s3252_s26 + $0xa8] sm:$0xff]  ;;  %v663_v40 = vld [vmem:[%s3252_s26 + $0xe0] sm:$0xff]  ;;  %s4911_s21 = smov (%p712_p9, %s711_s21), 0 }
  0xb1   : >> { %660 = vst [vmem:[%s3248_s23 + $0x90] sm:$0xff] %v659_v38  ;;  %662 = vst [vmem:[%s3248_s23 + $0xa8] sm:$0xff] %v661_v39  ;;  %v665_v41 = vld [vmem:[%s3252_s26 + $0xfc] sm:$0xff]  ;;  %v669_v43 = vld [vmem:[%s3252_s26 + $0x134] sm:$0xff]  ;;  %s2409_s25 = sshll.u32 %s4911_s21, 3  ;;  %s4882_s27 = smov %s4911_s21 }
  0xb2   : >> { %664 = vst [vmem:[%s3248_s23 + $0xc0] sm:$0xff] %v663_v40  ;;  %v667_v42 = vld [vmem:[%s3252_s26 + $0x118] sm:$0xff]  ;;  %666 = vst [vmem:[%s3248_s23 + $0xd8] sm:$0xff] %v665_v41  ;;  %v671_v44 = vld [vmem:[%s3252_s26 + $0x150] sm:$0xff]  ;;  %s3961_s8 = scalar_lea.vmem %s3891_s18, %s2409_s25   ;;  %s717_s10 = scalar_lea.vmem %s3894_s9, %s2409_s25 [#allocation2]  }
  0xb3   : >> { %668 = vst [vmem:[%s3248_s23 + $0xf0] sm:$0xff] %v667_v42  ;;  %670 = vst [vmem:[%s3248_s23 + $0x108] sm:$0xff] %v669_v43  ;;  %v673_v45 = vld [vmem:[%s3252_s26 + $0x16c] sm:$0xff]  ;;  %v677_v47 = vld [vmem:[%s3252_s26 + $0x1a4] sm:$0xff] }
  0xb4   : >> { %v675_v46 = vld [vmem:[%s3252_s26 + $0x188] sm:$0xff]  ;;  %672 = vst [vmem:[%s3248_s23 + $0x120] sm:$0xff] %v671_v44  ;;  %674 = vst [vmem:[%s3248_s23 + $0x138] sm:$0xff] %v673_v45  ;;  %v679_v48 = vld [vmem:[%s3252_s26 + $0x1c0] sm:$0xff] }
  0xb5   : >> { %676 = vst [vmem:[%s3248_s23 + $0x150] sm:$0xff] %v675_v46  ;;  %v681_v49 = vld [vmem:[%s3252_s26 + $0x1dc] sm:$0xff]  ;;  %678 = vst [vmem:[%s3248_s23 + $0x168] sm:$0xff] %v677_v47  ;;  %v685_v51 = vld [vmem:[%s3252_s26 + $0x214] sm:$0xff] }
  0xb6   : >> { %680 = vst [vmem:[%s3248_s23 + $0x180] sm:$0xff] %v679_v48  ;;  %682 = vst [vmem:[%s3248_s23 + $0x198] sm:$0xff] %v681_v49  ;;  %v683_v50 = vld [vmem:[%s3252_s26 + $0x1f8] sm:$0xff]  ;;  %v687_v52 = vld [vmem:[%s3252_s26 + $0x230] sm:$0xff] }
  0xb7   : >> { %684 = vst [vmem:[%s3248_s23 + $0x1b0] sm:$0xff] %v683_v50  ;;  %686 = vst [vmem:[%s3248_s23 + $0x1c8] sm:$0xff] %v685_v51  ;;  %v689_v53 = vld [vmem:[%s3252_s26 + $0x24c] sm:$0xff]  ;;  %v693_v55 = vld [vmem:[%s3252_s26 + $0x284] sm:$0xff]  ;;  %643 = sbr.rel (!%p640_p10) target bundleno = 173 (0xad), region = 268 }
  0xb8   : >> { %688 = vst [vmem:[%s3248_s23 + $0x1e0] sm:$0xff] %v687_v52  ;;  %v691_v54 = vld [vmem:[%s3252_s26 + $0x268] sm:$0xff]  ;;  %690 = vst [vmem:[%s3248_s23 + $0x1f8] sm:$0xff] %v689_v53  ;;  %v695_v56 = vld [vmem:[%s3252_s26 + $0x2a0] sm:$0xff] }
  0xb9   : >> { %692 = vst [vmem:[%s3248_s23 + $0x210] sm:$0xff] %v691_v54  ;;  %694 = vst [vmem:[%s3248_s23 + $0x228] sm:$0xff] %v693_v55  ;;  %v697_v57 = vld [vmem:[%s3252_s26 + $0x2bc] sm:$0xff]  ;;  %v701_v59 = vld [vmem:[%s3252_s26 + $0x2f4] sm:$0xff] }
  0xba   : >> { %v699_v58 = vld [vmem:[%s3252_s26 + $0x2d8] sm:$0xff]  ;;  %696 = vst [vmem:[%s3248_s23 + $0x240] sm:$0xff] %v695_v56  ;;  %698 = vst [vmem:[%s3248_s23 + $0x258] sm:$0xff] %v697_v57  ;;  %v703_v60 = vld [vmem:[%s3252_s26 + $0x310] sm:$0xff] }
  0xbb   : >> { %700 = vst [vmem:[%s3248_s23 + $0x270] sm:$0xff] %v699_v58  ;;  %v705_v61 = vld [vmem:[%s3252_s26 + $0x32c] sm:$0xff]  ;;  %702 = vst [vmem:[%s3248_s23 + $0x288] sm:$0xff] %v701_v59  ;;  %v709_v63 = vld [vmem:[%s3252_s26 + $0x364] sm:$0xff] }
  0xbc   : >> { %704 = vst [vmem:[%s3248_s23 + $0x2a0] sm:$0xff] %v703_v60  ;;  %706 = vst [vmem:[%s3248_s23 + $0x2b8] sm:$0xff] %v705_v61  ;;  %v707_v62 = vld [vmem:[%s3252_s26 + $0x348] sm:$0xff]  ;;  %s4881_s26 = smov %s3961_s8 }
  0xbd   : >> { %708 = vst [vmem:[%s3248_s23 + $0x2d0] sm:$0xff] %v707_v62  ;;  %710 = vst [vmem:[%s3248_s23 + $0x2e8] sm:$0xff] %v709_v63  ;;  %s4880_s23 = smov %s717_s10 }
  0xbe PF: > { %s3326_s6 = smov 0  }
  0xbf   : > { %s4002_s11 = sshllo.u32 %s3326_s6, %s3401_s5 }
  0xc0   : > { %v727_v0 = vld [vmem:[%s3704_s22] sm:%s4002_s11]  ;;  %v731_v2 = vld [vmem:[%s3704_s22 + $0x38] sm:%s4002_s11] }
  0xc1   : > { %v729_v1 = vld [vmem:[%s3704_s22 + $0x1c] sm:%s4002_s11]  ;;  %728 = vst [vmem:[%s3707_s24] sm:%s4002_s11] %v727_v0 }
  0xc2   : > { %730 = vst [vmem:[%s3707_s24 + $0x18] sm:%s4002_s11] %v729_v1  ;;  %v733_v3 = vld [vmem:[%s3704_s22 + $0x54] sm:%s4002_s11] }
  0xc3   : > { %732 = vst [vmem:[%s3707_s24 + $0x30] sm:%s4002_s11] %v731_v2  ;;  %734 = vst [vmem:[%s3707_s24 + $0x48] sm:%s4002_s11] %v733_v3 }
  0xc4   : > { %v735_v4 = vld [vmem:[%s3704_s22 + $0x70] sm:%s4002_s11]  ;;  %v739_v6 = vld [vmem:[%s3704_s22 + $0xa8] sm:%s4002_s11] }
  0xc5   : > { %v737_v5 = vld [vmem:[%s3704_s22 + $0x8c] sm:%s4002_s11]  ;;  %736 = vst [vmem:[%s3707_s24 + $0x60] sm:%s4002_s11] %v735_v4 }
  0xc6   : > { %738 = vst [vmem:[%s3707_s24 + $0x78] sm:%s4002_s11] %v737_v5  ;;  %v741_v7 = vld [vmem:[%s3704_s22 + $0xc4] sm:%s4002_s11] }
  0xc7   : > { %740 = vst [vmem:[%s3707_s24 + $0x90] sm:%s4002_s11] %v739_v6  ;;  %742 = vst [vmem:[%s3707_s24 + $0xa8] sm:%s4002_s11] %v741_v7 }
  0xc8   : > { %v743_v8 = vld [vmem:[%s3704_s22 + $0xe0] sm:%s4002_s11]  ;;  %v747_v10 = vld [vmem:[%s3704_s22 + $0x118] sm:%s4002_s11] }
  0xc9   : > { %v745_v9 = vld [vmem:[%s3704_s22 + $0xfc] sm:%s4002_s11]  ;;  %744 = vst [vmem:[%s3707_s24 + $0xc0] sm:%s4002_s11] %v743_v8 }
  0xca   : > { %746 = vst [vmem:[%s3707_s24 + $0xd8] sm:%s4002_s11] %v745_v9  ;;  %v749_v11 = vld [vmem:[%s3704_s22 + $0x134] sm:%s4002_s11] }
  0xcb   : > { %748 = vst [vmem:[%s3707_s24 + $0xf0] sm:%s4002_s11] %v747_v10  ;;  %750 = vst [vmem:[%s3707_s24 + $0x108] sm:%s4002_s11] %v749_v11 }
  0xcc   : > { %v751_v12 = vld [vmem:[%s3704_s22 + $0x150] sm:%s4002_s11]  ;;  %v755_v14 = vld [vmem:[%s3704_s22 + $0x188] sm:%s4002_s11] }
  0xcd   : > { %v753_v13 = vld [vmem:[%s3704_s22 + $0x16c] sm:%s4002_s11]  ;;  %752 = vst [vmem:[%s3707_s24 + $0x120] sm:%s4002_s11] %v751_v12 }
  0xce   : > { %754 = vst [vmem:[%s3707_s24 + $0x138] sm:%s4002_s11] %v753_v13  ;;  %v757_v15 = vld [vmem:[%s3704_s22 + $0x1a4] sm:%s4002_s11] }
  0xcf   : > { %756 = vst [vmem:[%s3707_s24 + $0x150] sm:%s4002_s11] %v755_v14  ;;  %758 = vst [vmem:[%s3707_s24 + $0x168] sm:%s4002_s11] %v757_v15 }
  0xd0   : > { %v759_v16 = vld [vmem:[%s3704_s22 + $0x1c0] sm:%s4002_s11]  ;;  %v763_v18 = vld [vmem:[%s3704_s22 + $0x1f8] sm:%s4002_s11] }
  0xd1   : > { %v761_v17 = vld [vmem:[%s3704_s22 + $0x1dc] sm:%s4002_s11]  ;;  %760 = vst [vmem:[%s3707_s24 + $0x180] sm:%s4002_s11] %v759_v16 }
  0xd2   : > { %762 = vst [vmem:[%s3707_s24 + $0x198] sm:%s4002_s11] %v761_v17  ;;  %v765_v19 = vld [vmem:[%s3704_s22 + $0x214] sm:%s4002_s11] }
  0xd3   : > { %764 = vst [vmem:[%s3707_s24 + $0x1b0] sm:%s4002_s11] %v763_v18  ;;  %766 = vst [vmem:[%s3707_s24 + $0x1c8] sm:%s4002_s11] %v765_v19 }
  0xd4   : > { %v767_v20 = vld [vmem:[%s3704_s22 + $0x230] sm:%s4002_s11]  ;;  %v771_v22 = vld [vmem:[%s3704_s22 + $0x268] sm:%s4002_s11] }
  0xd5   : > { %v769_v21 = vld [vmem:[%s3704_s22 + $0x24c] sm:%s4002_s11]  ;;  %768 = vst [vmem:[%s3707_s24 + $0x1e0] sm:%s4002_s11] %v767_v20 }
  0xd6   : > { %770 = vst [vmem:[%s3707_s24 + $0x1f8] sm:%s4002_s11] %v769_v21  ;;  %v773_v23 = vld [vmem:[%s3704_s22 + $0x284] sm:%s4002_s11] }
  0xd7   : > { %772 = vst [vmem:[%s3707_s24 + $0x210] sm:%s4002_s11] %v771_v22  ;;  %774 = vst [vmem:[%s3707_s24 + $0x228] sm:%s4002_s11] %v773_v23 }
  0xd8   : > { %v775_v24 = vld [vmem:[%s3704_s22 + $0x2a0] sm:%s4002_s11]  ;;  %v779_v26 = vld [vmem:[%s3704_s22 + $0x2d8] sm:%s4002_s11] }
  0xd9   : > { %v777_v25 = vld [vmem:[%s3704_s22 + $0x2bc] sm:%s4002_s11]  ;;  %776 = vst [vmem:[%s3707_s24 + $0x240] sm:%s4002_s11] %v775_v24 }
  0xda   : > { %778 = vst [vmem:[%s3707_s24 + $0x258] sm:%s4002_s11] %v777_v25  ;;  %v781_v27 = vld [vmem:[%s3704_s22 + $0x2f4] sm:%s4002_s11] }
  0xdb   : > { %780 = vst [vmem:[%s3707_s24 + $0x270] sm:%s4002_s11] %v779_v26  ;;  %782 = vst [vmem:[%s3707_s24 + $0x288] sm:%s4002_s11] %v781_v27 }
  0xdc   : > { %v783_v28 = vld [vmem:[%s3704_s22 + $0x310] sm:%s4002_s11]  ;;  %v787_v30 = vld [vmem:[%s3704_s22 + $0x348] sm:%s4002_s11] }
  0xdd   : > { %v785_v29 = vld [vmem:[%s3704_s22 + $0x32c] sm:%s4002_s11]  ;;  %784 = vst [vmem:[%s3707_s24 + $0x2a0] sm:%s4002_s11] %v783_v28 }
  0xde   : > { %786 = vst [vmem:[%s3707_s24 + $0x2b8] sm:%s4002_s11] %v785_v29  ;;  %v789_v31 = vld [vmem:[%s3704_s22 + $0x364] sm:%s4002_s11] }
  0xdf   : > { %788 = vst [vmem:[%s3707_s24 + $0x2d0] sm:%s4002_s11] %v787_v30  ;;  %790 = vst [vmem:[%s3707_s24 + $0x2e8] sm:%s4002_s11] %v789_v31 }
  0xe0 PF: > { %p2411_p11 = scmp.ge.u32.totalorder %s3395_s30, 8 }
  0xe1   : > { %s3327_s5 = smov (!%p2411_p11), 0  }
  0xe2   : > { %153 = sbr.rel (%p2411_p11) target bundleno = 259 (0x103), region = 40  ;;  %s4134_s22 = sshllo.u32 (!%p2411_p11), %s3327_s5, %s3395_s30 }
  0xe3   : > { %v163_v32 = vld [vmem:[%s3393_s28] sm:%s4134_s22] (!%p2411_p11)  ;;  %v167_v34 = vld [vmem:[%s3393_s28 + $0x38] sm:%s4134_s22] (!%p2411_p11) }
  0xe4   : > { %v165_v33 = vld [vmem:[%s3393_s28 + $0x1c] sm:%s4134_s22] (!%p2411_p11)  ;;  %164 = vst [vmem:[%s3397_s4] sm:%s4134_s22] (!%p2411_p11), %v163_v32 }
  0xe5   : > { %166 = vst [vmem:[%s3397_s4 + $0x18] sm:%s4134_s22] (!%p2411_p11), %v165_v33  ;;  %v169_v35 = vld [vmem:[%s3393_s28 + $0x54] sm:%s4134_s22] (!%p2411_p11) }
  0xe6   : > { %168 = vst [vmem:[%s3397_s4 + $0x30] sm:%s4134_s22] (!%p2411_p11), %v167_v34  ;;  %170 = vst [vmem:[%s3397_s4 + $0x48] sm:%s4134_s22] (!%p2411_p11), %v169_v35 }
  0xe7   : > { %v171_v36 = vld [vmem:[%s3393_s28 + $0x70] sm:%s4134_s22] (!%p2411_p11)  ;;  %v175_v38 = vld [vmem:[%s3393_s28 + $0xa8] sm:%s4134_s22] (!%p2411_p11) }
  0xe8   : > { %v173_v37 = vld [vmem:[%s3393_s28 + $0x8c] sm:%s4134_s22] (!%p2411_p11)  ;;  %172 = vst [vmem:[%s3397_s4 + $0x60] sm:%s4134_s22] (!%p2411_p11), %v171_v36 }
  0xe9   : > { %174 = vst [vmem:[%s3397_s4 + $0x78] sm:%s4134_s22] %v173_v37  ;;  %v177_v39 = vld [vmem:[%s3393_s28 + $0xc4] sm:%s4134_s22] }
  0xea   : > { %176 = vst [vmem:[%s3397_s4 + $0x90] sm:%s4134_s22] %v175_v38  ;;  %178 = vst [vmem:[%s3397_s4 + $0xa8] sm:%s4134_s22] %v177_v39 }
  0xeb   : > { %v179_v40 = vld [vmem:[%s3393_s28 + $0xe0] sm:%s4134_s22]  ;;  %v183_v42 = vld [vmem:[%s3393_s28 + $0x118] sm:%s4134_s22] }
  0xec   : > { %v181_v41 = vld [vmem:[%s3393_s28 + $0xfc] sm:%s4134_s22]  ;;  %180 = vst [vmem:[%s3397_s4 + $0xc0] sm:%s4134_s22] %v179_v40 }
  0xed   : > { %182 = vst [vmem:[%s3397_s4 + $0xd8] sm:%s4134_s22] %v181_v41  ;;  %v185_v43 = vld [vmem:[%s3393_s28 + $0x134] sm:%s4134_s22] }
  0xee   : > { %184 = vst [vmem:[%s3397_s4 + $0xf0] sm:%s4134_s22] %v183_v42  ;;  %186 = vst [vmem:[%s3397_s4 + $0x108] sm:%s4134_s22] %v185_v43 }
  0xef   : > { %v187_v44 = vld [vmem:[%s3393_s28 + $0x150] sm:%s4134_s22]  ;;  %v191_v46 = vld [vmem:[%s3393_s28 + $0x188] sm:%s4134_s22] }
  0xf0   : > { %v189_v45 = vld [vmem:[%s3393_s28 + $0x16c] sm:%s4134_s22]  ;;  %188 = vst [vmem:[%s3397_s4 + $0x120] sm:%s4134_s22] %v187_v44 }
  0xf1   : > { %190 = vst [vmem:[%s3397_s4 + $0x138] sm:%s4134_s22] %v189_v45  ;;  %v193_v47 = vld [vmem:[%s3393_s28 + $0x1a4] sm:%s4134_s22] }
  0xf2   : > { %192 = vst [vmem:[%s3397_s4 + $0x150] sm:%s4134_s22] %v191_v46  ;;  %194 = vst [vmem:[%s3397_s4 + $0x168] sm:%s4134_s22] %v193_v47 }
  0xf3   : > { %v195_v48 = vld [vmem:[%s3393_s28 + $0x1c0] sm:%s4134_s22]  ;;  %v199_v50 = vld [vmem:[%s3393_s28 + $0x1f8] sm:%s4134_s22] }
  0xf4   : > { %v197_v49 = vld [vmem:[%s3393_s28 + $0x1dc] sm:%s4134_s22]  ;;  %196 = vst [vmem:[%s3397_s4 + $0x180] sm:%s4134_s22] %v195_v48 }
  0xf5   : > { %198 = vst [vmem:[%s3397_s4 + $0x198] sm:%s4134_s22] %v197_v49  ;;  %v201_v51 = vld [vmem:[%s3393_s28 + $0x214] sm:%s4134_s22] }
  0xf6   : > { %200 = vst [vmem:[%s3397_s4 + $0x1b0] sm:%s4134_s22] %v199_v50  ;;  %202 = vst [vmem:[%s3397_s4 + $0x1c8] sm:%s4134_s22] %v201_v51 }
  0xf7   : > { %v203_v52 = vld [vmem:[%s3393_s28 + $0x230] sm:%s4134_s22]  ;;  %v207_v54 = vld [vmem:[%s3393_s28 + $0x268] sm:%s4134_s22] }
  0xf8   : > { %v205_v53 = vld [vmem:[%s3393_s28 + $0x24c] sm:%s4134_s22]  ;;  %204 = vst [vmem:[%s3397_s4 + $0x1e0] sm:%s4134_s22] %v203_v52 }
  0xf9   : > { %206 = vst [vmem:[%s3397_s4 + $0x1f8] sm:%s4134_s22] %v205_v53  ;;  %v209_v55 = vld [vmem:[%s3393_s28 + $0x284] sm:%s4134_s22] }
  0xfa   : > { %208 = vst [vmem:[%s3397_s4 + $0x210] sm:%s4134_s22] %v207_v54  ;;  %210 = vst [vmem:[%s3397_s4 + $0x228] sm:%s4134_s22] %v209_v55 }
  0xfb   : > { %v211_v56 = vld [vmem:[%s3393_s28 + $0x2a0] sm:%s4134_s22]  ;;  %v215_v58 = vld [vmem:[%s3393_s28 + $0x2d8] sm:%s4134_s22] }
  0xfc   : > { %v213_v57 = vld [vmem:[%s3393_s28 + $0x2bc] sm:%s4134_s22]  ;;  %212 = vst [vmem:[%s3397_s4 + $0x240] sm:%s4134_s22] %v211_v56 }
  0xfd   : > { %214 = vst [vmem:[%s3397_s4 + $0x258] sm:%s4134_s22] %v213_v57  ;;  %v217_v59 = vld [vmem:[%s3393_s28 + $0x2f4] sm:%s4134_s22] }
  0xfe   : > { %216 = vst [vmem:[%s3397_s4 + $0x270] sm:%s4134_s22] %v215_v58  ;;  %218 = vst [vmem:[%s3397_s4 + $0x288] sm:%s4134_s22] %v217_v59 }
  0xff   : > { %v219_v60 = vld [vmem:[%s3393_s28 + $0x310] sm:%s4134_s22]  ;;  %v223_v62 = vld [vmem:[%s3393_s28 + $0x348] sm:%s4134_s22] }
 0x100   : > { %v221_v61 = vld [vmem:[%s3393_s28 + $0x32c] sm:%s4134_s22]  ;;  %220 = vst [vmem:[%s3397_s4 + $0x2a0] sm:%s4134_s22] %v219_v60 }
 0x101   : > { %222 = vst [vmem:[%s3397_s4 + $0x2b8] sm:%s4134_s22] %v221_v61  ;;  %v225_v63 = vld [vmem:[%s3393_s28 + $0x364] sm:%s4134_s22] }
 0x102   : > { %224 = vst [vmem:[%s3397_s4 + $0x2d0] sm:%s4134_s22] %v223_v62  ;;  %226 = vst [vmem:[%s3397_s4 + $0x2e8] sm:%s4134_s22] %v225_v63 }
 0x103 PF: > { %p2412_p12 = scmp.ge.s32.totalorder %s3196_s14, 1  ;;  %p793_p13 = scmp.lt.s32.totalorder %s3196_s14, 3 }
 0x105   : > { %p794_p0 = pnand %p2412_p12, %p793_p13 }
 0x106   : > { %s800_s30 = sand.u32 (!%p794_p0), 1, %s3188_s12   ;;  %v4270_v0 = vld [vmem:[%s4858_s0 + $0x4] ss:$8 sps:$4 sm:$0xff] (!%p794_p0)   ;;  %v3328_v9 = vmov (!%p794_p0), 0  }
 0x107   : > { %797 = sbr.rel (%p794_p0) target bundleno = 786 (0x312), region = 94  ;;  %1488 = vmatprep.mubr.bf16.mxu0 (!%p794_p0), %v4270_v0  ;;  %1541 = vmatprep.mubr.bf16.mxu1 (!%p794_p0), %v4270_v0 }
 0x108   : > { %s2607_s28 = smul.u32 (!%p794_p0), 768, %s800_s30  ;;  %2894 = vset.pattern.permute.xlu0 (!%p794_p0), %v3328_v9  ;;  %2895 = vset.pattern.permute.xlu1 (!%p794_p0), %v3328_v9  ;;  %v3034_v9 = vld [vmem:[%s4858_s0 + $0x14] ss:$8 sps:$4 sm:$0xff] (!%p794_p0)  }
 0x109   : > { %s2608_s5 = smul.u32 (!%p794_p0), 96, %s800_s30 }
 0x10a   : > { %s4276_s4 = scalar_lea.vmem (!%p794_p0), [#allocation2], %s2607_s28 }
 0x10b   : > { %v2896_v1 = vld [vmem:[%s4276_s4 + $0x4] ss:$24 sps:$4 sm:$0xff] (!%p794_p0)   ;;  %v2900_v3 = vld [vmem:[%s4276_s4] ss:$24 sps:$4 sm:$0xff] (!%p794_p0)   ;;  %v2902_v5 = vld [vmem:[%s4276_s4 + $0x34] ss:$24 sps:$4 sm:$0xff] (!%p794_p0)  }
 0x10c   : > { %v2898_v2 = vld [vmem:[%s4276_s4 + $0xc] ss:$24 sps:$4 sm:$0xff] (!%p794_p0)   ;;  %1456 = vmatprep.subr.bf16.mxu0 (!%p794_p0), %v2896_v1  ;;  %v2901_v4 = vld [vmem:[%s4276_s4 + $0x8] ss:$24 sps:$4 sm:$0xff] (!%p794_p0)   ;;  %v2904_v6 = vld [vmem:[%s4276_s4 + $0x3c] ss:$24 sps:$4 sm:$0xff] (!%p794_p0)  }
 0x10d   : > { %1509 = vmatprep.subr.bf16.mxu1 (!%p794_p0), %v2898_v2  ;;  %1457 = vmatpush1.bf16.msra.mxu0 (!%p794_p0), %v2900_v3  ;;  %v2906_v7 = vld [vmem:[%s4276_s4 + $0x30] ss:$24 sps:$4 sm:$0xff] (!%p794_p0)   ;;  %v2908_v10 = vld [vmem:[%s4276_s4 + $0x64] ss:$24 sps:$4 sm:$0xff] (!%p794_p0)   ;;  %v2912_v12 = vld [vmem:[%s4276_s4 + $0x60] ss:$24 sps:$4 sm:$0xff] (!%p794_p0)  }
 0x10e   : > { %1510 = vmatpush1.bf16.msra.mxu1 %v2901_v4  ;;  %1458 = vmatprep.subr.bf16.mxu0 %v2902_v5  ;;  %v2907_v8 = vld [vmem:[%s4276_s4 + $0x38] ss:$24 sps:$4 sm:$0xff]   ;;  %v2910_v11 = vld [vmem:[%s4276_s4 + $0x6c] ss:$24 sps:$4 sm:$0xff]   ;;  %v2913_v13 = vld [vmem:[%s4276_s4 + $0x68] ss:$24 sps:$4 sm:$0xff]  }
 0x10f   : > { %1511 = vmatprep.subr.bf16.mxu1 %v2904_v6  ;;  %v2914_v14 = vld [vmem:[%s4276_s4 + $0x94] ss:$24 sps:$4 sm:$0xff]   ;;  %v2918_v16 = vld [vmem:[%s4276_s4 + $0x90] ss:$24 sps:$4 sm:$0xff]   ;;  %v2920_v18 = vld [vmem:[%s4276_s4 + $0xc4] ss:$24 sps:$4 sm:$0xff]  }
 0x110   : > { %v2916_v15 = vld [vmem:[%s4276_s4 + $0x9c] ss:$24 sps:$4 sm:$0xff]   ;;  %v2919_v17 = vld [vmem:[%s4276_s4 + $0x98] ss:$24 sps:$4 sm:$0xff]   ;;  %v2922_v19 = vld [vmem:[%s4276_s4 + $0xcc] ss:$24 sps:$4 sm:$0xff]  }
 0x111   : > { %1459 = vmatpush1.bf16.msra.mxu0 %v2906_v7  ;;  %v2924_v20 = vld [vmem:[%s4276_s4 + $0xc0] ss:$24 sps:$4 sm:$0xff]   ;;  %v2926_v22 = vld [vmem:[%s4276_s4 + $0xf4] ss:$24 sps:$4 sm:$0xff]   ;;  %v2930_v24 = vld [vmem:[%s4276_s4 + $0xf0] ss:$24 sps:$4 sm:$0xff]  }
 0x112   : > { %1512 = vmatpush1.bf16.msra.mxu1 %v2907_v8  ;;  %1460 = vmatprep.subr.bf16.mxu0 %v2908_v10  ;;  %v2925_v21 = vld [vmem:[%s4276_s4 + $0xc8] ss:$24 sps:$4 sm:$0xff]   ;;  %v2928_v23 = vld [vmem:[%s4276_s4 + $0xfc] ss:$24 sps:$4 sm:$0xff]   ;;  %v2931_v25 = vld [vmem:[%s4276_s4 + $0xf8] ss:$24 sps:$4 sm:$0xff]  }
 0x113   : > { %1513 = vmatprep.subr.bf16.mxu1 %v2910_v11  ;;  %v2932_v26 = vld [vmem:[%s4276_s4 + $0x124] ss:$24 sps:$4 sm:$0xff]   ;;  %v2936_v28 = vld [vmem:[%s4276_s4 + $0x120] ss:$24 sps:$4 sm:$0xff]   ;;  %v2938_v30 = vld [vmem:[%s4276_s4 + $0x154] ss:$24 sps:$4 sm:$0xff]  }
 0x114   : > { %v2934_v27 = vld [vmem:[%s4276_s4 + $0x12c] ss:$24 sps:$4 sm:$0xff]   ;;  %v2937_v29 = vld [vmem:[%s4276_s4 + $0x128] ss:$24 sps:$4 sm:$0xff]   ;;  %v2940_v31 = vld [vmem:[%s4276_s4 + $0x15c] ss:$24 sps:$4 sm:$0xff]  }
 0x115   : > { %1461 = vmatpush1.bf16.msra.mxu0 %v2912_v12  ;;  %v2942_v32 = vld [vmem:[%s4276_s4 + $0x150] ss:$24 sps:$4 sm:$0xff]   ;;  %v2944_v34 = vld [vmem:[%s4276_s4 + $0x184] ss:$24 sps:$4 sm:$0xff]   ;;  %v2948_v36 = vld [vmem:[%s4276_s4 + $0x180] ss:$24 sps:$4 sm:$0xff]  }
 0x116   : > { %1514 = vmatpush1.bf16.msra.mxu1 %v2913_v13  ;;  %1462 = vmatprep.subr.bf16.mxu0 %v2914_v14  ;;  %v2943_v33 = vld [vmem:[%s4276_s4 + $0x158] ss:$24 sps:$4 sm:$0xff]   ;;  %v2946_v35 = vld [vmem:[%s4276_s4 + $0x18c] ss:$24 sps:$4 sm:$0xff]   ;;  %v2949_v37 = vld [vmem:[%s4276_s4 + $0x188] ss:$24 sps:$4 sm:$0xff]  }
 0x117   : > { %1515 = vmatprep.subr.bf16.mxu1 %v2916_v15  ;;  %v2950_v38 = vld [vmem:[%s4276_s4 + $0x1b4] ss:$24 sps:$4 sm:$0xff]   ;;  %v2954_v40 = vld [vmem:[%s4276_s4 + $0x1b0] ss:$24 sps:$4 sm:$0xff]   ;;  %v2956_v42 = vld [vmem:[%s4276_s4 + $0x1e4] ss:$24 sps:$4 sm:$0xff]  }
 0x118   : > { %v2952_v39 = vld [vmem:[%s4276_s4 + $0x1bc] ss:$24 sps:$4 sm:$0xff]   ;;  %v2955_v41 = vld [vmem:[%s4276_s4 + $0x1b8] ss:$24 sps:$4 sm:$0xff]   ;;  %v2958_v43 = vld [vmem:[%s4276_s4 + $0x1ec] ss:$24 sps:$4 sm:$0xff]  }
 0x119   : > { %1463 = vmatpush1.bf16.msra.mxu0 %v2918_v16  ;;  %v2960_v44 = vld [vmem:[%s4276_s4 + $0x1e0] ss:$24 sps:$4 sm:$0xff]   ;;  %v2962_v46 = vld [vmem:[%s4276_s4 + $0x214] ss:$24 sps:$4 sm:$0xff]   ;;  %v2966_v48 = vld [vmem:[%s4276_s4 + $0x210] ss:$24 sps:$4 sm:$0xff]  }
 0x11a   : > { %1516 = vmatpush1.bf16.msra.mxu1 %v2919_v17  ;;  %1464 = vmatprep.subr.bf16.mxu0 %v2920_v18  ;;  %v2961_v45 = vld [vmem:[%s4276_s4 + $0x1e8] ss:$24 sps:$4 sm:$0xff]   ;;  %v2964_v47 = vld [vmem:[%s4276_s4 + $0x21c] ss:$24 sps:$4 sm:$0xff]   ;;  %v2967_v49 = vld [vmem:[%s4276_s4 + $0x218] ss:$24 sps:$4 sm:$0xff]  }
 0x11b   : > { %1517 = vmatprep.subr.bf16.mxu1 %v2922_v19  ;;  %v2968_v50 = vld [vmem:[%s4276_s4 + $0x244] ss:$24 sps:$4 sm:$0xff]   ;;  %v2972_v52 = vld [vmem:[%s4276_s4 + $0x240] ss:$24 sps:$4 sm:$0xff]   ;;  %v2974_v54 = vld [vmem:[%s4276_s4 + $0x274] ss:$24 sps:$4 sm:$0xff]  }
 0x11c   : > { %v2970_v51 = vld [vmem:[%s4276_s4 + $0x24c] ss:$24 sps:$4 sm:$0xff]   ;;  %v2973_v53 = vld [vmem:[%s4276_s4 + $0x248] ss:$24 sps:$4 sm:$0xff]   ;;  %v2976_v55 = vld [vmem:[%s4276_s4 + $0x27c] ss:$24 sps:$4 sm:$0xff]  }
 0x11d   : > { %1465 = vmatpush1.bf16.msra.mxu0 %v2924_v20  ;;  %v2978_v56 = vld [vmem:[%s4276_s4 + $0x270] ss:$24 sps:$4 sm:$0xff]   ;;  %v2980_v58 = vld [vmem:[%s4276_s4 + $0x2a4] ss:$24 sps:$4 sm:$0xff]   ;;  %v2984_v60 = vld [vmem:[%s4276_s4 + $0x2a0] ss:$24 sps:$4 sm:$0xff]  }
 0x11e   : > { %1518 = vmatpush1.bf16.msra.mxu1 %v2925_v21  ;;  %1466 = vmatprep.subr.bf16.mxu0 %v2926_v22  ;;  %v2979_v57 = vld [vmem:[%s4276_s4 + $0x278] ss:$24 sps:$4 sm:$0xff]   ;;  %v2982_v59 = vld [vmem:[%s4276_s4 + $0x2ac] ss:$24 sps:$4 sm:$0xff]   ;;  %v2985_v61 = vld [vmem:[%s4276_s4 + $0x2a8] ss:$24 sps:$4 sm:$0xff]  }
 0x11f   : > { %1519 = vmatprep.subr.bf16.mxu1 %v2928_v23  ;;  %v2986_v62 = vld [vmem:[%s4276_s4 + $0x2d4] ss:$24 sps:$4 sm:$0xff]   ;;  %v2990_v1 = vld [vmem:[%s4276_s4 + $0x2d0] ss:$24 sps:$4 sm:$0xff]   ;;  %v932_v6 = vld [vmem:[%s4860_s2] sm:$0xff]  ;;  %s4422_s12 = scalar_lea.vmem [#allocation3], %s2608_s5  }
 0x120   : > { %v2988_v63 = vld [vmem:[%s4276_s4 + $0x2dc] ss:$24 sps:$4 sm:$0xff]   ;;  %v2991_v2 = vld [vmem:[%s4276_s4 + $0x2d8] ss:$24 sps:$4 sm:$0xff]   ;;  %v4346_v4 = vld [vmem:[%s4858_s0] ss:$8 sps:$4 sm:$0xff]   ;;  %938 = vperm.xlu0 %2894, %v932_v6  }
 0x121   : > { %1467 = vmatpush1.bf16.msra.mxu0 %v2930_v24  ;;  %v2997_v3 = vld [vmem:[%s4276_s4 + $0x14] ss:$24 sps:$4 sm:$0xff]   ;;  %v2995_v5 = vld [vmem:[%s4276_s4 + $0x10] ss:$24 sps:$4 sm:$0xff]   ;;  %v3000_v8 = vld [vmem:[%s4276_s4 + $0x44] ss:$24 sps:$4 sm:$0xff]  }
 0x122   : > { %1520 = vmatpush1.bf16.msra.mxu1 %v2931_v25  ;;  %1468 = vmatprep.subr.bf16.mxu0 %v2932_v26  ;;  %v934_v7 = vld [vmem:[%s4860_s2 + $0x10] sm:$0xff]  ;;  %v2998_v10 = vld [vmem:[%s4276_s4 + $0x40] ss:$24 sps:$4 sm:$0xff]   ;;  %v933_v11 = vld [vmem:[%s4860_s2 + $0x8] sm:$0xff]  ;;  %s1730_s22 = smul.u32 (%p3382_p5), 6, %s3367_s15 }
 0x123   : > { %1521 = vmatprep.subr.bf16.mxu1 %v2934_v27  ;;  %948 = vperm.xlu1 %2895, %v934_v7   ;;  %v935_v12 = vld [vmem:[%s4860_s2 + $0x18] sm:$0xff]  ;;  %v3003_v13 = vld [vmem:[%s4276_s4 + $0x74] ss:$24 sps:$4 sm:$0xff]   ;;  %v3001_v15 = vld [vmem:[%s4276_s4 + $0x70] ss:$24 sps:$4 sm:$0xff]   ;;  %s2569_s30 = smul.u32 (%p3382_p5), 24, %s3367_s15 }
 0x124   : > { %v4372_v14 = vld [vmem:[%s4858_s0 + $0x10] ss:$8 sps:$4 sm:$0xff]   ;;  %943 = vperm.xlu0 %2894, %v933_v11   ;;  %v3006_v16 = vld [vmem:[%s4276_s4 + $0xa4] ss:$24 sps:$4 sm:$0xff]   ;;  %v3009_v18 = vld [vmem:[%s4276_s4 + $0xd4] ss:$24 sps:$4 sm:$0xff]  }
 0x125   : > { %1469 = vmatpush1.bf16.msra.mxu0 %v2936_v28  ;;  %v3004_v17 = vld [vmem:[%s4276_s4 + $0xa0] ss:$24 sps:$4 sm:$0xff]   ;;  %v3007_v19 = vld [vmem:[%s4276_s4 + $0xd0] ss:$24 sps:$4 sm:$0xff]   ;;  %v3012_v20 = vld [vmem:[%s4276_s4 + $0x104] ss:$24 sps:$4 sm:$0xff]  }
 0x126   : > { %1522 = vmatpush1.bf16.msra.mxu1 %v2937_v29  ;;  %1470 = vmatprep.subr.bf16.mxu0 %v2938_v30  ;;  %v3010_v21 = vld [vmem:[%s4276_s4 + $0x100] ss:$24 sps:$4 sm:$0xff]   ;;  %v3015_v22 = vld [vmem:[%s4276_s4 + $0x134] ss:$24 sps:$4 sm:$0xff]   ;;  %v3018_v23 = vld [vmem:[%s4276_s4 + $0x164] ss:$24 sps:$4 sm:$0xff]  }
 0x127   : > { %1523 = vmatprep.subr.bf16.mxu1 %v2940_v31  ;;  %953 = vperm.xlu1 %2895, %v935_v12   ;;  %v3016_v24 = vld [vmem:[%s4276_s4 + $0x160] ss:$24 sps:$4 sm:$0xff]   ;;  %v3021_v25 = vld [vmem:[%s4276_s4 + $0x194] ss:$24 sps:$4 sm:$0xff]   ;;  %v3019_v26 = vld [vmem:[%s4276_s4 + $0x190] ss:$24 sps:$4 sm:$0xff]  }
 0x128   : > { %v3024_v27 = vld [vmem:[%s4276_s4 + $0x1c4] ss:$24 sps:$4 sm:$0xff]   ;;  %v3022_v28 = vld [vmem:[%s4276_s4 + $0x1c0] ss:$24 sps:$4 sm:$0xff]   ;;  %v3027_v29 = vld [vmem:[%s4276_s4 + $0x1f4] ss:$24 sps:$4 sm:$0xff]  }
 0x129   : > { %1471 = vmatpush1.bf16.msra.mxu0 %v2942_v32  ;;  %v3025_v30 = vld [vmem:[%s4276_s4 + $0x1f0] ss:$24 sps:$4 sm:$0xff]   ;;  %v3030_v31 = vld [vmem:[%s4276_s4 + $0x224] ss:$24 sps:$4 sm:$0xff]   ;;  %v3028_v32 = vld [vmem:[%s4276_s4 + $0x220] ss:$24 sps:$4 sm:$0xff]  }
 0x12a   : > { %1524 = vmatpush1.bf16.msra.mxu1 %v2943_v33  ;;  %1472 = vmatprep.subr.bf16.mxu0 %v2944_v34  ;;  %v3033_v33 = vld [vmem:[%s4276_s4 + $0x254] ss:$24 sps:$4 sm:$0xff]   ;;  %v3031_v34 = vld [vmem:[%s4276_s4 + $0x250] ss:$24 sps:$4 sm:$0xff]   ;;  %s1731_s24 = ssub.s32 (%p3382_p5), 7, %s1730_s22 }
 0x12b   : > { %1525 = vmatprep.subr.bf16.mxu1 %v2946_v35  ;;  %v3038_v35 = vld [vmem:[%s4276_s4 + $0x284] ss:$24 sps:$4 sm:$0xff]   ;;  %p1732_p1 = scmp.lt.s32.totalorder (%p3382_p5), %s1731_s24, 6 }
 0x12d   : > { %1473 = vmatpush1.bf16.msra.mxu0 %v2948_v36  ;;  %v3036_v36 = vld [vmem:[%s4276_s4 + $0x280] ss:$24 sps:$4 sm:$0xff]  }
 0x12e   : > { %1526 = vmatpush1.bf16.msra.mxu1 %v2949_v37  ;;  %1474 = vmatprep.subr.bf16.mxu0 %v2950_v38  ;;  %v3042_v37 = vld [vmem:[%s4276_s4 + $0x2b4] ss:$24 sps:$4 sm:$0xff]   ;;  %v3040_v38 = vld [vmem:[%s4276_s4 + $0x2b0] ss:$24 sps:$4 sm:$0xff]  }
 0x12f   : > { %1527 = vmatprep.subr.bf16.mxu1 %v2952_v39  ;;  %v3045_v39 = vld [vmem:[%s4276_s4 + $0x2e4] ss:$24 sps:$4 sm:$0xff]  }
 0x131   : > { %1475 = vmatpush1.bf16.msra.mxu0 %v2954_v40  ;;  %v3043_v40 = vld [vmem:[%s4276_s4 + $0x2e0] ss:$24 sps:$4 sm:$0xff]  }
 0x132   : > { %1528 = vmatpush1.bf16.msra.mxu1 %v2955_v41  ;;  %1476 = vmatprep.subr.bf16.mxu0 %v2956_v42 }
 0x133   : > { %1529 = vmatprep.subr.bf16.mxu1 %v2958_v43 }
 0x135   : > { %1477 = vmatpush1.bf16.msra.mxu0 %v2960_v44 }
 0x136   : > { %1530 = vmatpush1.bf16.msra.mxu1 %v2961_v45  ;;  %1478 = vmatprep.subr.bf16.mxu0 %v2962_v46 }
 0x137   : > { %1531 = vmatprep.subr.bf16.mxu1 %v2964_v47 }
 0x139   : > { %1479 = vmatpush1.bf16.msra.mxu0 %v2966_v48 }
 0x13a   : > { %1532 = vmatpush1.bf16.msra.mxu1 %v2967_v49  ;;  %1480 = vmatprep.subr.bf16.mxu0 %v2968_v50 }
 0x13b   : > { %1533 = vmatprep.subr.bf16.mxu1 %v2970_v51 }
 0x13d   : > { %1481 = vmatpush1.bf16.msra.mxu0 %v2972_v52 }
 0x13e   : > { %1534 = vmatpush1.bf16.msra.mxu1 %v2973_v53  ;;  %1482 = vmatprep.subr.bf16.mxu0 %v2974_v54 }
 0x13f   : > { %1535 = vmatprep.subr.bf16.mxu1 %v2976_v55 }
 0x141   : > { %1483 = vmatpush1.bf16.msra.mxu0 %v2978_v56 }
 0x142   : > { %1536 = vmatpush1.bf16.msra.mxu1 %v2979_v57  ;;  %1484 = vmatprep.subr.bf16.mxu0 %v2980_v58 }
 0x143   : > { %1537 = vmatprep.subr.bf16.mxu1 %v2982_v59 }
 0x145   : > { %1485 = vmatpush1.bf16.msra.mxu0 %v2984_v60 }
 0x146   : > { %1538 = vmatpush1.bf16.msra.mxu1 %v2985_v61  ;;  %1486 = vmatprep.subr.bf16.mxu0 %v2986_v62 }
 0x147   : > { %1539 = vmatprep.subr.bf16.mxu1 %v2988_v63 }
 0x149   : > { %1487 = vmatpush1.bf16.msra.mxu0 %v2990_v1 }
 0x14a   : > { %1540 = vmatpush1.bf16.msra.mxu1 %v2991_v2  ;;  %1562 = vmatprep.subr.bf16.mxu0 %v2997_v3 }
 0x14b   : > { %2574 = vmatprep.subr.bf16.mxu1 %v2997_v3 }
 0x14c   : > { %1489 = vmatmul.mubr.bf16.vlgmr.msra.gmra.mrb[0].mxu0 %v4346_v4 }
 0x14d   : > { %1542 = vmatmul.mubr.bf16.vlgmr.msra.gmra.mrb[0].mxu1 %v4346_v4  ;;  %1563 = vmatpush1.bf16.msra.mxu0 %v2995_v5 }
 0x14e   : > { %2590 = vmatpush1.bf16.msra.mxu1 %v2995_v5  ;;  %1564 = vmatprep.subr.bf16.mxu0 %v3000_v8 }
 0x14f   : > { %2575 = vmatprep.subr.bf16.mxu1 %v3000_v8  ;;  %1498 = vmatprep.mubr.bf16.mxu0 %v3034_v9 }
 0x150   : > { %1551 = vmatprep.mubr.bf16.mxu1 %v3034_v9 }
 0x151   : > { %1565 = vmatpush1.bf16.msra.mxu0 %v2998_v10 }
 0x152   : > { %2591 = vmatpush1.bf16.msra.mxu1 %v2998_v10  ;;  %1566 = vmatprep.subr.bf16.mxu0 %v3003_v13 }
 0x153   : > { %2576 = vmatprep.subr.bf16.mxu1 %v3003_v13 }
 0x154   : > { %1499 = vmatmul.mubr.bf16.gmra.mrb[4].mxu0 %v4372_v14 }
 0x155   : > { %1552 = vmatmul.mubr.bf16.gmra.mrb[4].mxu1 %v4372_v14  ;;  %1567 = vmatpush1.bf16.msra.mxu0 %v3001_v15 }
 0x156   : > { %2592 = vmatpush1.bf16.msra.mxu1 %v3001_v15  ;;  %1568 = vmatprep.subr.bf16.mxu0 %v3006_v16 }
 0x157   : > { %2577 = vmatprep.subr.bf16.mxu1 %v3006_v16  ;;  %1594 = vmatprep.mubr.bf16.mxu0 %v4270_v0  ;;  %v3013_v0 = vld [vmem:[%s4276_s4 + $0x130] ss:$24 sps:$4 sm:$0xff]   ;;  %s4453_s4 = scalar_lea.vmem (%p3382_p5), %s4861_s3, %s2569_s30  }
 0x158   : > { %1604 = vmatprep.mubr.bf16.mxu1 %v3034_v9 }
 0x159   : > { %1569 = vmatpush1.bf16.msra.mxu0 %v3004_v17 }
 0x15a   : > { %2593 = vmatpush1.bf16.msra.mxu1 %v3004_v17  ;;  %1570 = vmatprep.subr.bf16.mxu0 %v3009_v18 }
 0x15b   : > { %2578 = vmatprep.subr.bf16.mxu1 %v3009_v18 }
 0x15d   : > { %1571 = vmatpush1.bf16.msra.mxu0 %v3007_v19 }
 0x15e   : > { %2594 = vmatpush1.bf16.msra.mxu1 %v3007_v19  ;;  %1572 = vmatprep.subr.bf16.mxu0 %v3012_v20 }
 0x15f   : > { %2579 = vmatprep.subr.bf16.mxu1 %v3012_v20 }
 0x161   : > { %1573 = vmatpush1.bf16.msra.mxu0 %v3010_v21 }
 0x162   : > { %2595 = vmatpush1.bf16.msra.mxu1 %v3010_v21  ;;  %1574 = vmatprep.subr.bf16.mxu0 %v3015_v22 }
 0x163   : > { %2580 = vmatprep.subr.bf16.mxu1 %v3015_v22 }
 0x165   : > { %1575 = vmatpush1.bf16.msra.mxu0 %v3013_v0 }
 0x166   : > { %2596 = vmatpush1.bf16.msra.mxu1 %v3013_v0  ;;  %1576 = vmatprep.subr.bf16.mxu0 %v3018_v23 }
 0x167   : > { %2581 = vmatprep.subr.bf16.mxu1 %v3018_v23 }
 0x169   : > { %1577 = vmatpush1.bf16.msra.mxu0 %v3016_v24 }
 0x16a   : > { %2597 = vmatpush1.bf16.msra.mxu1 %v3016_v24  ;;  %1578 = vmatprep.subr.bf16.mxu0 %v3021_v25 }
 0x16b   : > { %2582 = vmatprep.subr.bf16.mxu1 %v3021_v25 }
 0x16d   : > { %1579 = vmatpush1.bf16.msra.mxu0 %v3019_v26 }
 0x16e   : > { %2598 = vmatpush1.bf16.msra.mxu1 %v3019_v26  ;;  %1580 = vmatprep.subr.bf16.mxu0 %v3024_v27 }
 0x16f   : > { %2583 = vmatprep.subr.bf16.mxu1 %v3024_v27 }
 0x171   : > { %1581 = vmatpush1.bf16.msra.mxu0 %v3022_v28 }
 0x172   : > { %2599 = vmatpush1.bf16.msra.mxu1 %v3022_v28  ;;  %1582 = vmatprep.subr.bf16.mxu0 %v3027_v29 }
 0x173   : > { %2584 = vmatprep.subr.bf16.mxu1 %v3027_v29 }
 0x175   : > { %1583 = vmatpush1.bf16.msra.mxu0 %v3025_v30 }
 0x176   : > { %2600 = vmatpush1.bf16.msra.mxu1 %v3025_v30  ;;  %1584 = vmatprep.subr.bf16.mxu0 %v3030_v31 }
 0x177   : > { %2585 = vmatprep.subr.bf16.mxu1 %v3030_v31 }
 0x179   : > { %1585 = vmatpush1.bf16.msra.mxu0 %v3028_v32 }
 0x17a   : > { %2601 = vmatpush1.bf16.msra.mxu1 %v3028_v32  ;;  %1586 = vmatprep.subr.bf16.mxu0 %v3033_v33 }
 0x17b   : > { %2586 = vmatprep.subr.bf16.mxu1 %v3033_v33 }
 0x17d   : > { %1587 = vmatpush1.bf16.msra.mxu0 %v3031_v34 }
 0x17e   : > { %2602 = vmatpush1.bf16.msra.mxu1 %v3031_v34  ;;  %1588 = vmatprep.subr.bf16.mxu0 %v3038_v35 }
 0x17f   : > { %2587 = vmatprep.subr.bf16.mxu1 %v3038_v35 }
 0x181   : > { %1589 = vmatpush1.bf16.msra.mxu0 %v3036_v36 }
 0x182   : > { %2603 = vmatpush1.bf16.msra.mxu1 %v3036_v36  ;;  %1590 = vmatprep.subr.bf16.mxu0 %v3042_v37 }
 0x183   : > { %2588 = vmatprep.subr.bf16.mxu1 %v3042_v37 }
 0x185   : > { %1591 = vmatpush1.bf16.msra.mxu0 %v3040_v38 }
 0x186   : > { %2604 = vmatpush1.bf16.msra.mxu1 %v3040_v38  ;;  %1592 = vmatprep.subr.bf16.mxu0 %v3045_v39 }
 0x187   : > { %2589 = vmatprep.subr.bf16.mxu1 %v3045_v39 }
 0x189   : > { %1593 = vmatpush1.bf16.msra.mxu0 %v3043_v40 }
 0x18a   : > { %2605 = vmatpush1.bf16.msra.mxu1 %v3043_v40 }
 0x18c   : > { %1595 = vmatmul.mubr.bf16.vlgmr.msra.gmra.mrb[8].mxu0 %v4346_v4 }
 0x18d   : > { %1605 = vmatmul.mubr.bf16.vlgmr.msra.gmra.mrb[8].mxu1 %v4372_v14 }
 0x19f   : > { %v4406_v41 = vpop.permute.xlu0 %938 }
 0x1a2   : > { %v4410_v43 = vpop.permute.xlu1 %948 }
 0x1a3   : > { %v4408_v42 = vpop.permute.xlu0 %943 }
 0x1a6   : > { %v954_v7 = vpop.permute.xlu1 %953 }
 0x21f   : > { %v1490_v44 = vpop.f32.mrb[0].mxu0 }
 0x220   : > { %v1543_v45 = vpop.f32.mrb[0].mxu1  ;;  %v1491_v46 = vadd.f32 %v1490_v44, %v4406_v41  ;;  %v1492_v48 = vpop.f32.mrb[1].mxu0 }
 0x221   : > { %v1544_v47 = vadd.f32 %v1543_v45, %v4406_v41  ;;  %v1545_v49 = vpop.f32.mrb[1].mxu1  ;;  %v1493_v50 = vadd.f32 %v1492_v48, %v4406_v41  ;;  %v1494_v52 = vpop.f32.mrb[2].mxu0 }
 0x222   : > { %v1546_v51 = vadd.f32 %v1545_v49, %v4406_v41  ;;  %v1547_v53 = vpop.f32.mrb[2].mxu1  ;;  %v1615_v54 = vmax.f32 %v1491_v46, 0.0  ;;  %v1495_v56 = vadd.f32 %v1494_v52, %v4408_v42  ;;  %v1496_v58 = vpop.f32.mrb[3].mxu0 }
 0x223   : > { %v1617_v55 = vmax.f32 %v1544_v47, 0.0  ;;  %v1548_v57 = vadd.f32 %v1547_v53, %v4408_v42  ;;  %v1549_v59 = vpop.f32.mrb[3].mxu1  ;;  %v1616_v60 = vmax.f32 %v1493_v50, 0.0  ;;  %v1497_v62 = vadd.f32 %v1496_v58, %v4408_v42 }
 0x224   : > { %v1618_v61 = vmax.f32 %v1546_v51, 0.0  ;;  %v1550_v63 = vadd.f32 %v1549_v59, %v4408_v42  ;;  %v1621_v1 = vmax.f32 %v1495_v56, 0.0 }
 0x225   : > { %v1623_v2 = vmax.f32 %v1548_v57, 0.0  ;;  %v2557_v3 = vpack.c.bf16 %v1616_v60, %v1615_v54  ;;  %v1622_v5 = vmax.f32 %v1497_v62, 0.0 }
 0x226   : > { %v2558_v4 = vpack.c.bf16 %v1618_v61, %v1617_v55  ;;  %v1624_v6 = vmax.f32 %v1550_v63, 0.0 }
 0x227   : > { %1711 = vst [vmem:[%s4422_s12] sm:$0xff] %v2557_v3  ;;  %v2560_v8 = vpack.c.bf16 %v1622_v5, %v1621_v1  ;;  %v1500_v10 = vpop.f32.mrb[4].mxu0 }
 0x228   : > { %1712 = vst [vmem:[%s4422_s12 + $0x8] sm:$0xff] %v2558_v4  ;;  %v2561_v9 = vpack.c.bf16 %v1624_v6, %v1623_v2  ;;  %v1553_v11 = vpop.f32.mrb[4].mxu1  ;;  %v1501_v12 = vadd.f32 %v1500_v10, %v4410_v43  ;;  %v1502_v14 = vpop.f32.mrb[5].mxu0 }
 0x229   : > { %v1554_v13 = vadd.f32 %v1553_v11, %v4410_v43  ;;  %v1555_v15 = vpop.f32.mrb[5].mxu1  ;;  %1714 = vst [vmem:[%s4422_s12 + $0x18] sm:$0xff] %v2560_v8  ;;  %v1503_v16 = vadd.f32 %v1502_v14, %v4410_v43  ;;  %v1504_v18 = vpop.f32.mrb[6].mxu0 }
 0x22a   : > { %1715 = vst [vmem:[%s4422_s12 + $0x20] sm:$0xff] %v2561_v9  ;;  %v1556_v17 = vadd.f32 %v1555_v15, %v4410_v43  ;;  %v1557_v19 = vpop.f32.mrb[6].mxu1  ;;  %v1627_v20 = vmax.f32 %v1501_v12, 0.0  ;;  %v1505_v22 = vadd.f32 %v1504_v18, %v954_v7  ;;  %v1506_v0 = vpop.f32.mrb[7].mxu0 }
 0x22b   : > { %v1629_v21 = vmax.f32 %v1554_v13, 0.0  ;;  %v1558_v23 = vadd.f32 %v1557_v19, %v954_v7  ;;  %v1559_v24 = vpop.f32.mrb[7].mxu1  ;;  %v1628_v25 = vmax.f32 %v1503_v16, 0.0  ;;  %v1507_v27 = vadd.f32 %v1506_v0, %v954_v7 }
 0x22c   : > { %v1630_v26 = vmax.f32 %v1556_v17, 0.0  ;;  %v1560_v28 = vadd.f32 %v1559_v24, %v954_v7  ;;  %v1633_v29 = vmax.f32 %v1505_v22, 0.0 }
 0x22d   : > { %v1635_v30 = vmax.f32 %v1558_v23, 0.0  ;;  %v2563_v31 = vpack.c.bf16 %v1628_v25, %v1627_v20  ;;  %v1634_v33 = vmax.f32 %v1507_v27, 0.0 }
 0x22e   : > { %v2564_v32 = vpack.c.bf16 %v1630_v26, %v1629_v21  ;;  %v1636_v34 = vmax.f32 %v1560_v28, 0.0 }
 0x22f   : > { %1717 = vst [vmem:[%s4422_s12 + $0x30] sm:$0xff] %v2563_v31  ;;  %v2566_v35 = vpack.c.bf16 %v1634_v33, %v1633_v29 }
 0x230   : > { %1718 = vst [vmem:[%s4422_s12 + $0x38] sm:$0xff] %v2564_v32  ;;  %v2567_v36 = vpack.c.bf16 %v1636_v34, %v1635_v30 }
 0x231   : > { %1720 = vst [vmem:[%s4422_s12 + $0x48] sm:$0xff] %v2566_v35 }
 0x232   : > { %1721 = vst [vmem:[%s4422_s12 + $0x50] sm:$0xff] %v2567_v36 }
 0x25f   : > { %v1596_v37 = vpop.f32.mrb[8].mxu0 }
 0x260   : > { %v1606_v38 = vpop.f32.mrb[8].mxu1  ;;  %v1597_v39 = vadd.f32 %v1596_v37, %v4406_v41  ;;  %v1598_v44 = vpop.f32.mrb[9].mxu0 }
 0x261   : > { %v1607_v40 = vadd.f32 %v1606_v38, %v4410_v43  ;;  %v1608_v45 = vpop.f32.mrb[9].mxu1  ;;  %v1599_v46 = vadd.f32 %v1598_v44, %v4406_v41  ;;  %v1600_v48 = vpop.f32.mrb[10].mxu0 }
 0x262   : > { %v1609_v47 = vadd.f32 %v1608_v45, %v4410_v43  ;;  %v1610_v49 = vpop.f32.mrb[10].mxu1  ;;  %v1619_v50 = vmax.f32 %v1597_v39, 0.0  ;;  %v1601_v52 = vadd.f32 %v1600_v48, %v4408_v42  ;;  %v1602_v54 = vpop.f32.mrb[11].mxu0 }
 0x263   : > { %v1631_v51 = vmax.f32 %v1607_v40, 0.0  ;;  %v1611_v53 = vadd.f32 %v1610_v49, %v954_v7  ;;  %v1612_v55 = vpop.f32.mrb[11].mxu1  ;;  %v1620_v56 = vmax.f32 %v1599_v46, 0.0  ;;  %v1603_v58 = vadd.f32 %v1602_v54, %v4408_v42 }
 0x264   : > { %v1632_v57 = vmax.f32 %v1609_v47, 0.0  ;;  %v1613_v41 = vadd.f32 %v1612_v55, %v954_v7  ;;  %v1625_v59 = vmax.f32 %v1601_v52, 0.0  ;;  %1729 = sbr.rel (!%p3382_p5) target bundleno = 786 (0x312), region = 102 }
 0x265   : > { %v1637_v43 = vmax.f32 %v1611_v53, 0.0  ;;  %v2559_v60 = vpack.c.bf16 %v1620_v56, %v1619_v50  ;;  %v1626_v62 = vmax.f32 %v1603_v58, 0.0 }
 0x266   : > { %v2565_v61 = vpack.c.bf16 %v1632_v57, %v1631_v51  ;;  %v1638_v63 = vmax.f32 %v1613_v41, 0.0 }
 0x267   : > { %1713 = vst [vmem:[%s4422_s12 + $0x10] sm:$0xff] %v2559_v60  ;;  %v2562_v1 = vpack.c.bf16 %v1626_v62, %v1625_v59 }
 0x268   : > { %1719 = vst [vmem:[%s4422_s12 + $0x40] sm:$0xff] %v2565_v61  ;;  %v2568_v2 = vpack.c.bf16 %v1638_v63, %v1637_v43 }
 0x269   : > { %1716 = vst [vmem:[%s4422_s12 + $0x28] sm:$0xff] %v2562_v1 }
 0x26a   : > { %1722 = vst [vmem:[%s4422_s12 + $0x58] sm:$0xff] %v2568_v2 }
 0x26b   : > { %s4913_s24 = smov (!%p1732_p1, %s1731_s24), 6 }
 0x26c   : > { %s2525_s14 = sshll.u32 %s4913_s24, 8  ;;  %s4455_s17 = sshll.u32 %s4913_s24, 2 }
 0x26d   : > { %p2529_p2 = scmp.eq.s32.totalorder %s2525_s14, 0 }
 0x26e   : > { %p1742_p3 = scmp.lt.u32.totalorder (!%p2529_p2), %s4455_s17, 8 }
 0x26f   : > { %1741 = sbr.rel (%p2529_p2) target bundleno = 786 (0x312), region = 106 }
 0x276   : > { %1745 = sbr.rel (%p1742_p3) target bundleno = 777 (0x309), region = 110  ;;  %s4459_s20 = sand.u32 (!%p1742_p3), 7, %s4455_s17  }
 0x277   : > { %p1767_p5 = scmp.eq.s32.totalorder (!%p1742_p3), %s4459_s20, 0  ;;  %p2530_p4 = scmp.ne.s32.totalorder (!%p1742_p3), %s4459_s20, 0 }
 0x27d   : > { %1770 = sbr.rel (%p2530_p4) target bundleno = 704 (0x2c0), region = 125  ;;  %s1771_s15 = sshrl.u32 (!%p2530_p4), %s4455_s17, 3 }
 0x27e   : > { %s4466_s18 = sshrl.u32 (!%p2530_p4), %s1771_s15, 4 }
 0x27f   : > { %p2531_p6 = scmp.le.s32.totalorder (!%p2530_p4), %s4466_s18, 0 }
 0x284   : > { %2312 = sbr.rel (%p2531_p6) target bundleno = 684 (0x2ac), region = 273  ;;  %s4883_s9 = smov (!%p2531_p6), %s4453_s4 }
 0x285   : > { %s4884_s23 = smov (!%p2531_p6), %s4422_s12  ;;  %s4475_s26 = smov (!%p2531_p6), 0  }
 0x286   : > { %s4477_s27 = smov (!%p2531_p6), 0  }
 0x28b LB: >> { %v1802_v42 = vld [vmem:[%s3268_s23 + $0x48] sm:$0xff]  ;;  %v1804_v3 = vld [vmem:[%s3268_s23 + $0x50] sm:$0xff]  ;;  %v1806_v4 = vld [vmem:[%s3268_s23 + $0x58] sm:$0xff]  ;;  %s1912_s29 = sadd.s32 1, %s3272_s26  ;;  %s1778_s27 = sadd.s32 1, %s3276_s27   ;;  %s3276_s27 = sphi %s4477_s27, %s1778_s27   ;;  %s3272_s26 = sphi %s4475_s26, %s4887_s26   ;;  %s3268_s23 = sphi %s4884_s23, %s1917_s23   ;;  %s3264_s9 = sphi %s4883_s9, %s4886_s9  }
 0x28c   : >> { %1803 = vst [vmem:[%s3264_s9 + $0x48] sm:$0xff] %v1802_v42  ;;  %1805 = vst [vmem:[%s3264_s9 + $0x50] sm:$0xff] %v1804_v3  ;;  %v1808_v5 = vld [vmem:[%s3268_s23 + $0x60] sm:$0xff]  ;;  %v1810_v6 = vld [vmem:[%s3268_s23 + $0x68] sm:$0xff]  ;;  %p4522_p7 = scmp.ge.s32.totalorder %s1912_s29, %s4466_s18  ;;  %p1777_p8 = scmp.ge.s32.totalorder %s1778_s27, %s4466_s18 }
 0x28d   : >> { %1807 = vst [vmem:[%s3264_s9 + $0x58] sm:$0xff] %v1806_v4  ;;  %v1812_v7 = vld [vmem:[%s3268_s23 + $0x70] sm:$0xff]  ;;  %1809 = vst [vmem:[%s3264_s9 + $0x60] sm:$0xff] %v1808_v5  ;;  %v1814_v8 = vld [vmem:[%s3268_s23 + $0x78] sm:$0xff] }
 0x28e   : >> { %1811 = vst [vmem:[%s3264_s9 + $0x68] sm:$0xff] %v1810_v6  ;;  %1813 = vst [vmem:[%s3264_s9 + $0x70] sm:$0xff] %v1812_v7  ;;  %v1796_v9 = vld [vmem:[%s3268_s23 + $0x30] sm:$0xff]  ;;  %v1798_v10 = vld [vmem:[%s3268_s23 + $0x38] sm:$0xff]  ;;  %s4915_s29 = smov (%p4522_p7, %s1912_s29), 0 }
 0x28f   : >> { %1829 = vst [vmem:[%s3264_s9 + $0x4c] sm:$0xff] %v1802_v42  ;;  %1831 = vst [vmem:[%s3264_s9 + $0x54] sm:$0xff] %v1804_v3  ;;  %v1800_v11 = vld [vmem:[%s3268_s23 + $0x40] sm:$0xff]  ;;  %v1844_v13 = vld [vmem:[%s3268_s23 + $0x88] sm:$0xff]  ;;  %s2532_s25 = sshll.u32 %s4915_s29, 7  ;;  %s4887_s26 = smov %s4915_s29 }
 0x290   : >> { %1815 = vst [vmem:[%s3264_s9 + $0x78] sm:$0xff] %v1814_v8  ;;  %1797 = vst [vmem:[%s3264_s9 + $0x30] sm:$0xff] %v1796_v9  ;;  %v1842_v12 = vld [vmem:[%s3268_s23 + $0x80] sm:$0xff]  ;;  %v1846_v14 = vld [vmem:[%s3268_s23 + $0x90] sm:$0xff]  ;;  %s1918_s8 = scalar_lea.vmem %s4453_s4, %s2532_s25  }
 0x291   : >> { %1799 = vst [vmem:[%s3264_s9 + $0x38] sm:$0xff] %v1798_v10  ;;  %1833 = vst [vmem:[%s3264_s9 + $0x5c] sm:$0xff] %v1806_v4  ;;  %v1790_v15 = vld [vmem:[%s3268_s23 + $0x18] sm:$0xff]  ;;  %v1792_v16 = vld [vmem:[%s3268_s23 + $0x20] sm:$0xff] }
 0x292   : >> { %1835 = vst [vmem:[%s3264_s9 + $0x64] sm:$0xff] %v1808_v5  ;;  %1837 = vst [vmem:[%s3264_s9 + $0x6c] sm:$0xff] %v1810_v6  ;;  %v1794_v17 = vld [vmem:[%s3268_s23 + $0x28] sm:$0xff]  ;;  %v1874_v18 = vld [vmem:[%s3268_s23 + $0x98] sm:$0xff] }
 0x293   : >> { %1855 = vst [vmem:[%s3264_s9 + $0x50] sm:$0xff] %v1802_v42  ;;  %1801 = vst [vmem:[%s3264_s9 + $0x40] sm:$0xff] %v1800_v11  ;;  %v1876_v19 = vld [vmem:[%s3268_s23 + $0xa0] sm:$0xff]  ;;  %v1878_v20 = vld [vmem:[%s3268_s23 + $0xa8] sm:$0xff] }
 0x294   : >> { %1839 = vst [vmem:[%s3264_s9 + $0x74] sm:$0xff] %v1812_v7  ;;  %1841 = vst [vmem:[%s3264_s9 + $0x7c] sm:$0xff] %v1814_v8  ;;  %v1784_v21 = vld [vmem:[%s3268_s23] sm:$0xff]  ;;  %v1786_v22 = vld [vmem:[%s3268_s23 + $0x8] sm:$0xff] }
 0x295   : >> { %1843 = vst [vmem:[%s3264_s9 + $0x84] sm:$0xff] %v1842_v12  ;;  %1845 = vst [vmem:[%s3264_s9 + $0x8c] sm:$0xff] %v1844_v13  ;;  %v1788_v0 = vld [vmem:[%s3268_s23 + $0x10] sm:$0xff]  ;;  %v1908_v24 = vld [vmem:[%s3268_s23 + $0xb8] sm:$0xff] }
 0x296   : >> { %1823 = vst [vmem:[%s3264_s9 + $0x34] sm:$0xff] %v1796_v9  ;;  %1857 = vst [vmem:[%s3264_s9 + $0x58] sm:$0xff] %v1804_v3  ;;  %v1906_v23 = vld [vmem:[%s3268_s23 + $0xb0] sm:$0xff]  ;;  %v1910_v25 = vld [vmem:[%s3268_s23 + $0xc0] sm:$0xff]  ;;  %s1917_s23 = scalar_lea.vmem %s4422_s12, %s2532_s25 [#allocation3]  }
 0x297   : >> { %1859 = vst [vmem:[%s3264_s9 + $0x60] sm:$0xff] %v1806_v4  ;;  %1861 = vst [vmem:[%s3264_s9 + $0x68] sm:$0xff] %v1808_v5 }
 0x298   : >> { %1847 = vst [vmem:[%s3264_s9 + $0x94] sm:$0xff] %v1846_v14  ;;  %1791 = vst [vmem:[%s3264_s9 + $0x18] sm:$0xff] %v1790_v15 }
 0x299   : >> { %1793 = vst [vmem:[%s3264_s9 + $0x20] sm:$0xff] %v1792_v16  ;;  %1825 = vst [vmem:[%s3264_s9 + $0x3c] sm:$0xff] %v1798_v10 }
 0x29a   : >> { %1827 = vst [vmem:[%s3264_s9 + $0x44] sm:$0xff] %v1800_v11  ;;  %1863 = vst [vmem:[%s3264_s9 + $0x70] sm:$0xff] %v1810_v6 }
 0x29b   : >> { %1865 = vst [vmem:[%s3264_s9 + $0x78] sm:$0xff] %v1812_v7  ;;  %1867 = vst [vmem:[%s3264_s9 + $0x80] sm:$0xff] %v1814_v8 }
 0x29c   : >> { %1869 = vst [vmem:[%s3264_s9 + $0x88] sm:$0xff] %v1842_v12  ;;  %1881 = vst [vmem:[%s3264_s9 + $0x54] sm:$0xff] %v1802_v42 }
 0x29d   : >> { %1883 = vst [vmem:[%s3264_s9 + $0x5c] sm:$0xff] %v1804_v3  ;;  %1885 = vst [vmem:[%s3264_s9 + $0x64] sm:$0xff] %v1806_v4 }
 0x29e   : >> { %1795 = vst [vmem:[%s3264_s9 + $0x28] sm:$0xff] %v1794_v17  ;;  %1871 = vst [vmem:[%s3264_s9 + $0x90] sm:$0xff] %v1844_v13 }
 0x29f   : >> { %1873 = vst [vmem:[%s3264_s9 + $0x98] sm:$0xff] %v1846_v14  ;;  %1875 = vst [vmem:[%s3264_s9 + $0xa0] sm:$0xff] %v1874_v18 }
 0x2a0   : >> { %1877 = vst [vmem:[%s3264_s9 + $0xa8] sm:$0xff] %v1876_v19  ;;  %1817 = vst [vmem:[%s3264_s9 + $0x1c] sm:$0xff] %v1790_v15 }
 0x2a1   : >> { %1849 = vst [vmem:[%s3264_s9 + $0x38] sm:$0xff] %v1796_v9  ;;  %1851 = vst [vmem:[%s3264_s9 + $0x40] sm:$0xff] %v1798_v10 }
 0x2a2   : >> { %1853 = vst [vmem:[%s3264_s9 + $0x48] sm:$0xff] %v1800_v11  ;;  %1887 = vst [vmem:[%s3264_s9 + $0x6c] sm:$0xff] %v1808_v5 }
 0x2a3   : >> { %1889 = vst [vmem:[%s3264_s9 + $0x74] sm:$0xff] %v1810_v6  ;;  %1891 = vst [vmem:[%s3264_s9 + $0x7c] sm:$0xff] %v1812_v7 }
 0x2a4   : >> { %1893 = vst [vmem:[%s3264_s9 + $0x84] sm:$0xff] %v1814_v8  ;;  %1879 = vst [vmem:[%s3264_s9 + $0xb0] sm:$0xff] %v1878_v20 }
 0x2a5   : >> { %1785 = vst [vmem:[%s3264_s9] sm:$0xff] %v1784_v21  ;;  %1787 = vst [vmem:[%s3264_s9 + $0x8] sm:$0xff] %v1786_v22  ;;  %1780 = sbr.rel (!%p1777_p8) target bundleno = 651 (0x28b), region = 279 }
 0x2a6   : >> { %1819 = vst [vmem:[%s3264_s9 + $0x24] sm:$0xff] %v1792_v16  ;;  %1821 = vst [vmem:[%s3264_s9 + $0x2c] sm:$0xff] %v1794_v17 }
 0x2a7   : >> { %1895 = vst [vmem:[%s3264_s9 + $0x8c] sm:$0xff] %v1842_v12  ;;  %1897 = vst [vmem:[%s3264_s9 + $0x94] sm:$0xff] %v1844_v13 }
 0x2a8   : >> { %1899 = vst [vmem:[%s3264_s9 + $0x9c] sm:$0xff] %v1846_v14  ;;  %1901 = vst [vmem:[%s3264_s9 + $0xa4] sm:$0xff] %v1874_v18 }
 0x2a9   : >> { %1789 = vst [vmem:[%s3264_s9 + $0x10] sm:$0xff] %v1788_v0  ;;  %1903 = vst [vmem:[%s3264_s9 + $0xac] sm:$0xff] %v1876_v19 }
 0x2aa   : >> { %1905 = vst [vmem:[%s3264_s9 + $0xb4] sm:$0xff] %v1878_v20  ;;  %1907 = vst [vmem:[%s3264_s9 + $0xbc] sm:$0xff] %v1906_v23 }
 0x2ab   : >> { %1909 = vst [vmem:[%s3264_s9 + $0xc4] sm:$0xff] %v1908_v24  ;;  %1911 = vst [vmem:[%s3264_s9 + $0xcc] sm:$0xff] %v1910_v25  ;;  %s4886_s9 = smov %s1918_s8 }
 0x2ac PF: > { %s4610_s10 = sand.u32 15, %s1771_s15   ;;  %s2570_s6 = sshll.u32 %s4466_s18, 11 }
 0x2ad   : > { %s1923_s11 = sshra.s32 %s2570_s6, 4  ;;  %p2537_p9 = scmp.le.s32.totalorder %s4610_s10, 0 }
 0x2ae   : > { %s4614_s5 = scalar_lea.vmem %s4422_s12, %s1923_s11 [#allocation3]   ;;  %s4617_s22 = scalar_lea.vmem %s4453_s4, %s1923_s11  }
 0x2af   : > { %2326 = sbr.rel (%p2537_p9) target bundleno = 704 (0x2c0), region = 284  ;;  %s4888_s30 = smov (!%p2537_p9), %s4617_s22 }
 0x2b0   : > { %s4889_s24 = smov (!%p2537_p9), %s4614_s5  ;;  %s4626_s7 = smov (!%p2537_p9), 0  }
 0x2b1   : > { %s3290_s28 = smov (!%p2537_p9), 0  }
 0x2b6 LB: >> { %v1939_v26 = vld [vmem:[%s3284_s24] sm:$0xff]  ;;  %v1941_v27 = vld [vmem:[%s3284_s24 + $0x18] sm:$0xff]  ;;  %v1943_v28 = vld [vmem:[%s3284_s24 + $0x30] sm:$0xff]  ;;  %s1947_s14 = sadd.s32 1, %s3288_s7  ;;  %s1933_s28 = sadd.s32 1, %s3292_s28   ;;  %s3292_s28 = sphi %s3290_s28, %s1933_s28   ;;  %s3288_s7 = sphi %s4626_s7, %s4890_s7   ;;  %s3284_s24 = sphi %s4889_s24, %s1952_s24   ;;  %s3280_s30 = sphi %s4888_s30, %s1953_s30  }
 0x2b7   : >> { %1940 = vst [vmem:[%s3280_s30] sm:$0xff] %v1939_v26  ;;  %1942 = vst [vmem:[%s3280_s30 + $0x1c] sm:$0xff] %v1941_v27  ;;  %v1945_v29 = vld [vmem:[%s3284_s24 + $0x48] sm:$0xff]  ;;  %p1948_p10 = scmp.ge.s32.totalorder %s1947_s14, %s4610_s10  ;;  %p1932_p11 = scmp.ge.s32.totalorder %s1933_s28, %s4610_s10 }
 0x2b8   : >> { %1944 = vst [vmem:[%s3280_s30 + $0x38] sm:$0xff] %v1943_v28  ;;  %1946 = vst [vmem:[%s3280_s30 + $0x54] sm:$0xff] %v1945_v29 }
 0x2b9   : >> { %s4917_s14 = smov (%p1948_p10, %s1947_s14), 0  ;;  %1935 = sbr.rel (!%p1932_p11) target bundleno = 694 (0x2b6), region = 290 }
 0x2ba   : >> { %s2538_s15 = sshll.u32 %s4917_s14, 3  ;;  %s4890_s7 = smov %s4917_s14 }
 0x2bb   : >> { %s1952_s24 = scalar_lea.vmem %s4614_s5, %s2538_s15 [#allocation3]   ;;  %s1953_s30 = scalar_lea.vmem %s4617_s22, %s2538_s15  }
 0x2c0 PF: > { %1956 = sbr.rel (%p1767_p5) target bundleno = 777 (0x309), region = 143  ;;  %s1958_s18 = ssub.s32 (!%p1767_p5), %s4455_s17, %s4459_s20 }
 0x2c1   : > { %s1962_s9 = sshrl.u32 (!%p1767_p5), %s4455_s17, 3  ;;  %s4647_s23 = scalar_lea.vmem (!%p1767_p5), %s4422_s12, %s1958_s18 [#allocation3] }
 0x2c2   : > { %s4650_s26 = scalar_lea.vmem (!%p1767_p5), %s4453_s4, %s1958_s18  ;;  %s4654_s27 = sshrl.u32 (!%p1767_p5), %s1962_s9, 4 }
 0x2c3   : > { %p2540_p12 = scmp.le.s32.totalorder (!%p1767_p5), %s4654_s27, 0 }
 0x2c7   : > { %2340 = sbr.rel (%p2540_p12) target bundleno = 751 (0x2ef), region = 295  ;;  %s4891_s29 = smov (!%p2540_p12), %s4453_s4 }
 0x2c8   : > { %s4892_s21 = smov (!%p2540_p12), %s4422_s12  ;;  %s4663_s25 = smov (!%p2540_p12), 0  }
 0x2c9   : > { %s4665_s8 = smov (!%p2540_p12), 0  }
 0x2ce LB: >> { %v1993_v30 = vld [vmem:[%s3300_s21 + $0x48] sm:$0xff]  ;;  %v1995_v31 = vld [vmem:[%s3300_s21 + $0x50] sm:$0xff]  ;;  %v1997_v32 = vld [vmem:[%s3300_s21 + $0x58] sm:$0xff]  ;;  %s2103_s10 = sadd.s32 1, %s3304_s25  ;;  %s1969_s8 = sadd.s32 1, %s3308_s8   ;;  %s3308_s8 = sphi %s4665_s8, %s1969_s8   ;;  %s3304_s25 = sphi %s4663_s25, %s4895_s25   ;;  %s3300_s21 = sphi %s4892_s21, %s2108_s21   ;;  %s3296_s29 = sphi %s4891_s29, %s4894_s29  }
 0x2cf   : >> { %1994 = vst [vmem:[%s3296_s29 + $0x48] sm:$0xff] %v1993_v30  ;;  %1996 = vst [vmem:[%s3296_s29 + $0x50] sm:$0xff] %v1995_v31  ;;  %v1999_v33 = vld [vmem:[%s3300_s21 + $0x60] sm:$0xff]  ;;  %v2001_v34 = vld [vmem:[%s3300_s21 + $0x68] sm:$0xff]  ;;  %p4710_p13 = scmp.ge.s32.totalorder %s2103_s10, %s4654_s27  ;;  %p1968_p0 = scmp.ge.s32.totalorder %s1969_s8, %s4654_s27 }
 0x2d0   : >> { %1998 = vst [vmem:[%s3296_s29 + $0x58] sm:$0xff] %v1997_v32  ;;  %v2003_v35 = vld [vmem:[%s3300_s21 + $0x70] sm:$0xff]  ;;  %2000 = vst [vmem:[%s3296_s29 + $0x60] sm:$0xff] %v1999_v33  ;;  %v2005_v36 = vld [vmem:[%s3300_s21 + $0x78] sm:$0xff] }
 0x2d1   : >> { %2002 = vst [vmem:[%s3296_s29 + $0x68] sm:$0xff] %v2001_v34  ;;  %2004 = vst [vmem:[%s3296_s29 + $0x70] sm:$0xff] %v2003_v35  ;;  %v1987_v37 = vld [vmem:[%s3300_s21 + $0x30] sm:$0xff]  ;;  %v1989_v38 = vld [vmem:[%s3300_s21 + $0x38] sm:$0xff]  ;;  %s4919_s10 = smov (%p4710_p13, %s2103_s10), 0 }
 0x2d2   : >> { %2020 = vst [vmem:[%s3296_s29 + $0x4c] sm:$0xff] %v1993_v30  ;;  %2022 = vst [vmem:[%s3296_s29 + $0x54] sm:$0xff] %v1995_v31  ;;  %v1991_v39 = vld [vmem:[%s3300_s21 + $0x40] sm:$0xff]  ;;  %v2035_v44 = vld [vmem:[%s3300_s21 + $0x88] sm:$0xff]  ;;  %s2541_s11 = sshll.u32 %s4919_s10, 7  ;;  %s4895_s25 = smov %s4919_s10 }
 0x2d3   : >> { %2006 = vst [vmem:[%s3296_s29 + $0x78] sm:$0xff] %v2005_v36  ;;  %1988 = vst [vmem:[%s3296_s29 + $0x30] sm:$0xff] %v1987_v37  ;;  %v2033_v40 = vld [vmem:[%s3300_s21 + $0x80] sm:$0xff]  ;;  %v2037_v45 = vld [vmem:[%s3300_s21 + $0x90] sm:$0xff]  ;;  %s2109_s5 = scalar_lea.vmem %s4453_s4, %s2541_s11  }
 0x2d4   : >> { %1990 = vst [vmem:[%s3296_s29 + $0x38] sm:$0xff] %v1989_v38  ;;  %2024 = vst [vmem:[%s3296_s29 + $0x5c] sm:$0xff] %v1997_v32  ;;  %v1981_v46 = vld [vmem:[%s3300_s21 + $0x18] sm:$0xff]  ;;  %v1983_v47 = vld [vmem:[%s3300_s21 + $0x20] sm:$0xff] }
 0x2d5   : >> { %2026 = vst [vmem:[%s3296_s29 + $0x64] sm:$0xff] %v1999_v33  ;;  %2028 = vst [vmem:[%s3296_s29 + $0x6c] sm:$0xff] %v2001_v34  ;;  %v1985_v48 = vld [vmem:[%s3300_s21 + $0x28] sm:$0xff]  ;;  %v2065_v49 = vld [vmem:[%s3300_s21 + $0x98] sm:$0xff] }
 0x2d6   : >> { %2046 = vst [vmem:[%s3296_s29 + $0x50] sm:$0xff] %v1993_v30  ;;  %1992 = vst [vmem:[%s3296_s29 + $0x40] sm:$0xff] %v1991_v39  ;;  %v2067_v50 = vld [vmem:[%s3300_s21 + $0xa0] sm:$0xff]  ;;  %v2069_v51 = vld [vmem:[%s3300_s21 + $0xa8] sm:$0xff] }
 0x2d7   : >> { %2030 = vst [vmem:[%s3296_s29 + $0x74] sm:$0xff] %v2003_v35  ;;  %2032 = vst [vmem:[%s3296_s29 + $0x7c] sm:$0xff] %v2005_v36  ;;  %v1975_v52 = vld [vmem:[%s3300_s21] sm:$0xff]  ;;  %v1977_v53 = vld [vmem:[%s3300_s21 + $0x8] sm:$0xff] }
 0x2d8   : >> { %2034 = vst [vmem:[%s3296_s29 + $0x84] sm:$0xff] %v2033_v40  ;;  %2036 = vst [vmem:[%s3296_s29 + $0x8c] sm:$0xff] %v2035_v44  ;;  %v1979_v54 = vld [vmem:[%s3300_s21 + $0x10] sm:$0xff]  ;;  %v2099_v56 = vld [vmem:[%s3300_s21 + $0xb8] sm:$0xff] }
 0x2d9   : >> { %2014 = vst [vmem:[%s3296_s29 + $0x34] sm:$0xff] %v1987_v37  ;;  %2048 = vst [vmem:[%s3296_s29 + $0x58] sm:$0xff] %v1995_v31  ;;  %v2097_v55 = vld [vmem:[%s3300_s21 + $0xb0] sm:$0xff]  ;;  %v2101_v57 = vld [vmem:[%s3300_s21 + $0xc0] sm:$0xff]  ;;  %s2108_s21 = scalar_lea.vmem %s4422_s12, %s2541_s11 [#allocation3]  }
 0x2da   : >> { %2050 = vst [vmem:[%s3296_s29 + $0x60] sm:$0xff] %v1997_v32  ;;  %2052 = vst [vmem:[%s3296_s29 + $0x68] sm:$0xff] %v1999_v33 }
 0x2db   : >> { %2038 = vst [vmem:[%s3296_s29 + $0x94] sm:$0xff] %v2037_v45  ;;  %1982 = vst [vmem:[%s3296_s29 + $0x18] sm:$0xff] %v1981_v46 }
 0x2dc   : >> { %1984 = vst [vmem:[%s3296_s29 + $0x20] sm:$0xff] %v1983_v47  ;;  %2016 = vst [vmem:[%s3296_s29 + $0x3c] sm:$0xff] %v1989_v38 }
 0x2dd   : >> { %2018 = vst [vmem:[%s3296_s29 + $0x44] sm:$0xff] %v1991_v39  ;;  %2054 = vst [vmem:[%s3296_s29 + $0x70] sm:$0xff] %v2001_v34 }
 0x2de   : >> { %2056 = vst [vmem:[%s3296_s29 + $0x78] sm:$0xff] %v2003_v35  ;;  %2058 = vst [vmem:[%s3296_s29 + $0x80] sm:$0xff] %v2005_v36 }
 0x2df   : >> { %2060 = vst [vmem:[%s3296_s29 + $0x88] sm:$0xff] %v2033_v40  ;;  %2072 = vst [vmem:[%s3296_s29 + $0x54] sm:$0xff] %v1993_v30 }
 0x2e0   : >> { %2074 = vst [vmem:[%s3296_s29 + $0x5c] sm:$0xff] %v1995_v31  ;;  %2076 = vst [vmem:[%s3296_s29 + $0x64] sm:$0xff] %v1997_v32 }
 0x2e1   : >> { %1986 = vst [vmem:[%s3296_s29 + $0x28] sm:$0xff] %v1985_v48  ;;  %2062 = vst [vmem:[%s3296_s29 + $0x90] sm:$0xff] %v2035_v44 }
 0x2e2   : >> { %2064 = vst [vmem:[%s3296_s29 + $0x98] sm:$0xff] %v2037_v45  ;;  %2066 = vst [vmem:[%s3296_s29 + $0xa0] sm:$0xff] %v2065_v49 }
 0x2e3   : >> { %2068 = vst [vmem:[%s3296_s29 + $0xa8] sm:$0xff] %v2067_v50  ;;  %2008 = vst [vmem:[%s3296_s29 + $0x1c] sm:$0xff] %v1981_v46 }
 0x2e4   : >> { %2040 = vst [vmem:[%s3296_s29 + $0x38] sm:$0xff] %v1987_v37  ;;  %2042 = vst [vmem:[%s3296_s29 + $0x40] sm:$0xff] %v1989_v38 }
 0x2e5   : >> { %2044 = vst [vmem:[%s3296_s29 + $0x48] sm:$0xff] %v1991_v39  ;;  %2078 = vst [vmem:[%s3296_s29 + $0x6c] sm:$0xff] %v1999_v33 }
 0x2e6   : >> { %2080 = vst [vmem:[%s3296_s29 + $0x74] sm:$0xff] %v2001_v34  ;;  %2082 = vst [vmem:[%s3296_s29 + $0x7c] sm:$0xff] %v2003_v35 }
 0x2e7   : >> { %2084 = vst [vmem:[%s3296_s29 + $0x84] sm:$0xff] %v2005_v36  ;;  %2070 = vst [vmem:[%s3296_s29 + $0xb0] sm:$0xff] %v2069_v51 }
 0x2e8   : >> { %1976 = vst [vmem:[%s3296_s29] sm:$0xff] %v1975_v52  ;;  %1978 = vst [vmem:[%s3296_s29 + $0x8] sm:$0xff] %v1977_v53  ;;  %1971 = sbr.rel (!%p1968_p0) target bundleno = 718 (0x2ce), region = 301 }
 0x2e9   : >> { %2010 = vst [vmem:[%s3296_s29 + $0x24] sm:$0xff] %v1983_v47  ;;  %2012 = vst [vmem:[%s3296_s29 + $0x2c] sm:$0xff] %v1985_v48 }
 0x2ea   : >> { %2086 = vst [vmem:[%s3296_s29 + $0x8c] sm:$0xff] %v2033_v40  ;;  %2088 = vst [vmem:[%s3296_s29 + $0x94] sm:$0xff] %v2035_v44 }
 0x2eb   : >> { %2090 = vst [vmem:[%s3296_s29 + $0x9c] sm:$0xff] %v2037_v45  ;;  %2092 = vst [vmem:[%s3296_s29 + $0xa4] sm:$0xff] %v2065_v49 }
 0x2ec   : >> { %1980 = vst [vmem:[%s3296_s29 + $0x10] sm:$0xff] %v1979_v54  ;;  %2094 = vst [vmem:[%s3296_s29 + $0xac] sm:$0xff] %v2067_v50 }
 0x2ed   : >> { %2096 = vst [vmem:[%s3296_s29 + $0xb4] sm:$0xff] %v2069_v51  ;;  %2098 = vst [vmem:[%s3296_s29 + $0xbc] sm:$0xff] %v2097_v55 }
 0x2ee   : >> { %2100 = vst [vmem:[%s3296_s29 + $0xc4] sm:$0xff] %v2099_v56  ;;  %2102 = vst [vmem:[%s3296_s29 + $0xcc] sm:$0xff] %v2101_v57  ;;  %s4894_s29 = smov %s2109_s5 }
 0x2ef PF: > { %s4798_s22 = sand.u32 15, %s1962_s9   ;;  %s2572_s30 = sshll.u32 %s4654_s27, 11 }
 0x2f0   : > { %s2114_s24 = sshra.s32 %s2572_s30, 4  ;;  %p2546_p1 = scmp.le.s32.totalorder %s4798_s22, 0 }
 0x2f1   : > { %s4802_s7 = scalar_lea.vmem %s4422_s12, %s2114_s24 [#allocation3]   ;;  %s4805_s28 = scalar_lea.vmem %s4453_s4, %s2114_s24  }
 0x2f2   : > { %2354 = sbr.rel (%p2546_p1) target bundleno = 771 (0x303), region = 306  ;;  %s4896_s14 = smov (!%p2546_p1), %s4805_s28 }
 0x2f3   : > { %s4897_s15 = smov (!%p2546_p1), %s4802_s7  ;;  %s4814_s18 = smov (!%p2546_p1), 0  }
 0x2f4   : > { %s3322_s29 = smov (!%p2546_p1), 0  }
 0x2f9 LB: >> { %v2130_v58 = vld [vmem:[%s3316_s15] sm:$0xff]  ;;  %v2132_v41 = vld [vmem:[%s3316_s15 + $0x18] sm:$0xff]  ;;  %v2134_v59 = vld [vmem:[%s3316_s15 + $0x30] sm:$0xff]  ;;  %s2138_s9 = sadd.s32 1, %s3320_s18  ;;  %s2124_s29 = sadd.s32 1, %s3324_s29   ;;  %s3324_s29 = sphi %s3322_s29, %s2124_s29   ;;  %s3320_s18 = sphi %s4814_s18, %s4898_s18   ;;  %s3316_s15 = sphi %s4897_s15, %s2143_s15   ;;  %s3312_s14 = sphi %s4896_s14, %s2144_s14  }
 0x2fa   : >> { %2131 = vst [vmem:[%s3312_s14] sm:$0xff] %v2130_v58  ;;  %2133 = vst [vmem:[%s3312_s14 + $0x1c] sm:$0xff] %v2132_v41  ;;  %v2136_v43 = vld [vmem:[%s3316_s15 + $0x48] sm:$0xff]  ;;  %p2139_p2 = scmp.ge.s32.totalorder %s2138_s9, %s4798_s22  ;;  %p2123_p3 = scmp.ge.s32.totalorder %s2124_s29, %s4798_s22 }
 0x2fb   : >> { %2135 = vst [vmem:[%s3312_s14 + $0x38] sm:$0xff] %v2134_v59  ;;  %2137 = vst [vmem:[%s3312_s14 + $0x54] sm:$0xff] %v2136_v43 }
 0x2fc   : >> { %s4921_s9 = smov (%p2139_p2, %s2138_s9), 0  ;;  %2126 = sbr.rel (!%p2123_p3) target bundleno = 761 (0x2f9), region = 312 }
 0x2fd   : >> { %s2547_s27 = sshll.u32 %s4921_s9, 3  ;;  %s4898_s18 = smov %s4921_s9 }
 0x2fe   : >> { %s2143_s15 = scalar_lea.vmem %s4802_s7, %s2547_s27 [#allocation3]   ;;  %s2144_s14 = scalar_lea.vmem %s4805_s28, %s2547_s27  }
 0x303 PF: > { %s3329_s21 = smov 0  }
 0x304   : > { %s2145_s25 = sshllo.u32 %s3329_s21, %s4459_s20 }
 0x305   : > { %v2154_v60 = vld [vmem:[%s4647_s23] sm:%s2145_s25]  ;;  %v2156_v61 = vld [vmem:[%s4647_s23 + $0x18] sm:%s2145_s25] }
 0x306   : > { %2155 = vst [vmem:[%s4650_s26] sm:%s2145_s25] %v2154_v60  ;;  %2157 = vst [vmem:[%s4650_s26 + $0x1c] sm:%s2145_s25] %v2156_v61 }
 0x307   : > { %v2158_v62 = vld [vmem:[%s4647_s23 + $0x30] sm:%s2145_s25]  ;;  %v2160_v63 = vld [vmem:[%s4647_s23 + $0x48] sm:%s2145_s25] }
 0x308   : > { %2159 = vst [vmem:[%s4650_s26 + $0x38] sm:%s2145_s25] %v2158_v62  ;;  %2161 = vst [vmem:[%s4650_s26 + $0x54] sm:%s2145_s25] %v2160_v63 }
 0x309 PF: > { %p2549_p5 = scmp.ge.u32.totalorder %s4455_s17, 8 }
 0x30a   : > { %s3330_s8 = smov (!%p2549_p5), 0  }
 0x30b   : > { %1748 = sbr.rel (%p2549_p5) target bundleno = 786 (0x312), region = 114  ;;  %s1749_s20 = sshllo.u32 (!%p2549_p5), %s3330_s8, %s4455_s17 }
 0x30c   : > { %v1758_v1 = vld [vmem:[%s4422_s12] sm:%s1749_s20] (!%p2549_p5)  ;;  %v1760_v2 = vld [vmem:[%s4422_s12 + $0x18] sm:%s1749_s20] (!%p2549_p5) }
 0x30d   : > { %1759 = vst [vmem:[%s4453_s4] sm:%s1749_s20] (!%p2549_p5), %v1758_v1  ;;  %1761 = vst [vmem:[%s4453_s4 + $0x1c] sm:%s1749_s20] (!%p2549_p5), %v1760_v2 }
 0x30e   : > { %v1762_v42 = vld [vmem:[%s4422_s12 + $0x30] sm:%s1749_s20] (!%p2549_p5)  ;;  %v1764_v3 = vld [vmem:[%s4422_s12 + $0x48] sm:%s1749_s20] (!%p2549_p5) }
 0x30f   : > { %1763 = vst [vmem:[%s4453_s4 + $0x38] sm:%s1749_s20] (!%p2549_p5), %v1762_v42  ;;  %1765 = vst [vmem:[%s4453_s4 + $0x54] sm:%s1749_s20] (!%p2549_p5), %v1764_v3 }
 0x312 PF: > { %p10_p4 = scmp.ge.s32.totalorder %s3370_s16, 4   ;;  %s4899_s12 = smov %s3192_s13 }
 0x313   : > { %s4900_s13 = smov %s3380_s19  ;;  %s4901_s14 = smov %s3370_s16 }
 0x314   :  { %12 = sbr.rel (!%p10_p4) target bundleno = 2 (0x2), region = 323 }

// kernel: actor_forward.5
= control target key start
LH: loop header
LB: loop body
LE: loop exit
PB: predicated region body
PF: predicated region fallthrough
CT: control target
= control target key end

     0   :  { %s1477_s12 = smov 0   ;;  %s1479_s13 = smov 0   ;;  %s1793_s0 = inlined_call_operand.vmem [shape: bf16[64,512], index: 0, kind: input, shape index: {}]   ;;  %s1794_s1 = inlined_call_operand.vmem [shape: bf16[512,162], index: 1, kind: input, shape index: {}]   ;;  %s1795_s2 = inlined_call_operand.vmem [shape: f32[64,1], index: 2, kind: input, shape index: {}]   ;;  %s1796_s3 = inlined_call_operand.vmem [shape: bf16[64,162], index: 3, kind: output, shape index: {}]  }
   0x1   :  { %s1481_s14 = smov 0  }
   0x2 LB: > { %s1169_s15 = sadd.s32 4294967295, %s1454_s14   ;;  %s1494_s16 = sadd.s32 1, %s1454_s14   ;;  %s1454_s14 = sphi %s1481_s14, %s1800_s14   ;;  %s1450_s13 = sphi %s1479_s13, %s1799_s13   ;;  %s1446_s12 = sphi %s1477_s12, %s1798_s12  }
   0x3   : > { %s38_s17 = ssub.s32 %s1454_s14, %s1494_s16  ;;  %s41_s18 = sadd.s32 1, %s1450_s13 }
   0x4   : > { %p39_p0 = scmp.eq.s32.totalorder %s38_s17, 0  ;;  %p48_p1 = scmp.ne.s32.totalorder %s1450_s13, %s1446_s12 }
   0x5   : > { %p49_p2 = scmp.eq.s32.totalorder %s1454_s14, 0  ;;  %p99_p3 = scmp.eq.s32.totalorder %s1169_s15, 1 }
   0x6   : > { %s1505_s19 = scalar_select %p39_p0, %s1450_s13, %s41_s18  }
   0x7   : > { %p50_p4 = por %p49_p2, %p48_p1  ;;  %p1507_p5 = por %p99_p3, %p48_p1 }
   0x8   : > { %p1172_p6 = scmp.ge.s32.totalorder %s1454_s14, 2 }
   0xa   : > { %127 = sbr.rel (%p1172_p6) target bundleno = 63 (0x3f), region = 24 }
  0x11   : > { %130 = sbr.rel (!%p50_p4) target bundleno = 63 (0x3f), region = 28  ;;  %s132_s21 = sand.u32 (%p50_p4), 1, %s1450_s13  }
  0x12   : > { %s1174_s22 = sshll.u32 (%p50_p4), %s1454_s14, 2  ;;  %s1173_s23 = sshll.u32 (%p50_p4), %s132_s21, 8 }
  0x13   : > { %s1517_s26 = scalar_lea.vmem (%p50_p4), %s1794_s1, %s1174_s22  ;;  %s1521_s27 = scalar_lea.vmem (%p50_p4), [#allocation2], %s1173_s23 }
  0x14   : > { %v152_v0 = vld [vmem:[%s1517_s26] sm:$0xf] (%p50_p4)  ;;  %v154_v1 = vld [vmem:[%s1517_s26 + $0x8] sm:$0xf] (%p50_p4)  ;;  %v156_v2 = vld [vmem:[%s1517_s26 + $0x10] sm:$0xf] (%p50_p4) }
  0x15   : > { %153 = vst [vmem:[%s1521_s27] sm:$0xf] (%p50_p4), %v152_v0  ;;  %155 = vst [vmem:[%s1521_s27 + $0x4] sm:$0xf] (%p50_p4), %v154_v1  ;;  %v158_v3 = vld [vmem:[%s1517_s26 + $0x18] sm:$0xf] (%p50_p4) }
  0x16   : > { %v160_v4 = vld [vmem:[%s1517_s26 + $0x20] sm:$0xf] (%p50_p4)  ;;  %157 = vst [vmem:[%s1521_s27 + $0x8] sm:$0xf] (%p50_p4), %v156_v2  ;;  %159 = vst [vmem:[%s1521_s27 + $0xc] sm:$0xf] (%p50_p4), %v158_v3 }
  0x17   : > { %161 = vst [vmem:[%s1521_s27 + $0x10] sm:$0xf] (%p50_p4), %v160_v4  ;;  %v162_v5 = vld [vmem:[%s1517_s26 + $0x28] sm:$0xf] (%p50_p4)  ;;  %v164_v6 = vld [vmem:[%s1517_s26 + $0x30] sm:$0xf] (%p50_p4) }
  0x18   : > { %v166_v7 = vld [vmem:[%s1517_s26 + $0x38] sm:$0xf]  ;;  %163 = vst [vmem:[%s1521_s27 + $0x14] sm:$0xf] %v162_v5  ;;  %165 = vst [vmem:[%s1521_s27 + $0x18] sm:$0xf] %v164_v6 }
  0x19   : > { %167 = vst [vmem:[%s1521_s27 + $0x1c] sm:$0xf] %v166_v7  ;;  %v168_v8 = vld [vmem:[%s1517_s26 + $0x40] sm:$0xf]  ;;  %v170_v9 = vld [vmem:[%s1517_s26 + $0x48] sm:$0xf] }
  0x1a   : > { %v172_v10 = vld [vmem:[%s1517_s26 + $0x50] sm:$0xf]  ;;  %169 = vst [vmem:[%s1521_s27 + $0x20] sm:$0xf] %v168_v8  ;;  %171 = vst [vmem:[%s1521_s27 + $0x24] sm:$0xf] %v170_v9 }
  0x1b   : > { %173 = vst [vmem:[%s1521_s27 + $0x28] sm:$0xf] %v172_v10  ;;  %v174_v11 = vld [vmem:[%s1517_s26 + $0x58] sm:$0xf]  ;;  %v176_v12 = vld [vmem:[%s1517_s26 + $0x60] sm:$0xf] }
  0x1c   : > { %v178_v13 = vld [vmem:[%s1517_s26 + $0x68] sm:$0xf]  ;;  %175 = vst [vmem:[%s1521_s27 + $0x2c] sm:$0xf] %v174_v11  ;;  %177 = vst [vmem:[%s1521_s27 + $0x30] sm:$0xf] %v176_v12 }
  0x1d   : > { %179 = vst [vmem:[%s1521_s27 + $0x34] sm:$0xf] %v178_v13  ;;  %v180_v14 = vld [vmem:[%s1517_s26 + $0x70] sm:$0xf]  ;;  %v182_v15 = vld [vmem:[%s1517_s26 + $0x78] sm:$0xf] }
  0x1e   : > { %v184_v16 = vld [vmem:[%s1517_s26 + $0x80] sm:$0xf]  ;;  %181 = vst [vmem:[%s1521_s27 + $0x38] sm:$0xf] %v180_v14  ;;  %183 = vst [vmem:[%s1521_s27 + $0x3c] sm:$0xf] %v182_v15 }
  0x1f   : > { %185 = vst [vmem:[%s1521_s27 + $0x40] sm:$0xf] %v184_v16  ;;  %v186_v17 = vld [vmem:[%s1517_s26 + $0x88] sm:$0xf]  ;;  %v188_v18 = vld [vmem:[%s1517_s26 + $0x90] sm:$0xf] }
  0x20   : > { %v190_v19 = vld [vmem:[%s1517_s26 + $0x98] sm:$0xf]  ;;  %187 = vst [vmem:[%s1521_s27 + $0x44] sm:$0xf] %v186_v17  ;;  %189 = vst [vmem:[%s1521_s27 + $0x48] sm:$0xf] %v188_v18 }
  0x21   : > { %191 = vst [vmem:[%s1521_s27 + $0x4c] sm:$0xf] %v190_v19  ;;  %v192_v20 = vld [vmem:[%s1517_s26 + $0xa0] sm:$0xf]  ;;  %v194_v21 = vld [vmem:[%s1517_s26 + $0xa8] sm:$0xf] }
  0x22   : > { %v196_v22 = vld [vmem:[%s1517_s26 + $0xb0] sm:$0xf]  ;;  %193 = vst [vmem:[%s1521_s27 + $0x50] sm:$0xf] %v192_v20  ;;  %195 = vst [vmem:[%s1521_s27 + $0x54] sm:$0xf] %v194_v21 }
  0x23   : > { %197 = vst [vmem:[%s1521_s27 + $0x58] sm:$0xf] %v196_v22  ;;  %v198_v23 = vld [vmem:[%s1517_s26 + $0xb8] sm:$0xf]  ;;  %v200_v24 = vld [vmem:[%s1517_s26 + $0xc0] sm:$0xf] }
  0x24   : > { %v202_v25 = vld [vmem:[%s1517_s26 + $0xc8] sm:$0xf]  ;;  %199 = vst [vmem:[%s1521_s27 + $0x5c] sm:$0xf] %v198_v23  ;;  %201 = vst [vmem:[%s1521_s27 + $0x60] sm:$0xf] %v200_v24 }
  0x25   : > { %203 = vst [vmem:[%s1521_s27 + $0x64] sm:$0xf] %v202_v25  ;;  %v204_v26 = vld [vmem:[%s1517_s26 + $0xd0] sm:$0xf]  ;;  %v206_v27 = vld [vmem:[%s1517_s26 + $0xd8] sm:$0xf] }
  0x26   : > { %v208_v28 = vld [vmem:[%s1517_s26 + $0xe0] sm:$0xf]  ;;  %205 = vst [vmem:[%s1521_s27 + $0x68] sm:$0xf] %v204_v26  ;;  %207 = vst [vmem:[%s1521_s27 + $0x6c] sm:$0xf] %v206_v27 }
  0x27   : > { %209 = vst [vmem:[%s1521_s27 + $0x70] sm:$0xf] %v208_v28  ;;  %v210_v29 = vld [vmem:[%s1517_s26 + $0xe8] sm:$0xf]  ;;  %v212_v30 = vld [vmem:[%s1517_s26 + $0xf0] sm:$0xf] }
  0x28   : > { %v214_v31 = vld [vmem:[%s1517_s26 + $0xf8] sm:$0xf]  ;;  %211 = vst [vmem:[%s1521_s27 + $0x74] sm:$0xf] %v210_v29  ;;  %213 = vst [vmem:[%s1521_s27 + $0x78] sm:$0xf] %v212_v30 }
  0x29   : > { %215 = vst [vmem:[%s1521_s27 + $0x7c] sm:$0xf] %v214_v31  ;;  %v216_v32 = vld [vmem:[%s1517_s26 + $0x100] sm:$0xf]  ;;  %v218_v33 = vld [vmem:[%s1517_s26 + $0x108] sm:$0xf] }
  0x2a   : > { %v220_v34 = vld [vmem:[%s1517_s26 + $0x110] sm:$0xf]  ;;  %217 = vst [vmem:[%s1521_s27 + $0x80] sm:$0xf] %v216_v32  ;;  %219 = vst [vmem:[%s1521_s27 + $0x84] sm:$0xf] %v218_v33 }
  0x2b   : > { %221 = vst [vmem:[%s1521_s27 + $0x88] sm:$0xf] %v220_v34  ;;  %v222_v35 = vld [vmem:[%s1517_s26 + $0x118] sm:$0xf]  ;;  %v224_v36 = vld [vmem:[%s1517_s26 + $0x120] sm:$0xf] }
  0x2c   : > { %v226_v37 = vld [vmem:[%s1517_s26 + $0x128] sm:$0xf]  ;;  %223 = vst [vmem:[%s1521_s27 + $0x8c] sm:$0xf] %v222_v35  ;;  %225 = vst [vmem:[%s1521_s27 + $0x90] sm:$0xf] %v224_v36 }
  0x2d   : > { %227 = vst [vmem:[%s1521_s27 + $0x94] sm:$0xf] %v226_v37  ;;  %v228_v38 = vld [vmem:[%s1517_s26 + $0x130] sm:$0xf]  ;;  %v230_v39 = vld [vmem:[%s1517_s26 + $0x138] sm:$0xf] }
  0x2e   : > { %v232_v40 = vld [vmem:[%s1517_s26 + $0x140] sm:$0xf]  ;;  %229 = vst [vmem:[%s1521_s27 + $0x98] sm:$0xf] %v228_v38  ;;  %231 = vst [vmem:[%s1521_s27 + $0x9c] sm:$0xf] %v230_v39 }
  0x2f   : > { %233 = vst [vmem:[%s1521_s27 + $0xa0] sm:$0xf] %v232_v40  ;;  %v234_v41 = vld [vmem:[%s1517_s26 + $0x148] sm:$0xf]  ;;  %v236_v42 = vld [vmem:[%s1517_s26 + $0x150] sm:$0xf] }
  0x30   : > { %v238_v43 = vld [vmem:[%s1517_s26 + $0x158] sm:$0xf]  ;;  %235 = vst [vmem:[%s1521_s27 + $0xa4] sm:$0xf] %v234_v41  ;;  %237 = vst [vmem:[%s1521_s27 + $0xa8] sm:$0xf] %v236_v42 }
  0x31   : > { %239 = vst [vmem:[%s1521_s27 + $0xac] sm:$0xf] %v238_v43  ;;  %v240_v44 = vld [vmem:[%s1517_s26 + $0x160] sm:$0xf]  ;;  %v242_v45 = vld [vmem:[%s1517_s26 + $0x168] sm:$0xf] }
  0x32   : > { %v244_v46 = vld [vmem:[%s1517_s26 + $0x170] sm:$0xf]  ;;  %241 = vst [vmem:[%s1521_s27 + $0xb0] sm:$0xf] %v240_v44  ;;  %243 = vst [vmem:[%s1521_s27 + $0xb4] sm:$0xf] %v242_v45 }
  0x33   : > { %245 = vst [vmem:[%s1521_s27 + $0xb8] sm:$0xf] %v244_v46  ;;  %v246_v47 = vld [vmem:[%s1517_s26 + $0x178] sm:$0xf]  ;;  %v248_v48 = vld [vmem:[%s1517_s26 + $0x180] sm:$0xf] }
  0x34   : > { %v250_v49 = vld [vmem:[%s1517_s26 + $0x188] sm:$0xf]  ;;  %247 = vst [vmem:[%s1521_s27 + $0xbc] sm:$0xf] %v246_v47  ;;  %249 = vst [vmem:[%s1521_s27 + $0xc0] sm:$0xf] %v248_v48 }
  0x35   : > { %251 = vst [vmem:[%s1521_s27 + $0xc4] sm:$0xf] %v250_v49  ;;  %v252_v50 = vld [vmem:[%s1517_s26 + $0x190] sm:$0xf]  ;;  %v254_v51 = vld [vmem:[%s1517_s26 + $0x198] sm:$0xf] }
  0x36   : > { %v256_v52 = vld [vmem:[%s1517_s26 + $0x1a0] sm:$0xf]  ;;  %253 = vst [vmem:[%s1521_s27 + $0xc8] sm:$0xf] %v252_v50  ;;  %255 = vst [vmem:[%s1521_s27 + $0xcc] sm:$0xf] %v254_v51 }
  0x37   : > { %257 = vst [vmem:[%s1521_s27 + $0xd0] sm:$0xf] %v256_v52  ;;  %v258_v53 = vld [vmem:[%s1517_s26 + $0x1a8] sm:$0xf]  ;;  %v260_v54 = vld [vmem:[%s1517_s26 + $0x1b0] sm:$0xf] }
  0x38   : > { %v262_v55 = vld [vmem:[%s1517_s26 + $0x1b8] sm:$0xf]  ;;  %259 = vst [vmem:[%s1521_s27 + $0xd4] sm:$0xf] %v258_v53  ;;  %261 = vst [vmem:[%s1521_s27 + $0xd8] sm:$0xf] %v260_v54 }
  0x39   : > { %263 = vst [vmem:[%s1521_s27 + $0xdc] sm:$0xf] %v262_v55  ;;  %v264_v56 = vld [vmem:[%s1517_s26 + $0x1c0] sm:$0xf]  ;;  %v266_v57 = vld [vmem:[%s1517_s26 + $0x1c8] sm:$0xf] }
  0x3a   : > { %v268_v58 = vld [vmem:[%s1517_s26 + $0x1d0] sm:$0xf]  ;;  %265 = vst [vmem:[%s1521_s27 + $0xe0] sm:$0xf] %v264_v56  ;;  %267 = vst [vmem:[%s1521_s27 + $0xe4] sm:$0xf] %v266_v57 }
  0x3b   : > { %269 = vst [vmem:[%s1521_s27 + $0xe8] sm:$0xf] %v268_v58  ;;  %v270_v59 = vld [vmem:[%s1517_s26 + $0x1d8] sm:$0xf]  ;;  %v272_v60 = vld [vmem:[%s1517_s26 + $0x1e0] sm:$0xf] }
  0x3c   : > { %v274_v61 = vld [vmem:[%s1517_s26 + $0x1e8] sm:$0xf]  ;;  %271 = vst [vmem:[%s1521_s27 + $0xec] sm:$0xf] %v270_v59  ;;  %273 = vst [vmem:[%s1521_s27 + $0xf0] sm:$0xf] %v272_v60 }
  0x3d   : > { %275 = vst [vmem:[%s1521_s27 + $0xf4] sm:$0xf] %v274_v61  ;;  %v276_v62 = vld [vmem:[%s1517_s26 + $0x1f0] sm:$0xf]  ;;  %v278_v63 = vld [vmem:[%s1517_s26 + $0x1f8] sm:$0xf] }
  0x3e   : > { %277 = vst [vmem:[%s1521_s27 + $0xf8] sm:$0xf] %v276_v62  ;;  %279 = vst [vmem:[%s1521_s27 + $0xfc] sm:$0xf] %v278_v63 }
  0x3f PF: > { %p1175_p7 = scmp.ge.s32.totalorder %s1454_s14, 1  ;;  %p429_p8 = scmp.lt.s32.totalorder %s1454_s14, 3 }
  0x41   : > { %p430_p9 = pnand %p1175_p7, %p429_p8 }
  0x42   : > { %s436_s28 = sand.u32 (!%p430_p9), 1, %s1446_s12   ;;  %v1410_v0 = vld [vmem:[%s1793_s0 + $0x4] ss:$16 sps:$4 sm:$0xff] (!%p430_p9)   ;;  %v1456_v1 = vmov (!%p430_p9), 0   ;;  %v1413_v2 = vld [vmem:[%s1793_s0 + $0xc] ss:$16 sps:$4 sm:$0xff] (!%p430_p9)  }
  0x43   : > { %433 = sbr.rel (%p430_p9) target bundleno = 361 (0x169), region = 69  ;;  %s1176_s29 = sshll.u32 (!%p430_p9), %s436_s28, 8  ;;  %1374 = vset.pattern.permute.xlu0 (!%p430_p9), %v1456_v1  ;;  %1375 = vset.pattern.permute.xlu1 (!%p430_p9), %v1456_v1  ;;  %v1408_v33 = vld [vmem:[%s1793_s0] ss:$16 sps:$4 sm:$0xff] (!%p430_p9)   ;;  %v1411_v35 = vld [vmem:[%s1793_s0 + $0x8] ss:$16 sps:$4 sm:$0xff] (!%p430_p9)  }
  0x44   : > { %s1660_s7 = scalar_lea.vmem (!%p430_p9), [#allocation2], %s1176_s29  ;;  %891 = vmatprep.mubr.bf16.mxu0 (!%p430_p9), %v1410_v0  ;;  %956 = vmatprep.mubr.bf16.mxu1 (!%p430_p9), %v1413_v2  ;;  %v1414_v37 = vld [vmem:[%s1793_s0 + $0x24] ss:$16 sps:$4 sm:$0xff] (!%p430_p9)   ;;  %v1416_v38 = vld [vmem:[%s1793_s0 + $0x2c] ss:$16 sps:$4 sm:$0xff] (!%p430_p9)   ;;  %s1177_s21 = sshll.u32 (!%p430_p9), %s436_s28, 5 }
  0x45   : > { %v1376_v3 = vld [vmem:[%s1660_s7 + $0x40] sm:$0xff] (!%p430_p9)   ;;  %v1380_v7 = vld [vmem:[%s1660_s7 + $0x48] sm:$0xff] (!%p430_p9)   ;;  %v1384_v11 = vld [vmem:[%s1660_s7 + $0x50] sm:$0xff] (!%p430_p9)   ;;  %s1762_s12 = scalar_lea.vmem (!%p430_p9), [#allocation3], %s1177_s21 }
  0x46   : > { %v1377_v4 = vld [vmem:[%s1660_s7 + $0xc0] sm:$0xff] (!%p430_p9)   ;;  %1269 = vmatprep.subr.bf16.mxu0 (!%p430_p9), %v1376_v3  ;;  %v1381_v8 = vld [vmem:[%s1660_s7 + $0xc8] sm:$0xff] (!%p430_p9)   ;;  %v1385_v12 = vld [vmem:[%s1660_s7 + $0xd0] sm:$0xff] (!%p430_p9)  }
  0x47   : > { %v1378_v5 = vld [vmem:[%s1660_s7] sm:$0xff] (!%p430_p9)   ;;  %1309 = vmatprep.subr.bf16.mxu1 (!%p430_p9), %v1377_v4  ;;  %v1382_v9 = vld [vmem:[%s1660_s7 + $0x8] sm:$0xff] (!%p430_p9)   ;;  %v1386_v13 = vld [vmem:[%s1660_s7 + $0x10] sm:$0xff] (!%p430_p9)  }
  0x48   : > { %v1379_v6 = vld [vmem:[%s1660_s7 + $0x80] sm:$0xff] (!%p430_p9)   ;;  %1270 = vmatpush3.bf16.msra.mxu0 (!%p430_p9), %v1378_v5  ;;  %v1383_v10 = vld [vmem:[%s1660_s7 + $0x88] sm:$0xff] (!%p430_p9)   ;;  %v1387_v14 = vld [vmem:[%s1660_s7 + $0x90] sm:$0xff] (!%p430_p9)  }
  0x49   : > { %1310 = vmatpush3.bf16.msra.mxu1 (!%p430_p9), %v1379_v6  ;;  %1271 = vmatprep.subr.bf16.mxu0 (!%p430_p9), %v1380_v7  ;;  %v1388_v15 = vld [vmem:[%s1660_s7 + $0x58] sm:$0xff] (!%p430_p9)   ;;  %v1392_v19 = vld [vmem:[%s1660_s7 + $0x60] sm:$0xff] (!%p430_p9)   ;;  %v1396_v23 = vld [vmem:[%s1660_s7 + $0x68] sm:$0xff] (!%p430_p9)  }
  0x4a   : > { %1311 = vmatprep.subr.bf16.mxu1 %v1381_v8  ;;  %v1389_v16 = vld [vmem:[%s1660_s7 + $0xd8] sm:$0xff]   ;;  %v1393_v20 = vld [vmem:[%s1660_s7 + $0xe0] sm:$0xff]   ;;  %v1397_v24 = vld [vmem:[%s1660_s7 + $0xe8] sm:$0xff]   ;;  %s1235_s28 = sshll.u32 (%p1507_p5), %s1169_s15, 2 }
  0x4b   : > { %v1390_v17 = vld [vmem:[%s1660_s7 + $0x18] sm:$0xff]   ;;  %v1394_v21 = vld [vmem:[%s1660_s7 + $0x20] sm:$0xff]   ;;  %v1398_v25 = vld [vmem:[%s1660_s7 + $0x28] sm:$0xff]   ;;  %s1045_s24 = scalar_lea.vmem (%p1507_p5), %s1796_s3, %s1235_s28 }
  0x4c   : > { %1272 = vmatpush3.bf16.msra.mxu0 %v1382_v9  ;;  %v1391_v18 = vld [vmem:[%s1660_s7 + $0x98] sm:$0xff]   ;;  %v1395_v22 = vld [vmem:[%s1660_s7 + $0xa0] sm:$0xff]   ;;  %v1399_v26 = vld [vmem:[%s1660_s7 + $0xa8] sm:$0xff]  }
  0x4d   : > { %1312 = vmatpush3.bf16.msra.mxu1 %v1383_v10  ;;  %1273 = vmatprep.subr.bf16.mxu0 %v1384_v11  ;;  %v1400_v27 = vld [vmem:[%s1660_s7 + $0x70] sm:$0xff]   ;;  %v1404_v31 = vld [vmem:[%s1660_s7 + $0x78] sm:$0xff]   ;;  %v539_v40 = vld [vmem:[%s1795_s2] sm:$0xff] }
  0x4e   : > { %1313 = vmatprep.subr.bf16.mxu1 %v1385_v12  ;;  %v1401_v28 = vld [vmem:[%s1660_s7 + $0xf0] sm:$0xff]   ;;  %v1405_v32 = vld [vmem:[%s1660_s7 + $0xf8] sm:$0xff]   ;;  %549 = vperm.xlu0 %1374, %v539_v40   ;;  %v540_v45 = vld [vmem:[%s1795_s2 + $0x8] sm:$0xff] }
  0x4f   : > { %v1402_v29 = vld [vmem:[%s1660_s7 + $0x30] sm:$0xff]   ;;  %v1406_v34 = vld [vmem:[%s1660_s7 + $0x38] sm:$0xff]   ;;  %v543_v47 = vld [vmem:[%s1795_s2 + $0x20] sm:$0xff] }
  0x50   : > { %1274 = vmatpush3.bf16.msra.mxu0 %v1386_v13  ;;  %v1403_v30 = vld [vmem:[%s1660_s7 + $0xb0] sm:$0xff]   ;;  %v1407_v36 = vld [vmem:[%s1660_s7 + $0xb8] sm:$0xff]   ;;  %v544_v49 = vld [vmem:[%s1795_s2 + $0x28] sm:$0xff] }
  0x51   : > { %1314 = vmatpush3.bf16.msra.mxu1 %v1387_v14  ;;  %1275 = vmatprep.subr.bf16.mxu0 %v1388_v15  ;;  %v1418_v39 = vld [vmem:[%s1793_s0 + $0x20] ss:$16 sps:$4 sm:$0xff]   ;;  %v1419_v41 = vld [vmem:[%s1793_s0 + $0x28] ss:$16 sps:$4 sm:$0xff]   ;;  %v1420_v42 = vld [vmem:[%s1793_s0 + $0x44] ss:$16 sps:$4 sm:$0xff]  }
  0x52   : > { %1315 = vmatprep.subr.bf16.mxu1 %v1389_v16  ;;  %v541_v43 = vld [vmem:[%s1795_s2 + $0x10] sm:$0xff]  ;;  %v1422_v44 = vld [vmem:[%s1793_s0 + $0x4c] ss:$16 sps:$4 sm:$0xff]   ;;  %554 = vperm.xlu0 %1374, %v540_v45   ;;  %v1425_v50 = vld [vmem:[%s1793_s0 + $0x48] ss:$16 sps:$4 sm:$0xff]  }
  0x53   : > { %559 = vperm.xlu1 %1375, %v541_v43   ;;  %v542_v46 = vld [vmem:[%s1795_s2 + $0x18] sm:$0xff]  ;;  %v1424_v48 = vld [vmem:[%s1793_s0 + $0x40] ss:$16 sps:$4 sm:$0xff]   ;;  %v1426_v51 = vld [vmem:[%s1793_s0 + $0x64] ss:$16 sps:$4 sm:$0xff]  }
  0x54   : > { %1276 = vmatpush3.bf16.msra.mxu0 %v1390_v17  ;;  %v1428_v52 = vld [vmem:[%s1793_s0 + $0x6c] ss:$16 sps:$4 sm:$0xff]   ;;  %v545_v53 = vld [vmem:[%s1795_s2 + $0x30] sm:$0xff]  ;;  %v1431_v56 = vld [vmem:[%s1793_s0 + $0x68] ss:$16 sps:$4 sm:$0xff]  }
  0x55   : > { %1316 = vmatpush3.bf16.msra.mxu1 %v1391_v18  ;;  %1277 = vmatprep.subr.bf16.mxu0 %v1392_v19  ;;  %v546_v54 = vld [vmem:[%s1795_s2 + $0x38] sm:$0xff]  ;;  %v1430_v55 = vld [vmem:[%s1793_s0 + $0x60] ss:$16 sps:$4 sm:$0xff]  }
  0x56   : > { %1317 = vmatprep.subr.bf16.mxu1 %v1393_v20  ;;  %569 = vperm.xlu0 %1374, %v543_v47  }
  0x57   : > { %564 = vperm.xlu1 %1375, %v542_v46  }
  0x58   : > { %1278 = vmatpush3.bf16.msra.mxu0 %v1394_v21 }
  0x59   : > { %1318 = vmatpush3.bf16.msra.mxu1 %v1395_v22  ;;  %1279 = vmatprep.subr.bf16.mxu0 %v1396_v23 }
  0x5a   : > { %1319 = vmatprep.subr.bf16.mxu1 %v1397_v24  ;;  %579 = vperm.xlu0 %1374, %v545_v53  }
  0x5b   : > { %574 = vperm.xlu1 %1375, %v544_v49  }
  0x5c   : > { %1280 = vmatpush3.bf16.msra.mxu0 %v1398_v25 }
  0x5d   : > { %1320 = vmatpush3.bf16.msra.mxu1 %v1399_v26  ;;  %1281 = vmatprep.subr.bf16.mxu0 %v1400_v27 }
  0x5e   : > { %1321 = vmatprep.subr.bf16.mxu1 %v1401_v28 }
  0x5f   : > { %584 = vperm.xlu1 %1375, %v546_v54  }
  0x60   : > { %1282 = vmatpush3.bf16.msra.mxu0 %v1402_v29 }
  0x61   : > { %1322 = vmatpush3.bf16.msra.mxu1 %v1403_v30  ;;  %1283 = vmatprep.subr.bf16.mxu0 %v1404_v31 }
  0x62   : > { %1323 = vmatprep.subr.bf16.mxu1 %v1405_v32 }
  0x64   : > { %1284 = vmatpush3.bf16.msra.mxu0 %v1406_v34 }
  0x65   : > { %1324 = vmatpush3.bf16.msra.mxu1 %v1407_v36 }
  0x67   : > { %892 = vmatmul.mubr.bf16.vlgmr.msra.gmra.mrb[0].mxu0 %v1408_v33 }
  0x68   : > { %957 = vmatmul.mubr.bf16.vlgmr.msra.gmra.mrb[0].mxu1 %v1411_v35  ;;  %899 = vmatprep.mubr.bf16.mxu0 %v1414_v37 }
  0x69   : > { %964 = vmatprep.mubr.bf16.mxu1 %v1416_v38 }
  0x6f   : > { %900 = vmatmul.mubr.bf16.gmra.mrb[4].mxu0 %v1418_v39 }
  0x70   : > { %965 = vmatmul.mubr.bf16.gmra.mrb[4].mxu1 %v1419_v41  ;;  %907 = vmatprep.mubr.bf16.mxu0 %v1420_v42 }
  0x71   : > { %972 = vmatprep.mubr.bf16.mxu1 %v1422_v44 }
  0x77   : > { %908 = vmatmul.mubr.bf16.gmra.mrb[8].mxu0 %v1424_v48 }
  0x78   : > { %973 = vmatmul.mubr.bf16.gmra.mrb[8].mxu1 %v1425_v50  ;;  %915 = vmatprep.mubr.bf16.mxu0 %v1426_v51 }
  0x79   : > { %980 = vmatprep.mubr.bf16.mxu1 %v1428_v52 }
  0x7f   : > { %916 = vmatmul.mubr.bf16.gmra.mrb[12].mxu0 %v1430_v55 }
  0x80   : > { %981 = vmatmul.mubr.bf16.gmra.mrb[12].mxu1 %v1431_v56 }
  0xcd   : > { %v550_v57 = vpop.permute.xlu0 %549 }
  0xd1   : > { %v555_v59 = vpop.permute.xlu0 %554 }
  0xd2   : > { %v560_v10 = vpop.permute.xlu1 %559 }
  0xd5   : > { %v570_v32 = vpop.permute.xlu0 %569 }
  0xd6   : > { %v565_v27 = vpop.permute.xlu1 %564 }
  0xd9   : > { %v580_v52 = vpop.permute.xlu0 %579 }
  0xda   : > { %v575_v48 = vpop.permute.xlu1 %574 }
 0x13a   : > { %v1285_v58 = vpop.f32.mrb[0].mxu0 }
 0x13b   : > { %v1325_v60 = vpop.f32.mrb[0].mxu1  ;;  %v1286_v61 = vpop.f32.mrb[1].mxu0 }
 0x13c   : > { %v1287_v62 = vadd.f32 %v1286_v61, %v1285_v58  ;;  %v1326_v63 = vpop.f32.mrb[1].mxu1  ;;  %v1288_v0 = vpop.f32.mrb[2].mxu0 }
 0x13d   : > { %v1327_v1 = vadd.f32 %v1326_v63, %v1325_v60  ;;  %v1328_v2 = vpop.f32.mrb[2].mxu1  ;;  %v1289_v3 = vpop.f32.mrb[3].mxu0 }
 0x13e   : > { %v894_v4 = vadd.f32 %v1287_v62, %v550_v57  ;;  %v1290_v5 = vadd.f32 %v1289_v3, %v1288_v0  ;;  %v1329_v6 = vpop.f32.mrb[3].mxu1 }
 0x13f   : > { %v1330_v7 = vadd.f32 %v1329_v6, %v1328_v2 }
 0x140   : > { %v959_v8 = vadd.f32 %v1327_v1, %v894_v4  ;;  %v897_v9 = vadd.f32 %v1290_v5, %v555_v59  ;;  %v585_v5 = vpop.permute.xlu1 %584 }
 0x142   : > { %v962_v11 = vadd.f32 %v1330_v7, %v897_v9  ;;  %v1291_v12 = vpop.f32.mrb[4].mxu0  ;;  %v989_v15 = vmax.f32 %v959_v8, 0.0 }
 0x143   : > { %v1331_v13 = vpop.f32.mrb[4].mxu1  ;;  %v1292_v14 = vpop.f32.mrb[5].mxu0 }
 0x144   : > { %v990_v16 = vmax.f32 %v962_v11, 0.0  ;;  %v1293_v17 = vadd.f32 %v1292_v14, %v1291_v12  ;;  %v1332_v18 = vpop.f32.mrb[5].mxu1  ;;  %v1294_v19 = vpop.f32.mrb[6].mxu0 }
 0x145   : > { %v1333_v20 = vadd.f32 %v1332_v18, %v1331_v13  ;;  %v1334_v21 = vpop.f32.mrb[6].mxu1  ;;  %v1295_v22 = vpop.f32.mrb[7].mxu0 }
 0x146   : > { %v1249_v23 = vpack.c.bf16 %v990_v16, %v989_v15  ;;  %v902_v24 = vadd.f32 %v1293_v17, %v560_v10  ;;  %v1296_v25 = vadd.f32 %v1295_v22, %v1294_v19  ;;  %v1335_v26 = vpop.f32.mrb[7].mxu1 }
 0x147   : > { %v1336_v28 = vadd.f32 %v1335_v26, %v1334_v21 }
 0x148   : > { %1250 = vst [vmem:[%s1762_s12] sm:$0xff] %v1249_v23   ;;  %v967_v29 = vadd.f32 %v1333_v20, %v902_v24  ;;  %v905_v30 = vadd.f32 %v1296_v25, %v565_v27 }
 0x14a   : > { %v970_v31 = vadd.f32 %v1336_v28, %v905_v30  ;;  %v1297_v33 = vpop.f32.mrb[8].mxu0  ;;  %v991_v36 = vmax.f32 %v967_v29, 0.0 }
 0x14b   : > { %v1337_v34 = vpop.f32.mrb[8].mxu1  ;;  %v1298_v35 = vpop.f32.mrb[9].mxu0 }
 0x14c   : > { %v992_v37 = vmax.f32 %v970_v31, 0.0  ;;  %v1299_v38 = vadd.f32 %v1298_v35, %v1297_v33  ;;  %v1338_v39 = vpop.f32.mrb[9].mxu1  ;;  %v1300_v40 = vpop.f32.mrb[10].mxu0 }
 0x14d   : > { %v1339_v41 = vadd.f32 %v1338_v39, %v1337_v34  ;;  %v1340_v42 = vpop.f32.mrb[10].mxu1  ;;  %v1301_v43 = vpop.f32.mrb[11].mxu0 }
 0x14e   : > { %v1254_v44 = vpack.c.bf16 %v992_v37, %v991_v36  ;;  %v910_v45 = vadd.f32 %v1299_v38, %v570_v32  ;;  %v1302_v46 = vadd.f32 %v1301_v43, %v1300_v40  ;;  %v1341_v47 = vpop.f32.mrb[11].mxu1 }
 0x14f   : > { %v1342_v49 = vadd.f32 %v1341_v47, %v1340_v42  ;;  %v1061_v13 = vld [vmem:[%s1762_s12] sm:$0xf] (%p1507_p5)  ;;  %v1063_v14 = vld [vmem:[%s1762_s12 + $0x4] sm:$0xf] (%p1507_p5) }
 0x150   : > { %1266 = vst [vmem:[%s1762_s12 + $0x8] sm:$0xff] %v1254_v44   ;;  %v975_v50 = vadd.f32 %v1339_v41, %v910_v45  ;;  %v913_v51 = vadd.f32 %v1302_v46, %v575_v48  ;;  %1062 = vst [vmem:[%s1045_s24] sm:$0xf] (%p1507_p5), %v1061_v13 }
 0x151   : > { %1064 = vst [vmem:[%s1045_s24 + $0x8] sm:$0xf] (%p1507_p5), %v1063_v14 }
 0x152   : > { %v978_v53 = vadd.f32 %v1342_v49, %v913_v51  ;;  %v1303_v54 = vpop.f32.mrb[12].mxu0  ;;  %v993_v57 = vmax.f32 %v975_v50, 0.0 }
 0x153   : > { %v1343_v55 = vpop.f32.mrb[12].mxu1  ;;  %v1304_v56 = vpop.f32.mrb[13].mxu0 }
 0x154   : > { %v994_v58 = vmax.f32 %v978_v53, 0.0  ;;  %v1305_v59 = vadd.f32 %v1304_v56, %v1303_v54  ;;  %v1344_v60 = vpop.f32.mrb[13].mxu1  ;;  %v1306_v61 = vpop.f32.mrb[14].mxu0 }
 0x155   : > { %v1345_v62 = vadd.f32 %v1344_v60, %v1343_v55  ;;  %v1346_v63 = vpop.f32.mrb[14].mxu1  ;;  %v1307_v0 = vpop.f32.mrb[15].mxu0 }
 0x156   : > { %v1259_v1 = vpack.c.bf16 %v994_v58, %v993_v57  ;;  %v918_v2 = vadd.f32 %v1305_v59, %v580_v52  ;;  %v1308_v3 = vadd.f32 %v1307_v0, %v1306_v61  ;;  %v1347_v4 = vpop.f32.mrb[15].mxu1 }
 0x157   : > { %v1348_v6 = vadd.f32 %v1347_v4, %v1346_v63  ;;  %v1065_v15 = vld [vmem:[%s1762_s12 + $0x8] sm:$0xf] (%p1507_p5)  ;;  %v1067_v16 = vld [vmem:[%s1762_s12 + $0xc] sm:$0xf] (%p1507_p5) }
 0x158   : > { %1267 = vst [vmem:[%s1762_s12 + $0x10] sm:$0xff] %v1259_v1   ;;  %v983_v7 = vadd.f32 %v1345_v62, %v918_v2  ;;  %v921_v8 = vadd.f32 %v1308_v3, %v585_v5  ;;  %1066 = vst [vmem:[%s1045_s24 + $0x10] sm:$0xf] (%p1507_p5), %v1065_v15 }
 0x159   : > { %1068 = vst [vmem:[%s1045_s24 + $0x18] sm:$0xf] (%p1507_p5), %v1067_v16 }
 0x15a   : > { %v986_v9 = vadd.f32 %v1348_v6, %v921_v8  ;;  %v995_v10 = vmax.f32 %v983_v7, 0.0  ;;  %1043 = sbr.rel (!%p1507_p5) target bundleno = 361 (0x169), region = 77 }
 0x15c   : > { %v996_v11 = vmax.f32 %v986_v9, 0.0 }
 0x15e   : > { %v1264_v12 = vpack.c.bf16 %v996_v11, %v995_v10 }
 0x15f   : > { %v1069_v17 = vld [vmem:[%s1762_s12 + $0x10] sm:$0xf] (%p1507_p5)  ;;  %v1071_v18 = vld [vmem:[%s1762_s12 + $0x14] sm:$0xf] (%p1507_p5) }
 0x160   : > { %1268 = vst [vmem:[%s1762_s12 + $0x18] sm:$0xff] %v1264_v12   ;;  %1070 = vst [vmem:[%s1045_s24 + $0x20] sm:$0xf] (%p1507_p5), %v1069_v17 }
 0x161   : > { %1072 = vst [vmem:[%s1045_s24 + $0x28] sm:$0xf] %v1071_v18 }
 0x167   : > { %v1073_v19 = vld [vmem:[%s1762_s12 + $0x18] sm:$0xf]  ;;  %v1075_v20 = vld [vmem:[%s1762_s12 + $0x1c] sm:$0xf] }
 0x168   : > { %1074 = vst [vmem:[%s1045_s24 + $0x30] sm:$0xf] %v1073_v19  ;;  %1076 = vst [vmem:[%s1045_s24 + $0x38] sm:$0xf] %v1075_v20 }
 0x169 PF: > { %p10_p10 = scmp.ge.s32.totalorder %s1494_s16, 4   ;;  %s1798_s12 = smov %s1450_s13 }
 0x16a   : > { %s1799_s13 = smov %s1505_s19  ;;  %s1800_s14 = smov %s1494_s16 }
 0x16b   :  { %12 = sbr.rel (!%p10_p10) target bundleno = 2 (0x2), region = 149 }

// kernel: actor_forward.6
= control target key start
LH: loop header
LB: loop body
LE: loop exit
PB: predicated region body
PF: predicated region fallthrough
CT: control target
= control target key end

     0   :  { %v1013_v1 = vmov 0   ;;  %vm475_vm0 = vcmask 523264   ;;  %s1245_s1 = inlined_call_operand.vmem [shape: bf16[576,128], index: 1, kind: input, shape index: {}]   ;;  %s1246_s0 = inlined_call_operand.vmem [shape: bf16[64,576], index: 0, kind: input, shape index: {}]   ;;  %s1247_s2 = inlined_call_operand.vmem [shape: f32[64,1], index: 2, kind: input, shape index: {}]   ;;  %s1248_s3 = inlined_call_operand.vmem [shape: bf16[64,128], index: 3, kind: output, shape index: {}]  }
   0x1   :  { %v949_v0 = vld [vmem:[%s1245_s1 + $0x40] sm:$0xff]   ;;  %947 = vset.pattern.permute.xlu0 %v1013_v1  ;;  %948 = vset.pattern.permute.xlu1 %v1013_v1  ;;  %v953_v5 = vld [vmem:[%s1245_s1 + $0x48] sm:$0xff]   ;;  %v957_v9 = vld [vmem:[%s1245_s1 + $0x50] sm:$0xff]  }
   0x2   :  { %v950_v2 = vld [vmem:[%s1245_s1 + $0xc0] sm:$0xff]   ;;  %834 = vmatprep.subr.bf16.mxu0 %v949_v0  ;;  %v954_v6 = vld [vmem:[%s1245_s1 + $0xc8] sm:$0xff]   ;;  %v958_v10 = vld [vmem:[%s1245_s1 + $0xd0] sm:$0xff]  }
   0x3   :  { %v951_v3 = vld [vmem:[%s1245_s1] sm:$0xff]   ;;  %874 = vmatprep.subr.bf16.mxu1 %v950_v2  ;;  %v955_v7 = vld [vmem:[%s1245_s1 + $0x8] sm:$0xff]   ;;  %v959_v11 = vld [vmem:[%s1245_s1 + $0x10] sm:$0xff]  }
   0x4   :  { %v952_v4 = vld [vmem:[%s1245_s1 + $0x80] sm:$0xff]   ;;  %835 = vmatpush3.bf16.msra.mxu0 %v951_v3  ;;  %v956_v8 = vld [vmem:[%s1245_s1 + $0x88] sm:$0xff]   ;;  %v960_v12 = vld [vmem:[%s1245_s1 + $0x90] sm:$0xff]  }
   0x5   :  { %875 = vmatpush3.bf16.msra.mxu1 %v952_v4  ;;  %836 = vmatprep.subr.bf16.mxu0 %v953_v5  ;;  %v961_v13 = vld [vmem:[%s1245_s1 + $0x58] sm:$0xff]   ;;  %v965_v17 = vld [vmem:[%s1245_s1 + $0x60] sm:$0xff]   ;;  %v969_v21 = vld [vmem:[%s1245_s1 + $0x68] sm:$0xff]  }
   0x6   :  { %876 = vmatprep.subr.bf16.mxu1 %v954_v6  ;;  %v962_v14 = vld [vmem:[%s1245_s1 + $0xd8] sm:$0xff]   ;;  %v966_v18 = vld [vmem:[%s1245_s1 + $0xe0] sm:$0xff]   ;;  %v970_v22 = vld [vmem:[%s1245_s1 + $0xe8] sm:$0xff]  }
   0x7   :  { %v963_v15 = vld [vmem:[%s1245_s1 + $0x18] sm:$0xff]   ;;  %v967_v19 = vld [vmem:[%s1245_s1 + $0x20] sm:$0xff]   ;;  %v971_v23 = vld [vmem:[%s1245_s1 + $0x28] sm:$0xff]  }
   0x8   :  { %837 = vmatpush3.bf16.msra.mxu0 %v955_v7  ;;  %v964_v16 = vld [vmem:[%s1245_s1 + $0x98] sm:$0xff]   ;;  %v968_v20 = vld [vmem:[%s1245_s1 + $0xa0] sm:$0xff]   ;;  %v972_v24 = vld [vmem:[%s1245_s1 + $0xa8] sm:$0xff]  }
   0x9   :  { %877 = vmatpush3.bf16.msra.mxu1 %v956_v8  ;;  %838 = vmatprep.subr.bf16.mxu0 %v957_v9  ;;  %v973_v25 = vld [vmem:[%s1245_s1 + $0x70] sm:$0xff]   ;;  %v977_v29 = vld [vmem:[%s1245_s1 + $0x78] sm:$0xff]   ;;  %v986_v36 = vld [vmem:[%s1246_s0 + $0xc] ss:$20 sps:$4 sm:$0xff]  }
   0xa   :  { %878 = vmatprep.subr.bf16.mxu1 %v958_v10  ;;  %v974_v26 = vld [vmem:[%s1245_s1 + $0xf0] sm:$0xff]   ;;  %v978_v30 = vld [vmem:[%s1245_s1 + $0xf8] sm:$0xff]   ;;  %v987_v37 = vld [vmem:[%s1245_s1 + $0x100] sm:$0xff]   ;;  %585 = vmatprep.mubr.bf16.mxu1 %v986_v36 }
   0xb   :  { %v975_v27 = vld [vmem:[%s1245_s1 + $0x30] sm:$0xff]   ;;  %v979_v31 = vld [vmem:[%s1245_s1 + $0x38] sm:$0xff]   ;;  %v988_v38 = vld [vmem:[%s1246_s0 + $0x2c] ss:$20 sps:$4 sm:$0xff]  }
   0xc   :  { %839 = vmatpush3.bf16.msra.mxu0 %v959_v11  ;;  %v976_v28 = vld [vmem:[%s1245_s1 + $0xb0] sm:$0xff]   ;;  %v980_v32 = vld [vmem:[%s1245_s1 + $0xb8] sm:$0xff]   ;;  %v994_v40 = vld [vmem:[%s1245_s1 + $0x108] sm:$0xff]  }
   0xd   :  { %879 = vmatpush3.bf16.msra.mxu1 %v960_v12  ;;  %840 = vmatprep.subr.bf16.mxu0 %v961_v13  ;;  %v981_v33 = vld [vmem:[%s1246_s0] ss:$20 sps:$4 sm:$0xff]   ;;  %v983_v34 = vld [vmem:[%s1246_s0 + $0x4] ss:$20 sps:$4 sm:$0xff]   ;;  %v984_v35 = vld [vmem:[%s1246_s0 + $0x8] ss:$20 sps:$4 sm:$0xff]  }
   0xe   :  { %880 = vmatprep.subr.bf16.mxu1 %v962_v14  ;;  %520 = vmatprep.mubr.bf16.mxu0 %v983_v34  ;;  %v990_v39 = vld [vmem:[%s1246_s0 + $0x34] ss:$20 sps:$4 sm:$0xff]   ;;  %v993_v42 = vld [vmem:[%s1246_s0 + $0x30] ss:$20 sps:$4 sm:$0xff]   ;;  %v1008_v46 = vld [vmem:[%s1245_s1 + $0x118] sm:$0xff]  }
   0xf   :  { %v992_v41 = vld [vmem:[%s1246_s0 + $0x28] ss:$20 sps:$4 sm:$0xff]   ;;  %v1001_v45 = vld [vmem:[%s1245_s1 + $0x110] sm:$0xff]   ;;  %v1000_v48 = vld [vmem:[%s1246_s0 + $0x58] ss:$20 sps:$4 sm:$0xff]  }
  0x10   :  { %841 = vmatpush3.bf16.msra.mxu0 %v963_v15  ;;  %v995_v43 = vld [vmem:[%s1246_s0 + $0x54] ss:$20 sps:$4 sm:$0xff]   ;;  %v997_v44 = vld [vmem:[%s1246_s0 + $0x5c] ss:$20 sps:$4 sm:$0xff]   ;;  %v1004_v50 = vld [vmem:[%s1246_s0 + $0x84] ss:$20 sps:$4 sm:$0xff]  }
  0x11   :  { %881 = vmatpush3.bf16.msra.mxu1 %v964_v16  ;;  %842 = vmatprep.subr.bf16.mxu0 %v965_v17  ;;  %v999_v47 = vld [vmem:[%s1246_s0 + $0x50] ss:$20 sps:$4 sm:$0xff]   ;;  %v112_v53 = vld [vmem:[%s1247_s2 + $0x8] sm:$0xff]  ;;  %v114_v54 = vld [vmem:[%s1247_s2 + $0x18] sm:$0xff] }
  0x12   :  { %882 = vmatprep.subr.bf16.mxu1 %v966_v18  ;;  %v1002_v49 = vld [vmem:[%s1246_s0 + $0x7c] ss:$20 sps:$4 sm:$0xff]   ;;  %v111_v51 = vld [vmem:[%s1247_s2] sm:$0xff]  ;;  %v1006_v55 = vld [vmem:[%s1246_s0 + $0x78] ss:$20 sps:$4 sm:$0xff]  }
  0x13   :  { %v113_v52 = vld [vmem:[%s1247_s2 + $0x10] sm:$0xff]  ;;  %121 = vperm.xlu0 %947, %v111_v51   ;;  %v115_v58 = vld [vmem:[%s1247_s2 + $0x20] sm:$0xff]  ;;  %v116_v60 = vld [vmem:[%s1247_s2 + $0x28] sm:$0xff] }
  0x14   :  { %843 = vmatpush3.bf16.msra.mxu0 %v967_v19  ;;  %131 = vperm.xlu1 %948, %v113_v52   ;;  %v1007_v56 = vld [vmem:[%s1246_s0 + $0x80] ss:$20 sps:$4 sm:$0xff]   ;;  %v1009_v57 = vld [vmem:[%s1246_s0 + $0x10] ss:$20 sps:$4 sm:$0xff]   ;;  %v118_v62 = vld [vmem:[%s1247_s2 + $0x38] sm:$0xff] }
  0x15   :  { %883 = vmatpush3.bf16.msra.mxu1 %v968_v20  ;;  %844 = vmatprep.subr.bf16.mxu0 %v969_v21  ;;  %v1010_v59 = vld [vmem:[%s1246_s0 + $0x60] ss:$20 sps:$4 sm:$0xff]   ;;  %v1011_v63 = vld [vmem:[%s1246_s0 + $0x38] ss:$20 sps:$4 sm:$0xff]   ;;  %v1012_v0 = vld [vmem:[%s1246_s0 + $0x88] ss:$20 sps:$4 sm:$0xff]  }
  0x16   :  { %884 = vmatprep.subr.bf16.mxu1 %v970_v22  ;;  %v117_v61 = vld [vmem:[%s1247_s2 + $0x30] sm:$0xff] }
  0x17   :  { %126 = vperm.xlu0 %947, %v112_v53  }
  0x18   :  { %845 = vmatpush3.bf16.msra.mxu0 %v971_v23  ;;  %136 = vperm.xlu1 %948, %v114_v54  }
  0x19   :  { %885 = vmatpush3.bf16.msra.mxu1 %v972_v24  ;;  %846 = vmatprep.subr.bf16.mxu0 %v973_v25 }
  0x1a   :  { %886 = vmatprep.subr.bf16.mxu1 %v974_v26 }
  0x1b   :  { %141 = vperm.xlu0 %947, %v115_v58  }
  0x1c   :  { %847 = vmatpush3.bf16.msra.mxu0 %v975_v27  ;;  %146 = vperm.xlu1 %948, %v116_v60  }
  0x1d   :  { %887 = vmatpush3.bf16.msra.mxu1 %v976_v28  ;;  %848 = vmatprep.subr.bf16.mxu0 %v977_v29 }
  0x1e   :  { %888 = vmatprep.subr.bf16.mxu1 %v978_v30 }
  0x1f   :  { %151 = vperm.xlu0 %947, %v117_v61  }
  0x20   :  { %849 = vmatpush3.bf16.msra.mxu0 %v979_v31  ;;  %156 = vperm.xlu1 %948, %v118_v62  }
  0x21   :  { %889 = vmatpush3.bf16.msra.mxu1 %v980_v32  ;;  %922 = vmatprep.subr.bf16.mxu0 %v987_v37 }
  0x22   :  { %938 = vmatprep.subr.bf16.mxu1 %v987_v37 }
  0x23   :  { %521 = vmatmul.mubr.bf16.vlgmr.msra.gmra.mrb[0].mxu0 %v981_v33 }
  0x24   :  { %586 = vmatmul.mubr.bf16.vlgmr.msra.gmra.mrb[0].mxu1 %v984_v35  ;;  %923 = vmatpush3.bf16.msra.mxu0 %v987_v37 }
  0x25   :  { %942 = vmatpush3.bf16.msra.mxu1 %v987_v37  ;;  %528 = vmatprep.mubr.bf16.mxu0 %v988_v38 }
  0x26   :  { %593 = vmatprep.mubr.bf16.mxu1 %v990_v39  ;;  %924 = vmatprep.subr.bf16.mxu0 %v994_v40 }
  0x27   :  { %939 = vmatprep.subr.bf16.mxu1 %v994_v40 }
  0x28   :  { %925 = vmatpush3.bf16.msra.mxu0 %v994_v40 }
  0x29   :  { %943 = vmatpush3.bf16.msra.mxu1 %v994_v40  ;;  %926 = vmatprep.subr.bf16.mxu0 %v1001_v45 }
  0x2a   :  { %940 = vmatprep.subr.bf16.mxu1 %v1001_v45 }
  0x2b   :  { %529 = vmatmul.mubr.bf16.gmra.mrb[4].mxu0 %v992_v41 }
  0x2c   :  { %594 = vmatmul.mubr.bf16.gmra.mrb[4].mxu1 %v993_v42  ;;  %536 = vmatprep.mubr.bf16.mxu0 %v995_v43 }
  0x2d   :  { %601 = vmatprep.mubr.bf16.mxu1 %v997_v44  ;;  %927 = vmatpush3.bf16.msra.mxu0 %v1001_v45 }
  0x2e   :  { %944 = vmatpush3.bf16.msra.mxu1 %v1001_v45  ;;  %928 = vmatprep.subr.bf16.mxu0 %v1008_v46 }
  0x2f   :  { %941 = vmatprep.subr.bf16.mxu1 %v1008_v46 }
  0x31   :  { %929 = vmatpush3.bf16.msra.mxu0 %v1008_v46 }
  0x32   :  { %945 = vmatpush3.bf16.msra.mxu1 %v1008_v46 }
  0x33   :  { %537 = vmatmul.mubr.bf16.gmra.mrb[8].mxu0 %v999_v47 }
  0x34   :  { %602 = vmatmul.mubr.bf16.gmra.mrb[8].mxu1 %v1000_v48  ;;  %544 = vmatprep.mubr.bf16.mxu0 %v1002_v49 }
  0x35   :  { %609 = vmatprep.mubr.bf16.mxu1 %v1004_v50 }
  0x3b   :  { %545 = vmatmul.mubr.bf16.gmra.mrb[12].mxu0 %v1006_v55 }
  0x3c   :  { %610 = vmatmul.mubr.bf16.gmra.mrb[12].mxu1 %v1007_v56  ;;  %930 = vmatprep.mubr.msk.bf16.mxu0 %vm475_vm0, %v1009_v57 }
  0x3d   :  { %934 = vmatprep.mubr.msk.bf16.mxu1 %vm475_vm0, %v1010_v59 }
  0x43   :  { %931 = vmatmul.mubr.msk.bf16.vlgmr.msra.gmra.mrb[16].mxu0 %vm475_vm0, %v1011_v63 }
  0x44   :  { %935 = vmatmul.mubr.msk.bf16.vlgmr.msra.gmra.mrb[16].mxu1 %vm475_vm0, %v1012_v0 }
  0x92   :  { %v122_v1 = vpop.permute.xlu0 %121 }
  0x93   :  { %v132_v18 = vpop.permute.xlu1 %131 }
  0x96   :  { %v127_v3 = vpop.permute.xlu0 %126 }
  0x97   :  { %v137_v33 = vpop.permute.xlu1 %136 }
  0x9a   :  { %v142_v36 = vpop.permute.xlu0 %141 }
  0x9b   :  { %v147_v50 = vpop.permute.xlu1 %146 }
  0x9e   :  { %v152_v54 = vpop.permute.xlu0 %151 }
  0xf6   :  { %v850_v2 = vpop.f32.mrb[0].mxu0 }
  0xf7   :  { %v890_v4 = vpop.f32.mrb[0].mxu1  ;;  %v851_v5 = vpop.f32.mrb[1].mxu0 }
  0xf8   :  { %v852_v6 = vadd.f32 %v851_v5, %v850_v2  ;;  %v891_v7 = vpop.f32.mrb[1].mxu1  ;;  %v853_v8 = vpop.f32.mrb[2].mxu0 }
  0xf9   :  { %v892_v9 = vadd.f32 %v891_v7, %v890_v4  ;;  %v893_v10 = vpop.f32.mrb[2].mxu1  ;;  %v854_v11 = vpop.f32.mrb[3].mxu0 }
  0xfa   :  { %v523_v12 = vadd.f32 %v852_v6, %v122_v1  ;;  %v855_v13 = vadd.f32 %v854_v11, %v853_v8  ;;  %v894_v14 = vpop.f32.mrb[3].mxu1  ;;  %v157_v4 = vpop.permute.xlu1 %156 }
  0xfb   :  { %v895_v15 = vadd.f32 %v894_v14, %v893_v10 }
  0xfc   :  { %v526_v16 = vadd.f32 %v855_v13, %v127_v3  ;;  %v588_v17 = vadd.f32 %v892_v9, %v523_v12 }
  0xfe   :  { %v856_v19 = vpop.f32.mrb[4].mxu0  ;;  %v1230_v20 = vadd.f32 %v895_v15, %v526_v16 }
  0xff   :  { %v896_v21 = vpop.f32.mrb[4].mxu1  ;;  %v857_v22 = vpop.f32.mrb[5].mxu0 }
 0x100   :  { %v858_v23 = vadd.f32 %v857_v22, %v856_v19  ;;  %v897_v24 = vpop.f32.mrb[5].mxu1  ;;  %v859_v25 = vpop.f32.mrb[6].mxu0 }
 0x101   :  { %v898_v26 = vadd.f32 %v897_v24, %v896_v21  ;;  %v899_v27 = vpop.f32.mrb[6].mxu1  ;;  %v860_v28 = vpop.f32.mrb[7].mxu0 }
 0x102   :  { %v531_v29 = vadd.f32 %v858_v23, %v132_v18  ;;  %v861_v30 = vadd.f32 %v860_v28, %v859_v25  ;;  %v900_v31 = vpop.f32.mrb[7].mxu1 }
 0x103   :  { %v901_v32 = vadd.f32 %v900_v31, %v899_v27 }
 0x104   :  { %v534_v34 = vadd.f32 %v861_v30, %v137_v33  ;;  %v596_v35 = vadd.f32 %v898_v26, %v531_v29 }
 0x106   :  { %v862_v37 = vpop.f32.mrb[8].mxu0  ;;  %v599_v38 = vadd.f32 %v901_v32, %v534_v34 }
 0x107   :  { %v902_v39 = vpop.f32.mrb[8].mxu1  ;;  %v863_v40 = vpop.f32.mrb[9].mxu0 }
 0x108   :  { %v864_v41 = vadd.f32 %v863_v40, %v862_v37  ;;  %v903_v42 = vpop.f32.mrb[9].mxu1  ;;  %v865_v43 = vpop.f32.mrb[10].mxu0 }
 0x109   :  { %v904_v44 = vadd.f32 %v903_v42, %v902_v39  ;;  %v905_v45 = vpop.f32.mrb[10].mxu1  ;;  %v866_v46 = vpop.f32.mrb[11].mxu0 }
 0x10a   :  { %v539_v47 = vadd.f32 %v864_v41, %v142_v36  ;;  %v867_v48 = vadd.f32 %v866_v46, %v865_v43  ;;  %v906_v49 = vpop.f32.mrb[11].mxu1 }
 0x10b   :  { %v907_v51 = vadd.f32 %v906_v49, %v905_v45 }
 0x10c   :  { %v542_v52 = vadd.f32 %v867_v48, %v147_v50  ;;  %v604_v53 = vadd.f32 %v904_v44, %v539_v47 }
 0x10e   :  { %v868_v55 = vpop.f32.mrb[12].mxu0  ;;  %v607_v56 = vadd.f32 %v907_v51, %v542_v52 }
 0x10f   :  { %v908_v57 = vpop.f32.mrb[12].mxu1  ;;  %v869_v58 = vpop.f32.mrb[13].mxu0 }
 0x110   :  { %v870_v59 = vadd.f32 %v869_v58, %v868_v55  ;;  %v909_v60 = vpop.f32.mrb[13].mxu1  ;;  %v871_v61 = vpop.f32.mrb[14].mxu0 }
 0x111   :  { %v910_v62 = vadd.f32 %v909_v60, %v908_v57  ;;  %v911_v63 = vpop.f32.mrb[14].mxu1  ;;  %v872_v0 = vpop.f32.mrb[15].mxu0 }
 0x112   :  { %v547_v1 = vadd.f32 %v870_v59, %v152_v54  ;;  %v873_v2 = vadd.f32 %v872_v0, %v871_v61  ;;  %v912_v3 = vpop.f32.mrb[15].mxu1 }
 0x113   :  { %v913_v5 = vadd.f32 %v912_v3, %v911_v63 }
 0x114   :  { %v550_v6 = vadd.f32 %v873_v2, %v157_v4  ;;  %v612_v7 = vadd.f32 %v910_v62, %v547_v1 }
 0x116   :  { %v932_v8 = vpop.f32.mrb[16].mxu0  ;;  %v615_v9 = vadd.f32 %v913_v5, %v550_v6 }
 0x117   :  { %v661_v10 = vadd.f32 %v932_v8, %v596_v35  ;;  %v936_v11 = vpop.f32.mrb[16].mxu1  ;;  %v652_v12 = vpop.f32.mrb[17].mxu0 }
 0x118   :  { %v677_v13 = vadd.f32 %v936_v11, %v612_v7  ;;  %v653_v14 = vadd.f32 %v652_v12, %v588_v17  ;;  %v668_v15 = vpop.f32.mrb[17].mxu1  ;;  %v933_v16 = vpop.f32.mrb[18].mxu0 }
 0x119   :  { %v669_v18 = vadd.f32 %v668_v15, %v604_v53  ;;  %v664_v19 = vadd.f32 %v933_v16, %v599_v38  ;;  %v937_v21 = vpop.f32.mrb[18].mxu1  ;;  %v655_v22 = vpop.f32.mrb[19].mxu0  ;;  %v685_v26 = vmax.f32 %v661_v10, 0.0 }
 0x11a   :  { %v680_v23 = vadd.f32 %v937_v21, %v615_v9  ;;  %v656_v24 = vadd.f32 %v655_v22, %v1230_v20  ;;  %v671_v25 = vpop.f32.mrb[19].mxu1  ;;  %v689_v29 = vmax.f32 %v677_v13, 0.0  ;;  %v683_v30 = vmax.f32 %v653_v14, 0.0 }
 0x11b   :  { %v686_v27 = vmax.f32 %v664_v19, 0.0  ;;  %v672_v28 = vadd.f32 %v671_v25, %v607_v56  ;;  %v687_v33 = vmax.f32 %v669_v18, 0.0 }
 0x11c   :  { %v690_v31 = vmax.f32 %v680_v23, 0.0  ;;  %v684_v32 = vmax.f32 %v656_v24, 0.0 }
 0x11d   :  { %v819_v34 = vpack.c.bf16 %v686_v27, %v685_v26  ;;  %v688_v17 = vmax.f32 %v672_v28, 0.0 }
 0x11e   :  { %v829_v35 = vpack.c.bf16 %v690_v31, %v689_v29  ;;  %v814_v36 = vpack.c.bf16 %v684_v32, %v683_v30 }
 0x11f   :  { %831 = vst [vmem:[%s1248_s3 + $0x8] sm:$0xff] %v819_v34   ;;  %v824_v37 = vpack.c.bf16 %v688_v17, %v687_v33 }
 0x120   :  { %833 = vst [vmem:[%s1248_s3 + $0x18] sm:$0xff] %v829_v35   ;;  %815 = vst [vmem:[%s1248_s3] sm:$0xff] %v814_v36  }
 0x121   :  { %832 = vst [vmem:[%s1248_s3 + $0x10] sm:$0xff] %v824_v37  }

// kernel: actor_forward.7
= control target key start
LH: loop header
LB: loop body
LE: loop exit
PB: predicated region body
PF: predicated region fallthrough
CT: control target
= control target key end

     0   :  { %vm4904_vm0 = vcmask 523264   ;;  %s12952_s1 = inlined_call_operand.vmem [shape: bf16[3136,512], index: 1, kind: input, shape index: {}]   ;;  %s12953_s0 = inlined_call_operand.vmem [shape: bf16[16,3136], index: 0, kind: input, shape index: {}]   ;;  %s12954_s3 = inlined_call_operand.vmem [shape: bf16[512,512], index: 3, kind: input, shape index: {}]   ;;  %s12955_s5 = inlined_call_operand.vmem [shape: bf16[512,128], index: 5, kind: input, shape index: {}]   ;;  %s12956_s2 = inlined_call_operand.vmem [shape: f32[1,512], index: 2, kind: input, shape index: {}]   ;;  %s12957_s4 = inlined_call_operand.vmem [shape: f32[1,512], index: 4, kind: input, shape index: {}]   ;;  %s12958_s6 = inlined_call_operand.vmem [shape: f32[1,128], index: 6, kind: input, shape index: {}]   ;;  %s12959_s7 = inlined_call_operand.vmem [shape: f32[16,128], index: 7, kind: output, shape index: {}]  }
   0x1   :  { %v8518_v0 = vld [vmem:[%s12952_s1 + $0x4] ss:$16 sps:$4 sm:$0xff]   ;;  %v8520_v1 = vld [vmem:[%s12952_s1 + $0xc] ss:$16 sps:$4 sm:$0xff]   ;;  %v8522_v2 = vld [vmem:[%s12952_s1] ss:$16 sps:$4 sm:$0xff]  }
   0x2   :  { %4908 = vmatprep.subr.bf16.mxu0 %v8518_v0  ;;  %v8523_v3 = vld [vmem:[%s12952_s1 + $0x8] ss:$16 sps:$4 sm:$0xff]   ;;  %5467 = vmatprep.subr.bf16.mxu1 %v8520_v1  ;;  %v8524_v4 = vld [vmem:[%s12952_s1 + $0x24] ss:$16 sps:$4 sm:$0xff]   ;;  %v8526_v5 = vld [vmem:[%s12952_s1 + $0x2c] ss:$16 sps:$4 sm:$0xff]  }
   0x3   :  { %4909 = vmatpush1.bf16.msra.mxu0 %v8522_v2  ;;  %5468 = vmatpush1.bf16.msra.mxu1 %v8523_v3  ;;  %v8528_v6 = vld [vmem:[%s12952_s1 + $0x20] ss:$16 sps:$4 sm:$0xff]   ;;  %v8529_v7 = vld [vmem:[%s12952_s1 + $0x28] ss:$16 sps:$4 sm:$0xff]   ;;  %v8530_v8 = vld [vmem:[%s12952_s1 + $0x44] ss:$16 sps:$4 sm:$0xff]  }
   0x4   :  { %4910 = vmatprep.subr.bf16.mxu0 %v8524_v4  ;;  %5469 = vmatprep.subr.bf16.mxu1 %v8526_v5  ;;  %v8532_v9 = vld [vmem:[%s12952_s1 + $0x4c] ss:$16 sps:$4 sm:$0xff]   ;;  %v8534_v10 = vld [vmem:[%s12952_s1 + $0x40] ss:$16 sps:$4 sm:$0xff]   ;;  %v8535_v11 = vld [vmem:[%s12952_s1 + $0x48] ss:$16 sps:$4 sm:$0xff]  }
   0x5   :  { %v8536_v12 = vld [vmem:[%s12952_s1 + $0x64] ss:$16 sps:$4 sm:$0xff]   ;;  %v8538_v13 = vld [vmem:[%s12952_s1 + $0x6c] ss:$16 sps:$4 sm:$0xff]   ;;  %v8540_v14 = vld [vmem:[%s12952_s1 + $0x60] ss:$16 sps:$4 sm:$0xff]  }
   0x6   :  { %v8541_v15 = vld [vmem:[%s12952_s1 + $0x68] ss:$16 sps:$4 sm:$0xff]   ;;  %v8542_v16 = vld [vmem:[%s12952_s1 + $0x84] ss:$16 sps:$4 sm:$0xff]   ;;  %v8544_v17 = vld [vmem:[%s12952_s1 + $0x8c] ss:$16 sps:$4 sm:$0xff]  }
   0x7   :  { %4911 = vmatpush1.bf16.msra.mxu0 %v8528_v6  ;;  %5470 = vmatpush1.bf16.msra.mxu1 %v8529_v7  ;;  %v8546_v18 = vld [vmem:[%s12952_s1 + $0x80] ss:$16 sps:$4 sm:$0xff]   ;;  %v8547_v19 = vld [vmem:[%s12952_s1 + $0x88] ss:$16 sps:$4 sm:$0xff]   ;;  %v8548_v20 = vld [vmem:[%s12952_s1 + $0xa4] ss:$16 sps:$4 sm:$0xff]  }
   0x8   :  { %4912 = vmatprep.subr.bf16.mxu0 %v8530_v8  ;;  %5471 = vmatprep.subr.bf16.mxu1 %v8532_v9  ;;  %v8550_v21 = vld [vmem:[%s12952_s1 + $0xac] ss:$16 sps:$4 sm:$0xff]   ;;  %v8552_v22 = vld [vmem:[%s12952_s1 + $0xa0] ss:$16 sps:$4 sm:$0xff]   ;;  %v8553_v23 = vld [vmem:[%s12952_s1 + $0xa8] ss:$16 sps:$4 sm:$0xff]  }
   0x9   :  { %v8554_v24 = vld [vmem:[%s12952_s1 + $0xc4] ss:$16 sps:$4 sm:$0xff]   ;;  %v8556_v25 = vld [vmem:[%s12952_s1 + $0xcc] ss:$16 sps:$4 sm:$0xff]   ;;  %v8558_v26 = vld [vmem:[%s12952_s1 + $0xc0] ss:$16 sps:$4 sm:$0xff]  }
   0xa   :  { %v8559_v27 = vld [vmem:[%s12952_s1 + $0xc8] ss:$16 sps:$4 sm:$0xff]   ;;  %v8560_v28 = vld [vmem:[%s12952_s1 + $0xe4] ss:$16 sps:$4 sm:$0xff]   ;;  %v8562_v29 = vld [vmem:[%s12952_s1 + $0xec] ss:$16 sps:$4 sm:$0xff]  }
   0xb   :  { %4913 = vmatpush1.bf16.msra.mxu0 %v8534_v10  ;;  %5472 = vmatpush1.bf16.msra.mxu1 %v8535_v11  ;;  %v8564_v30 = vld [vmem:[%s12952_s1 + $0xe0] ss:$16 sps:$4 sm:$0xff]   ;;  %v8565_v31 = vld [vmem:[%s12952_s1 + $0xe8] ss:$16 sps:$4 sm:$0xff]   ;;  %v8566_v32 = vld [vmem:[%s12952_s1 + $0x104] ss:$16 sps:$4 sm:$0xff]  }
   0xc   :  { %4914 = vmatprep.subr.bf16.mxu0 %v8536_v12  ;;  %5473 = vmatprep.subr.bf16.mxu1 %v8538_v13  ;;  %v8568_v33 = vld [vmem:[%s12952_s1 + $0x10c] ss:$16 sps:$4 sm:$0xff]   ;;  %v8570_v34 = vld [vmem:[%s12952_s1 + $0x100] ss:$16 sps:$4 sm:$0xff]   ;;  %v8571_v35 = vld [vmem:[%s12952_s1 + $0x108] ss:$16 sps:$4 sm:$0xff]  }
   0xd   :  { %v8572_v36 = vld [vmem:[%s12952_s1 + $0x124] ss:$16 sps:$4 sm:$0xff]   ;;  %v8574_v37 = vld [vmem:[%s12952_s1 + $0x12c] ss:$16 sps:$4 sm:$0xff]   ;;  %v8576_v38 = vld [vmem:[%s12952_s1 + $0x120] ss:$16 sps:$4 sm:$0xff]  }
   0xe   :  { %v8577_v39 = vld [vmem:[%s12952_s1 + $0x128] ss:$16 sps:$4 sm:$0xff]   ;;  %v8578_v40 = vld [vmem:[%s12952_s1 + $0x144] ss:$16 sps:$4 sm:$0xff]   ;;  %v8580_v41 = vld [vmem:[%s12952_s1 + $0x14c] ss:$16 sps:$4 sm:$0xff]  }
   0xf   :  { %4915 = vmatpush1.bf16.msra.mxu0 %v8540_v14  ;;  %5474 = vmatpush1.bf16.msra.mxu1 %v8541_v15  ;;  %v8582_v42 = vld [vmem:[%s12952_s1 + $0x140] ss:$16 sps:$4 sm:$0xff]   ;;  %v8583_v43 = vld [vmem:[%s12952_s1 + $0x148] ss:$16 sps:$4 sm:$0xff]   ;;  %v8584_v44 = vld [vmem:[%s12952_s1 + $0x164] ss:$16 sps:$4 sm:$0xff]  }
  0x10   :  { %4916 = vmatprep.subr.bf16.mxu0 %v8542_v16  ;;  %5475 = vmatprep.subr.bf16.mxu1 %v8544_v17  ;;  %v8586_v45 = vld [vmem:[%s12952_s1 + $0x16c] ss:$16 sps:$4 sm:$0xff]   ;;  %v8588_v46 = vld [vmem:[%s12952_s1 + $0x160] ss:$16 sps:$4 sm:$0xff]   ;;  %v8589_v47 = vld [vmem:[%s12952_s1 + $0x168] ss:$16 sps:$4 sm:$0xff]  }
  0x11   :  { %v8616_v48 = vld [vmem:[%s12953_s0 + $0x4] ss:$100 sps:$4 sm:$0xff]   ;;  %v8592_v50 = vld [vmem:[%s12952_s1 + $0x18c] ss:$16 sps:$4 sm:$0xff]   ;;  %v8594_v51 = vld [vmem:[%s12952_s1 + $0x180] ss:$16 sps:$4 sm:$0xff]  }
  0x12   :  { %v8590_v49 = vld [vmem:[%s12952_s1 + $0x184] ss:$16 sps:$4 sm:$0xff]   ;;  %4940 = vmatprep.mubr.bf16.mxu0 %v8616_v48  ;;  %5499 = vmatprep.mubr.bf16.mxu1 %v8616_v48  ;;  %v8595_v52 = vld [vmem:[%s12952_s1 + $0x188] ss:$16 sps:$4 sm:$0xff]   ;;  %v8598_v54 = vld [vmem:[%s12952_s1 + $0x1ac] ss:$16 sps:$4 sm:$0xff]  }
  0x13   :  { %4917 = vmatpush1.bf16.msra.mxu0 %v8546_v18  ;;  %5476 = vmatpush1.bf16.msra.mxu1 %v8547_v19  ;;  %v8596_v53 = vld [vmem:[%s12952_s1 + $0x1a4] ss:$16 sps:$4 sm:$0xff]   ;;  %v8600_v55 = vld [vmem:[%s12952_s1 + $0x1a0] ss:$16 sps:$4 sm:$0xff]   ;;  %v8601_v56 = vld [vmem:[%s12952_s1 + $0x1a8] ss:$16 sps:$4 sm:$0xff]  }
  0x14   :  { %4918 = vmatprep.subr.bf16.mxu0 %v8548_v20  ;;  %5477 = vmatprep.subr.bf16.mxu1 %v8550_v21  ;;  %v8602_v57 = vld [vmem:[%s12952_s1 + $0x1c4] ss:$16 sps:$4 sm:$0xff]   ;;  %v8604_v58 = vld [vmem:[%s12952_s1 + $0x1cc] ss:$16 sps:$4 sm:$0xff]   ;;  %v8606_v59 = vld [vmem:[%s12952_s1 + $0x1c0] ss:$16 sps:$4 sm:$0xff]  }
  0x15   :  { %v8607_v60 = vld [vmem:[%s12952_s1 + $0x1c8] ss:$16 sps:$4 sm:$0xff]   ;;  %v8608_v61 = vld [vmem:[%s12952_s1 + $0x1e4] ss:$16 sps:$4 sm:$0xff]   ;;  %v8610_v62 = vld [vmem:[%s12952_s1 + $0x1ec] ss:$16 sps:$4 sm:$0xff]  }
  0x16   :  { %v8612_v63 = vld [vmem:[%s12952_s1 + $0x1e0] ss:$16 sps:$4 sm:$0xff]   ;;  %v8613_v0 = vld [vmem:[%s12952_s1 + $0x1e8] ss:$16 sps:$4 sm:$0xff]   ;;  %v8619_v1 = vld [vmem:[%s12952_s1 + $0x204] ss:$16 sps:$4 sm:$0xff]  }
  0x17   :  { %4919 = vmatpush1.bf16.msra.mxu0 %v8552_v22  ;;  %5478 = vmatpush1.bf16.msra.mxu1 %v8553_v23  ;;  %v8622_v2 = vld [vmem:[%s12952_s1 + $0x20c] ss:$16 sps:$4 sm:$0xff]   ;;  %v8614_v3 = vld [vmem:[%s12953_s0] ss:$100 sps:$4 sm:$0xff]   ;;  %v8620_v5 = vld [vmem:[%s12952_s1 + $0x208] ss:$16 sps:$4 sm:$0xff]  }
  0x18   :  { %4920 = vmatprep.subr.bf16.mxu0 %v8554_v24  ;;  %5479 = vmatprep.subr.bf16.mxu1 %v8556_v25  ;;  %v8617_v4 = vld [vmem:[%s12952_s1 + $0x200] ss:$16 sps:$4 sm:$0xff]   ;;  %v8625_v6 = vld [vmem:[%s12952_s1 + $0x224] ss:$16 sps:$4 sm:$0xff]   ;;  %v8628_v7 = vld [vmem:[%s12952_s1 + $0x22c] ss:$16 sps:$4 sm:$0xff]  }
  0x19   :  { %v8623_v8 = vld [vmem:[%s12952_s1 + $0x220] ss:$16 sps:$4 sm:$0xff]   ;;  %v8626_v9 = vld [vmem:[%s12952_s1 + $0x228] ss:$16 sps:$4 sm:$0xff]   ;;  %v8631_v10 = vld [vmem:[%s12952_s1 + $0x244] ss:$16 sps:$4 sm:$0xff]  }
  0x1a   :  { %v8634_v11 = vld [vmem:[%s12952_s1 + $0x24c] ss:$16 sps:$4 sm:$0xff]   ;;  %v8629_v12 = vld [vmem:[%s12952_s1 + $0x240] ss:$16 sps:$4 sm:$0xff]   ;;  %v8632_v13 = vld [vmem:[%s12952_s1 + $0x248] ss:$16 sps:$4 sm:$0xff]  }
  0x1b   :  { %4921 = vmatpush1.bf16.msra.mxu0 %v8558_v26  ;;  %5480 = vmatpush1.bf16.msra.mxu1 %v8559_v27  ;;  %v8637_v14 = vld [vmem:[%s12952_s1 + $0x264] ss:$16 sps:$4 sm:$0xff]   ;;  %v8640_v15 = vld [vmem:[%s12952_s1 + $0x26c] ss:$16 sps:$4 sm:$0xff]   ;;  %v8635_v16 = vld [vmem:[%s12952_s1 + $0x260] ss:$16 sps:$4 sm:$0xff]  }
  0x1c   :  { %4922 = vmatprep.subr.bf16.mxu0 %v8560_v28  ;;  %5481 = vmatprep.subr.bf16.mxu1 %v8562_v29  ;;  %v8638_v17 = vld [vmem:[%s12952_s1 + $0x268] ss:$16 sps:$4 sm:$0xff]   ;;  %v8643_v18 = vld [vmem:[%s12952_s1 + $0x284] ss:$16 sps:$4 sm:$0xff]   ;;  %v8646_v19 = vld [vmem:[%s12952_s1 + $0x28c] ss:$16 sps:$4 sm:$0xff]  }
  0x1d   :  { %v8641_v20 = vld [vmem:[%s12952_s1 + $0x280] ss:$16 sps:$4 sm:$0xff]   ;;  %v8644_v21 = vld [vmem:[%s12952_s1 + $0x288] ss:$16 sps:$4 sm:$0xff]   ;;  %v8649_v22 = vld [vmem:[%s12952_s1 + $0x2a4] ss:$16 sps:$4 sm:$0xff]  }
  0x1e   :  { %v8652_v23 = vld [vmem:[%s12952_s1 + $0x2ac] ss:$16 sps:$4 sm:$0xff]   ;;  %v8647_v24 = vld [vmem:[%s12952_s1 + $0x2a0] ss:$16 sps:$4 sm:$0xff]   ;;  %v8650_v25 = vld [vmem:[%s12952_s1 + $0x2a8] ss:$16 sps:$4 sm:$0xff]  }
  0x1f   :  { %4923 = vmatpush1.bf16.msra.mxu0 %v8564_v30  ;;  %5482 = vmatpush1.bf16.msra.mxu1 %v8565_v31  ;;  %v8655_v26 = vld [vmem:[%s12952_s1 + $0x2c4] ss:$16 sps:$4 sm:$0xff]   ;;  %v8658_v27 = vld [vmem:[%s12952_s1 + $0x2cc] ss:$16 sps:$4 sm:$0xff]   ;;  %v8653_v28 = vld [vmem:[%s12952_s1 + $0x2c0] ss:$16 sps:$4 sm:$0xff]  }
  0x20   :  { %4924 = vmatprep.subr.bf16.mxu0 %v8566_v32  ;;  %5483 = vmatprep.subr.bf16.mxu1 %v8568_v33  ;;  %v8656_v29 = vld [vmem:[%s12952_s1 + $0x2c8] ss:$16 sps:$4 sm:$0xff]   ;;  %v8715_v30 = vld [vmem:[%s12953_s0 + $0xc] ss:$100 sps:$4 sm:$0xff]   ;;  %v8661_v31 = vld [vmem:[%s12952_s1 + $0x2e4] ss:$16 sps:$4 sm:$0xff]  }
  0x21   :  { %v8664_v32 = vld [vmem:[%s12952_s1 + $0x2ec] ss:$16 sps:$4 sm:$0xff]   ;;  %v8659_v33 = vld [vmem:[%s12952_s1 + $0x2e0] ss:$16 sps:$4 sm:$0xff]  }
  0x22   :  { %v8688_v48 = vld [vmem:[%s12952_s1 + $0x36c] ss:$16 sps:$4 sm:$0xff]  }
  0x23   :  { %4925 = vmatpush1.bf16.msra.mxu0 %v8570_v34  ;;  %5484 = vmatpush1.bf16.msra.mxu1 %v8571_v35  ;;  %v8662_v34 = vld [vmem:[%s12952_s1 + $0x2e8] ss:$16 sps:$4 sm:$0xff]   ;;  %v8667_v35 = vld [vmem:[%s12952_s1 + $0x304] ss:$16 sps:$4 sm:$0xff]  }
  0x24   :  { %4926 = vmatprep.subr.bf16.mxu0 %v8572_v36  ;;  %5485 = vmatprep.subr.bf16.mxu1 %v8574_v37  ;;  %v8670_v36 = vld [vmem:[%s12952_s1 + $0x30c] ss:$16 sps:$4 sm:$0xff]   ;;  %v8665_v37 = vld [vmem:[%s12952_s1 + $0x300] ss:$16 sps:$4 sm:$0xff]  }
  0x27   :  { %4927 = vmatpush1.bf16.msra.mxu0 %v8576_v38  ;;  %5486 = vmatpush1.bf16.msra.mxu1 %v8577_v39  ;;  %v8668_v38 = vld [vmem:[%s12952_s1 + $0x308] ss:$16 sps:$4 sm:$0xff]   ;;  %v8673_v39 = vld [vmem:[%s12952_s1 + $0x324] ss:$16 sps:$4 sm:$0xff]  }
  0x28   :  { %4928 = vmatprep.subr.bf16.mxu0 %v8578_v40  ;;  %5487 = vmatprep.subr.bf16.mxu1 %v8580_v41  ;;  %v8676_v40 = vld [vmem:[%s12952_s1 + $0x32c] ss:$16 sps:$4 sm:$0xff]   ;;  %v8671_v41 = vld [vmem:[%s12952_s1 + $0x320] ss:$16 sps:$4 sm:$0xff]  }
  0x2b   :  { %4929 = vmatpush1.bf16.msra.mxu0 %v8582_v42  ;;  %5488 = vmatpush1.bf16.msra.mxu1 %v8583_v43  ;;  %v8674_v42 = vld [vmem:[%s12952_s1 + $0x328] ss:$16 sps:$4 sm:$0xff]   ;;  %v8679_v43 = vld [vmem:[%s12952_s1 + $0x344] ss:$16 sps:$4 sm:$0xff]  }
  0x2c   :  { %4930 = vmatprep.subr.bf16.mxu0 %v8584_v44  ;;  %5489 = vmatprep.subr.bf16.mxu1 %v8586_v45  ;;  %v8682_v44 = vld [vmem:[%s12952_s1 + $0x34c] ss:$16 sps:$4 sm:$0xff]   ;;  %v8677_v45 = vld [vmem:[%s12952_s1 + $0x340] ss:$16 sps:$4 sm:$0xff]  }
  0x2f   :  { %4931 = vmatpush1.bf16.msra.mxu0 %v8588_v46  ;;  %5490 = vmatpush1.bf16.msra.mxu1 %v8589_v47  ;;  %v8680_v46 = vld [vmem:[%s12952_s1 + $0x348] ss:$16 sps:$4 sm:$0xff]   ;;  %v8685_v47 = vld [vmem:[%s12952_s1 + $0x364] ss:$16 sps:$4 sm:$0xff]  }
  0x30   :  { %4932 = vmatprep.subr.bf16.mxu0 %v8590_v49  ;;  %5491 = vmatprep.subr.bf16.mxu1 %v8592_v50  ;;  %v8683_v49 = vld [vmem:[%s12952_s1 + $0x360] ss:$16 sps:$4 sm:$0xff]   ;;  %v8686_v50 = vld [vmem:[%s12952_s1 + $0x368] ss:$16 sps:$4 sm:$0xff]  }
  0x33   :  { %4933 = vmatpush1.bf16.msra.mxu0 %v8594_v51  ;;  %5492 = vmatpush1.bf16.msra.mxu1 %v8595_v52  ;;  %v8691_v51 = vld [vmem:[%s12952_s1 + $0x384] ss:$16 sps:$4 sm:$0xff]   ;;  %v8694_v52 = vld [vmem:[%s12952_s1 + $0x38c] ss:$16 sps:$4 sm:$0xff]  }
  0x34   :  { %4934 = vmatprep.subr.bf16.mxu0 %v8596_v53  ;;  %5493 = vmatprep.subr.bf16.mxu1 %v8598_v54  ;;  %v8689_v53 = vld [vmem:[%s12952_s1 + $0x380] ss:$16 sps:$4 sm:$0xff]   ;;  %v8692_v54 = vld [vmem:[%s12952_s1 + $0x388] ss:$16 sps:$4 sm:$0xff]  }
  0x37   :  { %4935 = vmatpush1.bf16.msra.mxu0 %v8600_v55  ;;  %5494 = vmatpush1.bf16.msra.mxu1 %v8601_v56  ;;  %v8697_v55 = vld [vmem:[%s12952_s1 + $0x3a4] ss:$16 sps:$4 sm:$0xff]   ;;  %v8700_v56 = vld [vmem:[%s12952_s1 + $0x3ac] ss:$16 sps:$4 sm:$0xff]  }
  0x38   :  { %4936 = vmatprep.subr.bf16.mxu0 %v8602_v57  ;;  %5495 = vmatprep.subr.bf16.mxu1 %v8604_v58  ;;  %v8695_v57 = vld [vmem:[%s12952_s1 + $0x3a0] ss:$16 sps:$4 sm:$0xff]   ;;  %v8698_v58 = vld [vmem:[%s12952_s1 + $0x3a8] ss:$16 sps:$4 sm:$0xff]  }
  0x3b   :  { %4937 = vmatpush1.bf16.msra.mxu0 %v8606_v59  ;;  %5496 = vmatpush1.bf16.msra.mxu1 %v8607_v60  ;;  %v8703_v59 = vld [vmem:[%s12952_s1 + $0x3c4] ss:$16 sps:$4 sm:$0xff]   ;;  %v8706_v60 = vld [vmem:[%s12952_s1 + $0x3cc] ss:$16 sps:$4 sm:$0xff]  }
  0x3c   :  { %4938 = vmatprep.subr.bf16.mxu0 %v8608_v61  ;;  %5497 = vmatprep.subr.bf16.mxu1 %v8610_v62  ;;  %v8701_v61 = vld [vmem:[%s12952_s1 + $0x3c0] ss:$16 sps:$4 sm:$0xff]   ;;  %v8704_v62 = vld [vmem:[%s12952_s1 + $0x3c8] ss:$16 sps:$4 sm:$0xff]  }
  0x3f   :  { %4939 = vmatpush1.bf16.msra.mxu0 %v8612_v63  ;;  %5498 = vmatpush1.bf16.msra.mxu1 %v8613_v0  ;;  %v8709_v63 = vld [vmem:[%s12952_s1 + $0x3e4] ss:$16 sps:$4 sm:$0xff]   ;;  %v8712_v0 = vld [vmem:[%s12952_s1 + $0x3ec] ss:$16 sps:$4 sm:$0xff]  }
  0x40   :  { %4951 = vmatprep.subr.bf16.mxu0 %v8619_v1  ;;  %5510 = vmatprep.subr.bf16.mxu1 %v8622_v2  ;;  %v8707_v1 = vld [vmem:[%s12952_s1 + $0x3e0] ss:$16 sps:$4 sm:$0xff]   ;;  %v8710_v2 = vld [vmem:[%s12952_s1 + $0x3e8] ss:$16 sps:$4 sm:$0xff]  }
  0x42   :  { %4941 = vmatmul.mubr.bf16.vlgmr.msra.gmra.mrb[0].mxu0 %v8614_v3  ;;  %5500 = vmatmul.mubr.bf16.vlgmr.msra.gmra.mrb[0].mxu1 %v8614_v3  ;;  %v8718_v3 = vld [vmem:[%s12952_s1 + $0x404] ss:$16 sps:$4 sm:$0xff]  }
  0x43   :  { %4952 = vmatpush1.bf16.msra.mxu0 %v8617_v4  ;;  %5511 = vmatpush1.bf16.msra.mxu1 %v8620_v5  ;;  %v8721_v4 = vld [vmem:[%s12952_s1 + $0x40c] ss:$16 sps:$4 sm:$0xff]  }
  0x44   :  { %4953 = vmatprep.subr.bf16.mxu0 %v8625_v6  ;;  %5512 = vmatprep.subr.bf16.mxu1 %v8628_v7  ;;  %v8713_v5 = vld [vmem:[%s12953_s0 + $0x8] ss:$100 sps:$4 sm:$0xff]   ;;  %v8716_v6 = vld [vmem:[%s12952_s1 + $0x400] ss:$16 sps:$4 sm:$0xff]  }
  0x45   :  { %4983 = vmatprep.mubr.bf16.mxu0 %v8715_v30  ;;  %5542 = vmatprep.mubr.bf16.mxu1 %v8715_v30  ;;  %v8719_v7 = vld [vmem:[%s12952_s1 + $0x408] ss:$16 sps:$4 sm:$0xff]   ;;  %v8757_v30 = vld [vmem:[%s12952_s1 + $0x4cc] ss:$16 sps:$4 sm:$0xff]  }
  0x47   :  { %4954 = vmatpush1.bf16.msra.mxu0 %v8623_v8  ;;  %5513 = vmatpush1.bf16.msra.mxu1 %v8626_v9  ;;  %v8724_v8 = vld [vmem:[%s12952_s1 + $0x424] ss:$16 sps:$4 sm:$0xff]   ;;  %v8727_v9 = vld [vmem:[%s12952_s1 + $0x42c] ss:$16 sps:$4 sm:$0xff]  }
  0x48   :  { %4955 = vmatprep.subr.bf16.mxu0 %v8631_v10  ;;  %5514 = vmatprep.subr.bf16.mxu1 %v8634_v11  ;;  %v8722_v10 = vld [vmem:[%s12952_s1 + $0x420] ss:$16 sps:$4 sm:$0xff]   ;;  %v8725_v11 = vld [vmem:[%s12952_s1 + $0x428] ss:$16 sps:$4 sm:$0xff]  }
  0x4b   :  { %4956 = vmatpush1.bf16.msra.mxu0 %v8629_v12  ;;  %5515 = vmatpush1.bf16.msra.mxu1 %v8632_v13  ;;  %v8814_v12 = vld [vmem:[%s12953_s0 + $0x14] ss:$100 sps:$4 sm:$0xff]  }
  0x4c   :  { %4957 = vmatprep.subr.bf16.mxu0 %v8637_v14  ;;  %5516 = vmatprep.subr.bf16.mxu1 %v8640_v15  ;;  %v8730_v13 = vld [vmem:[%s12952_s1 + $0x444] ss:$16 sps:$4 sm:$0xff]   ;;  %v8733_v14 = vld [vmem:[%s12952_s1 + $0x44c] ss:$16 sps:$4 sm:$0xff]   ;;  %v8728_v15 = vld [vmem:[%s12952_s1 + $0x440] ss:$16 sps:$4 sm:$0xff]  }
  0x4f   :  { %4958 = vmatpush1.bf16.msra.mxu0 %v8635_v16  ;;  %5517 = vmatpush1.bf16.msra.mxu1 %v8638_v17  ;;  %v8731_v16 = vld [vmem:[%s12952_s1 + $0x448] ss:$16 sps:$4 sm:$0xff]   ;;  %v8736_v17 = vld [vmem:[%s12952_s1 + $0x464] ss:$16 sps:$4 sm:$0xff]  }
  0x50   :  { %4959 = vmatprep.subr.bf16.mxu0 %v8643_v18  ;;  %5518 = vmatprep.subr.bf16.mxu1 %v8646_v19  ;;  %v8739_v18 = vld [vmem:[%s12952_s1 + $0x46c] ss:$16 sps:$4 sm:$0xff]   ;;  %v8734_v19 = vld [vmem:[%s12952_s1 + $0x460] ss:$16 sps:$4 sm:$0xff]  }
  0x53   :  { %4960 = vmatpush1.bf16.msra.mxu0 %v8641_v20  ;;  %5519 = vmatpush1.bf16.msra.mxu1 %v8644_v21  ;;  %v8737_v20 = vld [vmem:[%s12952_s1 + $0x468] ss:$16 sps:$4 sm:$0xff]   ;;  %v8742_v21 = vld [vmem:[%s12952_s1 + $0x484] ss:$16 sps:$4 sm:$0xff]  }
  0x54   :  { %4961 = vmatprep.subr.bf16.mxu0 %v8649_v22  ;;  %5520 = vmatprep.subr.bf16.mxu1 %v8652_v23  ;;  %v8745_v22 = vld [vmem:[%s12952_s1 + $0x48c] ss:$16 sps:$4 sm:$0xff]   ;;  %v8740_v23 = vld [vmem:[%s12952_s1 + $0x480] ss:$16 sps:$4 sm:$0xff]  }
  0x57   :  { %4962 = vmatpush1.bf16.msra.mxu0 %v8647_v24  ;;  %5521 = vmatpush1.bf16.msra.mxu1 %v8650_v25  ;;  %v8743_v24 = vld [vmem:[%s12952_s1 + $0x488] ss:$16 sps:$4 sm:$0xff]   ;;  %v8748_v25 = vld [vmem:[%s12952_s1 + $0x4a4] ss:$16 sps:$4 sm:$0xff]  }
  0x58   :  { %4963 = vmatprep.subr.bf16.mxu0 %v8655_v26  ;;  %5522 = vmatprep.subr.bf16.mxu1 %v8658_v27  ;;  %v8751_v26 = vld [vmem:[%s12952_s1 + $0x4ac] ss:$16 sps:$4 sm:$0xff]   ;;  %v8746_v27 = vld [vmem:[%s12952_s1 + $0x4a0] ss:$16 sps:$4 sm:$0xff]  }
  0x5b   :  { %4964 = vmatpush1.bf16.msra.mxu0 %v8653_v28  ;;  %5523 = vmatpush1.bf16.msra.mxu1 %v8656_v29  ;;  %v8749_v28 = vld [vmem:[%s12952_s1 + $0x4a8] ss:$16 sps:$4 sm:$0xff]   ;;  %v8754_v29 = vld [vmem:[%s12952_s1 + $0x4c4] ss:$16 sps:$4 sm:$0xff]  }
  0x5c   :  { %4965 = vmatprep.subr.bf16.mxu0 %v8661_v31  ;;  %5524 = vmatprep.subr.bf16.mxu1 %v8664_v32  ;;  %v8752_v31 = vld [vmem:[%s12952_s1 + $0x4c0] ss:$16 sps:$4 sm:$0xff]   ;;  %v8755_v32 = vld [vmem:[%s12952_s1 + $0x4c8] ss:$16 sps:$4 sm:$0xff]  }
  0x5f   :  { %4966 = vmatpush1.bf16.msra.mxu0 %v8659_v33  ;;  %5525 = vmatpush1.bf16.msra.mxu1 %v8662_v34  ;;  %v8760_v33 = vld [vmem:[%s12952_s1 + $0x4e4] ss:$16 sps:$4 sm:$0xff]   ;;  %v8763_v34 = vld [vmem:[%s12952_s1 + $0x4ec] ss:$16 sps:$4 sm:$0xff]  }
  0x60   :  { %4967 = vmatprep.subr.bf16.mxu0 %v8667_v35  ;;  %5526 = vmatprep.subr.bf16.mxu1 %v8670_v36  ;;  %v8758_v35 = vld [vmem:[%s12952_s1 + $0x4e0] ss:$16 sps:$4 sm:$0xff]   ;;  %v8761_v36 = vld [vmem:[%s12952_s1 + $0x4e8] ss:$16 sps:$4 sm:$0xff]  }
  0x63   :  { %4968 = vmatpush1.bf16.msra.mxu0 %v8665_v37  ;;  %5527 = vmatpush1.bf16.msra.mxu1 %v8668_v38  ;;  %v8766_v37 = vld [vmem:[%s12952_s1 + $0x504] ss:$16 sps:$4 sm:$0xff]   ;;  %v8769_v38 = vld [vmem:[%s12952_s1 + $0x50c] ss:$16 sps:$4 sm:$0xff]  }
  0x64   :  { %4969 = vmatprep.subr.bf16.mxu0 %v8673_v39  ;;  %5528 = vmatprep.subr.bf16.mxu1 %v8676_v40  ;;  %v8764_v39 = vld [vmem:[%s12952_s1 + $0x500] ss:$16 sps:$4 sm:$0xff]   ;;  %v8767_v40 = vld [vmem:[%s12952_s1 + $0x508] ss:$16 sps:$4 sm:$0xff]  }
  0x67   :  { %4970 = vmatpush1.bf16.msra.mxu0 %v8671_v41  ;;  %5529 = vmatpush1.bf16.msra.mxu1 %v8674_v42  ;;  %v8772_v41 = vld [vmem:[%s12952_s1 + $0x524] ss:$16 sps:$4 sm:$0xff]   ;;  %v8775_v42 = vld [vmem:[%s12952_s1 + $0x52c] ss:$16 sps:$4 sm:$0xff]  }
  0x68   :  { %4971 = vmatprep.subr.bf16.mxu0 %v8679_v43  ;;  %5530 = vmatprep.subr.bf16.mxu1 %v8682_v44  ;;  %v8770_v43 = vld [vmem:[%s12952_s1 + $0x520] ss:$16 sps:$4 sm:$0xff]   ;;  %v8773_v44 = vld [vmem:[%s12952_s1 + $0x528] ss:$16 sps:$4 sm:$0xff]  }
  0x6b   :  { %4972 = vmatpush1.bf16.msra.mxu0 %v8677_v45  ;;  %5531 = vmatpush1.bf16.msra.mxu1 %v8680_v46  ;;  %v8778_v45 = vld [vmem:[%s12952_s1 + $0x544] ss:$16 sps:$4 sm:$0xff]   ;;  %v8781_v46 = vld [vmem:[%s12952_s1 + $0x54c] ss:$16 sps:$4 sm:$0xff]  }
  0x6c   :  { %4973 = vmatprep.subr.bf16.mxu0 %v8685_v47  ;;  %5532 = vmatprep.subr.bf16.mxu1 %v8688_v48  ;;  %v8776_v47 = vld [vmem:[%s12952_s1 + $0x540] ss:$16 sps:$4 sm:$0xff]   ;;  %v8779_v48 = vld [vmem:[%s12952_s1 + $0x548] ss:$16 sps:$4 sm:$0xff]  }
  0x6f   :  { %4974 = vmatpush1.bf16.msra.mxu0 %v8683_v49  ;;  %5533 = vmatpush1.bf16.msra.mxu1 %v8686_v50  ;;  %v8784_v49 = vld [vmem:[%s12952_s1 + $0x564] ss:$16 sps:$4 sm:$0xff]   ;;  %v8787_v50 = vld [vmem:[%s12952_s1 + $0x56c] ss:$16 sps:$4 sm:$0xff]  }
  0x70   :  { %4975 = vmatprep.subr.bf16.mxu0 %v8691_v51  ;;  %5534 = vmatprep.subr.bf16.mxu1 %v8694_v52  ;;  %v8782_v51 = vld [vmem:[%s12952_s1 + $0x560] ss:$16 sps:$4 sm:$0xff]   ;;  %v8785_v52 = vld [vmem:[%s12952_s1 + $0x568] ss:$16 sps:$4 sm:$0xff]  }
  0x73   :  { %4976 = vmatpush1.bf16.msra.mxu0 %v8689_v53  ;;  %5535 = vmatpush1.bf16.msra.mxu1 %v8692_v54  ;;  %v8790_v53 = vld [vmem:[%s12952_s1 + $0x584] ss:$16 sps:$4 sm:$0xff]   ;;  %v8793_v54 = vld [vmem:[%s12952_s1 + $0x58c] ss:$16 sps:$4 sm:$0xff]  }
  0x74   :  { %4977 = vmatprep.subr.bf16.mxu0 %v8697_v55  ;;  %5536 = vmatprep.subr.bf16.mxu1 %v8700_v56  ;;  %v8788_v55 = vld [vmem:[%s12952_s1 + $0x580] ss:$16 sps:$4 sm:$0xff]   ;;  %v8791_v56 = vld [vmem:[%s12952_s1 + $0x588] ss:$16 sps:$4 sm:$0xff]  }
  0x77   :  { %4978 = vmatpush1.bf16.msra.mxu0 %v8695_v57  ;;  %5537 = vmatpush1.bf16.msra.mxu1 %v8698_v58  ;;  %v8796_v57 = vld [vmem:[%s12952_s1 + $0x5a4] ss:$16 sps:$4 sm:$0xff]   ;;  %v8799_v58 = vld [vmem:[%s12952_s1 + $0x5ac] ss:$16 sps:$4 sm:$0xff]  }
  0x78   :  { %4979 = vmatprep.subr.bf16.mxu0 %v8703_v59  ;;  %5538 = vmatprep.subr.bf16.mxu1 %v8706_v60  ;;  %v8794_v59 = vld [vmem:[%s12952_s1 + $0x5a0] ss:$16 sps:$4 sm:$0xff]   ;;  %v8797_v60 = vld [vmem:[%s12952_s1 + $0x5a8] ss:$16 sps:$4 sm:$0xff]  }
  0x7b   :  { %4980 = vmatpush1.bf16.msra.mxu0 %v8701_v61  ;;  %5539 = vmatpush1.bf16.msra.mxu1 %v8704_v62  ;;  %v8802_v61 = vld [vmem:[%s12952_s1 + $0x5c4] ss:$16 sps:$4 sm:$0xff]   ;;  %v8805_v62 = vld [vmem:[%s12952_s1 + $0x5cc] ss:$16 sps:$4 sm:$0xff]  }
  0x7c   :  { %4981 = vmatprep.subr.bf16.mxu0 %v8709_v63  ;;  %5540 = vmatprep.subr.bf16.mxu1 %v8712_v0  ;;  %v8800_v63 = vld [vmem:[%s12952_s1 + $0x5c0] ss:$16 sps:$4 sm:$0xff]   ;;  %v8803_v0 = vld [vmem:[%s12952_s1 + $0x5c8] ss:$16 sps:$4 sm:$0xff]  }
  0x7f   :  { %4982 = vmatpush1.bf16.msra.mxu0 %v8707_v1  ;;  %5541 = vmatpush1.bf16.msra.mxu1 %v8710_v2  ;;  %v8808_v1 = vld [vmem:[%s12952_s1 + $0x5e4] ss:$16 sps:$4 sm:$0xff]   ;;  %v8811_v2 = vld [vmem:[%s12952_s1 + $0x5ec] ss:$16 sps:$4 sm:$0xff]  }
  0x80   :  { %4994 = vmatprep.subr.bf16.mxu0 %v8718_v3  ;;  %5553 = vmatprep.subr.bf16.mxu1 %v8721_v4  ;;  %v8806_v3 = vld [vmem:[%s12952_s1 + $0x5e0] ss:$16 sps:$4 sm:$0xff]   ;;  %v8809_v4 = vld [vmem:[%s12952_s1 + $0x5e8] ss:$16 sps:$4 sm:$0xff]  }
  0x82   :  { %4984 = vmatmul.mubr.bf16.vlgmr.msra.gmra.mrb[0].mxu0 %v8713_v5  ;;  %5543 = vmatmul.mubr.bf16.vlgmr.msra.gmra.mrb[0].mxu1 %v8713_v5  ;;  %v8817_v5 = vld [vmem:[%s12952_s1 + $0x604] ss:$16 sps:$4 sm:$0xff]  }
  0x83   :  { %4995 = vmatpush1.bf16.msra.mxu0 %v8716_v6  ;;  %5554 = vmatpush1.bf16.msra.mxu1 %v8719_v7  ;;  %v8820_v6 = vld [vmem:[%s12952_s1 + $0x60c] ss:$16 sps:$4 sm:$0xff]   ;;  %v8812_v7 = vld [vmem:[%s12953_s0 + $0x10] ss:$100 sps:$4 sm:$0xff]  }
  0x84   :  { %4996 = vmatprep.subr.bf16.mxu0 %v8724_v8  ;;  %5555 = vmatprep.subr.bf16.mxu1 %v8727_v9  ;;  %v8815_v8 = vld [vmem:[%s12952_s1 + $0x600] ss:$16 sps:$4 sm:$0xff]   ;;  %v8818_v9 = vld [vmem:[%s12952_s1 + $0x608] ss:$16 sps:$4 sm:$0xff]  }
  0x85   :  { %5026 = vmatprep.mubr.bf16.mxu0 %v8814_v12  ;;  %5585 = vmatprep.mubr.bf16.mxu1 %v8814_v12  ;;  %v8913_v12 = vld [vmem:[%s12953_s0 + $0x1c] ss:$100 sps:$4 sm:$0xff]  }
  0x87   :  { %4997 = vmatpush1.bf16.msra.mxu0 %v8722_v10  ;;  %5556 = vmatpush1.bf16.msra.mxu1 %v8725_v11  ;;  %v8823_v10 = vld [vmem:[%s12952_s1 + $0x624] ss:$16 sps:$4 sm:$0xff]   ;;  %v8826_v11 = vld [vmem:[%s12952_s1 + $0x62c] ss:$16 sps:$4 sm:$0xff]  }
  0x88   :  { %4998 = vmatprep.subr.bf16.mxu0 %v8730_v13  ;;  %5557 = vmatprep.subr.bf16.mxu1 %v8733_v14  ;;  %v8821_v13 = vld [vmem:[%s12952_s1 + $0x620] ss:$16 sps:$4 sm:$0xff]   ;;  %v8824_v14 = vld [vmem:[%s12952_s1 + $0x628] ss:$16 sps:$4 sm:$0xff]  }
  0x8b   :  { %4999 = vmatpush1.bf16.msra.mxu0 %v8728_v15  ;;  %5558 = vmatpush1.bf16.msra.mxu1 %v8731_v16  ;;  %v8829_v15 = vld [vmem:[%s12952_s1 + $0x644] ss:$16 sps:$4 sm:$0xff]   ;;  %v8832_v16 = vld [vmem:[%s12952_s1 + $0x64c] ss:$16 sps:$4 sm:$0xff]  }
  0x8c   :  { %5000 = vmatprep.subr.bf16.mxu0 %v8736_v17  ;;  %5559 = vmatprep.subr.bf16.mxu1 %v8739_v18  ;;  %v8827_v17 = vld [vmem:[%s12952_s1 + $0x640] ss:$16 sps:$4 sm:$0xff]   ;;  %v8830_v18 = vld [vmem:[%s12952_s1 + $0x648] ss:$16 sps:$4 sm:$0xff]  }
  0x8f   :  { %5001 = vmatpush1.bf16.msra.mxu0 %v8734_v19  ;;  %5560 = vmatpush1.bf16.msra.mxu1 %v8737_v20  ;;  %v8835_v19 = vld [vmem:[%s12952_s1 + $0x664] ss:$16 sps:$4 sm:$0xff]   ;;  %v8838_v20 = vld [vmem:[%s12952_s1 + $0x66c] ss:$16 sps:$4 sm:$0xff]  }
  0x90   :  { %5002 = vmatprep.subr.bf16.mxu0 %v8742_v21  ;;  %5561 = vmatprep.subr.bf16.mxu1 %v8745_v22  ;;  %v8833_v21 = vld [vmem:[%s12952_s1 + $0x660] ss:$16 sps:$4 sm:$0xff]   ;;  %v8836_v22 = vld [vmem:[%s12952_s1 + $0x668] ss:$16 sps:$4 sm:$0xff]  }
  0x93   :  { %5003 = vmatpush1.bf16.msra.mxu0 %v8740_v23  ;;  %5562 = vmatpush1.bf16.msra.mxu1 %v8743_v24  ;;  %v8841_v23 = vld [vmem:[%s12952_s1 + $0x684] ss:$16 sps:$4 sm:$0xff]   ;;  %v8844_v24 = vld [vmem:[%s12952_s1 + $0x68c] ss:$16 sps:$4 sm:$0xff]  }
  0x94   :  { %5004 = vmatprep.subr.bf16.mxu0 %v8748_v25  ;;  %5563 = vmatprep.subr.bf16.mxu1 %v8751_v26  ;;  %v8839_v25 = vld [vmem:[%s12952_s1 + $0x680] ss:$16 sps:$4 sm:$0xff]   ;;  %v8842_v26 = vld [vmem:[%s12952_s1 + $0x688] ss:$16 sps:$4 sm:$0xff]  }
  0x97   :  { %5005 = vmatpush1.bf16.msra.mxu0 %v8746_v27  ;;  %5564 = vmatpush1.bf16.msra.mxu1 %v8749_v28  ;;  %v8847_v27 = vld [vmem:[%s12952_s1 + $0x6a4] ss:$16 sps:$4 sm:$0xff]   ;;  %v8850_v28 = vld [vmem:[%s12952_s1 + $0x6ac] ss:$16 sps:$4 sm:$0xff]  }
  0x98   :  { %5006 = vmatprep.subr.bf16.mxu0 %v8754_v29  ;;  %5565 = vmatprep.subr.bf16.mxu1 %v8757_v30  ;;  %v8845_v29 = vld [vmem:[%s12952_s1 + $0x6a0] ss:$16 sps:$4 sm:$0xff]   ;;  %v8848_v30 = vld [vmem:[%s12952_s1 + $0x6a8] ss:$16 sps:$4 sm:$0xff]  }
  0x9b   :  { %5007 = vmatpush1.bf16.msra.mxu0 %v8752_v31  ;;  %5566 = vmatpush1.bf16.msra.mxu1 %v8755_v32  ;;  %v8853_v31 = vld [vmem:[%s12952_s1 + $0x6c4] ss:$16 sps:$4 sm:$0xff]   ;;  %v8856_v32 = vld [vmem:[%s12952_s1 + $0x6cc] ss:$16 sps:$4 sm:$0xff]  }
  0x9c   :  { %5008 = vmatprep.subr.bf16.mxu0 %v8760_v33  ;;  %5567 = vmatprep.subr.bf16.mxu1 %v8763_v34  ;;  %v8851_v33 = vld [vmem:[%s12952_s1 + $0x6c0] ss:$16 sps:$4 sm:$0xff]   ;;  %v8854_v34 = vld [vmem:[%s12952_s1 + $0x6c8] ss:$16 sps:$4 sm:$0xff]  }
  0x9f   :  { %5009 = vmatpush1.bf16.msra.mxu0 %v8758_v35  ;;  %5568 = vmatpush1.bf16.msra.mxu1 %v8761_v36  ;;  %v8859_v35 = vld [vmem:[%s12952_s1 + $0x6e4] ss:$16 sps:$4 sm:$0xff]   ;;  %v8862_v36 = vld [vmem:[%s12952_s1 + $0x6ec] ss:$16 sps:$4 sm:$0xff]  }
  0xa0   :  { %5010 = vmatprep.subr.bf16.mxu0 %v8766_v37  ;;  %5569 = vmatprep.subr.bf16.mxu1 %v8769_v38  ;;  %v8857_v37 = vld [vmem:[%s12952_s1 + $0x6e0] ss:$16 sps:$4 sm:$0xff]   ;;  %v8860_v38 = vld [vmem:[%s12952_s1 + $0x6e8] ss:$16 sps:$4 sm:$0xff]  }
  0xa3   :  { %5011 = vmatpush1.bf16.msra.mxu0 %v8764_v39  ;;  %5570 = vmatpush1.bf16.msra.mxu1 %v8767_v40  ;;  %v8865_v39 = vld [vmem:[%s12952_s1 + $0x704] ss:$16 sps:$4 sm:$0xff]   ;;  %v8868_v40 = vld [vmem:[%s12952_s1 + $0x70c] ss:$16 sps:$4 sm:$0xff]  }
  0xa4   :  { %5012 = vmatprep.subr.bf16.mxu0 %v8772_v41  ;;  %5571 = vmatprep.subr.bf16.mxu1 %v8775_v42  ;;  %v8863_v41 = vld [vmem:[%s12952_s1 + $0x700] ss:$16 sps:$4 sm:$0xff]   ;;  %v8866_v42 = vld [vmem:[%s12952_s1 + $0x708] ss:$16 sps:$4 sm:$0xff]  }
  0xa7   :  { %5013 = vmatpush1.bf16.msra.mxu0 %v8770_v43  ;;  %5572 = vmatpush1.bf16.msra.mxu1 %v8773_v44  ;;  %v8871_v43 = vld [vmem:[%s12952_s1 + $0x724] ss:$16 sps:$4 sm:$0xff]   ;;  %v8874_v44 = vld [vmem:[%s12952_s1 + $0x72c] ss:$16 sps:$4 sm:$0xff]  }
  0xa8   :  { %5014 = vmatprep.subr.bf16.mxu0 %v8778_v45  ;;  %5573 = vmatprep.subr.bf16.mxu1 %v8781_v46  ;;  %v8869_v45 = vld [vmem:[%s12952_s1 + $0x720] ss:$16 sps:$4 sm:$0xff]   ;;  %v8872_v46 = vld [vmem:[%s12952_s1 + $0x728] ss:$16 sps:$4 sm:$0xff]  }
  0xab   :  { %5015 = vmatpush1.bf16.msra.mxu0 %v8776_v47  ;;  %5574 = vmatpush1.bf16.msra.mxu1 %v8779_v48  ;;  %v8877_v47 = vld [vmem:[%s12952_s1 + $0x744] ss:$16 sps:$4 sm:$0xff]   ;;  %v8880_v48 = vld [vmem:[%s12952_s1 + $0x74c] ss:$16 sps:$4 sm:$0xff]  }
  0xac   :  { %5016 = vmatprep.subr.bf16.mxu0 %v8784_v49  ;;  %5575 = vmatprep.subr.bf16.mxu1 %v8787_v50  ;;  %v8875_v49 = vld [vmem:[%s12952_s1 + $0x740] ss:$16 sps:$4 sm:$0xff]   ;;  %v8878_v50 = vld [vmem:[%s12952_s1 + $0x748] ss:$16 sps:$4 sm:$0xff]  }
  0xaf   :  { %5017 = vmatpush1.bf16.msra.mxu0 %v8782_v51  ;;  %5576 = vmatpush1.bf16.msra.mxu1 %v8785_v52  ;;  %v8883_v51 = vld [vmem:[%s12952_s1 + $0x764] ss:$16 sps:$4 sm:$0xff]   ;;  %v8886_v52 = vld [vmem:[%s12952_s1 + $0x76c] ss:$16 sps:$4 sm:$0xff]  }
  0xb0   :  { %5018 = vmatprep.subr.bf16.mxu0 %v8790_v53  ;;  %5577 = vmatprep.subr.bf16.mxu1 %v8793_v54  ;;  %v8881_v53 = vld [vmem:[%s12952_s1 + $0x760] ss:$16 sps:$4 sm:$0xff]   ;;  %v8884_v54 = vld [vmem:[%s12952_s1 + $0x768] ss:$16 sps:$4 sm:$0xff]  }
  0xb3   :  { %5019 = vmatpush1.bf16.msra.mxu0 %v8788_v55  ;;  %5578 = vmatpush1.bf16.msra.mxu1 %v8791_v56  ;;  %v8889_v55 = vld [vmem:[%s12952_s1 + $0x784] ss:$16 sps:$4 sm:$0xff]   ;;  %v8892_v56 = vld [vmem:[%s12952_s1 + $0x78c] ss:$16 sps:$4 sm:$0xff]  }
  0xb4   :  { %5020 = vmatprep.subr.bf16.mxu0 %v8796_v57  ;;  %5579 = vmatprep.subr.bf16.mxu1 %v8799_v58  ;;  %v8887_v57 = vld [vmem:[%s12952_s1 + $0x780] ss:$16 sps:$4 sm:$0xff]   ;;  %v8890_v58 = vld [vmem:[%s12952_s1 + $0x788] ss:$16 sps:$4 sm:$0xff]  }
  0xb7   :  { %5021 = vmatpush1.bf16.msra.mxu0 %v8794_v59  ;;  %5580 = vmatpush1.bf16.msra.mxu1 %v8797_v60  ;;  %v8895_v59 = vld [vmem:[%s12952_s1 + $0x7a4] ss:$16 sps:$4 sm:$0xff]   ;;  %v8898_v60 = vld [vmem:[%s12952_s1 + $0x7ac] ss:$16 sps:$4 sm:$0xff]  }
  0xb8   :  { %5022 = vmatprep.subr.bf16.mxu0 %v8802_v61  ;;  %5581 = vmatprep.subr.bf16.mxu1 %v8805_v62  ;;  %v8893_v61 = vld [vmem:[%s12952_s1 + $0x7a0] ss:$16 sps:$4 sm:$0xff]   ;;  %v8896_v62 = vld [vmem:[%s12952_s1 + $0x7a8] ss:$16 sps:$4 sm:$0xff]  }
  0xbb   :  { %5023 = vmatpush1.bf16.msra.mxu0 %v8800_v63  ;;  %5582 = vmatpush1.bf16.msra.mxu1 %v8803_v0  ;;  %v8901_v63 = vld [vmem:[%s12952_s1 + $0x7c4] ss:$16 sps:$4 sm:$0xff]   ;;  %v8904_v0 = vld [vmem:[%s12952_s1 + $0x7cc] ss:$16 sps:$4 sm:$0xff]  }
  0xbc   :  { %5024 = vmatprep.subr.bf16.mxu0 %v8808_v1  ;;  %5583 = vmatprep.subr.bf16.mxu1 %v8811_v2  ;;  %v8899_v1 = vld [vmem:[%s12952_s1 + $0x7c0] ss:$16 sps:$4 sm:$0xff]   ;;  %v8902_v2 = vld [vmem:[%s12952_s1 + $0x7c8] ss:$16 sps:$4 sm:$0xff]  }
  0xbf   :  { %5025 = vmatpush1.bf16.msra.mxu0 %v8806_v3  ;;  %5584 = vmatpush1.bf16.msra.mxu1 %v8809_v4  ;;  %v8907_v3 = vld [vmem:[%s12952_s1 + $0x7e4] ss:$16 sps:$4 sm:$0xff]   ;;  %v8910_v4 = vld [vmem:[%s12952_s1 + $0x7ec] ss:$16 sps:$4 sm:$0xff]  }
  0xc0   :  { %5037 = vmatprep.subr.bf16.mxu0 %v8817_v5  ;;  %5596 = vmatprep.subr.bf16.mxu1 %v8820_v6  ;;  %v8905_v5 = vld [vmem:[%s12952_s1 + $0x7e0] ss:$16 sps:$4 sm:$0xff]   ;;  %v8908_v6 = vld [vmem:[%s12952_s1 + $0x7e8] ss:$16 sps:$4 sm:$0xff]  }
  0xc2   :  { %5027 = vmatmul.mubr.bf16.vlgmr.msra.gmra.mrb[0].mxu0 %v8812_v7  ;;  %5586 = vmatmul.mubr.bf16.vlgmr.msra.gmra.mrb[0].mxu1 %v8812_v7  ;;  %v8916_v7 = vld [vmem:[%s12952_s1 + $0x804] ss:$16 sps:$4 sm:$0xff]  }
  0xc3   :  { %5038 = vmatpush1.bf16.msra.mxu0 %v8815_v8  ;;  %5597 = vmatpush1.bf16.msra.mxu1 %v8818_v9  ;;  %v8919_v8 = vld [vmem:[%s12952_s1 + $0x80c] ss:$16 sps:$4 sm:$0xff]  }
  0xc4   :  { %5039 = vmatprep.subr.bf16.mxu0 %v8823_v10  ;;  %5598 = vmatprep.subr.bf16.mxu1 %v8826_v11  ;;  %v8911_v9 = vld [vmem:[%s12953_s0 + $0x18] ss:$100 sps:$4 sm:$0xff]   ;;  %v8914_v10 = vld [vmem:[%s12952_s1 + $0x800] ss:$16 sps:$4 sm:$0xff]  }
  0xc5   :  { %5069 = vmatprep.mubr.bf16.mxu0 %v8913_v12  ;;  %5628 = vmatprep.mubr.bf16.mxu1 %v8913_v12  ;;  %v8917_v11 = vld [vmem:[%s12952_s1 + $0x808] ss:$16 sps:$4 sm:$0xff]   ;;  %v8922_v12 = vld [vmem:[%s12952_s1 + $0x824] ss:$16 sps:$4 sm:$0xff]  }
  0xc7   :  { %5040 = vmatpush1.bf16.msra.mxu0 %v8821_v13  ;;  %5599 = vmatpush1.bf16.msra.mxu1 %v8824_v14  ;;  %v8925_v13 = vld [vmem:[%s12952_s1 + $0x82c] ss:$16 sps:$4 sm:$0xff]   ;;  %v9012_v14 = vld [vmem:[%s12953_s0 + $0x24] ss:$100 sps:$4 sm:$0xff]  }
  0xc8   :  { %5041 = vmatprep.subr.bf16.mxu0 %v8829_v15  ;;  %5600 = vmatprep.subr.bf16.mxu1 %v8832_v16  ;;  %v8920_v15 = vld [vmem:[%s12952_s1 + $0x820] ss:$16 sps:$4 sm:$0xff]   ;;  %v8923_v16 = vld [vmem:[%s12952_s1 + $0x828] ss:$16 sps:$4 sm:$0xff]  }
  0xcb   :  { %5042 = vmatpush1.bf16.msra.mxu0 %v8827_v17  ;;  %5601 = vmatpush1.bf16.msra.mxu1 %v8830_v18  ;;  %v8928_v17 = vld [vmem:[%s12952_s1 + $0x844] ss:$16 sps:$4 sm:$0xff]   ;;  %v8931_v18 = vld [vmem:[%s12952_s1 + $0x84c] ss:$16 sps:$4 sm:$0xff]  }
  0xcc   :  { %5043 = vmatprep.subr.bf16.mxu0 %v8835_v19  ;;  %5602 = vmatprep.subr.bf16.mxu1 %v8838_v20  ;;  %v8926_v19 = vld [vmem:[%s12952_s1 + $0x840] ss:$16 sps:$4 sm:$0xff]   ;;  %v8929_v20 = vld [vmem:[%s12952_s1 + $0x848] ss:$16 sps:$4 sm:$0xff]  }
  0xcf   :  { %5044 = vmatpush1.bf16.msra.mxu0 %v8833_v21  ;;  %5603 = vmatpush1.bf16.msra.mxu1 %v8836_v22  ;;  %v8934_v21 = vld [vmem:[%s12952_s1 + $0x864] ss:$16 sps:$4 sm:$0xff]   ;;  %v8937_v22 = vld [vmem:[%s12952_s1 + $0x86c] ss:$16 sps:$4 sm:$0xff]  }
  0xd0   :  { %5045 = vmatprep.subr.bf16.mxu0 %v8841_v23  ;;  %5604 = vmatprep.subr.bf16.mxu1 %v8844_v24  ;;  %v8932_v23 = vld [vmem:[%s12952_s1 + $0x860] ss:$16 sps:$4 sm:$0xff]   ;;  %v8935_v24 = vld [vmem:[%s12952_s1 + $0x868] ss:$16 sps:$4 sm:$0xff]  }
  0xd3   :  { %5046 = vmatpush1.bf16.msra.mxu0 %v8839_v25  ;;  %5605 = vmatpush1.bf16.msra.mxu1 %v8842_v26  ;;  %v8940_v25 = vld [vmem:[%s12952_s1 + $0x884] ss:$16 sps:$4 sm:$0xff]   ;;  %v8943_v26 = vld [vmem:[%s12952_s1 + $0x88c] ss:$16 sps:$4 sm:$0xff]  }
  0xd4   :  { %5047 = vmatprep.subr.bf16.mxu0 %v8847_v27  ;;  %5606 = vmatprep.subr.bf16.mxu1 %v8850_v28  ;;  %v8938_v27 = vld [vmem:[%s12952_s1 + $0x880] ss:$16 sps:$4 sm:$0xff]   ;;  %v8941_v28 = vld [vmem:[%s12952_s1 + $0x888] ss:$16 sps:$4 sm:$0xff]  }
  0xd7   :  { %5048 = vmatpush1.bf16.msra.mxu0 %v8845_v29  ;;  %5607 = vmatpush1.bf16.msra.mxu1 %v8848_v30  ;;  %v8946_v29 = vld [vmem:[%s12952_s1 + $0x8a4] ss:$16 sps:$4 sm:$0xff]   ;;  %v8949_v30 = vld [vmem:[%s12952_s1 + $0x8ac] ss:$16 sps:$4 sm:$0xff]  }
  0xd8   :  { %5049 = vmatprep.subr.bf16.mxu0 %v8853_v31  ;;  %5608 = vmatprep.subr.bf16.mxu1 %v8856_v32  ;;  %v8944_v31 = vld [vmem:[%s12952_s1 + $0x8a0] ss:$16 sps:$4 sm:$0xff]   ;;  %v8947_v32 = vld [vmem:[%s12952_s1 + $0x8a8] ss:$16 sps:$4 sm:$0xff]  }
  0xdb   :  { %5050 = vmatpush1.bf16.msra.mxu0 %v8851_v33  ;;  %5609 = vmatpush1.bf16.msra.mxu1 %v8854_v34  ;;  %v8952_v33 = vld [vmem:[%s12952_s1 + $0x8c4] ss:$16 sps:$4 sm:$0xff]   ;;  %v8955_v34 = vld [vmem:[%s12952_s1 + $0x8cc] ss:$16 sps:$4 sm:$0xff]  }
  0xdc   :  { %5051 = vmatprep.subr.bf16.mxu0 %v8859_v35  ;;  %5610 = vmatprep.subr.bf16.mxu1 %v8862_v36  ;;  %v8950_v35 = vld [vmem:[%s12952_s1 + $0x8c0] ss:$16 sps:$4 sm:$0xff]   ;;  %v8953_v36 = vld [vmem:[%s12952_s1 + $0x8c8] ss:$16 sps:$4 sm:$0xff]  }
  0xdf   :  { %5052 = vmatpush1.bf16.msra.mxu0 %v8857_v37  ;;  %5611 = vmatpush1.bf16.msra.mxu1 %v8860_v38  ;;  %v8958_v37 = vld [vmem:[%s12952_s1 + $0x8e4] ss:$16 sps:$4 sm:$0xff]   ;;  %v8961_v38 = vld [vmem:[%s12952_s1 + $0x8ec] ss:$16 sps:$4 sm:$0xff]  }
  0xe0   :  { %5053 = vmatprep.subr.bf16.mxu0 %v8865_v39  ;;  %5612 = vmatprep.subr.bf16.mxu1 %v8868_v40  ;;  %v8956_v39 = vld [vmem:[%s12952_s1 + $0x8e0] ss:$16 sps:$4 sm:$0xff]   ;;  %v8959_v40 = vld [vmem:[%s12952_s1 + $0x8e8] ss:$16 sps:$4 sm:$0xff]  }
  0xe3   :  { %5054 = vmatpush1.bf16.msra.mxu0 %v8863_v41  ;;  %5613 = vmatpush1.bf16.msra.mxu1 %v8866_v42  ;;  %v8964_v41 = vld [vmem:[%s12952_s1 + $0x904] ss:$16 sps:$4 sm:$0xff]   ;;  %v8967_v42 = vld [vmem:[%s12952_s1 + $0x90c] ss:$16 sps:$4 sm:$0xff]  }
  0xe4   :  { %5055 = vmatprep.subr.bf16.mxu0 %v8871_v43  ;;  %5614 = vmatprep.subr.bf16.mxu1 %v8874_v44  ;;  %v8962_v43 = vld [vmem:[%s12952_s1 + $0x900] ss:$16 sps:$4 sm:$0xff]   ;;  %v8965_v44 = vld [vmem:[%s12952_s1 + $0x908] ss:$16 sps:$4 sm:$0xff]  }
  0xe7   :  { %5056 = vmatpush1.bf16.msra.mxu0 %v8869_v45  ;;  %5615 = vmatpush1.bf16.msra.mxu1 %v8872_v46  ;;  %v8970_v45 = vld [vmem:[%s12952_s1 + $0x924] ss:$16 sps:$4 sm:$0xff]   ;;  %v8973_v46 = vld [vmem:[%s12952_s1 + $0x92c] ss:$16 sps:$4 sm:$0xff]  }
  0xe8   :  { %5057 = vmatprep.subr.bf16.mxu0 %v8877_v47  ;;  %5616 = vmatprep.subr.bf16.mxu1 %v8880_v48  ;;  %v8968_v47 = vld [vmem:[%s12952_s1 + $0x920] ss:$16 sps:$4 sm:$0xff]   ;;  %v8971_v48 = vld [vmem:[%s12952_s1 + $0x928] ss:$16 sps:$4 sm:$0xff]  }
  0xeb   :  { %5058 = vmatpush1.bf16.msra.mxu0 %v8875_v49  ;;  %5617 = vmatpush1.bf16.msra.mxu1 %v8878_v50  ;;  %v8976_v49 = vld [vmem:[%s12952_s1 + $0x944] ss:$16 sps:$4 sm:$0xff]   ;;  %v8979_v50 = vld [vmem:[%s12952_s1 + $0x94c] ss:$16 sps:$4 sm:$0xff]  }
  0xec   :  { %5059 = vmatprep.subr.bf16.mxu0 %v8883_v51  ;;  %5618 = vmatprep.subr.bf16.mxu1 %v8886_v52  ;;  %v8974_v51 = vld [vmem:[%s12952_s1 + $0x940] ss:$16 sps:$4 sm:$0xff]   ;;  %v8977_v52 = vld [vmem:[%s12952_s1 + $0x948] ss:$16 sps:$4 sm:$0xff]  }
  0xef   :  { %5060 = vmatpush1.bf16.msra.mxu0 %v8881_v53  ;;  %5619 = vmatpush1.bf16.msra.mxu1 %v8884_v54  ;;  %v8982_v53 = vld [vmem:[%s12952_s1 + $0x964] ss:$16 sps:$4 sm:$0xff]   ;;  %v8985_v54 = vld [vmem:[%s12952_s1 + $0x96c] ss:$16 sps:$4 sm:$0xff]  }
  0xf0   :  { %5061 = vmatprep.subr.bf16.mxu0 %v8889_v55  ;;  %5620 = vmatprep.subr.bf16.mxu1 %v8892_v56  ;;  %v8980_v55 = vld [vmem:[%s12952_s1 + $0x960] ss:$16 sps:$4 sm:$0xff]   ;;  %v8983_v56 = vld [vmem:[%s12952_s1 + $0x968] ss:$16 sps:$4 sm:$0xff]  }
  0xf3   :  { %5062 = vmatpush1.bf16.msra.mxu0 %v8887_v57  ;;  %5621 = vmatpush1.bf16.msra.mxu1 %v8890_v58  ;;  %v8988_v57 = vld [vmem:[%s12952_s1 + $0x984] ss:$16 sps:$4 sm:$0xff]   ;;  %v8991_v58 = vld [vmem:[%s12952_s1 + $0x98c] ss:$16 sps:$4 sm:$0xff]  }
  0xf4   :  { %5063 = vmatprep.subr.bf16.mxu0 %v8895_v59  ;;  %5622 = vmatprep.subr.bf16.mxu1 %v8898_v60  ;;  %v8986_v59 = vld [vmem:[%s12952_s1 + $0x980] ss:$16 sps:$4 sm:$0xff]   ;;  %v8989_v60 = vld [vmem:[%s12952_s1 + $0x988] ss:$16 sps:$4 sm:$0xff]  }
  0xf7   :  { %5064 = vmatpush1.bf16.msra.mxu0 %v8893_v61  ;;  %5623 = vmatpush1.bf16.msra.mxu1 %v8896_v62  ;;  %v8994_v61 = vld [vmem:[%s12952_s1 + $0x9a4] ss:$16 sps:$4 sm:$0xff]   ;;  %v8997_v62 = vld [vmem:[%s12952_s1 + $0x9ac] ss:$16 sps:$4 sm:$0xff]  }
  0xf8   :  { %5065 = vmatprep.subr.bf16.mxu0 %v8901_v63  ;;  %5624 = vmatprep.subr.bf16.mxu1 %v8904_v0  ;;  %v8992_v63 = vld [vmem:[%s12952_s1 + $0x9a0] ss:$16 sps:$4 sm:$0xff]   ;;  %v8995_v0 = vld [vmem:[%s12952_s1 + $0x9a8] ss:$16 sps:$4 sm:$0xff]  }
  0xfb   :  { %5066 = vmatpush1.bf16.msra.mxu0 %v8899_v1  ;;  %5625 = vmatpush1.bf16.msra.mxu1 %v8902_v2  ;;  %v9000_v1 = vld [vmem:[%s12952_s1 + $0x9c4] ss:$16 sps:$4 sm:$0xff]   ;;  %v9003_v2 = vld [vmem:[%s12952_s1 + $0x9cc] ss:$16 sps:$4 sm:$0xff]  }
  0xfc   :  { %5067 = vmatprep.subr.bf16.mxu0 %v8907_v3  ;;  %5626 = vmatprep.subr.bf16.mxu1 %v8910_v4  ;;  %v8998_v3 = vld [vmem:[%s12952_s1 + $0x9c0] ss:$16 sps:$4 sm:$0xff]   ;;  %v9001_v4 = vld [vmem:[%s12952_s1 + $0x9c8] ss:$16 sps:$4 sm:$0xff]  }
  0xff   :  { %5068 = vmatpush1.bf16.msra.mxu0 %v8905_v5  ;;  %5627 = vmatpush1.bf16.msra.mxu1 %v8908_v6  ;;  %v9006_v5 = vld [vmem:[%s12952_s1 + $0x9e4] ss:$16 sps:$4 sm:$0xff]   ;;  %v9009_v6 = vld [vmem:[%s12952_s1 + $0x9ec] ss:$16 sps:$4 sm:$0xff]  }
 0x100   :  { %5080 = vmatprep.subr.bf16.mxu0 %v8916_v7  ;;  %5639 = vmatprep.subr.bf16.mxu1 %v8919_v8  ;;  %v9004_v7 = vld [vmem:[%s12952_s1 + $0x9e0] ss:$16 sps:$4 sm:$0xff]   ;;  %v9007_v8 = vld [vmem:[%s12952_s1 + $0x9e8] ss:$16 sps:$4 sm:$0xff]  }
 0x102   :  { %5070 = vmatmul.mubr.bf16.vlgmr.msra.gmra.mrb[0].mxu0 %v8911_v9  ;;  %5629 = vmatmul.mubr.bf16.vlgmr.msra.gmra.mrb[0].mxu1 %v8911_v9  ;;  %v9010_v9 = vld [vmem:[%s12953_s0 + $0x20] ss:$100 sps:$4 sm:$0xff]  }
 0x103   :  { %5081 = vmatpush1.bf16.msra.mxu0 %v8914_v10  ;;  %5640 = vmatpush1.bf16.msra.mxu1 %v8917_v11  ;;  %v9015_v10 = vld [vmem:[%s12952_s1 + $0xa04] ss:$16 sps:$4 sm:$0xff]   ;;  %v9018_v11 = vld [vmem:[%s12952_s1 + $0xa0c] ss:$16 sps:$4 sm:$0xff]  }
 0x104   :  { %5082 = vmatprep.subr.bf16.mxu0 %v8922_v12  ;;  %5641 = vmatprep.subr.bf16.mxu1 %v8925_v13  ;;  %v9013_v12 = vld [vmem:[%s12952_s1 + $0xa00] ss:$16 sps:$4 sm:$0xff]   ;;  %v9016_v13 = vld [vmem:[%s12952_s1 + $0xa08] ss:$16 sps:$4 sm:$0xff]  }
 0x105   :  { %5112 = vmatprep.mubr.bf16.mxu0 %v9012_v14  ;;  %5671 = vmatprep.mubr.bf16.mxu1 %v9012_v14  ;;  %v9021_v14 = vld [vmem:[%s12952_s1 + $0xa24] ss:$16 sps:$4 sm:$0xff]  }
 0x107   :  { %5083 = vmatpush1.bf16.msra.mxu0 %v8920_v15  ;;  %5642 = vmatpush1.bf16.msra.mxu1 %v8923_v16  ;;  %v9024_v15 = vld [vmem:[%s12952_s1 + $0xa2c] ss:$16 sps:$4 sm:$0xff]  }
 0x108   :  { %5084 = vmatprep.subr.bf16.mxu0 %v8928_v17  ;;  %5643 = vmatprep.subr.bf16.mxu1 %v8931_v18  ;;  %v9111_v16 = vld [vmem:[%s12953_s0 + $0x2c] ss:$100 sps:$4 sm:$0xff]   ;;  %v9022_v18 = vld [vmem:[%s12952_s1 + $0xa28] ss:$16 sps:$4 sm:$0xff]  }
 0x109   :  { %v9019_v17 = vld [vmem:[%s12952_s1 + $0xa20] ss:$16 sps:$4 sm:$0xff]  }
 0x10b   :  { %5085 = vmatpush1.bf16.msra.mxu0 %v8926_v19  ;;  %5644 = vmatpush1.bf16.msra.mxu1 %v8929_v20  ;;  %v9027_v19 = vld [vmem:[%s12952_s1 + $0xa44] ss:$16 sps:$4 sm:$0xff]   ;;  %v9030_v20 = vld [vmem:[%s12952_s1 + $0xa4c] ss:$16 sps:$4 sm:$0xff]  }
 0x10c   :  { %5086 = vmatprep.subr.bf16.mxu0 %v8934_v21  ;;  %5645 = vmatprep.subr.bf16.mxu1 %v8937_v22  ;;  %v9025_v21 = vld [vmem:[%s12952_s1 + $0xa40] ss:$16 sps:$4 sm:$0xff]   ;;  %v9028_v22 = vld [vmem:[%s12952_s1 + $0xa48] ss:$16 sps:$4 sm:$0xff]  }
 0x10f   :  { %5087 = vmatpush1.bf16.msra.mxu0 %v8932_v23  ;;  %5646 = vmatpush1.bf16.msra.mxu1 %v8935_v24  ;;  %v9033_v23 = vld [vmem:[%s12952_s1 + $0xa64] ss:$16 sps:$4 sm:$0xff]   ;;  %v9036_v24 = vld [vmem:[%s12952_s1 + $0xa6c] ss:$16 sps:$4 sm:$0xff]  }
 0x110   :  { %5088 = vmatprep.subr.bf16.mxu0 %v8940_v25  ;;  %5647 = vmatprep.subr.bf16.mxu1 %v8943_v26  ;;  %v9031_v25 = vld [vmem:[%s12952_s1 + $0xa60] ss:$16 sps:$4 sm:$0xff]   ;;  %v9034_v26 = vld [vmem:[%s12952_s1 + $0xa68] ss:$16 sps:$4 sm:$0xff]  }
 0x113   :  { %5089 = vmatpush1.bf16.msra.mxu0 %v8938_v27  ;;  %5648 = vmatpush1.bf16.msra.mxu1 %v8941_v28  ;;  %v9039_v27 = vld [vmem:[%s12952_s1 + $0xa84] ss:$16 sps:$4 sm:$0xff]   ;;  %v9042_v28 = vld [vmem:[%s12952_s1 + $0xa8c] ss:$16 sps:$4 sm:$0xff]  }
 0x114   :  { %5090 = vmatprep.subr.bf16.mxu0 %v8946_v29  ;;  %5649 = vmatprep.subr.bf16.mxu1 %v8949_v30  ;;  %v9037_v29 = vld [vmem:[%s12952_s1 + $0xa80] ss:$16 sps:$4 sm:$0xff]   ;;  %v9040_v30 = vld [vmem:[%s12952_s1 + $0xa88] ss:$16 sps:$4 sm:$0xff]  }
 0x117   :  { %5091 = vmatpush1.bf16.msra.mxu0 %v8944_v31  ;;  %5650 = vmatpush1.bf16.msra.mxu1 %v8947_v32  ;;  %v9045_v31 = vld [vmem:[%s12952_s1 + $0xaa4] ss:$16 sps:$4 sm:$0xff]   ;;  %v9048_v32 = vld [vmem:[%s12952_s1 + $0xaac] ss:$16 sps:$4 sm:$0xff]  }
 0x118   :  { %5092 = vmatprep.subr.bf16.mxu0 %v8952_v33  ;;  %5651 = vmatprep.subr.bf16.mxu1 %v8955_v34  ;;  %v9043_v33 = vld [vmem:[%s12952_s1 + $0xaa0] ss:$16 sps:$4 sm:$0xff]   ;;  %v9046_v34 = vld [vmem:[%s12952_s1 + $0xaa8] ss:$16 sps:$4 sm:$0xff]  }
 0x11b   :  { %5093 = vmatpush1.bf16.msra.mxu0 %v8950_v35  ;;  %5652 = vmatpush1.bf16.msra.mxu1 %v8953_v36  ;;  %v9051_v35 = vld [vmem:[%s12952_s1 + $0xac4] ss:$16 sps:$4 sm:$0xff]   ;;  %v9054_v36 = vld [vmem:[%s12952_s1 + $0xacc] ss:$16 sps:$4 sm:$0xff]  }
 0x11c   :  { %5094 = vmatprep.subr.bf16.mxu0 %v8958_v37  ;;  %5653 = vmatprep.subr.bf16.mxu1 %v8961_v38  ;;  %v9049_v37 = vld [vmem:[%s12952_s1 + $0xac0] ss:$16 sps:$4 sm:$0xff]   ;;  %v9052_v38 = vld [vmem:[%s12952_s1 + $0xac8] ss:$16 sps:$4 sm:$0xff]  }
 0x11f   :  { %5095 = vmatpush1.bf16.msra.mxu0 %v8956_v39  ;;  %5654 = vmatpush1.bf16.msra.mxu1 %v8959_v40  ;;  %v9057_v39 = vld [vmem:[%s12952_s1 + $0xae4] ss:$16 sps:$4 sm:$0xff]   ;;  %v9060_v40 = vld [vmem:[%s12952_s1 + $0xaec] ss:$16 sps:$4 sm:$0xff]  }
 0x120   :  { %5096 = vmatprep.subr.bf16.mxu0 %v8964_v41  ;;  %5655 = vmatprep.subr.bf16.mxu1 %v8967_v42  ;;  %v9055_v41 = vld [vmem:[%s12952_s1 + $0xae0] ss:$16 sps:$4 sm:$0xff]   ;;  %v9058_v42 = vld [vmem:[%s12952_s1 + $0xae8] ss:$16 sps:$4 sm:$0xff]  }
 0x123   :  { %5097 = vmatpush1.bf16.msra.mxu0 %v8962_v43  ;;  %5656 = vmatpush1.bf16.msra.mxu1 %v8965_v44  ;;  %v9063_v43 = vld [vmem:[%s12952_s1 + $0xb04] ss:$16 sps:$4 sm:$0xff]   ;;  %v9066_v44 = vld [vmem:[%s12952_s1 + $0xb0c] ss:$16 sps:$4 sm:$0xff]  }
 0x124   :  { %5098 = vmatprep.subr.bf16.mxu0 %v8970_v45  ;;  %5657 = vmatprep.subr.bf16.mxu1 %v8973_v46  ;;  %v9061_v45 = vld [vmem:[%s12952_s1 + $0xb00] ss:$16 sps:$4 sm:$0xff]   ;;  %v9064_v46 = vld [vmem:[%s12952_s1 + $0xb08] ss:$16 sps:$4 sm:$0xff]  }
 0x127   :  { %5099 = vmatpush1.bf16.msra.mxu0 %v8968_v47  ;;  %5658 = vmatpush1.bf16.msra.mxu1 %v8971_v48  ;;  %v9069_v47 = vld [vmem:[%s12952_s1 + $0xb24] ss:$16 sps:$4 sm:$0xff]   ;;  %v9072_v48 = vld [vmem:[%s12952_s1 + $0xb2c] ss:$16 sps:$4 sm:$0xff]  }
 0x128   :  { %5100 = vmatprep.subr.bf16.mxu0 %v8976_v49  ;;  %5659 = vmatprep.subr.bf16.mxu1 %v8979_v50  ;;  %v9067_v49 = vld [vmem:[%s12952_s1 + $0xb20] ss:$16 sps:$4 sm:$0xff]   ;;  %v9070_v50 = vld [vmem:[%s12952_s1 + $0xb28] ss:$16 sps:$4 sm:$0xff]  }
 0x12b   :  { %5101 = vmatpush1.bf16.msra.mxu0 %v8974_v51  ;;  %5660 = vmatpush1.bf16.msra.mxu1 %v8977_v52  ;;  %v9075_v51 = vld [vmem:[%s12952_s1 + $0xb44] ss:$16 sps:$4 sm:$0xff]   ;;  %v9078_v52 = vld [vmem:[%s12952_s1 + $0xb4c] ss:$16 sps:$4 sm:$0xff]  }
 0x12c   :  { %5102 = vmatprep.subr.bf16.mxu0 %v8982_v53  ;;  %5661 = vmatprep.subr.bf16.mxu1 %v8985_v54  ;;  %v9073_v53 = vld [vmem:[%s12952_s1 + $0xb40] ss:$16 sps:$4 sm:$0xff]   ;;  %v9076_v54 = vld [vmem:[%s12952_s1 + $0xb48] ss:$16 sps:$4 sm:$0xff]  }
 0x12f   :  { %5103 = vmatpush1.bf16.msra.mxu0 %v8980_v55  ;;  %5662 = vmatpush1.bf16.msra.mxu1 %v8983_v56  ;;  %v9081_v55 = vld [vmem:[%s12952_s1 + $0xb64] ss:$16 sps:$4 sm:$0xff]   ;;  %v9084_v56 = vld [vmem:[%s12952_s1 + $0xb6c] ss:$16 sps:$4 sm:$0xff]  }
 0x130   :  { %5104 = vmatprep.subr.bf16.mxu0 %v8988_v57  ;;  %5663 = vmatprep.subr.bf16.mxu1 %v8991_v58  ;;  %v9079_v57 = vld [vmem:[%s12952_s1 + $0xb60] ss:$16 sps:$4 sm:$0xff]   ;;  %v9082_v58 = vld [vmem:[%s12952_s1 + $0xb68] ss:$16 sps:$4 sm:$0xff]  }
 0x133   :  { %5105 = vmatpush1.bf16.msra.mxu0 %v8986_v59  ;;  %5664 = vmatpush1.bf16.msra.mxu1 %v8989_v60  ;;  %v9087_v59 = vld [vmem:[%s12952_s1 + $0xb84] ss:$16 sps:$4 sm:$0xff]   ;;  %v9090_v60 = vld [vmem:[%s12952_s1 + $0xb8c] ss:$16 sps:$4 sm:$0xff]  }
 0x134   :  { %5106 = vmatprep.subr.bf16.mxu0 %v8994_v61  ;;  %5665 = vmatprep.subr.bf16.mxu1 %v8997_v62  ;;  %v9085_v61 = vld [vmem:[%s12952_s1 + $0xb80] ss:$16 sps:$4 sm:$0xff]   ;;  %v9088_v62 = vld [vmem:[%s12952_s1 + $0xb88] ss:$16 sps:$4 sm:$0xff]  }
 0x137   :  { %5107 = vmatpush1.bf16.msra.mxu0 %v8992_v63  ;;  %5666 = vmatpush1.bf16.msra.mxu1 %v8995_v0  ;;  %v9093_v63 = vld [vmem:[%s12952_s1 + $0xba4] ss:$16 sps:$4 sm:$0xff]   ;;  %v9096_v0 = vld [vmem:[%s12952_s1 + $0xbac] ss:$16 sps:$4 sm:$0xff]  }
 0x138   :  { %5108 = vmatprep.subr.bf16.mxu0 %v9000_v1  ;;  %5667 = vmatprep.subr.bf16.mxu1 %v9003_v2  ;;  %v9091_v1 = vld [vmem:[%s12952_s1 + $0xba0] ss:$16 sps:$4 sm:$0xff]   ;;  %v9094_v2 = vld [vmem:[%s12952_s1 + $0xba8] ss:$16 sps:$4 sm:$0xff]  }
 0x13b   :  { %5109 = vmatpush1.bf16.msra.mxu0 %v8998_v3  ;;  %5668 = vmatpush1.bf16.msra.mxu1 %v9001_v4  ;;  %v9099_v3 = vld [vmem:[%s12952_s1 + $0xbc4] ss:$16 sps:$4 sm:$0xff]   ;;  %v9102_v4 = vld [vmem:[%s12952_s1 + $0xbcc] ss:$16 sps:$4 sm:$0xff]  }
 0x13c   :  { %5110 = vmatprep.subr.bf16.mxu0 %v9006_v5  ;;  %5669 = vmatprep.subr.bf16.mxu1 %v9009_v6  ;;  %v9097_v5 = vld [vmem:[%s12952_s1 + $0xbc0] ss:$16 sps:$4 sm:$0xff]   ;;  %v9100_v6 = vld [vmem:[%s12952_s1 + $0xbc8] ss:$16 sps:$4 sm:$0xff]  }
 0x13f   :  { %5111 = vmatpush1.bf16.msra.mxu0 %v9004_v7  ;;  %5670 = vmatpush1.bf16.msra.mxu1 %v9007_v8  ;;  %v9105_v7 = vld [vmem:[%s12952_s1 + $0xbe4] ss:$16 sps:$4 sm:$0xff]   ;;  %v9108_v8 = vld [vmem:[%s12952_s1 + $0xbec] ss:$16 sps:$4 sm:$0xff]  }
 0x140   :  { %5123 = vmatprep.subr.bf16.mxu0 %v9015_v10  ;;  %5682 = vmatprep.subr.bf16.mxu1 %v9018_v11  ;;  %v9106_v10 = vld [vmem:[%s12952_s1 + $0xbe8] ss:$16 sps:$4 sm:$0xff]  }
 0x141   :  { %v9109_v11 = vld [vmem:[%s12953_s0 + $0x28] ss:$100 sps:$4 sm:$0xff]  }
 0x142   :  { %5113 = vmatmul.mubr.bf16.vlgmr.msra.gmra.mrb[0].mxu0 %v9010_v9  ;;  %5672 = vmatmul.mubr.bf16.vlgmr.msra.gmra.mrb[0].mxu1 %v9010_v9  ;;  %v9103_v9 = vld [vmem:[%s12952_s1 + $0xbe0] ss:$16 sps:$4 sm:$0xff]  }
 0x143   :  { %5124 = vmatpush1.bf16.msra.mxu0 %v9013_v12  ;;  %5683 = vmatpush1.bf16.msra.mxu1 %v9016_v13  ;;  %v9114_v12 = vld [vmem:[%s12952_s1 + $0xc04] ss:$16 sps:$4 sm:$0xff]   ;;  %v9117_v13 = vld [vmem:[%s12952_s1 + $0xc0c] ss:$16 sps:$4 sm:$0xff]  }
 0x144   :  { %5125 = vmatprep.subr.bf16.mxu0 %v9021_v14  ;;  %5684 = vmatprep.subr.bf16.mxu1 %v9024_v15  ;;  %v9112_v14 = vld [vmem:[%s12952_s1 + $0xc00] ss:$16 sps:$4 sm:$0xff]   ;;  %v9115_v15 = vld [vmem:[%s12952_s1 + $0xc08] ss:$16 sps:$4 sm:$0xff]  }
 0x145   :  { %5155 = vmatprep.mubr.bf16.mxu0 %v9111_v16  ;;  %5714 = vmatprep.mubr.bf16.mxu1 %v9111_v16  ;;  %v9120_v16 = vld [vmem:[%s12952_s1 + $0xc24] ss:$16 sps:$4 sm:$0xff]  }
 0x147   :  { %5126 = vmatpush1.bf16.msra.mxu0 %v9019_v17  ;;  %5685 = vmatpush1.bf16.msra.mxu1 %v9022_v18  ;;  %v9123_v17 = vld [vmem:[%s12952_s1 + $0xc2c] ss:$16 sps:$4 sm:$0xff]   ;;  %v9210_v18 = vld [vmem:[%s12953_s0 + $0x34] ss:$100 sps:$4 sm:$0xff]  }
 0x148   :  { %5127 = vmatprep.subr.bf16.mxu0 %v9027_v19  ;;  %5686 = vmatprep.subr.bf16.mxu1 %v9030_v20  ;;  %v9118_v19 = vld [vmem:[%s12952_s1 + $0xc20] ss:$16 sps:$4 sm:$0xff]   ;;  %v9121_v20 = vld [vmem:[%s12952_s1 + $0xc28] ss:$16 sps:$4 sm:$0xff]  }
 0x14b   :  { %5128 = vmatpush1.bf16.msra.mxu0 %v9025_v21  ;;  %5687 = vmatpush1.bf16.msra.mxu1 %v9028_v22  ;;  %v9126_v21 = vld [vmem:[%s12952_s1 + $0xc44] ss:$16 sps:$4 sm:$0xff]   ;;  %v9129_v22 = vld [vmem:[%s12952_s1 + $0xc4c] ss:$16 sps:$4 sm:$0xff]  }
 0x14c   :  { %5129 = vmatprep.subr.bf16.mxu0 %v9033_v23  ;;  %5688 = vmatprep.subr.bf16.mxu1 %v9036_v24  ;;  %v9124_v23 = vld [vmem:[%s12952_s1 + $0xc40] ss:$16 sps:$4 sm:$0xff]   ;;  %v9127_v24 = vld [vmem:[%s12952_s1 + $0xc48] ss:$16 sps:$4 sm:$0xff]  }
 0x14f   :  { %5130 = vmatpush1.bf16.msra.mxu0 %v9031_v25  ;;  %5689 = vmatpush1.bf16.msra.mxu1 %v9034_v26  ;;  %v9132_v25 = vld [vmem:[%s12952_s1 + $0xc64] ss:$16 sps:$4 sm:$0xff]   ;;  %v9135_v26 = vld [vmem:[%s12952_s1 + $0xc6c] ss:$16 sps:$4 sm:$0xff]  }
 0x150   :  { %5131 = vmatprep.subr.bf16.mxu0 %v9039_v27  ;;  %5690 = vmatprep.subr.bf16.mxu1 %v9042_v28  ;;  %v9130_v27 = vld [vmem:[%s12952_s1 + $0xc60] ss:$16 sps:$4 sm:$0xff]   ;;  %v9133_v28 = vld [vmem:[%s12952_s1 + $0xc68] ss:$16 sps:$4 sm:$0xff]  }
 0x153   :  { %5132 = vmatpush1.bf16.msra.mxu0 %v9037_v29  ;;  %5691 = vmatpush1.bf16.msra.mxu1 %v9040_v30  ;;  %v9138_v29 = vld [vmem:[%s12952_s1 + $0xc84] ss:$16 sps:$4 sm:$0xff]   ;;  %v9141_v30 = vld [vmem:[%s12952_s1 + $0xc8c] ss:$16 sps:$4 sm:$0xff]  }
 0x154   :  { %5133 = vmatprep.subr.bf16.mxu0 %v9045_v31  ;;  %5692 = vmatprep.subr.bf16.mxu1 %v9048_v32  ;;  %v9136_v31 = vld [vmem:[%s12952_s1 + $0xc80] ss:$16 sps:$4 sm:$0xff]   ;;  %v9139_v32 = vld [vmem:[%s12952_s1 + $0xc88] ss:$16 sps:$4 sm:$0xff]  }
 0x157   :  { %5134 = vmatpush1.bf16.msra.mxu0 %v9043_v33  ;;  %5693 = vmatpush1.bf16.msra.mxu1 %v9046_v34  ;;  %v9144_v33 = vld [vmem:[%s12952_s1 + $0xca4] ss:$16 sps:$4 sm:$0xff]   ;;  %v9147_v34 = vld [vmem:[%s12952_s1 + $0xcac] ss:$16 sps:$4 sm:$0xff]  }
 0x158   :  { %5135 = vmatprep.subr.bf16.mxu0 %v9051_v35  ;;  %5694 = vmatprep.subr.bf16.mxu1 %v9054_v36  ;;  %v9142_v35 = vld [vmem:[%s12952_s1 + $0xca0] ss:$16 sps:$4 sm:$0xff]   ;;  %v9145_v36 = vld [vmem:[%s12952_s1 + $0xca8] ss:$16 sps:$4 sm:$0xff]  }
 0x15b   :  { %5136 = vmatpush1.bf16.msra.mxu0 %v9049_v37  ;;  %5695 = vmatpush1.bf16.msra.mxu1 %v9052_v38  ;;  %v9150_v37 = vld [vmem:[%s12952_s1 + $0xcc4] ss:$16 sps:$4 sm:$0xff]   ;;  %v9153_v38 = vld [vmem:[%s12952_s1 + $0xccc] ss:$16 sps:$4 sm:$0xff]  }
 0x15c   :  { %5137 = vmatprep.subr.bf16.mxu0 %v9057_v39  ;;  %5696 = vmatprep.subr.bf16.mxu1 %v9060_v40  ;;  %v9148_v39 = vld [vmem:[%s12952_s1 + $0xcc0] ss:$16 sps:$4 sm:$0xff]   ;;  %v9151_v40 = vld [vmem:[%s12952_s1 + $0xcc8] ss:$16 sps:$4 sm:$0xff]  }
 0x15f   :  { %5138 = vmatpush1.bf16.msra.mxu0 %v9055_v41  ;;  %5697 = vmatpush1.bf16.msra.mxu1 %v9058_v42  ;;  %v9156_v41 = vld [vmem:[%s12952_s1 + $0xce4] ss:$16 sps:$4 sm:$0xff]   ;;  %v9159_v42 = vld [vmem:[%s12952_s1 + $0xcec] ss:$16 sps:$4 sm:$0xff]  }
 0x160   :  { %5139 = vmatprep.subr.bf16.mxu0 %v9063_v43  ;;  %5698 = vmatprep.subr.bf16.mxu1 %v9066_v44  ;;  %v9154_v43 = vld [vmem:[%s12952_s1 + $0xce0] ss:$16 sps:$4 sm:$0xff]   ;;  %v9157_v44 = vld [vmem:[%s12952_s1 + $0xce8] ss:$16 sps:$4 sm:$0xff]  }
 0x163   :  { %5140 = vmatpush1.bf16.msra.mxu0 %v9061_v45  ;;  %5699 = vmatpush1.bf16.msra.mxu1 %v9064_v46  ;;  %v9162_v45 = vld [vmem:[%s12952_s1 + $0xd04] ss:$16 sps:$4 sm:$0xff]   ;;  %v9165_v46 = vld [vmem:[%s12952_s1 + $0xd0c] ss:$16 sps:$4 sm:$0xff]  }
 0x164   :  { %5141 = vmatprep.subr.bf16.mxu0 %v9069_v47  ;;  %5700 = vmatprep.subr.bf16.mxu1 %v9072_v48  ;;  %v9160_v47 = vld [vmem:[%s12952_s1 + $0xd00] ss:$16 sps:$4 sm:$0xff]   ;;  %v9163_v48 = vld [vmem:[%s12952_s1 + $0xd08] ss:$16 sps:$4 sm:$0xff]  }
 0x167   :  { %5142 = vmatpush1.bf16.msra.mxu0 %v9067_v49  ;;  %5701 = vmatpush1.bf16.msra.mxu1 %v9070_v50  ;;  %v9168_v49 = vld [vmem:[%s12952_s1 + $0xd24] ss:$16 sps:$4 sm:$0xff]   ;;  %v9171_v50 = vld [vmem:[%s12952_s1 + $0xd2c] ss:$16 sps:$4 sm:$0xff]  }
 0x168   :  { %5143 = vmatprep.subr.bf16.mxu0 %v9075_v51  ;;  %5702 = vmatprep.subr.bf16.mxu1 %v9078_v52  ;;  %v9166_v51 = vld [vmem:[%s12952_s1 + $0xd20] ss:$16 sps:$4 sm:$0xff]   ;;  %v9169_v52 = vld [vmem:[%s12952_s1 + $0xd28] ss:$16 sps:$4 sm:$0xff]  }
 0x16b   :  { %5144 = vmatpush1.bf16.msra.mxu0 %v9073_v53  ;;  %5703 = vmatpush1.bf16.msra.mxu1 %v9076_v54  ;;  %v9174_v53 = vld [vmem:[%s12952_s1 + $0xd44] ss:$16 sps:$4 sm:$0xff]   ;;  %v9177_v54 = vld [vmem:[%s12952_s1 + $0xd4c] ss:$16 sps:$4 sm:$0xff]  }
 0x16c   :  { %5145 = vmatprep.subr.bf16.mxu0 %v9081_v55  ;;  %5704 = vmatprep.subr.bf16.mxu1 %v9084_v56  ;;  %v9172_v55 = vld [vmem:[%s12952_s1 + $0xd40] ss:$16 sps:$4 sm:$0xff]   ;;  %v9175_v56 = vld [vmem:[%s12952_s1 + $0xd48] ss:$16 sps:$4 sm:$0xff]  }
 0x16f   :  { %5146 = vmatpush1.bf16.msra.mxu0 %v9079_v57  ;;  %5705 = vmatpush1.bf16.msra.mxu1 %v9082_v58  ;;  %v9180_v57 = vld [vmem:[%s12952_s1 + $0xd64] ss:$16 sps:$4 sm:$0xff]   ;;  %v9183_v58 = vld [vmem:[%s12952_s1 + $0xd6c] ss:$16 sps:$4 sm:$0xff]  }
 0x170   :  { %5147 = vmatprep.subr.bf16.mxu0 %v9087_v59  ;;  %5706 = vmatprep.subr.bf16.mxu1 %v9090_v60  ;;  %v9178_v59 = vld [vmem:[%s12952_s1 + $0xd60] ss:$16 sps:$4 sm:$0xff]   ;;  %v9181_v60 = vld [vmem:[%s12952_s1 + $0xd68] ss:$16 sps:$4 sm:$0xff]  }
 0x173   :  { %5148 = vmatpush1.bf16.msra.mxu0 %v9085_v61  ;;  %5707 = vmatpush1.bf16.msra.mxu1 %v9088_v62  ;;  %v9186_v61 = vld [vmem:[%s12952_s1 + $0xd84] ss:$16 sps:$4 sm:$0xff]   ;;  %v9189_v62 = vld [vmem:[%s12952_s1 + $0xd8c] ss:$16 sps:$4 sm:$0xff]  }
 0x174   :  { %5149 = vmatprep.subr.bf16.mxu0 %v9093_v63  ;;  %5708 = vmatprep.subr.bf16.mxu1 %v9096_v0  ;;  %v9184_v63 = vld [vmem:[%s12952_s1 + $0xd80] ss:$16 sps:$4 sm:$0xff]   ;;  %v9187_v0 = vld [vmem:[%s12952_s1 + $0xd88] ss:$16 sps:$4 sm:$0xff]  }
 0x177   :  { %5150 = vmatpush1.bf16.msra.mxu0 %v9091_v1  ;;  %5709 = vmatpush1.bf16.msra.mxu1 %v9094_v2  ;;  %v9192_v1 = vld [vmem:[%s12952_s1 + $0xda4] ss:$16 sps:$4 sm:$0xff]   ;;  %v9195_v2 = vld [vmem:[%s12952_s1 + $0xdac] ss:$16 sps:$4 sm:$0xff]  }
 0x178   :  { %5151 = vmatprep.subr.bf16.mxu0 %v9099_v3  ;;  %5710 = vmatprep.subr.bf16.mxu1 %v9102_v4  ;;  %v9190_v3 = vld [vmem:[%s12952_s1 + $0xda0] ss:$16 sps:$4 sm:$0xff]   ;;  %v9193_v4 = vld [vmem:[%s12952_s1 + $0xda8] ss:$16 sps:$4 sm:$0xff]  }
 0x17b   :  { %5152 = vmatpush1.bf16.msra.mxu0 %v9097_v5  ;;  %5711 = vmatpush1.bf16.msra.mxu1 %v9100_v6  ;;  %v9198_v5 = vld [vmem:[%s12952_s1 + $0xdc4] ss:$16 sps:$4 sm:$0xff]   ;;  %v9201_v6 = vld [vmem:[%s12952_s1 + $0xdcc] ss:$16 sps:$4 sm:$0xff]  }
 0x17c   :  { %5153 = vmatprep.subr.bf16.mxu0 %v9105_v7  ;;  %5712 = vmatprep.subr.bf16.mxu1 %v9108_v8  ;;  %v9196_v7 = vld [vmem:[%s12952_s1 + $0xdc0] ss:$16 sps:$4 sm:$0xff]   ;;  %v9199_v8 = vld [vmem:[%s12952_s1 + $0xdc8] ss:$16 sps:$4 sm:$0xff]  }
 0x17f   :  { %5154 = vmatpush1.bf16.msra.mxu0 %v9103_v9  ;;  %5713 = vmatpush1.bf16.msra.mxu1 %v9106_v10  ;;  %v9204_v9 = vld [vmem:[%s12952_s1 + $0xde4] ss:$16 sps:$4 sm:$0xff]   ;;  %v9207_v10 = vld [vmem:[%s12952_s1 + $0xdec] ss:$16 sps:$4 sm:$0xff]  }
 0x180   :  { %5166 = vmatprep.subr.bf16.mxu0 %v9114_v12  ;;  %5725 = vmatprep.subr.bf16.mxu1 %v9117_v13  ;;  %v9205_v12 = vld [vmem:[%s12952_s1 + $0xde8] ss:$16 sps:$4 sm:$0xff]   ;;  %v9208_v13 = vld [vmem:[%s12953_s0 + $0x30] ss:$100 sps:$4 sm:$0xff]  }
 0x182   :  { %5156 = vmatmul.mubr.bf16.vlgmr.msra.gmra.mrb[0].mxu0 %v9109_v11  ;;  %5715 = vmatmul.mubr.bf16.vlgmr.msra.gmra.mrb[0].mxu1 %v9109_v11  ;;  %v9202_v11 = vld [vmem:[%s12952_s1 + $0xde0] ss:$16 sps:$4 sm:$0xff]  }
 0x183   :  { %5167 = vmatpush1.bf16.msra.mxu0 %v9112_v14  ;;  %5726 = vmatpush1.bf16.msra.mxu1 %v9115_v15  ;;  %v9213_v14 = vld [vmem:[%s12952_s1 + $0xe04] ss:$16 sps:$4 sm:$0xff]   ;;  %v9216_v15 = vld [vmem:[%s12952_s1 + $0xe0c] ss:$16 sps:$4 sm:$0xff]  }
 0x184   :  { %5168 = vmatprep.subr.bf16.mxu0 %v9120_v16  ;;  %5727 = vmatprep.subr.bf16.mxu1 %v9123_v17  ;;  %v9211_v16 = vld [vmem:[%s12952_s1 + $0xe00] ss:$16 sps:$4 sm:$0xff]   ;;  %v9214_v17 = vld [vmem:[%s12952_s1 + $0xe08] ss:$16 sps:$4 sm:$0xff]  }
 0x185   :  { %5198 = vmatprep.mubr.bf16.mxu0 %v9210_v18  ;;  %5757 = vmatprep.mubr.bf16.mxu1 %v9210_v18  ;;  %v9219_v18 = vld [vmem:[%s12952_s1 + $0xe24] ss:$16 sps:$4 sm:$0xff]  }
 0x187   :  { %5169 = vmatpush1.bf16.msra.mxu0 %v9118_v19  ;;  %5728 = vmatpush1.bf16.msra.mxu1 %v9121_v20  ;;  %v9222_v19 = vld [vmem:[%s12952_s1 + $0xe2c] ss:$16 sps:$4 sm:$0xff]  }
 0x188   :  { %5170 = vmatprep.subr.bf16.mxu0 %v9126_v21  ;;  %5729 = vmatprep.subr.bf16.mxu1 %v9129_v22  ;;  %v9309_v20 = vld [vmem:[%s12953_s0 + $0x3c] ss:$100 sps:$4 sm:$0xff]   ;;  %v9220_v22 = vld [vmem:[%s12952_s1 + $0xe28] ss:$16 sps:$4 sm:$0xff]  }
 0x189   :  { %v9217_v21 = vld [vmem:[%s12952_s1 + $0xe20] ss:$16 sps:$4 sm:$0xff]  }
 0x18b   :  { %5171 = vmatpush1.bf16.msra.mxu0 %v9124_v23  ;;  %5730 = vmatpush1.bf16.msra.mxu1 %v9127_v24  ;;  %v9225_v23 = vld [vmem:[%s12952_s1 + $0xe44] ss:$16 sps:$4 sm:$0xff]   ;;  %v9228_v24 = vld [vmem:[%s12952_s1 + $0xe4c] ss:$16 sps:$4 sm:$0xff]  }
 0x18c   :  { %5172 = vmatprep.subr.bf16.mxu0 %v9132_v25  ;;  %5731 = vmatprep.subr.bf16.mxu1 %v9135_v26  ;;  %v9223_v25 = vld [vmem:[%s12952_s1 + $0xe40] ss:$16 sps:$4 sm:$0xff]   ;;  %v9226_v26 = vld [vmem:[%s12952_s1 + $0xe48] ss:$16 sps:$4 sm:$0xff]  }
 0x18f   :  { %5173 = vmatpush1.bf16.msra.mxu0 %v9130_v27  ;;  %5732 = vmatpush1.bf16.msra.mxu1 %v9133_v28  ;;  %v9231_v27 = vld [vmem:[%s12952_s1 + $0xe64] ss:$16 sps:$4 sm:$0xff]   ;;  %v9234_v28 = vld [vmem:[%s12952_s1 + $0xe6c] ss:$16 sps:$4 sm:$0xff]  }
 0x190   :  { %5174 = vmatprep.subr.bf16.mxu0 %v9138_v29  ;;  %5733 = vmatprep.subr.bf16.mxu1 %v9141_v30  ;;  %v9229_v29 = vld [vmem:[%s12952_s1 + $0xe60] ss:$16 sps:$4 sm:$0xff]   ;;  %v9232_v30 = vld [vmem:[%s12952_s1 + $0xe68] ss:$16 sps:$4 sm:$0xff]  }
 0x193   :  { %5175 = vmatpush1.bf16.msra.mxu0 %v9136_v31  ;;  %5734 = vmatpush1.bf16.msra.mxu1 %v9139_v32  ;;  %v9237_v31 = vld [vmem:[%s12952_s1 + $0xe84] ss:$16 sps:$4 sm:$0xff]   ;;  %v9240_v32 = vld [vmem:[%s12952_s1 + $0xe8c] ss:$16 sps:$4 sm:$0xff]  }
 0x194   :  { %5176 = vmatprep.subr.bf16.mxu0 %v9144_v33  ;;  %5735 = vmatprep.subr.bf16.mxu1 %v9147_v34  ;;  %v9235_v33 = vld [vmem:[%s12952_s1 + $0xe80] ss:$16 sps:$4 sm:$0xff]   ;;  %v9238_v34 = vld [vmem:[%s12952_s1 + $0xe88] ss:$16 sps:$4 sm:$0xff]  }
 0x197   :  { %5177 = vmatpush1.bf16.msra.mxu0 %v9142_v35  ;;  %5736 = vmatpush1.bf16.msra.mxu1 %v9145_v36  ;;  %v9243_v35 = vld [vmem:[%s12952_s1 + $0xea4] ss:$16 sps:$4 sm:$0xff]   ;;  %v9246_v36 = vld [vmem:[%s12952_s1 + $0xeac] ss:$16 sps:$4 sm:$0xff]  }
 0x198   :  { %5178 = vmatprep.subr.bf16.mxu0 %v9150_v37  ;;  %5737 = vmatprep.subr.bf16.mxu1 %v9153_v38  ;;  %v9241_v37 = vld [vmem:[%s12952_s1 + $0xea0] ss:$16 sps:$4 sm:$0xff]   ;;  %v9244_v38 = vld [vmem:[%s12952_s1 + $0xea8] ss:$16 sps:$4 sm:$0xff]  }
 0x19b   :  { %5179 = vmatpush1.bf16.msra.mxu0 %v9148_v39  ;;  %5738 = vmatpush1.bf16.msra.mxu1 %v9151_v40  ;;  %v9249_v39 = vld [vmem:[%s12952_s1 + $0xec4] ss:$16 sps:$4 sm:$0xff]   ;;  %v9252_v40 = vld [vmem:[%s12952_s1 + $0xecc] ss:$16 sps:$4 sm:$0xff]  }
 0x19c   :  { %5180 = vmatprep.subr.bf16.mxu0 %v9156_v41  ;;  %5739 = vmatprep.subr.bf16.mxu1 %v9159_v42  ;;  %v9247_v41 = vld [vmem:[%s12952_s1 + $0xec0] ss:$16 sps:$4 sm:$0xff]   ;;  %v9250_v42 = vld [vmem:[%s12952_s1 + $0xec8] ss:$16 sps:$4 sm:$0xff]  }
 0x19f   :  { %5181 = vmatpush1.bf16.msra.mxu0 %v9154_v43  ;;  %5740 = vmatpush1.bf16.msra.mxu1 %v9157_v44  ;;  %v9255_v43 = vld [vmem:[%s12952_s1 + $0xee4] ss:$16 sps:$4 sm:$0xff]   ;;  %v9258_v44 = vld [vmem:[%s12952_s1 + $0xeec] ss:$16 sps:$4 sm:$0xff]  }
 0x1a0   :  { %5182 = vmatprep.subr.bf16.mxu0 %v9162_v45  ;;  %5741 = vmatprep.subr.bf16.mxu1 %v9165_v46  ;;  %v9253_v45 = vld [vmem:[%s12952_s1 + $0xee0] ss:$16 sps:$4 sm:$0xff]   ;;  %v9256_v46 = vld [vmem:[%s12952_s1 + $0xee8] ss:$16 sps:$4 sm:$0xff]  }
 0x1a3   :  { %5183 = vmatpush1.bf16.msra.mxu0 %v9160_v47  ;;  %5742 = vmatpush1.bf16.msra.mxu1 %v9163_v48  ;;  %v9261_v47 = vld [vmem:[%s12952_s1 + $0xf04] ss:$16 sps:$4 sm:$0xff]   ;;  %v9264_v48 = vld [vmem:[%s12952_s1 + $0xf0c] ss:$16 sps:$4 sm:$0xff]  }
 0x1a4   :  { %5184 = vmatprep.subr.bf16.mxu0 %v9168_v49  ;;  %5743 = vmatprep.subr.bf16.mxu1 %v9171_v50  ;;  %v9259_v49 = vld [vmem:[%s12952_s1 + $0xf00] ss:$16 sps:$4 sm:$0xff]   ;;  %v9262_v50 = vld [vmem:[%s12952_s1 + $0xf08] ss:$16 sps:$4 sm:$0xff]  }
 0x1a7   :  { %5185 = vmatpush1.bf16.msra.mxu0 %v9166_v51  ;;  %5744 = vmatpush1.bf16.msra.mxu1 %v9169_v52  ;;  %v9267_v51 = vld [vmem:[%s12952_s1 + $0xf24] ss:$16 sps:$4 sm:$0xff]   ;;  %v9270_v52 = vld [vmem:[%s12952_s1 + $0xf2c] ss:$16 sps:$4 sm:$0xff]  }
 0x1a8   :  { %5186 = vmatprep.subr.bf16.mxu0 %v9174_v53  ;;  %5745 = vmatprep.subr.bf16.mxu1 %v9177_v54  ;;  %v9265_v53 = vld [vmem:[%s12952_s1 + $0xf20] ss:$16 sps:$4 sm:$0xff]   ;;  %v9268_v54 = vld [vmem:[%s12952_s1 + $0xf28] ss:$16 sps:$4 sm:$0xff]  }
 0x1ab   :  { %5187 = vmatpush1.bf16.msra.mxu0 %v9172_v55  ;;  %5746 = vmatpush1.bf16.msra.mxu1 %v9175_v56  ;;  %v9273_v55 = vld [vmem:[%s12952_s1 + $0xf44] ss:$16 sps:$4 sm:$0xff]   ;;  %v9276_v56 = vld [vmem:[%s12952_s1 + $0xf4c] ss:$16 sps:$4 sm:$0xff]  }
 0x1ac   :  { %5188 = vmatprep.subr.bf16.mxu0 %v9180_v57  ;;  %5747 = vmatprep.subr.bf16.mxu1 %v9183_v58  ;;  %v9271_v57 = vld [vmem:[%s12952_s1 + $0xf40] ss:$16 sps:$4 sm:$0xff]   ;;  %v9274_v58 = vld [vmem:[%s12952_s1 + $0xf48] ss:$16 sps:$4 sm:$0xff]  }
 0x1af   :  { %5189 = vmatpush1.bf16.msra.mxu0 %v9178_v59  ;;  %5748 = vmatpush1.bf16.msra.mxu1 %v9181_v60  ;;  %v9279_v59 = vld [vmem:[%s12952_s1 + $0xf64] ss:$16 sps:$4 sm:$0xff]   ;;  %v9282_v60 = vld [vmem:[%s12952_s1 + $0xf6c] ss:$16 sps:$4 sm:$0xff]  }
 0x1b0   :  { %5190 = vmatprep.subr.bf16.mxu0 %v9186_v61  ;;  %5749 = vmatprep.subr.bf16.mxu1 %v9189_v62  ;;  %v9277_v61 = vld [vmem:[%s12952_s1 + $0xf60] ss:$16 sps:$4 sm:$0xff]   ;;  %v9280_v62 = vld [vmem:[%s12952_s1 + $0xf68] ss:$16 sps:$4 sm:$0xff]  }
 0x1b3   :  { %5191 = vmatpush1.bf16.msra.mxu0 %v9184_v63  ;;  %5750 = vmatpush1.bf16.msra.mxu1 %v9187_v0  ;;  %v9285_v63 = vld [vmem:[%s12952_s1 + $0xf84] ss:$16 sps:$4 sm:$0xff]   ;;  %v9288_v0 = vld [vmem:[%s12952_s1 + $0xf8c] ss:$16 sps:$4 sm:$0xff]  }
 0x1b4   :  { %5192 = vmatprep.subr.bf16.mxu0 %v9192_v1  ;;  %5751 = vmatprep.subr.bf16.mxu1 %v9195_v2  ;;  %v9283_v1 = vld [vmem:[%s12952_s1 + $0xf80] ss:$16 sps:$4 sm:$0xff]   ;;  %v9286_v2 = vld [vmem:[%s12952_s1 + $0xf88] ss:$16 sps:$4 sm:$0xff]  }
 0x1b7   :  { %5193 = vmatpush1.bf16.msra.mxu0 %v9190_v3  ;;  %5752 = vmatpush1.bf16.msra.mxu1 %v9193_v4  ;;  %v9291_v3 = vld [vmem:[%s12952_s1 + $0xfa4] ss:$16 sps:$4 sm:$0xff]   ;;  %v9294_v4 = vld [vmem:[%s12952_s1 + $0xfac] ss:$16 sps:$4 sm:$0xff]  }
 0x1b8   :  { %5194 = vmatprep.subr.bf16.mxu0 %v9198_v5  ;;  %5753 = vmatprep.subr.bf16.mxu1 %v9201_v6  ;;  %v9289_v5 = vld [vmem:[%s12952_s1 + $0xfa0] ss:$16 sps:$4 sm:$0xff]   ;;  %v9292_v6 = vld [vmem:[%s12952_s1 + $0xfa8] ss:$16 sps:$4 sm:$0xff]  }
 0x1bb   :  { %5195 = vmatpush1.bf16.msra.mxu0 %v9196_v7  ;;  %5754 = vmatpush1.bf16.msra.mxu1 %v9199_v8  ;;  %v9297_v7 = vld [vmem:[%s12952_s1 + $0xfc4] ss:$16 sps:$4 sm:$0xff]   ;;  %v9300_v8 = vld [vmem:[%s12952_s1 + $0xfcc] ss:$16 sps:$4 sm:$0xff]  }
 0x1bc   :  { %5196 = vmatprep.subr.bf16.mxu0 %v9204_v9  ;;  %5755 = vmatprep.subr.bf16.mxu1 %v9207_v10  ;;  %v9295_v9 = vld [vmem:[%s12952_s1 + $0xfc0] ss:$16 sps:$4 sm:$0xff]   ;;  %v9298_v10 = vld [vmem:[%s12952_s1 + $0xfc8] ss:$16 sps:$4 sm:$0xff]  }
 0x1bf   :  { %5197 = vmatpush1.bf16.msra.mxu0 %v9202_v11  ;;  %5756 = vmatpush1.bf16.msra.mxu1 %v9205_v12  ;;  %v9303_v11 = vld [vmem:[%s12952_s1 + $0xfe4] ss:$16 sps:$4 sm:$0xff]   ;;  %v9306_v12 = vld [vmem:[%s12952_s1 + $0xfec] ss:$16 sps:$4 sm:$0xff]  }
 0x1c0   :  { %5209 = vmatprep.subr.bf16.mxu0 %v9213_v14  ;;  %5768 = vmatprep.subr.bf16.mxu1 %v9216_v15  ;;  %v9304_v14 = vld [vmem:[%s12952_s1 + $0xfe8] ss:$16 sps:$4 sm:$0xff]   ;;  %v9312_v15 = vld [vmem:[%s12952_s1 + $0x1004] ss:$16 sps:$4 sm:$0xff]  }
 0x1c2   :  { %5199 = vmatmul.mubr.bf16.vlgmr.msra.gmra.mrb[0].mxu0 %v9208_v13  ;;  %5758 = vmatmul.mubr.bf16.vlgmr.msra.gmra.mrb[0].mxu1 %v9208_v13  ;;  %v9301_v13 = vld [vmem:[%s12952_s1 + $0xfe0] ss:$16 sps:$4 sm:$0xff]  }
 0x1c3   :  { %5210 = vmatpush1.bf16.msra.mxu0 %v9211_v16  ;;  %5769 = vmatpush1.bf16.msra.mxu1 %v9214_v17  ;;  %v9315_v16 = vld [vmem:[%s12952_s1 + $0x100c] ss:$16 sps:$4 sm:$0xff]  }
 0x1c4   :  { %5211 = vmatprep.subr.bf16.mxu0 %v9219_v18  ;;  %5770 = vmatprep.subr.bf16.mxu1 %v9222_v19  ;;  %v9307_v17 = vld [vmem:[%s12953_s0 + $0x38] ss:$100 sps:$4 sm:$0xff]   ;;  %v9310_v18 = vld [vmem:[%s12952_s1 + $0x1000] ss:$16 sps:$4 sm:$0xff]  }
 0x1c5   :  { %5241 = vmatprep.mubr.bf16.mxu0 %v9309_v20  ;;  %5800 = vmatprep.mubr.bf16.mxu1 %v9309_v20  ;;  %v9313_v19 = vld [vmem:[%s12952_s1 + $0x1008] ss:$16 sps:$4 sm:$0xff]   ;;  %v9318_v20 = vld [vmem:[%s12952_s1 + $0x1024] ss:$16 sps:$4 sm:$0xff]  }
 0x1c7   :  { %5212 = vmatpush1.bf16.msra.mxu0 %v9217_v21  ;;  %5771 = vmatpush1.bf16.msra.mxu1 %v9220_v22  ;;  %v9321_v21 = vld [vmem:[%s12952_s1 + $0x102c] ss:$16 sps:$4 sm:$0xff]   ;;  %v9408_v22 = vld [vmem:[%s12953_s0 + $0x44] ss:$100 sps:$4 sm:$0xff]  }
 0x1c8   :  { %5213 = vmatprep.subr.bf16.mxu0 %v9225_v23  ;;  %5772 = vmatprep.subr.bf16.mxu1 %v9228_v24  ;;  %v9316_v23 = vld [vmem:[%s12952_s1 + $0x1020] ss:$16 sps:$4 sm:$0xff]   ;;  %v9319_v24 = vld [vmem:[%s12952_s1 + $0x1028] ss:$16 sps:$4 sm:$0xff]  }
 0x1cb   :  { %5214 = vmatpush1.bf16.msra.mxu0 %v9223_v25  ;;  %5773 = vmatpush1.bf16.msra.mxu1 %v9226_v26  ;;  %v9324_v25 = vld [vmem:[%s12952_s1 + $0x1044] ss:$16 sps:$4 sm:$0xff]   ;;  %v9327_v26 = vld [vmem:[%s12952_s1 + $0x104c] ss:$16 sps:$4 sm:$0xff]  }
 0x1cc   :  { %5215 = vmatprep.subr.bf16.mxu0 %v9231_v27  ;;  %5774 = vmatprep.subr.bf16.mxu1 %v9234_v28  ;;  %v9322_v27 = vld [vmem:[%s12952_s1 + $0x1040] ss:$16 sps:$4 sm:$0xff]   ;;  %v9325_v28 = vld [vmem:[%s12952_s1 + $0x1048] ss:$16 sps:$4 sm:$0xff]  }
 0x1cf   :  { %5216 = vmatpush1.bf16.msra.mxu0 %v9229_v29  ;;  %5775 = vmatpush1.bf16.msra.mxu1 %v9232_v30  ;;  %v9330_v29 = vld [vmem:[%s12952_s1 + $0x1064] ss:$16 sps:$4 sm:$0xff]   ;;  %v9333_v30 = vld [vmem:[%s12952_s1 + $0x106c] ss:$16 sps:$4 sm:$0xff]  }
 0x1d0   :  { %5217 = vmatprep.subr.bf16.mxu0 %v9237_v31  ;;  %5776 = vmatprep.subr.bf16.mxu1 %v9240_v32  ;;  %v9328_v31 = vld [vmem:[%s12952_s1 + $0x1060] ss:$16 sps:$4 sm:$0xff]   ;;  %v9331_v32 = vld [vmem:[%s12952_s1 + $0x1068] ss:$16 sps:$4 sm:$0xff]  }
 0x1d3   :  { %5218 = vmatpush1.bf16.msra.mxu0 %v9235_v33  ;;  %5777 = vmatpush1.bf16.msra.mxu1 %v9238_v34  ;;  %v9336_v33 = vld [vmem:[%s12952_s1 + $0x1084] ss:$16 sps:$4 sm:$0xff]   ;;  %v9339_v34 = vld [vmem:[%s12952_s1 + $0x108c] ss:$16 sps:$4 sm:$0xff]  }
 0x1d4   :  { %5219 = vmatprep.subr.bf16.mxu0 %v9243_v35  ;;  %5778 = vmatprep.subr.bf16.mxu1 %v9246_v36  ;;  %v9334_v35 = vld [vmem:[%s12952_s1 + $0x1080] ss:$16 sps:$4 sm:$0xff]   ;;  %v9337_v36 = vld [vmem:[%s12952_s1 + $0x1088] ss:$16 sps:$4 sm:$0xff]  }
 0x1d7   :  { %5220 = vmatpush1.bf16.msra.mxu0 %v9241_v37  ;;  %5779 = vmatpush1.bf16.msra.mxu1 %v9244_v38  ;;  %v9342_v37 = vld [vmem:[%s12952_s1 + $0x10a4] ss:$16 sps:$4 sm:$0xff]   ;;  %v9345_v38 = vld [vmem:[%s12952_s1 + $0x10ac] ss:$16 sps:$4 sm:$0xff]  }
 0x1d8   :  { %5221 = vmatprep.subr.bf16.mxu0 %v9249_v39  ;;  %5780 = vmatprep.subr.bf16.mxu1 %v9252_v40  ;;  %v9340_v39 = vld [vmem:[%s12952_s1 + $0x10a0] ss:$16 sps:$4 sm:$0xff]   ;;  %v9343_v40 = vld [vmem:[%s12952_s1 + $0x10a8] ss:$16 sps:$4 sm:$0xff]  }
 0x1db   :  { %5222 = vmatpush1.bf16.msra.mxu0 %v9247_v41  ;;  %5781 = vmatpush1.bf16.msra.mxu1 %v9250_v42  ;;  %v9348_v41 = vld [vmem:[%s12952_s1 + $0x10c4] ss:$16 sps:$4 sm:$0xff]   ;;  %v9351_v42 = vld [vmem:[%s12952_s1 + $0x10cc] ss:$16 sps:$4 sm:$0xff]  }
 0x1dc   :  { %5223 = vmatprep.subr.bf16.mxu0 %v9255_v43  ;;  %5782 = vmatprep.subr.bf16.mxu1 %v9258_v44  ;;  %v9346_v43 = vld [vmem:[%s12952_s1 + $0x10c0] ss:$16 sps:$4 sm:$0xff]   ;;  %v9349_v44 = vld [vmem:[%s12952_s1 + $0x10c8] ss:$16 sps:$4 sm:$0xff]  }
 0x1df   :  { %5224 = vmatpush1.bf16.msra.mxu0 %v9253_v45  ;;  %5783 = vmatpush1.bf16.msra.mxu1 %v9256_v46  ;;  %v9354_v45 = vld [vmem:[%s12952_s1 + $0x10e4] ss:$16 sps:$4 sm:$0xff]   ;;  %v9357_v46 = vld [vmem:[%s12952_s1 + $0x10ec] ss:$16 sps:$4 sm:$0xff]  }
 0x1e0   :  { %5225 = vmatprep.subr.bf16.mxu0 %v9261_v47  ;;  %5784 = vmatprep.subr.bf16.mxu1 %v9264_v48  ;;  %v9352_v47 = vld [vmem:[%s12952_s1 + $0x10e0] ss:$16 sps:$4 sm:$0xff]   ;;  %v9355_v48 = vld [vmem:[%s12952_s1 + $0x10e8] ss:$16 sps:$4 sm:$0xff]  }
 0x1e3   :  { %5226 = vmatpush1.bf16.msra.mxu0 %v9259_v49  ;;  %5785 = vmatpush1.bf16.msra.mxu1 %v9262_v50  ;;  %v9360_v49 = vld [vmem:[%s12952_s1 + $0x1104] ss:$16 sps:$4 sm:$0xff]   ;;  %v9363_v50 = vld [vmem:[%s12952_s1 + $0x110c] ss:$16 sps:$4 sm:$0xff]  }
 0x1e4   :  { %5227 = vmatprep.subr.bf16.mxu0 %v9267_v51  ;;  %5786 = vmatprep.subr.bf16.mxu1 %v9270_v52  ;;  %v9358_v51 = vld [vmem:[%s12952_s1 + $0x1100] ss:$16 sps:$4 sm:$0xff]   ;;  %v9361_v52 = vld [vmem:[%s12952_s1 + $0x1108] ss:$16 sps:$4 sm:$0xff]  }
 0x1e7   :  { %5228 = vmatpush1.bf16.msra.mxu0 %v9265_v53  ;;  %5787 = vmatpush1.bf16.msra.mxu1 %v9268_v54  ;;  %v9366_v53 = vld [vmem:[%s12952_s1 + $0x1124] ss:$16 sps:$4 sm:$0xff]   ;;  %v9369_v54 = vld [vmem:[%s12952_s1 + $0x112c] ss:$16 sps:$4 sm:$0xff]  }
 0x1e8   :  { %5229 = vmatprep.subr.bf16.mxu0 %v9273_v55  ;;  %5788 = vmatprep.subr.bf16.mxu1 %v9276_v56  ;;  %v9364_v55 = vld [vmem:[%s12952_s1 + $0x1120] ss:$16 sps:$4 sm:$0xff]   ;;  %v9367_v56 = vld [vmem:[%s12952_s1 + $0x1128] ss:$16 sps:$4 sm:$0xff]  }
 0x1eb   :  { %5230 = vmatpush1.bf16.msra.mxu0 %v9271_v57  ;;  %5789 = vmatpush1.bf16.msra.mxu1 %v9274_v58  ;;  %v9372_v57 = vld [vmem:[%s12952_s1 + $0x1144] ss:$16 sps:$4 sm:$0xff]   ;;  %v9375_v58 = vld [vmem:[%s12952_s1 + $0x114c] ss:$16 sps:$4 sm:$0xff]  }
 0x1ec   :  { %5231 = vmatprep.subr.bf16.mxu0 %v9279_v59  ;;  %5790 = vmatprep.subr.bf16.mxu1 %v9282_v60  ;;  %v9370_v59 = vld [vmem:[%s12952_s1 + $0x1140] ss:$16 sps:$4 sm:$0xff]   ;;  %v9373_v60 = vld [vmem:[%s12952_s1 + $0x1148] ss:$16 sps:$4 sm:$0xff]  }
 0x1ef   :  { %5232 = vmatpush1.bf16.msra.mxu0 %v9277_v61  ;;  %5791 = vmatpush1.bf16.msra.mxu1 %v9280_v62  ;;  %v9378_v61 = vld [vmem:[%s12952_s1 + $0x1164] ss:$16 sps:$4 sm:$0xff]   ;;  %v9381_v62 = vld [vmem:[%s12952_s1 + $0x116c] ss:$16 sps:$4 sm:$0xff]  }
 0x1f0   :  { %5233 = vmatprep.subr.bf16.mxu0 %v9285_v63  ;;  %5792 = vmatprep.subr.bf16.mxu1 %v9288_v0  ;;  %v9376_v63 = vld [vmem:[%s12952_s1 + $0x1160] ss:$16 sps:$4 sm:$0xff]   ;;  %v9379_v0 = vld [vmem:[%s12952_s1 + $0x1168] ss:$16 sps:$4 sm:$0xff]  }
 0x1f3   :  { %5234 = vmatpush1.bf16.msra.mxu0 %v9283_v1  ;;  %5793 = vmatpush1.bf16.msra.mxu1 %v9286_v2  ;;  %v9384_v1 = vld [vmem:[%s12952_s1 + $0x1184] ss:$16 sps:$4 sm:$0xff]   ;;  %v9387_v2 = vld [vmem:[%s12952_s1 + $0x118c] ss:$16 sps:$4 sm:$0xff]  }
 0x1f4   :  { %5235 = vmatprep.subr.bf16.mxu0 %v9291_v3  ;;  %5794 = vmatprep.subr.bf16.mxu1 %v9294_v4  ;;  %v9382_v3 = vld [vmem:[%s12952_s1 + $0x1180] ss:$16 sps:$4 sm:$0xff]   ;;  %v9385_v4 = vld [vmem:[%s12952_s1 + $0x1188] ss:$16 sps:$4 sm:$0xff]  }
 0x1f7   :  { %5236 = vmatpush1.bf16.msra.mxu0 %v9289_v5  ;;  %5795 = vmatpush1.bf16.msra.mxu1 %v9292_v6  ;;  %v9390_v5 = vld [vmem:[%s12952_s1 + $0x11a4] ss:$16 sps:$4 sm:$0xff]   ;;  %v9393_v6 = vld [vmem:[%s12952_s1 + $0x11ac] ss:$16 sps:$4 sm:$0xff]  }
 0x1f8   :  { %5237 = vmatprep.subr.bf16.mxu0 %v9297_v7  ;;  %5796 = vmatprep.subr.bf16.mxu1 %v9300_v8  ;;  %v9388_v7 = vld [vmem:[%s12952_s1 + $0x11a0] ss:$16 sps:$4 sm:$0xff]   ;;  %v9391_v8 = vld [vmem:[%s12952_s1 + $0x11a8] ss:$16 sps:$4 sm:$0xff]  }
 0x1fb   :  { %5238 = vmatpush1.bf16.msra.mxu0 %v9295_v9  ;;  %5797 = vmatpush1.bf16.msra.mxu1 %v9298_v10  ;;  %v9396_v9 = vld [vmem:[%s12952_s1 + $0x11c4] ss:$16 sps:$4 sm:$0xff]   ;;  %v9399_v10 = vld [vmem:[%s12952_s1 + $0x11cc] ss:$16 sps:$4 sm:$0xff]  }
 0x1fc   :  { %5239 = vmatprep.subr.bf16.mxu0 %v9303_v11  ;;  %5798 = vmatprep.subr.bf16.mxu1 %v9306_v12  ;;  %v9394_v11 = vld [vmem:[%s12952_s1 + $0x11c0] ss:$16 sps:$4 sm:$0xff]   ;;  %v9397_v12 = vld [vmem:[%s12952_s1 + $0x11c8] ss:$16 sps:$4 sm:$0xff]  }
 0x1ff   :  { %5240 = vmatpush1.bf16.msra.mxu0 %v9301_v13  ;;  %5799 = vmatpush1.bf16.msra.mxu1 %v9304_v14  ;;  %v9402_v13 = vld [vmem:[%s12952_s1 + $0x11e4] ss:$16 sps:$4 sm:$0xff]   ;;  %v9405_v14 = vld [vmem:[%s12952_s1 + $0x11ec] ss:$16 sps:$4 sm:$0xff]  }
 0x200   :  { %5252 = vmatprep.subr.bf16.mxu0 %v9312_v15  ;;  %5811 = vmatprep.subr.bf16.mxu1 %v9315_v16  ;;  %v9400_v15 = vld [vmem:[%s12952_s1 + $0x11e0] ss:$16 sps:$4 sm:$0xff]   ;;  %v9403_v16 = vld [vmem:[%s12952_s1 + $0x11e8] ss:$16 sps:$4 sm:$0xff]  }
 0x202   :  { %5242 = vmatmul.mubr.bf16.vlgmr.msra.gmra.mrb[0].mxu0 %v9307_v17  ;;  %5801 = vmatmul.mubr.bf16.vlgmr.msra.gmra.mrb[0].mxu1 %v9307_v17  ;;  %v9411_v17 = vld [vmem:[%s12952_s1 + $0x1204] ss:$16 sps:$4 sm:$0xff]  }
 0x203   :  { %5253 = vmatpush1.bf16.msra.mxu0 %v9310_v18  ;;  %5812 = vmatpush1.bf16.msra.mxu1 %v9313_v19  ;;  %v9414_v18 = vld [vmem:[%s12952_s1 + $0x120c] ss:$16 sps:$4 sm:$0xff]   ;;  %v9406_v19 = vld [vmem:[%s12953_s0 + $0x40] ss:$100 sps:$4 sm:$0xff]  }
 0x204   :  { %5254 = vmatprep.subr.bf16.mxu0 %v9318_v20  ;;  %5813 = vmatprep.subr.bf16.mxu1 %v9321_v21  ;;  %v9409_v20 = vld [vmem:[%s12952_s1 + $0x1200] ss:$16 sps:$4 sm:$0xff]   ;;  %v9412_v21 = vld [vmem:[%s12952_s1 + $0x1208] ss:$16 sps:$4 sm:$0xff]  }
 0x205   :  { %5284 = vmatprep.mubr.bf16.mxu0 %v9408_v22  ;;  %5843 = vmatprep.mubr.bf16.mxu1 %v9408_v22  ;;  %v9417_v22 = vld [vmem:[%s12952_s1 + $0x1224] ss:$16 sps:$4 sm:$0xff]  }
 0x207   :  { %5255 = vmatpush1.bf16.msra.mxu0 %v9316_v23  ;;  %5814 = vmatpush1.bf16.msra.mxu1 %v9319_v24  ;;  %v9420_v23 = vld [vmem:[%s12952_s1 + $0x122c] ss:$16 sps:$4 sm:$0xff]  }
 0x208   :  { %5256 = vmatprep.subr.bf16.mxu0 %v9324_v25  ;;  %5815 = vmatprep.subr.bf16.mxu1 %v9327_v26  ;;  %v9507_v24 = vld [vmem:[%s12953_s0 + $0x4c] ss:$100 sps:$4 sm:$0xff]   ;;  %v9418_v26 = vld [vmem:[%s12952_s1 + $0x1228] ss:$16 sps:$4 sm:$0xff]  }
 0x209   :  { %v9415_v25 = vld [vmem:[%s12952_s1 + $0x1220] ss:$16 sps:$4 sm:$0xff]  }
 0x20b   :  { %5257 = vmatpush1.bf16.msra.mxu0 %v9322_v27  ;;  %5816 = vmatpush1.bf16.msra.mxu1 %v9325_v28  ;;  %v9423_v27 = vld [vmem:[%s12952_s1 + $0x1244] ss:$16 sps:$4 sm:$0xff]   ;;  %v9426_v28 = vld [vmem:[%s12952_s1 + $0x124c] ss:$16 sps:$4 sm:$0xff]  }
 0x20c   :  { %5258 = vmatprep.subr.bf16.mxu0 %v9330_v29  ;;  %5817 = vmatprep.subr.bf16.mxu1 %v9333_v30  ;;  %v9421_v29 = vld [vmem:[%s12952_s1 + $0x1240] ss:$16 sps:$4 sm:$0xff]   ;;  %v9424_v30 = vld [vmem:[%s12952_s1 + $0x1248] ss:$16 sps:$4 sm:$0xff]  }
 0x20f   :  { %5259 = vmatpush1.bf16.msra.mxu0 %v9328_v31  ;;  %5818 = vmatpush1.bf16.msra.mxu1 %v9331_v32  ;;  %v9429_v31 = vld [vmem:[%s12952_s1 + $0x1264] ss:$16 sps:$4 sm:$0xff]   ;;  %v9432_v32 = vld [vmem:[%s12952_s1 + $0x126c] ss:$16 sps:$4 sm:$0xff]  }
 0x210   :  { %5260 = vmatprep.subr.bf16.mxu0 %v9336_v33  ;;  %5819 = vmatprep.subr.bf16.mxu1 %v9339_v34  ;;  %v9427_v33 = vld [vmem:[%s12952_s1 + $0x1260] ss:$16 sps:$4 sm:$0xff]   ;;  %v9430_v34 = vld [vmem:[%s12952_s1 + $0x1268] ss:$16 sps:$4 sm:$0xff]  }
 0x213   :  { %5261 = vmatpush1.bf16.msra.mxu0 %v9334_v35  ;;  %5820 = vmatpush1.bf16.msra.mxu1 %v9337_v36  ;;  %v9435_v35 = vld [vmem:[%s12952_s1 + $0x1284] ss:$16 sps:$4 sm:$0xff]   ;;  %v9438_v36 = vld [vmem:[%s12952_s1 + $0x128c] ss:$16 sps:$4 sm:$0xff]  }
 0x214   :  { %5262 = vmatprep.subr.bf16.mxu0 %v9342_v37  ;;  %5821 = vmatprep.subr.bf16.mxu1 %v9345_v38  ;;  %v9433_v37 = vld [vmem:[%s12952_s1 + $0x1280] ss:$16 sps:$4 sm:$0xff]   ;;  %v9436_v38 = vld [vmem:[%s12952_s1 + $0x1288] ss:$16 sps:$4 sm:$0xff]  }
 0x217   :  { %5263 = vmatpush1.bf16.msra.mxu0 %v9340_v39  ;;  %5822 = vmatpush1.bf16.msra.mxu1 %v9343_v40  ;;  %v9441_v39 = vld [vmem:[%s12952_s1 + $0x12a4] ss:$16 sps:$4 sm:$0xff]   ;;  %v9444_v40 = vld [vmem:[%s12952_s1 + $0x12ac] ss:$16 sps:$4 sm:$0xff]  }
 0x218   :  { %5264 = vmatprep.subr.bf16.mxu0 %v9348_v41  ;;  %5823 = vmatprep.subr.bf16.mxu1 %v9351_v42  ;;  %v9439_v41 = vld [vmem:[%s12952_s1 + $0x12a0] ss:$16 sps:$4 sm:$0xff]   ;;  %v9442_v42 = vld [vmem:[%s12952_s1 + $0x12a8] ss:$16 sps:$4 sm:$0xff]  }
 0x21b   :  { %5265 = vmatpush1.bf16.msra.mxu0 %v9346_v43  ;;  %5824 = vmatpush1.bf16.msra.mxu1 %v9349_v44  ;;  %v9447_v43 = vld [vmem:[%s12952_s1 + $0x12c4] ss:$16 sps:$4 sm:$0xff]   ;;  %v9450_v44 = vld [vmem:[%s12952_s1 + $0x12cc] ss:$16 sps:$4 sm:$0xff]  }
 0x21c   :  { %5266 = vmatprep.subr.bf16.mxu0 %v9354_v45  ;;  %5825 = vmatprep.subr.bf16.mxu1 %v9357_v46  ;;  %v9445_v45 = vld [vmem:[%s12952_s1 + $0x12c0] ss:$16 sps:$4 sm:$0xff]   ;;  %v9448_v46 = vld [vmem:[%s12952_s1 + $0x12c8] ss:$16 sps:$4 sm:$0xff]  }
 0x21f   :  { %5267 = vmatpush1.bf16.msra.mxu0 %v9352_v47  ;;  %5826 = vmatpush1.bf16.msra.mxu1 %v9355_v48  ;;  %v9453_v47 = vld [vmem:[%s12952_s1 + $0x12e4] ss:$16 sps:$4 sm:$0xff]   ;;  %v9456_v48 = vld [vmem:[%s12952_s1 + $0x12ec] ss:$16 sps:$4 sm:$0xff]  }
 0x220   :  { %5268 = vmatprep.subr.bf16.mxu0 %v9360_v49  ;;  %5827 = vmatprep.subr.bf16.mxu1 %v9363_v50  ;;  %v9451_v49 = vld [vmem:[%s12952_s1 + $0x12e0] ss:$16 sps:$4 sm:$0xff]   ;;  %v9454_v50 = vld [vmem:[%s12952_s1 + $0x12e8] ss:$16 sps:$4 sm:$0xff]  }
 0x223   :  { %5269 = vmatpush1.bf16.msra.mxu0 %v9358_v51  ;;  %5828 = vmatpush1.bf16.msra.mxu1 %v9361_v52  ;;  %v9459_v51 = vld [vmem:[%s12952_s1 + $0x1304] ss:$16 sps:$4 sm:$0xff]   ;;  %v9462_v52 = vld [vmem:[%s12952_s1 + $0x130c] ss:$16 sps:$4 sm:$0xff]  }
 0x224   :  { %5270 = vmatprep.subr.bf16.mxu0 %v9366_v53  ;;  %5829 = vmatprep.subr.bf16.mxu1 %v9369_v54  ;;  %v9457_v53 = vld [vmem:[%s12952_s1 + $0x1300] ss:$16 sps:$4 sm:$0xff]   ;;  %v9460_v54 = vld [vmem:[%s12952_s1 + $0x1308] ss:$16 sps:$4 sm:$0xff]  }
 0x227   :  { %5271 = vmatpush1.bf16.msra.mxu0 %v9364_v55  ;;  %5830 = vmatpush1.bf16.msra.mxu1 %v9367_v56  ;;  %v9465_v55 = vld [vmem:[%s12952_s1 + $0x1324] ss:$16 sps:$4 sm:$0xff]   ;;  %v9468_v56 = vld [vmem:[%s12952_s1 + $0x132c] ss:$16 sps:$4 sm:$0xff]  }
 0x228   :  { %5272 = vmatprep.subr.bf16.mxu0 %v9372_v57  ;;  %5831 = vmatprep.subr.bf16.mxu1 %v9375_v58  ;;  %v9463_v57 = vld [vmem:[%s12952_s1 + $0x1320] ss:$16 sps:$4 sm:$0xff]   ;;  %v9466_v58 = vld [vmem:[%s12952_s1 + $0x1328] ss:$16 sps:$4 sm:$0xff]  }
 0x22b   :  { %5273 = vmatpush1.bf16.msra.mxu0 %v9370_v59  ;;  %5832 = vmatpush1.bf16.msra.mxu1 %v9373_v60  ;;  %v9471_v59 = vld [vmem:[%s12952_s1 + $0x1344] ss:$16 sps:$4 sm:$0xff]   ;;  %v9474_v60 = vld [vmem:[%s12952_s1 + $0x134c] ss:$16 sps:$4 sm:$0xff]  }
 0x22c   :  { %5274 = vmatprep.subr.bf16.mxu0 %v9378_v61  ;;  %5833 = vmatprep.subr.bf16.mxu1 %v9381_v62  ;;  %v9469_v61 = vld [vmem:[%s12952_s1 + $0x1340] ss:$16 sps:$4 sm:$0xff]   ;;  %v9472_v62 = vld [vmem:[%s12952_s1 + $0x1348] ss:$16 sps:$4 sm:$0xff]  }
 0x22f   :  { %5275 = vmatpush1.bf16.msra.mxu0 %v9376_v63  ;;  %5834 = vmatpush1.bf16.msra.mxu1 %v9379_v0  ;;  %v9477_v63 = vld [vmem:[%s12952_s1 + $0x1364] ss:$16 sps:$4 sm:$0xff]   ;;  %v9480_v0 = vld [vmem:[%s12952_s1 + $0x136c] ss:$16 sps:$4 sm:$0xff]  }
 0x230   :  { %5276 = vmatprep.subr.bf16.mxu0 %v9384_v1  ;;  %5835 = vmatprep.subr.bf16.mxu1 %v9387_v2  ;;  %v9475_v1 = vld [vmem:[%s12952_s1 + $0x1360] ss:$16 sps:$4 sm:$0xff]   ;;  %v9478_v2 = vld [vmem:[%s12952_s1 + $0x1368] ss:$16 sps:$4 sm:$0xff]  }
 0x233   :  { %5277 = vmatpush1.bf16.msra.mxu0 %v9382_v3  ;;  %5836 = vmatpush1.bf16.msra.mxu1 %v9385_v4  ;;  %v9483_v3 = vld [vmem:[%s12952_s1 + $0x1384] ss:$16 sps:$4 sm:$0xff]   ;;  %v9486_v4 = vld [vmem:[%s12952_s1 + $0x138c] ss:$16 sps:$4 sm:$0xff]  }
 0x234   :  { %5278 = vmatprep.subr.bf16.mxu0 %v9390_v5  ;;  %5837 = vmatprep.subr.bf16.mxu1 %v9393_v6  ;;  %v9481_v5 = vld [vmem:[%s12952_s1 + $0x1380] ss:$16 sps:$4 sm:$0xff]   ;;  %v9484_v6 = vld [vmem:[%s12952_s1 + $0x1388] ss:$16 sps:$4 sm:$0xff]  }
 0x237   :  { %5279 = vmatpush1.bf16.msra.mxu0 %v9388_v7  ;;  %5838 = vmatpush1.bf16.msra.mxu1 %v9391_v8  ;;  %v9489_v7 = vld [vmem:[%s12952_s1 + $0x13a4] ss:$16 sps:$4 sm:$0xff]   ;;  %v9492_v8 = vld [vmem:[%s12952_s1 + $0x13ac] ss:$16 sps:$4 sm:$0xff]  }
 0x238   :  { %5280 = vmatprep.subr.bf16.mxu0 %v9396_v9  ;;  %5839 = vmatprep.subr.bf16.mxu1 %v9399_v10  ;;  %v9487_v9 = vld [vmem:[%s12952_s1 + $0x13a0] ss:$16 sps:$4 sm:$0xff]   ;;  %v9490_v10 = vld [vmem:[%s12952_s1 + $0x13a8] ss:$16 sps:$4 sm:$0xff]  }
 0x23b   :  { %5281 = vmatpush1.bf16.msra.mxu0 %v9394_v11  ;;  %5840 = vmatpush1.bf16.msra.mxu1 %v9397_v12  ;;  %v9495_v11 = vld [vmem:[%s12952_s1 + $0x13c4] ss:$16 sps:$4 sm:$0xff]   ;;  %v9498_v12 = vld [vmem:[%s12952_s1 + $0x13cc] ss:$16 sps:$4 sm:$0xff]  }
 0x23c   :  { %5282 = vmatprep.subr.bf16.mxu0 %v9402_v13  ;;  %5841 = vmatprep.subr.bf16.mxu1 %v9405_v14  ;;  %v9493_v13 = vld [vmem:[%s12952_s1 + $0x13c0] ss:$16 sps:$4 sm:$0xff]   ;;  %v9496_v14 = vld [vmem:[%s12952_s1 + $0x13c8] ss:$16 sps:$4 sm:$0xff]  }
 0x23f   :  { %5283 = vmatpush1.bf16.msra.mxu0 %v9400_v15  ;;  %5842 = vmatpush1.bf16.msra.mxu1 %v9403_v16  ;;  %v9501_v15 = vld [vmem:[%s12952_s1 + $0x13e4] ss:$16 sps:$4 sm:$0xff]   ;;  %v9504_v16 = vld [vmem:[%s12952_s1 + $0x13ec] ss:$16 sps:$4 sm:$0xff]  }
 0x240   :  { %5295 = vmatprep.subr.bf16.mxu0 %v9411_v17  ;;  %5854 = vmatprep.subr.bf16.mxu1 %v9414_v18  ;;  %v9499_v17 = vld [vmem:[%s12952_s1 + $0x13e0] ss:$16 sps:$4 sm:$0xff]   ;;  %v9502_v18 = vld [vmem:[%s12952_s1 + $0x13e8] ss:$16 sps:$4 sm:$0xff]  }
 0x242   :  { %5285 = vmatmul.mubr.bf16.vlgmr.msra.gmra.mrb[0].mxu0 %v9406_v19  ;;  %5844 = vmatmul.mubr.bf16.vlgmr.msra.gmra.mrb[0].mxu1 %v9406_v19  ;;  %v9510_v19 = vld [vmem:[%s12952_s1 + $0x1404] ss:$16 sps:$4 sm:$0xff]  }
 0x243   :  { %5296 = vmatpush1.bf16.msra.mxu0 %v9409_v20  ;;  %5855 = vmatpush1.bf16.msra.mxu1 %v9412_v21  ;;  %v9513_v20 = vld [vmem:[%s12952_s1 + $0x140c] ss:$16 sps:$4 sm:$0xff]  }
 0x244   :  { %5297 = vmatprep.subr.bf16.mxu0 %v9417_v22  ;;  %5856 = vmatprep.subr.bf16.mxu1 %v9420_v23  ;;  %v9505_v21 = vld [vmem:[%s12953_s0 + $0x48] ss:$100 sps:$4 sm:$0xff]   ;;  %v9508_v22 = vld [vmem:[%s12952_s1 + $0x1400] ss:$16 sps:$4 sm:$0xff]  }
 0x245   :  { %5327 = vmatprep.mubr.bf16.mxu0 %v9507_v24  ;;  %5886 = vmatprep.mubr.bf16.mxu1 %v9507_v24  ;;  %v9511_v23 = vld [vmem:[%s12952_s1 + $0x1408] ss:$16 sps:$4 sm:$0xff]   ;;  %v9516_v24 = vld [vmem:[%s12952_s1 + $0x1424] ss:$16 sps:$4 sm:$0xff]  }
 0x247   :  { %5298 = vmatpush1.bf16.msra.mxu0 %v9415_v25  ;;  %5857 = vmatpush1.bf16.msra.mxu1 %v9418_v26  ;;  %v9519_v25 = vld [vmem:[%s12952_s1 + $0x142c] ss:$16 sps:$4 sm:$0xff]   ;;  %v9606_v26 = vld [vmem:[%s12953_s0 + $0x54] ss:$100 sps:$4 sm:$0xff]  }
 0x248   :  { %5299 = vmatprep.subr.bf16.mxu0 %v9423_v27  ;;  %5858 = vmatprep.subr.bf16.mxu1 %v9426_v28  ;;  %v9514_v27 = vld [vmem:[%s12952_s1 + $0x1420] ss:$16 sps:$4 sm:$0xff]   ;;  %v9517_v28 = vld [vmem:[%s12952_s1 + $0x1428] ss:$16 sps:$4 sm:$0xff]  }
 0x24b   :  { %5300 = vmatpush1.bf16.msra.mxu0 %v9421_v29  ;;  %5859 = vmatpush1.bf16.msra.mxu1 %v9424_v30  ;;  %v9522_v29 = vld [vmem:[%s12952_s1 + $0x1444] ss:$16 sps:$4 sm:$0xff]   ;;  %v9525_v30 = vld [vmem:[%s12952_s1 + $0x144c] ss:$16 sps:$4 sm:$0xff]  }
 0x24c   :  { %5301 = vmatprep.subr.bf16.mxu0 %v9429_v31  ;;  %5860 = vmatprep.subr.bf16.mxu1 %v9432_v32  ;;  %v9520_v31 = vld [vmem:[%s12952_s1 + $0x1440] ss:$16 sps:$4 sm:$0xff]   ;;  %v9523_v32 = vld [vmem:[%s12952_s1 + $0x1448] ss:$16 sps:$4 sm:$0xff]  }
 0x24f   :  { %5302 = vmatpush1.bf16.msra.mxu0 %v9427_v33  ;;  %5861 = vmatpush1.bf16.msra.mxu1 %v9430_v34  ;;  %v9528_v33 = vld [vmem:[%s12952_s1 + $0x1464] ss:$16 sps:$4 sm:$0xff]   ;;  %v9531_v34 = vld [vmem:[%s12952_s1 + $0x146c] ss:$16 sps:$4 sm:$0xff]  }
 0x250   :  { %5303 = vmatprep.subr.bf16.mxu0 %v9435_v35  ;;  %5862 = vmatprep.subr.bf16.mxu1 %v9438_v36  ;;  %v9526_v35 = vld [vmem:[%s12952_s1 + $0x1460] ss:$16 sps:$4 sm:$0xff]   ;;  %v9529_v36 = vld [vmem:[%s12952_s1 + $0x1468] ss:$16 sps:$4 sm:$0xff]  }
 0x253   :  { %5304 = vmatpush1.bf16.msra.mxu0 %v9433_v37  ;;  %5863 = vmatpush1.bf16.msra.mxu1 %v9436_v38  ;;  %v9534_v37 = vld [vmem:[%s12952_s1 + $0x1484] ss:$16 sps:$4 sm:$0xff]   ;;  %v9537_v38 = vld [vmem:[%s12952_s1 + $0x148c] ss:$16 sps:$4 sm:$0xff]  }
 0x254   :  { %5305 = vmatprep.subr.bf16.mxu0 %v9441_v39  ;;  %5864 = vmatprep.subr.bf16.mxu1 %v9444_v40  ;;  %v9532_v39 = vld [vmem:[%s12952_s1 + $0x1480] ss:$16 sps:$4 sm:$0xff]   ;;  %v9535_v40 = vld [vmem:[%s12952_s1 + $0x1488] ss:$16 sps:$4 sm:$0xff]  }
 0x257   :  { %5306 = vmatpush1.bf16.msra.mxu0 %v9439_v41  ;;  %5865 = vmatpush1.bf16.msra.mxu1 %v9442_v42  ;;  %v9540_v41 = vld [vmem:[%s12952_s1 + $0x14a4] ss:$16 sps:$4 sm:$0xff]   ;;  %v9543_v42 = vld [vmem:[%s12952_s1 + $0x14ac] ss:$16 sps:$4 sm:$0xff]  }
 0x258   :  { %5307 = vmatprep.subr.bf16.mxu0 %v9447_v43  ;;  %5866 = vmatprep.subr.bf16.mxu1 %v9450_v44  ;;  %v9538_v43 = vld [vmem:[%s12952_s1 + $0x14a0] ss:$16 sps:$4 sm:$0xff]   ;;  %v9541_v44 = vld [vmem:[%s12952_s1 + $0x14a8] ss:$16 sps:$4 sm:$0xff]  }
 0x25b   :  { %5308 = vmatpush1.bf16.msra.mxu0 %v9445_v45  ;;  %5867 = vmatpush1.bf16.msra.mxu1 %v9448_v46  ;;  %v9546_v45 = vld [vmem:[%s12952_s1 + $0x14c4] ss:$16 sps:$4 sm:$0xff]   ;;  %v9549_v46 = vld [vmem:[%s12952_s1 + $0x14cc] ss:$16 sps:$4 sm:$0xff]  }
 0x25c   :  { %5309 = vmatprep.subr.bf16.mxu0 %v9453_v47  ;;  %5868 = vmatprep.subr.bf16.mxu1 %v9456_v48  ;;  %v9544_v47 = vld [vmem:[%s12952_s1 + $0x14c0] ss:$16 sps:$4 sm:$0xff]   ;;  %v9547_v48 = vld [vmem:[%s12952_s1 + $0x14c8] ss:$16 sps:$4 sm:$0xff]  }
 0x25f   :  { %5310 = vmatpush1.bf16.msra.mxu0 %v9451_v49  ;;  %5869 = vmatpush1.bf16.msra.mxu1 %v9454_v50  ;;  %v9552_v49 = vld [vmem:[%s12952_s1 + $0x14e4] ss:$16 sps:$4 sm:$0xff]   ;;  %v9555_v50 = vld [vmem:[%s12952_s1 + $0x14ec] ss:$16 sps:$4 sm:$0xff]  }
 0x260   :  { %5311 = vmatprep.subr.bf16.mxu0 %v9459_v51  ;;  %5870 = vmatprep.subr.bf16.mxu1 %v9462_v52  ;;  %v9550_v51 = vld [vmem:[%s12952_s1 + $0x14e0] ss:$16 sps:$4 sm:$0xff]   ;;  %v9553_v52 = vld [vmem:[%s12952_s1 + $0x14e8] ss:$16 sps:$4 sm:$0xff]  }
 0x263   :  { %5312 = vmatpush1.bf16.msra.mxu0 %v9457_v53  ;;  %5871 = vmatpush1.bf16.msra.mxu1 %v9460_v54  ;;  %v9558_v53 = vld [vmem:[%s12952_s1 + $0x1504] ss:$16 sps:$4 sm:$0xff]   ;;  %v9561_v54 = vld [vmem:[%s12952_s1 + $0x150c] ss:$16 sps:$4 sm:$0xff]  }
 0x264   :  { %5313 = vmatprep.subr.bf16.mxu0 %v9465_v55  ;;  %5872 = vmatprep.subr.bf16.mxu1 %v9468_v56  ;;  %v9556_v55 = vld [vmem:[%s12952_s1 + $0x1500] ss:$16 sps:$4 sm:$0xff]   ;;  %v9559_v56 = vld [vmem:[%s12952_s1 + $0x1508] ss:$16 sps:$4 sm:$0xff]  }
 0x267   :  { %5314 = vmatpush1.bf16.msra.mxu0 %v9463_v57  ;;  %5873 = vmatpush1.bf16.msra.mxu1 %v9466_v58  ;;  %v9564_v57 = vld [vmem:[%s12952_s1 + $0x1524] ss:$16 sps:$4 sm:$0xff]   ;;  %v9567_v58 = vld [vmem:[%s12952_s1 + $0x152c] ss:$16 sps:$4 sm:$0xff]  }
 0x268   :  { %5315 = vmatprep.subr.bf16.mxu0 %v9471_v59  ;;  %5874 = vmatprep.subr.bf16.mxu1 %v9474_v60  ;;  %v9562_v59 = vld [vmem:[%s12952_s1 + $0x1520] ss:$16 sps:$4 sm:$0xff]   ;;  %v9565_v60 = vld [vmem:[%s12952_s1 + $0x1528] ss:$16 sps:$4 sm:$0xff]  }
 0x26b   :  { %5316 = vmatpush1.bf16.msra.mxu0 %v9469_v61  ;;  %5875 = vmatpush1.bf16.msra.mxu1 %v9472_v62  ;;  %v9570_v61 = vld [vmem:[%s12952_s1 + $0x1544] ss:$16 sps:$4 sm:$0xff]   ;;  %v9573_v62 = vld [vmem:[%s12952_s1 + $0x154c] ss:$16 sps:$4 sm:$0xff]  }
 0x26c   :  { %5317 = vmatprep.subr.bf16.mxu0 %v9477_v63  ;;  %5876 = vmatprep.subr.bf16.mxu1 %v9480_v0  ;;  %v9568_v63 = vld [vmem:[%s12952_s1 + $0x1540] ss:$16 sps:$4 sm:$0xff]   ;;  %v9571_v0 = vld [vmem:[%s12952_s1 + $0x1548] ss:$16 sps:$4 sm:$0xff]  }
 0x26f   :  { %5318 = vmatpush1.bf16.msra.mxu0 %v9475_v1  ;;  %5877 = vmatpush1.bf16.msra.mxu1 %v9478_v2  ;;  %v9576_v1 = vld [vmem:[%s12952_s1 + $0x1564] ss:$16 sps:$4 sm:$0xff]   ;;  %v9579_v2 = vld [vmem:[%s12952_s1 + $0x156c] ss:$16 sps:$4 sm:$0xff]  }
 0x270   :  { %5319 = vmatprep.subr.bf16.mxu0 %v9483_v3  ;;  %5878 = vmatprep.subr.bf16.mxu1 %v9486_v4  ;;  %v9574_v3 = vld [vmem:[%s12952_s1 + $0x1560] ss:$16 sps:$4 sm:$0xff]   ;;  %v9577_v4 = vld [vmem:[%s12952_s1 + $0x1568] ss:$16 sps:$4 sm:$0xff]  }
 0x273   :  { %5320 = vmatpush1.bf16.msra.mxu0 %v9481_v5  ;;  %5879 = vmatpush1.bf16.msra.mxu1 %v9484_v6  ;;  %v9582_v5 = vld [vmem:[%s12952_s1 + $0x1584] ss:$16 sps:$4 sm:$0xff]   ;;  %v9585_v6 = vld [vmem:[%s12952_s1 + $0x158c] ss:$16 sps:$4 sm:$0xff]  }
 0x274   :  { %5321 = vmatprep.subr.bf16.mxu0 %v9489_v7  ;;  %5880 = vmatprep.subr.bf16.mxu1 %v9492_v8  ;;  %v9580_v7 = vld [vmem:[%s12952_s1 + $0x1580] ss:$16 sps:$4 sm:$0xff]   ;;  %v9583_v8 = vld [vmem:[%s12952_s1 + $0x1588] ss:$16 sps:$4 sm:$0xff]  }
 0x277   :  { %5322 = vmatpush1.bf16.msra.mxu0 %v9487_v9  ;;  %5881 = vmatpush1.bf16.msra.mxu1 %v9490_v10  ;;  %v9588_v9 = vld [vmem:[%s12952_s1 + $0x15a4] ss:$16 sps:$4 sm:$0xff]   ;;  %v9591_v10 = vld [vmem:[%s12952_s1 + $0x15ac] ss:$16 sps:$4 sm:$0xff]  }
 0x278   :  { %5323 = vmatprep.subr.bf16.mxu0 %v9495_v11  ;;  %5882 = vmatprep.subr.bf16.mxu1 %v9498_v12  ;;  %v9586_v11 = vld [vmem:[%s12952_s1 + $0x15a0] ss:$16 sps:$4 sm:$0xff]   ;;  %v9589_v12 = vld [vmem:[%s12952_s1 + $0x15a8] ss:$16 sps:$4 sm:$0xff]  }
 0x27b   :  { %5324 = vmatpush1.bf16.msra.mxu0 %v9493_v13  ;;  %5883 = vmatpush1.bf16.msra.mxu1 %v9496_v14  ;;  %v9594_v13 = vld [vmem:[%s12952_s1 + $0x15c4] ss:$16 sps:$4 sm:$0xff]   ;;  %v9597_v14 = vld [vmem:[%s12952_s1 + $0x15cc] ss:$16 sps:$4 sm:$0xff]  }
 0x27c   :  { %5325 = vmatprep.subr.bf16.mxu0 %v9501_v15  ;;  %5884 = vmatprep.subr.bf16.mxu1 %v9504_v16  ;;  %v9592_v15 = vld [vmem:[%s12952_s1 + $0x15c0] ss:$16 sps:$4 sm:$0xff]   ;;  %v9595_v16 = vld [vmem:[%s12952_s1 + $0x15c8] ss:$16 sps:$4 sm:$0xff]  }
 0x27f   :  { %5326 = vmatpush1.bf16.msra.mxu0 %v9499_v17  ;;  %5885 = vmatpush1.bf16.msra.mxu1 %v9502_v18  ;;  %v9600_v17 = vld [vmem:[%s12952_s1 + $0x15e4] ss:$16 sps:$4 sm:$0xff]   ;;  %v9603_v18 = vld [vmem:[%s12952_s1 + $0x15ec] ss:$16 sps:$4 sm:$0xff]  }
 0x280   :  { %5338 = vmatprep.subr.bf16.mxu0 %v9510_v19  ;;  %5897 = vmatprep.subr.bf16.mxu1 %v9513_v20  ;;  %v9598_v19 = vld [vmem:[%s12952_s1 + $0x15e0] ss:$16 sps:$4 sm:$0xff]   ;;  %v9601_v20 = vld [vmem:[%s12952_s1 + $0x15e8] ss:$16 sps:$4 sm:$0xff]  }
 0x282   :  { %5328 = vmatmul.mubr.bf16.vlgmr.msra.gmra.mrb[0].mxu0 %v9505_v21  ;;  %5887 = vmatmul.mubr.bf16.vlgmr.msra.gmra.mrb[0].mxu1 %v9505_v21  ;;  %v9604_v21 = vld [vmem:[%s12953_s0 + $0x50] ss:$100 sps:$4 sm:$0xff]  }
 0x283   :  { %5339 = vmatpush1.bf16.msra.mxu0 %v9508_v22  ;;  %5898 = vmatpush1.bf16.msra.mxu1 %v9511_v23  ;;  %v9609_v22 = vld [vmem:[%s12952_s1 + $0x1604] ss:$16 sps:$4 sm:$0xff]   ;;  %v9612_v23 = vld [vmem:[%s12952_s1 + $0x160c] ss:$16 sps:$4 sm:$0xff]  }
 0x284   :  { %5340 = vmatprep.subr.bf16.mxu0 %v9516_v24  ;;  %5899 = vmatprep.subr.bf16.mxu1 %v9519_v25  ;;  %v9607_v24 = vld [vmem:[%s12952_s1 + $0x1600] ss:$16 sps:$4 sm:$0xff]   ;;  %v9610_v25 = vld [vmem:[%s12952_s1 + $0x1608] ss:$16 sps:$4 sm:$0xff]  }
 0x285   :  { %5370 = vmatprep.mubr.bf16.mxu0 %v9606_v26  ;;  %5929 = vmatprep.mubr.bf16.mxu1 %v9606_v26  ;;  %v9615_v26 = vld [vmem:[%s12952_s1 + $0x1624] ss:$16 sps:$4 sm:$0xff]  }
 0x287   :  { %5341 = vmatpush1.bf16.msra.mxu0 %v9514_v27  ;;  %5900 = vmatpush1.bf16.msra.mxu1 %v9517_v28  ;;  %v9618_v27 = vld [vmem:[%s12952_s1 + $0x162c] ss:$16 sps:$4 sm:$0xff]  }
 0x288   :  { %5342 = vmatprep.subr.bf16.mxu0 %v9522_v29  ;;  %5901 = vmatprep.subr.bf16.mxu1 %v9525_v30  ;;  %v9705_v28 = vld [vmem:[%s12953_s0 + $0x5c] ss:$100 sps:$4 sm:$0xff]   ;;  %v9616_v30 = vld [vmem:[%s12952_s1 + $0x1628] ss:$16 sps:$4 sm:$0xff]  }
 0x289   :  { %v9613_v29 = vld [vmem:[%s12952_s1 + $0x1620] ss:$16 sps:$4 sm:$0xff]  }
 0x28b   :  { %5343 = vmatpush1.bf16.msra.mxu0 %v9520_v31  ;;  %5902 = vmatpush1.bf16.msra.mxu1 %v9523_v32  ;;  %v9621_v31 = vld [vmem:[%s12952_s1 + $0x1644] ss:$16 sps:$4 sm:$0xff]   ;;  %v9624_v32 = vld [vmem:[%s12952_s1 + $0x164c] ss:$16 sps:$4 sm:$0xff]  }
 0x28c   :  { %5344 = vmatprep.subr.bf16.mxu0 %v9528_v33  ;;  %5903 = vmatprep.subr.bf16.mxu1 %v9531_v34  ;;  %v9619_v33 = vld [vmem:[%s12952_s1 + $0x1640] ss:$16 sps:$4 sm:$0xff]   ;;  %v9622_v34 = vld [vmem:[%s12952_s1 + $0x1648] ss:$16 sps:$4 sm:$0xff]  }
 0x28f   :  { %5345 = vmatpush1.bf16.msra.mxu0 %v9526_v35  ;;  %5904 = vmatpush1.bf16.msra.mxu1 %v9529_v36  ;;  %v9627_v35 = vld [vmem:[%s12952_s1 + $0x1664] ss:$16 sps:$4 sm:$0xff]   ;;  %v9630_v36 = vld [vmem:[%s12952_s1 + $0x166c] ss:$16 sps:$4 sm:$0xff]  }
 0x290   :  { %5346 = vmatprep.subr.bf16.mxu0 %v9534_v37  ;;  %5905 = vmatprep.subr.bf16.mxu1 %v9537_v38  ;;  %v9625_v37 = vld [vmem:[%s12952_s1 + $0x1660] ss:$16 sps:$4 sm:$0xff]   ;;  %v9628_v38 = vld [vmem:[%s12952_s1 + $0x1668] ss:$16 sps:$4 sm:$0xff]  }
 0x293   :  { %5347 = vmatpush1.bf16.msra.mxu0 %v9532_v39  ;;  %5906 = vmatpush1.bf16.msra.mxu1 %v9535_v40  ;;  %v9633_v39 = vld [vmem:[%s12952_s1 + $0x1684] ss:$16 sps:$4 sm:$0xff]   ;;  %v9636_v40 = vld [vmem:[%s12952_s1 + $0x168c] ss:$16 sps:$4 sm:$0xff]  }
 0x294   :  { %5348 = vmatprep.subr.bf16.mxu0 %v9540_v41  ;;  %5907 = vmatprep.subr.bf16.mxu1 %v9543_v42  ;;  %v9631_v41 = vld [vmem:[%s12952_s1 + $0x1680] ss:$16 sps:$4 sm:$0xff]   ;;  %v9634_v42 = vld [vmem:[%s12952_s1 + $0x1688] ss:$16 sps:$4 sm:$0xff]  }
 0x297   :  { %5349 = vmatpush1.bf16.msra.mxu0 %v9538_v43  ;;  %5908 = vmatpush1.bf16.msra.mxu1 %v9541_v44  ;;  %v9639_v43 = vld [vmem:[%s12952_s1 + $0x16a4] ss:$16 sps:$4 sm:$0xff]   ;;  %v9642_v44 = vld [vmem:[%s12952_s1 + $0x16ac] ss:$16 sps:$4 sm:$0xff]  }
 0x298   :  { %5350 = vmatprep.subr.bf16.mxu0 %v9546_v45  ;;  %5909 = vmatprep.subr.bf16.mxu1 %v9549_v46  ;;  %v9637_v45 = vld [vmem:[%s12952_s1 + $0x16a0] ss:$16 sps:$4 sm:$0xff]   ;;  %v9640_v46 = vld [vmem:[%s12952_s1 + $0x16a8] ss:$16 sps:$4 sm:$0xff]  }
 0x29b   :  { %5351 = vmatpush1.bf16.msra.mxu0 %v9544_v47  ;;  %5910 = vmatpush1.bf16.msra.mxu1 %v9547_v48  ;;  %v9645_v47 = vld [vmem:[%s12952_s1 + $0x16c4] ss:$16 sps:$4 sm:$0xff]   ;;  %v9648_v48 = vld [vmem:[%s12952_s1 + $0x16cc] ss:$16 sps:$4 sm:$0xff]  }
 0x29c   :  { %5352 = vmatprep.subr.bf16.mxu0 %v9552_v49  ;;  %5911 = vmatprep.subr.bf16.mxu1 %v9555_v50  ;;  %v9643_v49 = vld [vmem:[%s12952_s1 + $0x16c0] ss:$16 sps:$4 sm:$0xff]   ;;  %v9646_v50 = vld [vmem:[%s12952_s1 + $0x16c8] ss:$16 sps:$4 sm:$0xff]  }
 0x29f   :  { %5353 = vmatpush1.bf16.msra.mxu0 %v9550_v51  ;;  %5912 = vmatpush1.bf16.msra.mxu1 %v9553_v52  ;;  %v9651_v51 = vld [vmem:[%s12952_s1 + $0x16e4] ss:$16 sps:$4 sm:$0xff]   ;;  %v9654_v52 = vld [vmem:[%s12952_s1 + $0x16ec] ss:$16 sps:$4 sm:$0xff]  }
 0x2a0   :  { %5354 = vmatprep.subr.bf16.mxu0 %v9558_v53  ;;  %5913 = vmatprep.subr.bf16.mxu1 %v9561_v54  ;;  %v9649_v53 = vld [vmem:[%s12952_s1 + $0x16e0] ss:$16 sps:$4 sm:$0xff]   ;;  %v9652_v54 = vld [vmem:[%s12952_s1 + $0x16e8] ss:$16 sps:$4 sm:$0xff]  }
 0x2a3   :  { %5355 = vmatpush1.bf16.msra.mxu0 %v9556_v55  ;;  %5914 = vmatpush1.bf16.msra.mxu1 %v9559_v56  ;;  %v9657_v55 = vld [vmem:[%s12952_s1 + $0x1704] ss:$16 sps:$4 sm:$0xff]   ;;  %v9660_v56 = vld [vmem:[%s12952_s1 + $0x170c] ss:$16 sps:$4 sm:$0xff]  }
 0x2a4   :  { %5356 = vmatprep.subr.bf16.mxu0 %v9564_v57  ;;  %5915 = vmatprep.subr.bf16.mxu1 %v9567_v58  ;;  %v9655_v57 = vld [vmem:[%s12952_s1 + $0x1700] ss:$16 sps:$4 sm:$0xff]   ;;  %v9658_v58 = vld [vmem:[%s12952_s1 + $0x1708] ss:$16 sps:$4 sm:$0xff]  }
 0x2a7   :  { %5357 = vmatpush1.bf16.msra.mxu0 %v9562_v59  ;;  %5916 = vmatpush1.bf16.msra.mxu1 %v9565_v60  ;;  %v9663_v59 = vld [vmem:[%s12952_s1 + $0x1724] ss:$16 sps:$4 sm:$0xff]   ;;  %v9666_v60 = vld [vmem:[%s12952_s1 + $0x172c] ss:$16 sps:$4 sm:$0xff]  }
 0x2a8   :  { %5358 = vmatprep.subr.bf16.mxu0 %v9570_v61  ;;  %5917 = vmatprep.subr.bf16.mxu1 %v9573_v62  ;;  %v9661_v61 = vld [vmem:[%s12952_s1 + $0x1720] ss:$16 sps:$4 sm:$0xff]   ;;  %v9664_v62 = vld [vmem:[%s12952_s1 + $0x1728] ss:$16 sps:$4 sm:$0xff]  }
 0x2ab   :  { %5359 = vmatpush1.bf16.msra.mxu0 %v9568_v63  ;;  %5918 = vmatpush1.bf16.msra.mxu1 %v9571_v0  ;;  %v9669_v63 = vld [vmem:[%s12952_s1 + $0x1744] ss:$16 sps:$4 sm:$0xff]   ;;  %v9672_v0 = vld [vmem:[%s12952_s1 + $0x174c] ss:$16 sps:$4 sm:$0xff]  }
 0x2ac   :  { %5360 = vmatprep.subr.bf16.mxu0 %v9576_v1  ;;  %5919 = vmatprep.subr.bf16.mxu1 %v9579_v2  ;;  %v9667_v1 = vld [vmem:[%s12952_s1 + $0x1740] ss:$16 sps:$4 sm:$0xff]   ;;  %v9670_v2 = vld [vmem:[%s12952_s1 + $0x1748] ss:$16 sps:$4 sm:$0xff]  }
 0x2af   :  { %5361 = vmatpush1.bf16.msra.mxu0 %v9574_v3  ;;  %5920 = vmatpush1.bf16.msra.mxu1 %v9577_v4  ;;  %v9675_v3 = vld [vmem:[%s12952_s1 + $0x1764] ss:$16 sps:$4 sm:$0xff]   ;;  %v9678_v4 = vld [vmem:[%s12952_s1 + $0x176c] ss:$16 sps:$4 sm:$0xff]  }
 0x2b0   :  { %5362 = vmatprep.subr.bf16.mxu0 %v9582_v5  ;;  %5921 = vmatprep.subr.bf16.mxu1 %v9585_v6  ;;  %v9673_v5 = vld [vmem:[%s12952_s1 + $0x1760] ss:$16 sps:$4 sm:$0xff]   ;;  %v9676_v6 = vld [vmem:[%s12952_s1 + $0x1768] ss:$16 sps:$4 sm:$0xff]  }
 0x2b3   :  { %5363 = vmatpush1.bf16.msra.mxu0 %v9580_v7  ;;  %5922 = vmatpush1.bf16.msra.mxu1 %v9583_v8  ;;  %v9681_v7 = vld [vmem:[%s12952_s1 + $0x1784] ss:$16 sps:$4 sm:$0xff]   ;;  %v9684_v8 = vld [vmem:[%s12952_s1 + $0x178c] ss:$16 sps:$4 sm:$0xff]  }
 0x2b4   :  { %5364 = vmatprep.subr.bf16.mxu0 %v9588_v9  ;;  %5923 = vmatprep.subr.bf16.mxu1 %v9591_v10  ;;  %v9679_v9 = vld [vmem:[%s12952_s1 + $0x1780] ss:$16 sps:$4 sm:$0xff]   ;;  %v9682_v10 = vld [vmem:[%s12952_s1 + $0x1788] ss:$16 sps:$4 sm:$0xff]  }
 0x2b7   :  { %5365 = vmatpush1.bf16.msra.mxu0 %v9586_v11  ;;  %5924 = vmatpush1.bf16.msra.mxu1 %v9589_v12  ;;  %v9687_v11 = vld [vmem:[%s12952_s1 + $0x17a4] ss:$16 sps:$4 sm:$0xff]   ;;  %v9690_v12 = vld [vmem:[%s12952_s1 + $0x17ac] ss:$16 sps:$4 sm:$0xff]  }
 0x2b8   :  { %5366 = vmatprep.subr.bf16.mxu0 %v9594_v13  ;;  %5925 = vmatprep.subr.bf16.mxu1 %v9597_v14  ;;  %v9685_v13 = vld [vmem:[%s12952_s1 + $0x17a0] ss:$16 sps:$4 sm:$0xff]   ;;  %v9688_v14 = vld [vmem:[%s12952_s1 + $0x17a8] ss:$16 sps:$4 sm:$0xff]  }
 0x2bb   :  { %5367 = vmatpush1.bf16.msra.mxu0 %v9592_v15  ;;  %5926 = vmatpush1.bf16.msra.mxu1 %v9595_v16  ;;  %v9693_v15 = vld [vmem:[%s12952_s1 + $0x17c4] ss:$16 sps:$4 sm:$0xff]   ;;  %v9696_v16 = vld [vmem:[%s12952_s1 + $0x17cc] ss:$16 sps:$4 sm:$0xff]  }
 0x2bc   :  { %5368 = vmatprep.subr.bf16.mxu0 %v9600_v17  ;;  %5927 = vmatprep.subr.bf16.mxu1 %v9603_v18  ;;  %v9691_v17 = vld [vmem:[%s12952_s1 + $0x17c0] ss:$16 sps:$4 sm:$0xff]   ;;  %v9694_v18 = vld [vmem:[%s12952_s1 + $0x17c8] ss:$16 sps:$4 sm:$0xff]  }
 0x2bf   :  { %5369 = vmatpush1.bf16.msra.mxu0 %v9598_v19  ;;  %5928 = vmatpush1.bf16.msra.mxu1 %v9601_v20  ;;  %v9699_v19 = vld [vmem:[%s12952_s1 + $0x17e4] ss:$16 sps:$4 sm:$0xff]   ;;  %v9702_v20 = vld [vmem:[%s12952_s1 + $0x17ec] ss:$16 sps:$4 sm:$0xff]  }
 0x2c0   :  { %5381 = vmatprep.subr.bf16.mxu0 %v9609_v22  ;;  %5940 = vmatprep.subr.bf16.mxu1 %v9612_v23  ;;  %v9700_v22 = vld [vmem:[%s12952_s1 + $0x17e8] ss:$16 sps:$4 sm:$0xff]   ;;  %v9708_v23 = vld [vmem:[%s12952_s1 + $0x1804] ss:$16 sps:$4 sm:$0xff]  }
 0x2c2   :  { %5371 = vmatmul.mubr.bf16.vlgmr.msra.gmra.mrb[0].mxu0 %v9604_v21  ;;  %5930 = vmatmul.mubr.bf16.vlgmr.msra.gmra.mrb[0].mxu1 %v9604_v21  ;;  %v9697_v21 = vld [vmem:[%s12952_s1 + $0x17e0] ss:$16 sps:$4 sm:$0xff]  }
 0x2c3   :  { %5382 = vmatpush1.bf16.msra.mxu0 %v9607_v24  ;;  %5941 = vmatpush1.bf16.msra.mxu1 %v9610_v25  ;;  %v9711_v24 = vld [vmem:[%s12952_s1 + $0x180c] ss:$16 sps:$4 sm:$0xff]  }
 0x2c4   :  { %5383 = vmatprep.subr.bf16.mxu0 %v9615_v26  ;;  %5942 = vmatprep.subr.bf16.mxu1 %v9618_v27  ;;  %v9703_v25 = vld [vmem:[%s12953_s0 + $0x58] ss:$100 sps:$4 sm:$0xff]   ;;  %v9706_v26 = vld [vmem:[%s12952_s1 + $0x1800] ss:$16 sps:$4 sm:$0xff]  }
 0x2c5   :  { %5413 = vmatprep.mubr.bf16.mxu0 %v9705_v28  ;;  %5972 = vmatprep.mubr.bf16.mxu1 %v9705_v28  ;;  %v9709_v27 = vld [vmem:[%s12952_s1 + $0x1808] ss:$16 sps:$4 sm:$0xff]   ;;  %v9714_v28 = vld [vmem:[%s12952_s1 + $0x1824] ss:$16 sps:$4 sm:$0xff]  }
 0x2c7   :  { %5384 = vmatpush1.bf16.msra.mxu0 %v9613_v29  ;;  %5943 = vmatpush1.bf16.msra.mxu1 %v9616_v30  ;;  %v9717_v29 = vld [vmem:[%s12952_s1 + $0x182c] ss:$16 sps:$4 sm:$0xff]   ;;  %v9712_v30 = vld [vmem:[%s12952_s1 + $0x1820] ss:$16 sps:$4 sm:$0xff]  }
 0x2c8   :  { %5385 = vmatprep.subr.bf16.mxu0 %v9621_v31  ;;  %5944 = vmatprep.subr.bf16.mxu1 %v9624_v32  ;;  %v9715_v31 = vld [vmem:[%s12952_s1 + $0x1828] ss:$16 sps:$4 sm:$0xff]   ;;  %v9720_v32 = vld [vmem:[%s12952_s1 + $0x1844] ss:$16 sps:$4 sm:$0xff]  }
 0x2cb   :  { %5386 = vmatpush1.bf16.msra.mxu0 %v9619_v33  ;;  %5945 = vmatpush1.bf16.msra.mxu1 %v9622_v34  ;;  %v9723_v33 = vld [vmem:[%s12952_s1 + $0x184c] ss:$16 sps:$4 sm:$0xff]   ;;  %v9963_v34 = vmov 0  }
 0x2cc   :  { %5387 = vmatprep.subr.bf16.mxu0 %v9627_v35  ;;  %5946 = vmatprep.subr.bf16.mxu1 %v9630_v36  ;;  %v9718_v35 = vld [vmem:[%s12952_s1 + $0x1840] ss:$16 sps:$4 sm:$0xff]   ;;  %v9721_v36 = vld [vmem:[%s12952_s1 + $0x1848] ss:$16 sps:$4 sm:$0xff]  }
 0x2cf   :  { %5388 = vmatpush1.bf16.msra.mxu0 %v9625_v37  ;;  %5947 = vmatpush1.bf16.msra.mxu1 %v9628_v38  ;;  %v9726_v37 = vld [vmem:[%s12952_s1 + $0x1864] ss:$16 sps:$4 sm:$0xff]   ;;  %v9729_v38 = vld [vmem:[%s12952_s1 + $0x186c] ss:$16 sps:$4 sm:$0xff]  }
 0x2d0   :  { %5389 = vmatprep.subr.bf16.mxu0 %v9633_v39  ;;  %5948 = vmatprep.subr.bf16.mxu1 %v9636_v40  ;;  %v9724_v39 = vld [vmem:[%s12952_s1 + $0x1860] ss:$16 sps:$4 sm:$0xff]   ;;  %v9727_v40 = vld [vmem:[%s12952_s1 + $0x1868] ss:$16 sps:$4 sm:$0xff]  }
 0x2d3   :  { %5390 = vmatpush1.bf16.msra.mxu0 %v9631_v41  ;;  %5949 = vmatpush1.bf16.msra.mxu1 %v9634_v42  ;;  %v9733_v41 = vld [vmem:[%s12954_s3 + $0x4] ss:$16 sps:$4 sm:$0xff]   ;;  %v9736_v42 = vld [vmem:[%s12954_s3 + $0xc] ss:$16 sps:$4 sm:$0xff]  }
 0x2d4   :  { %5391 = vmatprep.subr.bf16.mxu0 %v9639_v43  ;;  %5950 = vmatprep.subr.bf16.mxu1 %v9642_v44  ;;  %v9730_v43 = vld [vmem:[%s12953_s0 + $0x60] ss:$100 sps:$4 sm:$0xff]  }
 0x2d5   :  { %v9731_v44 = vld [vmem:[%s12954_s3] ss:$16 sps:$4 sm:$0xff]  }
 0x2d7   :  { %5392 = vmatpush1.bf16.msra.mxu0 %v9637_v45  ;;  %5951 = vmatpush1.bf16.msra.mxu1 %v9640_v46  ;;  %v9734_v45 = vld [vmem:[%s12954_s3 + $0x8] ss:$16 sps:$4 sm:$0xff]   ;;  %v9739_v46 = vld [vmem:[%s12954_s3 + $0x24] ss:$16 sps:$4 sm:$0xff]  }
 0x2d8   :  { %5393 = vmatprep.subr.bf16.mxu0 %v9645_v47  ;;  %5952 = vmatprep.subr.bf16.mxu1 %v9648_v48  ;;  %v9742_v47 = vld [vmem:[%s12954_s3 + $0x2c] ss:$16 sps:$4 sm:$0xff]   ;;  %v9737_v48 = vld [vmem:[%s12954_s3 + $0x20] ss:$16 sps:$4 sm:$0xff]  }
 0x2db   :  { %5394 = vmatpush1.bf16.msra.mxu0 %v9643_v49  ;;  %5953 = vmatpush1.bf16.msra.mxu1 %v9646_v50  ;;  %v9740_v49 = vld [vmem:[%s12954_s3 + $0x28] ss:$16 sps:$4 sm:$0xff]   ;;  %v9745_v50 = vld [vmem:[%s12954_s3 + $0x44] ss:$16 sps:$4 sm:$0xff]  }
 0x2dc   :  { %5395 = vmatprep.subr.bf16.mxu0 %v9651_v51  ;;  %5954 = vmatprep.subr.bf16.mxu1 %v9654_v52  ;;  %v9748_v51 = vld [vmem:[%s12954_s3 + $0x4c] ss:$16 sps:$4 sm:$0xff]   ;;  %v9743_v52 = vld [vmem:[%s12954_s3 + $0x40] ss:$16 sps:$4 sm:$0xff]  }
 0x2df   :  { %5396 = vmatpush1.bf16.msra.mxu0 %v9649_v53  ;;  %5955 = vmatpush1.bf16.msra.mxu1 %v9652_v54  ;;  %v9746_v53 = vld [vmem:[%s12954_s3 + $0x48] ss:$16 sps:$4 sm:$0xff]   ;;  %v9751_v54 = vld [vmem:[%s12954_s3 + $0x64] ss:$16 sps:$4 sm:$0xff]  }
 0x2e0   :  { %5397 = vmatprep.subr.bf16.mxu0 %v9657_v55  ;;  %5956 = vmatprep.subr.bf16.mxu1 %v9660_v56  ;;  %v9754_v55 = vld [vmem:[%s12954_s3 + $0x6c] ss:$16 sps:$4 sm:$0xff]   ;;  %v9749_v56 = vld [vmem:[%s12954_s3 + $0x60] ss:$16 sps:$4 sm:$0xff]  }
 0x2e3   :  { %5398 = vmatpush1.bf16.msra.mxu0 %v9655_v57  ;;  %5957 = vmatpush1.bf16.msra.mxu1 %v9658_v58  ;;  %v9752_v57 = vld [vmem:[%s12954_s3 + $0x68] ss:$16 sps:$4 sm:$0xff]   ;;  %v9757_v58 = vld [vmem:[%s12954_s3 + $0x84] ss:$16 sps:$4 sm:$0xff]  }
 0x2e4   :  { %5399 = vmatprep.subr.bf16.mxu0 %v9663_v59  ;;  %5958 = vmatprep.subr.bf16.mxu1 %v9666_v60  ;;  %v9760_v59 = vld [vmem:[%s12954_s3 + $0x8c] ss:$16 sps:$4 sm:$0xff]   ;;  %v9755_v60 = vld [vmem:[%s12954_s3 + $0x80] ss:$16 sps:$4 sm:$0xff]  }
 0x2e7   :  { %5400 = vmatpush1.bf16.msra.mxu0 %v9661_v61  ;;  %5959 = vmatpush1.bf16.msra.mxu1 %v9664_v62  ;;  %v9758_v61 = vld [vmem:[%s12954_s3 + $0x88] ss:$16 sps:$4 sm:$0xff]   ;;  %v9763_v62 = vld [vmem:[%s12954_s3 + $0xa4] ss:$16 sps:$4 sm:$0xff]  }
 0x2e8   :  { %5401 = vmatprep.subr.bf16.mxu0 %v9669_v63  ;;  %5960 = vmatprep.subr.bf16.mxu1 %v9672_v0  ;;  %v9766_v63 = vld [vmem:[%s12954_s3 + $0xac] ss:$16 sps:$4 sm:$0xff]   ;;  %v9761_v0 = vld [vmem:[%s12954_s3 + $0xa0] ss:$16 sps:$4 sm:$0xff]  }
 0x2eb   :  { %5402 = vmatpush1.bf16.msra.mxu0 %v9667_v1  ;;  %5961 = vmatpush1.bf16.msra.mxu1 %v9670_v2  ;;  %v9764_v1 = vld [vmem:[%s12954_s3 + $0xa8] ss:$16 sps:$4 sm:$0xff]   ;;  %v9769_v2 = vld [vmem:[%s12954_s3 + $0xc4] ss:$16 sps:$4 sm:$0xff]  }
 0x2ec   :  { %5403 = vmatprep.subr.bf16.mxu0 %v9675_v3  ;;  %5962 = vmatprep.subr.bf16.mxu1 %v9678_v4  ;;  %v9772_v3 = vld [vmem:[%s12954_s3 + $0xcc] ss:$16 sps:$4 sm:$0xff]   ;;  %v9767_v4 = vld [vmem:[%s12954_s3 + $0xc0] ss:$16 sps:$4 sm:$0xff]  }
 0x2ef   :  { %5404 = vmatpush1.bf16.msra.mxu0 %v9673_v5  ;;  %5963 = vmatpush1.bf16.msra.mxu1 %v9676_v6  ;;  %v9770_v5 = vld [vmem:[%s12954_s3 + $0xc8] ss:$16 sps:$4 sm:$0xff]   ;;  %v9775_v6 = vld [vmem:[%s12954_s3 + $0xe4] ss:$16 sps:$4 sm:$0xff]  }
 0x2f0   :  { %5405 = vmatprep.subr.bf16.mxu0 %v9681_v7  ;;  %5964 = vmatprep.subr.bf16.mxu1 %v9684_v8  ;;  %v9778_v7 = vld [vmem:[%s12954_s3 + $0xec] ss:$16 sps:$4 sm:$0xff]   ;;  %v9773_v8 = vld [vmem:[%s12954_s3 + $0xe0] ss:$16 sps:$4 sm:$0xff]  }
 0x2f3   :  { %5406 = vmatpush1.bf16.msra.mxu0 %v9679_v9  ;;  %5965 = vmatpush1.bf16.msra.mxu1 %v9682_v10  ;;  %v9776_v9 = vld [vmem:[%s12954_s3 + $0xe8] ss:$16 sps:$4 sm:$0xff]   ;;  %v9781_v10 = vld [vmem:[%s12954_s3 + $0x104] ss:$16 sps:$4 sm:$0xff]  }
 0x2f4   :  { %5407 = vmatprep.subr.bf16.mxu0 %v9687_v11  ;;  %5966 = vmatprep.subr.bf16.mxu1 %v9690_v12  ;;  %v9784_v11 = vld [vmem:[%s12954_s3 + $0x10c] ss:$16 sps:$4 sm:$0xff]   ;;  %v9779_v12 = vld [vmem:[%s12954_s3 + $0x100] ss:$16 sps:$4 sm:$0xff]  }
 0x2f7   :  { %5408 = vmatpush1.bf16.msra.mxu0 %v9685_v13  ;;  %5967 = vmatpush1.bf16.msra.mxu1 %v9688_v14  ;;  %v9782_v13 = vld [vmem:[%s12954_s3 + $0x108] ss:$16 sps:$4 sm:$0xff]   ;;  %v9787_v14 = vld [vmem:[%s12954_s3 + $0x124] ss:$16 sps:$4 sm:$0xff]  }
 0x2f8   :  { %5409 = vmatprep.subr.bf16.mxu0 %v9693_v15  ;;  %5968 = vmatprep.subr.bf16.mxu1 %v9696_v16  ;;  %v9790_v15 = vld [vmem:[%s12954_s3 + $0x12c] ss:$16 sps:$4 sm:$0xff]   ;;  %v9785_v16 = vld [vmem:[%s12954_s3 + $0x120] ss:$16 sps:$4 sm:$0xff]  }
 0x2fb   :  { %5410 = vmatpush1.bf16.msra.mxu0 %v9691_v17  ;;  %5969 = vmatpush1.bf16.msra.mxu1 %v9694_v18  ;;  %v9788_v17 = vld [vmem:[%s12954_s3 + $0x128] ss:$16 sps:$4 sm:$0xff]   ;;  %v9793_v18 = vld [vmem:[%s12954_s3 + $0x144] ss:$16 sps:$4 sm:$0xff]  }
 0x2fc   :  { %5411 = vmatprep.subr.bf16.mxu0 %v9699_v19  ;;  %5970 = vmatprep.subr.bf16.mxu1 %v9702_v20  ;;  %v9796_v19 = vld [vmem:[%s12954_s3 + $0x14c] ss:$16 sps:$4 sm:$0xff]   ;;  %v9791_v20 = vld [vmem:[%s12954_s3 + $0x140] ss:$16 sps:$4 sm:$0xff]  }
 0x2ff   :  { %5412 = vmatpush1.bf16.msra.mxu0 %v9697_v21  ;;  %5971 = vmatpush1.bf16.msra.mxu1 %v9700_v22  ;;  %v9794_v21 = vld [vmem:[%s12954_s3 + $0x148] ss:$16 sps:$4 sm:$0xff]   ;;  %v9799_v22 = vld [vmem:[%s12954_s3 + $0x164] ss:$16 sps:$4 sm:$0xff]  }
 0x300   :  { %5424 = vmatprep.subr.bf16.mxu0 %v9708_v23  ;;  %5983 = vmatprep.subr.bf16.mxu1 %v9711_v24  ;;  %v9802_v23 = vld [vmem:[%s12954_s3 + $0x16c] ss:$16 sps:$4 sm:$0xff]   ;;  %v9797_v24 = vld [vmem:[%s12954_s3 + $0x160] ss:$16 sps:$4 sm:$0xff]  }
 0x302   :  { %5414 = vmatmul.mubr.bf16.vlgmr.msra.gmra.mrb[0].mxu0 %v9703_v25  ;;  %5973 = vmatmul.mubr.bf16.vlgmr.msra.gmra.mrb[0].mxu1 %v9703_v25  ;;  %v9800_v25 = vld [vmem:[%s12954_s3 + $0x168] ss:$16 sps:$4 sm:$0xff]  }
 0x303   :  { %5425 = vmatpush1.bf16.msra.mxu0 %v9706_v26  ;;  %5984 = vmatpush1.bf16.msra.mxu1 %v9709_v27  ;;  %v9805_v26 = vld [vmem:[%s12954_s3 + $0x184] ss:$16 sps:$4 sm:$0xff]   ;;  %v9808_v27 = vld [vmem:[%s12954_s3 + $0x18c] ss:$16 sps:$4 sm:$0xff]  }
 0x304   :  { %5426 = vmatprep.subr.bf16.mxu0 %v9714_v28  ;;  %5985 = vmatprep.subr.bf16.mxu1 %v9717_v29  ;;  %v9803_v28 = vld [vmem:[%s12954_s3 + $0x180] ss:$16 sps:$4 sm:$0xff]   ;;  %v9806_v29 = vld [vmem:[%s12954_s3 + $0x188] ss:$16 sps:$4 sm:$0xff]  }
 0x305   :  { %5456 = vmatprep.mubr.bf16.mxu0 %v9963_v34  ;;  %6015 = vmatprep.mubr.bf16.mxu1 %v9963_v34  ;;  %v9817_v34 = vld [vmem:[%s12954_s3 + $0x1c4] ss:$16 sps:$4 sm:$0xff]  }
 0x307   :  { %5427 = vmatpush1.bf16.msra.mxu0 %v9712_v30  ;;  %5986 = vmatpush1.bf16.msra.mxu1 %v9715_v31  ;;  %v9811_v30 = vld [vmem:[%s12954_s3 + $0x1a4] ss:$16 sps:$4 sm:$0xff]   ;;  %v9814_v31 = vld [vmem:[%s12954_s3 + $0x1ac] ss:$16 sps:$4 sm:$0xff]  }
 0x308   :  { %5428 = vmatprep.subr.bf16.mxu0 %v9720_v32  ;;  %5987 = vmatprep.subr.bf16.mxu1 %v9723_v33  ;;  %v9809_v32 = vld [vmem:[%s12954_s3 + $0x1a0] ss:$16 sps:$4 sm:$0xff]   ;;  %v9812_v33 = vld [vmem:[%s12954_s3 + $0x1a8] ss:$16 sps:$4 sm:$0xff]  }
 0x30b   :  { %5429 = vmatpush1.bf16.msra.mxu0 %v9718_v35  ;;  %5988 = vmatpush1.bf16.msra.mxu1 %v9721_v36  ;;  %v9820_v35 = vld [vmem:[%s12954_s3 + $0x1cc] ss:$16 sps:$4 sm:$0xff]   ;;  %v9815_v36 = vld [vmem:[%s12954_s3 + $0x1c0] ss:$16 sps:$4 sm:$0xff]  }
 0x30c   :  { %5430 = vmatprep.subr.bf16.mxu0 %v9726_v37  ;;  %5989 = vmatprep.subr.bf16.mxu1 %v9729_v38  ;;  %v9818_v37 = vld [vmem:[%s12954_s3 + $0x1c8] ss:$16 sps:$4 sm:$0xff]   ;;  %v9823_v38 = vld [vmem:[%s12954_s3 + $0x1e4] ss:$16 sps:$4 sm:$0xff]  }
 0x30f   :  { %5431 = vmatpush1.bf16.msra.mxu0 %v9724_v39  ;;  %5990 = vmatpush1.bf16.msra.mxu1 %v9727_v40  ;;  %v9826_v39 = vld [vmem:[%s12954_s3 + $0x1ec] ss:$16 sps:$4 sm:$0xff]   ;;  %v9821_v40 = vld [vmem:[%s12954_s3 + $0x1e0] ss:$16 sps:$4 sm:$0xff]  }
 0x310   :  { %6828 = vmatprep.subr.bf16.mxu0 %v9733_v41  ;;  %6914 = vmatprep.subr.bf16.mxu1 %v9736_v42  ;;  %v9824_v41 = vld [vmem:[%s12954_s3 + $0x1e8] ss:$16 sps:$4 sm:$0xff]   ;;  %v9829_v42 = vld [vmem:[%s12954_s3 + $0x204] ss:$16 sps:$4 sm:$0xff]  }
 0x312   :  { %8190 = vmatmul.mubr.msk.bf16.vlgmr.msra.gmra.mrb[0].mxu0 %vm4904_vm0, %v9730_v43  ;;  %8191 = vmatmul.mubr.msk.bf16.vlgmr.msra.gmra.mrb[0].mxu1 %vm4904_vm0, %v9730_v43  ;;  %v9832_v43 = vld [vmem:[%s12954_s3 + $0x20c] ss:$16 sps:$4 sm:$0xff]  }
 0x313   :  { %6829 = vmatpush1.bf16.msra.mxu0 %v9731_v44  ;;  %6915 = vmatpush1.bf16.msra.mxu1 %v9734_v45  ;;  %v839_v44 = vlaneseq }
 0x314   :  { %6830 = vmatprep.subr.bf16.mxu0 %v9739_v46  ;;  %6916 = vmatprep.subr.bf16.mxu1 %v9742_v47 }
 0x315   :  { %v12629_v45 = vshrl.u32 %v839_v44, 7  ;;  %v9866_v44 = vld [vmem:[%s12954_s3 + $0x2c8] ss:$16 sps:$4 sm:$0xff]  }
 0x317   :  { %6831 = vmatpush1.bf16.msra.mxu0 %v9737_v48  ;;  %6917 = vmatpush1.bf16.msra.mxu1 %v9740_v49  ;;  %v841_v46 = vsub.s32 0, %v12629_v45  ;;  %v849_v47 = vsub.s32 2, %v12629_v45  ;;  %v837_v48 = vld [vmem:[%s12956_s2] sm:$0xf]  ;;  %v845_v49 = vsub.s32 1, %v12629_v45 }
 0x318   :  { %6832 = vmatprep.subr.bf16.mxu0 %v9745_v50  ;;  %6918 = vmatprep.subr.bf16.mxu1 %v9748_v51  ;;  %v853_v50 = vsub.s32 3, %v12629_v45 }
 0x319   :  { %v842_v51 = vrot.slane %v837_v48, %v841_v46 }
 0x31b   :  { %6833 = vmatpush1.bf16.msra.mxu0 %v9743_v52  ;;  %6919 = vmatpush1.bf16.msra.mxu1 %v9746_v53  ;;  %v850_v52 = vrot.slane %v837_v48, %v849_v47  ;;  %v846_v53 = vrot.slane %v837_v48, %v845_v49 }
 0x31c   :  { %6834 = vmatprep.subr.bf16.mxu0 %v9751_v54  ;;  %6920 = vmatprep.subr.bf16.mxu1 %v9754_v55  ;;  %v854_v54 = vrot.slane %v837_v48, %v853_v50  ;;  %v9871_v48 = vld [vmem:[%s12954_s3 + $0x2e4] ss:$16 sps:$4 sm:$0xff]  }
 0x31f   :  { %6835 = vmatpush1.bf16.msra.mxu0 %v9749_v56  ;;  %6921 = vmatpush1.bf16.msra.mxu1 %v9752_v57 }
 0x320   :  { %6836 = vmatprep.subr.bf16.mxu0 %v9757_v58  ;;  %6922 = vmatprep.subr.bf16.mxu1 %v9760_v59 }
 0x323   :  { %6837 = vmatpush1.bf16.msra.mxu0 %v9755_v60  ;;  %6923 = vmatpush1.bf16.msra.mxu1 %v9758_v61 }
 0x324   :  { %6838 = vmatprep.subr.bf16.mxu0 %v9763_v62  ;;  %6924 = vmatprep.subr.bf16.mxu1 %v9766_v63 }
 0x327   :  { %6839 = vmatpush1.bf16.msra.mxu0 %v9761_v0  ;;  %6925 = vmatpush1.bf16.msra.mxu1 %v9764_v1 }
 0x328   :  { %6840 = vmatprep.subr.bf16.mxu0 %v9769_v2  ;;  %6926 = vmatprep.subr.bf16.mxu1 %v9772_v3 }
 0x32b   :  { %6841 = vmatpush1.bf16.msra.mxu0 %v9767_v4  ;;  %6927 = vmatpush1.bf16.msra.mxu1 %v9770_v5 }
 0x32c   :  { %6842 = vmatprep.subr.bf16.mxu0 %v9775_v6  ;;  %6928 = vmatprep.subr.bf16.mxu1 %v9778_v7 }
 0x32f   :  { %6843 = vmatpush1.bf16.msra.mxu0 %v9773_v8  ;;  %6929 = vmatpush1.bf16.msra.mxu1 %v9776_v9 }
 0x330   :  { %6844 = vmatprep.subr.bf16.mxu0 %v9781_v10  ;;  %6930 = vmatprep.subr.bf16.mxu1 %v9784_v11 }
 0x333   :  { %6845 = vmatpush1.bf16.msra.mxu0 %v9779_v12  ;;  %6931 = vmatpush1.bf16.msra.mxu1 %v9782_v13 }
 0x334   :  { %6846 = vmatprep.subr.bf16.mxu0 %v9787_v14  ;;  %6932 = vmatprep.subr.bf16.mxu1 %v9790_v15 }
 0x337   :  { %6847 = vmatpush1.bf16.msra.mxu0 %v9785_v16  ;;  %6933 = vmatpush1.bf16.msra.mxu1 %v9788_v17 }
 0x338   :  { %6848 = vmatprep.subr.bf16.mxu0 %v9793_v18  ;;  %6934 = vmatprep.subr.bf16.mxu1 %v9796_v19  ;;  %v9827_v19 = vld [vmem:[%s12954_s3 + $0x200] ss:$16 sps:$4 sm:$0xff]  }
 0x33b   :  { %6849 = vmatpush1.bf16.msra.mxu0 %v9791_v20  ;;  %6935 = vmatpush1.bf16.msra.mxu1 %v9794_v21  ;;  %v9830_v20 = vld [vmem:[%s12954_s3 + $0x208] ss:$16 sps:$4 sm:$0xff]   ;;  %v9835_v21 = vld [vmem:[%s12954_s3 + $0x224] ss:$16 sps:$4 sm:$0xff]  }
 0x33c   :  { %6850 = vmatprep.subr.bf16.mxu0 %v9799_v22  ;;  %6936 = vmatprep.subr.bf16.mxu1 %v9802_v23  ;;  %v9838_v22 = vld [vmem:[%s12954_s3 + $0x22c] ss:$16 sps:$4 sm:$0xff]   ;;  %v9833_v23 = vld [vmem:[%s12954_s3 + $0x220] ss:$16 sps:$4 sm:$0xff]  }
 0x33f   :  { %6851 = vmatpush1.bf16.msra.mxu0 %v9797_v24  ;;  %6937 = vmatpush1.bf16.msra.mxu1 %v9800_v25  ;;  %v9836_v24 = vld [vmem:[%s12954_s3 + $0x228] ss:$16 sps:$4 sm:$0xff]   ;;  %v9841_v25 = vld [vmem:[%s12954_s3 + $0x244] ss:$16 sps:$4 sm:$0xff]  }
 0x340   :  { %6852 = vmatprep.subr.bf16.mxu0 %v9805_v26  ;;  %6938 = vmatprep.subr.bf16.mxu1 %v9808_v27  ;;  %v9844_v26 = vld [vmem:[%s12954_s3 + $0x24c] ss:$16 sps:$4 sm:$0xff]   ;;  %v9839_v27 = vld [vmem:[%s12954_s3 + $0x240] ss:$16 sps:$4 sm:$0xff]  }
 0x343   :  { %6853 = vmatpush1.bf16.msra.mxu0 %v9803_v28  ;;  %6939 = vmatpush1.bf16.msra.mxu1 %v9806_v29  ;;  %v9842_v28 = vld [vmem:[%s12954_s3 + $0x248] ss:$16 sps:$4 sm:$0xff]   ;;  %v9847_v29 = vld [vmem:[%s12954_s3 + $0x264] ss:$16 sps:$4 sm:$0xff]  }
 0x344   :  { %6854 = vmatprep.subr.bf16.mxu0 %v9811_v30  ;;  %6940 = vmatprep.subr.bf16.mxu1 %v9814_v31  ;;  %v9850_v30 = vld [vmem:[%s12954_s3 + $0x26c] ss:$16 sps:$4 sm:$0xff]   ;;  %v9845_v31 = vld [vmem:[%s12954_s3 + $0x260] ss:$16 sps:$4 sm:$0xff]  }
 0x347   :  { %6855 = vmatpush1.bf16.msra.mxu0 %v9809_v32  ;;  %6941 = vmatpush1.bf16.msra.mxu1 %v9812_v33  ;;  %v9848_v32 = vld [vmem:[%s12954_s3 + $0x268] ss:$16 sps:$4 sm:$0xff]   ;;  %v9853_v33 = vld [vmem:[%s12954_s3 + $0x284] ss:$16 sps:$4 sm:$0xff]  }
 0x348   :  { %6856 = vmatprep.subr.bf16.mxu0 %v9817_v34  ;;  %6942 = vmatprep.subr.bf16.mxu1 %v9820_v35  ;;  %v9856_v34 = vld [vmem:[%s12954_s3 + $0x28c] ss:$16 sps:$4 sm:$0xff]   ;;  %v9851_v35 = vld [vmem:[%s12954_s3 + $0x280] ss:$16 sps:$4 sm:$0xff]  }
 0x34b   :  { %6857 = vmatpush1.bf16.msra.mxu0 %v9815_v36  ;;  %6943 = vmatpush1.bf16.msra.mxu1 %v9818_v37  ;;  %v9854_v36 = vld [vmem:[%s12954_s3 + $0x288] ss:$16 sps:$4 sm:$0xff]   ;;  %v9859_v37 = vld [vmem:[%s12954_s3 + $0x2a4] ss:$16 sps:$4 sm:$0xff]  }
 0x34c   :  { %6858 = vmatprep.subr.bf16.mxu0 %v9823_v38  ;;  %6944 = vmatprep.subr.bf16.mxu1 %v9826_v39  ;;  %v9862_v38 = vld [vmem:[%s12954_s3 + $0x2ac] ss:$16 sps:$4 sm:$0xff]   ;;  %v9857_v39 = vld [vmem:[%s12954_s3 + $0x2a0] ss:$16 sps:$4 sm:$0xff]  }
 0x34f   :  { %6859 = vmatpush1.bf16.msra.mxu0 %v9821_v40  ;;  %6945 = vmatpush1.bf16.msra.mxu1 %v9824_v41  ;;  %v9860_v40 = vld [vmem:[%s12954_s3 + $0x2a8] ss:$16 sps:$4 sm:$0xff]   ;;  %v9865_v41 = vld [vmem:[%s12954_s3 + $0x2c4] ss:$16 sps:$4 sm:$0xff]  }
 0x350   :  { %6871 = vmatprep.subr.bf16.mxu0 %v9829_v42  ;;  %6957 = vmatprep.subr.bf16.mxu1 %v9832_v43  ;;  %v9868_v42 = vld [vmem:[%s12954_s3 + $0x2cc] ss:$16 sps:$4 sm:$0xff]   ;;  %v9863_v43 = vld [vmem:[%s12954_s3 + $0x2c0] ss:$16 sps:$4 sm:$0xff]  }
 0x3e5   :  { %v5458_v55 = vpop.f32.mrb[0].mxu0  ;;  %v6017_v56 = vpop.f32.mrb[0].mxu1 }
 0x3e6   :  { %v8397_v57 = vadd.f32 %v5458_v55, %v842_v51  ;;  %v8401_v58 = vadd.f32 %v6017_v56, %v850_v52  ;;  %v5460_v59 = vpop.f32.mrb[1].mxu0  ;;  %v6019_v60 = vpop.f32.mrb[1].mxu1  ;;  %v9880_v55 = vld [vmem:[%s12954_s3 + $0x30c] ss:$16 sps:$4 sm:$0xff]   ;;  %v9875_v56 = vld [vmem:[%s12954_s3 + $0x300] ss:$16 sps:$4 sm:$0xff]  }
 0x3e7   :  { %v8398_v61 = vadd.f32 %v5460_v59, %v846_v53  ;;  %v8402_v62 = vadd.f32 %v6019_v60, %v854_v54  ;;  %v5462_v63 = vpop.f32.mrb[2].mxu0  ;;  %v6021_v0 = vpop.f32.mrb[2].mxu1  ;;  %v9886_v59 = vld [vmem:[%s12954_s3 + $0x32c] ss:$16 sps:$4 sm:$0xff]   ;;  %v9881_v60 = vld [vmem:[%s12954_s3 + $0x320] ss:$16 sps:$4 sm:$0xff]  }
 0x3e8   :  { %v8399_v1 = vadd.f32 %v5462_v63, %v842_v51  ;;  %v8403_v2 = vadd.f32 %v6021_v0, %v850_v52  ;;  %v5464_v3 = vpop.f32.mrb[3].mxu0  ;;  %v6023_v4 = vpop.f32.mrb[3].mxu1  ;;  %v6026_v7 = vmax.f32 %v8397_v57, 0.0  ;;  %v6028_v8 = vmax.f32 %v8401_v58, 0.0  ;;  %v9874_v51 = vld [vmem:[%s12954_s3 + $0x2ec] ss:$16 sps:$4 sm:$0xff]  }
 0x3e9   :  { %v8400_v5 = vadd.f32 %v5464_v3, %v846_v53  ;;  %v8404_v6 = vadd.f32 %v6023_v4, %v854_v54  ;;  %v6027_v11 = vmax.f32 %v8398_v61, 0.0  ;;  %v6029_v12 = vmax.f32 %v8402_v62, 0.0  ;;  %v9869_v52 = vld [vmem:[%s12954_s3 + $0x2e0] ss:$16 sps:$4 sm:$0xff]   ;;  %v9872_v53 = vld [vmem:[%s12954_s3 + $0x2e8] ss:$16 sps:$4 sm:$0xff]  }
 0x3ea   :  { %v6030_v9 = vmax.f32 %v8399_v1, 0.0  ;;  %v6032_v10 = vmax.f32 %v8403_v2, 0.0  ;;  %v9877_v54 = vld [vmem:[%s12954_s3 + $0x304] ss:$16 sps:$4 sm:$0xff]   ;;  %v9878_v57 = vld [vmem:[%s12954_s3 + $0x308] ss:$16 sps:$4 sm:$0xff]  }
 0x3eb   :  { %v6031_v13 = vmax.f32 %v8400_v5, 0.0  ;;  %v6033_v14 = vmax.f32 %v8404_v6, 0.0  ;;  %v9883_v58 = vld [vmem:[%s12954_s3 + $0x324] ss:$16 sps:$4 sm:$0xff]   ;;  %v9884_v61 = vld [vmem:[%s12954_s3 + $0x328] ss:$16 sps:$4 sm:$0xff]  }
 0x3ec   :  { %v6034_v15 = vpack.c.bf16 %v6030_v9, %v6026_v7  ;;  %v12646_v16 = vpack.c.bf16 %v6032_v10, %v6028_v8  ;;  %v9889_v62 = vld [vmem:[%s12954_s3 + $0x344] ss:$16 sps:$4 sm:$0xff]   ;;  %v9892_v63 = vld [vmem:[%s12954_s3 + $0x34c] ss:$16 sps:$4 sm:$0xff]   ;;  %v9887_v0 = vld [vmem:[%s12954_s3 + $0x340] ss:$16 sps:$4 sm:$0xff]  }
 0x3ed   :  { %v6035_v17 = vpack.c.bf16 %v6031_v13, %v6027_v11  ;;  %v6037_v18 = vpack.c.bf16 %v6033_v14, %v6029_v12  ;;  %v9890_v1 = vld [vmem:[%s12954_s3 + $0x348] ss:$16 sps:$4 sm:$0xff]   ;;  %v9895_v2 = vld [vmem:[%s12954_s3 + $0x364] ss:$16 sps:$4 sm:$0xff]   ;;  %v9898_v3 = vld [vmem:[%s12954_s3 + $0x36c] ss:$16 sps:$4 sm:$0xff]  }
 0x3ee   :  { %v9893_v4 = vld [vmem:[%s12954_s3 + $0x360] ss:$16 sps:$4 sm:$0xff]   ;;  %v9896_v5 = vld [vmem:[%s12954_s3 + $0x368] ss:$16 sps:$4 sm:$0xff]   ;;  %v9901_v6 = vld [vmem:[%s12954_s3 + $0x384] ss:$16 sps:$4 sm:$0xff]  }
 0x3ef   :  { %6860 = vmatprep.mubr.bf16.mxu0 %v6035_v17  ;;  %6946 = vmatprep.mubr.bf16.mxu1 %v6035_v17  ;;  %v9904_v7 = vld [vmem:[%s12954_s3 + $0x38c] ss:$16 sps:$4 sm:$0xff]   ;;  %v9899_v8 = vld [vmem:[%s12954_s3 + $0x380] ss:$16 sps:$4 sm:$0xff]   ;;  %v9902_v9 = vld [vmem:[%s12954_s3 + $0x388] ss:$16 sps:$4 sm:$0xff]  }
 0x3f0   :  { %6861 = vmatmul.mubr.bf16.vlgmr.msra.gmra.mrb[4].mxu0 %v6034_v15  ;;  %6947 = vmatmul.mubr.bf16.vlgmr.msra.gmra.mrb[4].mxu1 %v6034_v15  ;;  %v9907_v10 = vld [vmem:[%s12954_s3 + $0x3a4] ss:$16 sps:$4 sm:$0xff]   ;;  %v9910_v11 = vld [vmem:[%s12954_s3 + $0x3ac] ss:$16 sps:$4 sm:$0xff]   ;;  %v9905_v12 = vld [vmem:[%s12954_s3 + $0x3a0] ss:$16 sps:$4 sm:$0xff]  }
 0x3f1   :  { %6872 = vmatpush1.bf16.msra.mxu0 %v9827_v19  ;;  %6958 = vmatpush1.bf16.msra.mxu1 %v9830_v20  ;;  %v9908_v13 = vld [vmem:[%s12954_s3 + $0x3a8] ss:$16 sps:$4 sm:$0xff]   ;;  %v9913_v14 = vld [vmem:[%s12954_s3 + $0x3c4] ss:$16 sps:$4 sm:$0xff]   ;;  %v9916_v15 = vld [vmem:[%s12954_s3 + $0x3cc] ss:$16 sps:$4 sm:$0xff]  }
 0x3f2   :  { %6903 = vmatprep.mubr.bf16.mxu0 %v6037_v18  ;;  %6989 = vmatprep.mubr.bf16.mxu1 %v6037_v18  ;;  %v9911_v17 = vld [vmem:[%s12954_s3 + $0x3c0] ss:$16 sps:$4 sm:$0xff]   ;;  %v9914_v18 = vld [vmem:[%s12954_s3 + $0x3c8] ss:$16 sps:$4 sm:$0xff]   ;;  %v9919_v19 = vld [vmem:[%s12954_s3 + $0x3e4] ss:$16 sps:$4 sm:$0xff]  }
 0x3f3   :  { %6873 = vmatprep.subr.bf16.mxu0 %v9835_v21  ;;  %6959 = vmatprep.subr.bf16.mxu1 %v9838_v22  ;;  %v9922_v20 = vld [vmem:[%s12954_s3 + $0x3ec] ss:$16 sps:$4 sm:$0xff]   ;;  %v9917_v21 = vld [vmem:[%s12954_s3 + $0x3e0] ss:$16 sps:$4 sm:$0xff]   ;;  %v9920_v22 = vld [vmem:[%s12954_s3 + $0x3e8] ss:$16 sps:$4 sm:$0xff]  }
 0x3f5   :  { %6874 = vmatpush1.bf16.msra.mxu0 %v9833_v23  ;;  %6960 = vmatpush1.bf16.msra.mxu1 %v9836_v24  ;;  %v9923_v23 = vld [vmem:[%s12955_s5 + $0x40] sm:$0xff]  }
 0x3f6   :  { %6875 = vmatprep.subr.bf16.mxu0 %v9841_v25  ;;  %6961 = vmatprep.subr.bf16.mxu1 %v9844_v26  ;;  %v9924_v24 = vld [vmem:[%s12955_s5 + $0xc0] sm:$0xff]  }
 0x3f7   :  { %v9925_v25 = vld [vmem:[%s12955_s5] sm:$0xff]  }
 0x3f8   :  { %v9926_v26 = vld [vmem:[%s12955_s5 + $0x80] sm:$0xff]  }
 0x3f9   :  { %6876 = vmatpush1.bf16.msra.mxu0 %v9839_v27  ;;  %6962 = vmatpush1.bf16.msra.mxu1 %v9842_v28  ;;  %v9927_v27 = vld [vmem:[%s12955_s5 + $0x48] sm:$0xff]  }
 0x3fa   :  { %6877 = vmatprep.subr.bf16.mxu0 %v9847_v29  ;;  %6963 = vmatprep.subr.bf16.mxu1 %v9850_v30  ;;  %v9928_v28 = vld [vmem:[%s12955_s5 + $0xc8] sm:$0xff]  }
 0x3fb   :  { %v9929_v29 = vld [vmem:[%s12955_s5 + $0x8] sm:$0xff]  }
 0x3fc   :  { %v9930_v30 = vld [vmem:[%s12955_s5 + $0x88] sm:$0xff]  }
 0x3fd   :  { %6878 = vmatpush1.bf16.msra.mxu0 %v9845_v31  ;;  %6964 = vmatpush1.bf16.msra.mxu1 %v9848_v32  ;;  %v9931_v31 = vld [vmem:[%s12955_s5 + $0x50] sm:$0xff]  }
 0x3fe   :  { %6879 = vmatprep.subr.bf16.mxu0 %v9853_v33  ;;  %6965 = vmatprep.subr.bf16.mxu1 %v9856_v34  ;;  %v9933_v32 = vld [vmem:[%s12955_s5 + $0x10] sm:$0xff]   ;;  %v9935_v34 = vld [vmem:[%s12955_s5 + $0x58] sm:$0xff]  }
 0x3ff   :  { %v9934_v33 = vld [vmem:[%s12955_s5 + $0x90] sm:$0xff]  }
 0x401   :  { %6880 = vmatpush1.bf16.msra.mxu0 %v9851_v35  ;;  %6966 = vmatpush1.bf16.msra.mxu1 %v9854_v36  ;;  %v9936_v35 = vld [vmem:[%s12955_s5 + $0xd8] sm:$0xff]  }
 0x402   :  { %6881 = vmatprep.subr.bf16.mxu0 %v9859_v37  ;;  %6967 = vmatprep.subr.bf16.mxu1 %v9862_v38  ;;  %v9937_v36 = vld [vmem:[%s12955_s5 + $0x18] sm:$0xff]   ;;  %v9939_v38 = vld [vmem:[%s12955_s5 + $0x60] sm:$0xff]  }
 0x403   :  { %v9938_v37 = vld [vmem:[%s12955_s5 + $0x98] sm:$0xff]  }
 0x405   :  { %6882 = vmatpush1.bf16.msra.mxu0 %v9857_v39  ;;  %6968 = vmatpush1.bf16.msra.mxu1 %v9860_v40  ;;  %v9940_v39 = vld [vmem:[%s12955_s5 + $0xe0] sm:$0xff]  }
 0x406   :  { %6883 = vmatprep.subr.bf16.mxu0 %v9865_v41  ;;  %6969 = vmatprep.subr.bf16.mxu1 %v9868_v42  ;;  %v9941_v40 = vld [vmem:[%s12955_s5 + $0x20] sm:$0xff]   ;;  %v9943_v42 = vld [vmem:[%s12955_s5 + $0x68] sm:$0xff]  }
 0x407   :  { %v9942_v41 = vld [vmem:[%s12955_s5 + $0xa0] sm:$0xff]  }
 0x409   :  { %6884 = vmatpush1.bf16.msra.mxu0 %v9863_v43  ;;  %6970 = vmatpush1.bf16.msra.mxu1 %v9866_v44  ;;  %v9944_v43 = vld [vmem:[%s12955_s5 + $0xe8] sm:$0xff]  }
 0x40a   :  { %6885 = vmatprep.subr.bf16.mxu0 %v9871_v48  ;;  %6971 = vmatprep.subr.bf16.mxu1 %v9874_v51  ;;  %v9945_v44 = vld [vmem:[%s12955_s5 + $0x28] sm:$0xff]   ;;  %v9947_v51 = vld [vmem:[%s12955_s5 + $0x70] sm:$0xff]  }
 0x40b   :  { %v9946_v48 = vld [vmem:[%s12955_s5 + $0xa8] sm:$0xff]  }
 0x40d   :  { %6886 = vmatpush1.bf16.msra.mxu0 %v9869_v52  ;;  %6972 = vmatpush1.bf16.msra.mxu1 %v9872_v53  ;;  %v9948_v52 = vld [vmem:[%s12955_s5 + $0xf0] sm:$0xff]  }
 0x40e   :  { %6887 = vmatprep.subr.bf16.mxu0 %v9877_v54  ;;  %6973 = vmatprep.subr.bf16.mxu1 %v9880_v55  ;;  %v9949_v53 = vld [vmem:[%s12955_s5 + $0x30] sm:$0xff]   ;;  %v9951_v55 = vld [vmem:[%s12955_s5 + $0x78] sm:$0xff]  }
 0x40f   :  { %v9950_v54 = vld [vmem:[%s12955_s5 + $0xb0] sm:$0xff]  }
 0x411   :  { %6888 = vmatpush1.bf16.msra.mxu0 %v9875_v56  ;;  %6974 = vmatpush1.bf16.msra.mxu1 %v9878_v57  ;;  %v9952_v56 = vld [vmem:[%s12955_s5 + $0xf8] sm:$0xff]  }
 0x412   :  { %6889 = vmatprep.subr.bf16.mxu0 %v9883_v58  ;;  %6975 = vmatprep.subr.bf16.mxu1 %v9886_v59  ;;  %v9953_v57 = vld [vmem:[%s12955_s5 + $0x38] sm:$0xff]   ;;  %v6166_v59 = vld [vmem:[%s12957_s4] sm:$0xf] }
 0x413   :  { %v9954_v58 = vld [vmem:[%s12955_s5 + $0xb8] sm:$0xff]  }
 0x415   :  { %6890 = vmatpush1.bf16.msra.mxu0 %v9881_v60  ;;  %6976 = vmatpush1.bf16.msra.mxu1 %v9884_v61  ;;  %v6171_v60 = vrot.slane %v6166_v59, %v841_v46  ;;  %v6179_v61 = vrot.slane %v6166_v59, %v849_v47 }
 0x416   :  { %6891 = vmatprep.subr.bf16.mxu0 %v9889_v62  ;;  %6977 = vmatprep.subr.bf16.mxu1 %v9892_v63  ;;  %v6175_v62 = vrot.slane %v6166_v59, %v845_v49  ;;  %v6183_v63 = vrot.slane %v6166_v59, %v853_v50 }
 0x419   :  { %6892 = vmatpush1.bf16.msra.mxu0 %v9887_v0  ;;  %6978 = vmatpush1.bf16.msra.mxu1 %v9890_v1 }
 0x41a   :  { %6893 = vmatprep.subr.bf16.mxu0 %v9895_v2  ;;  %6979 = vmatprep.subr.bf16.mxu1 %v9898_v3 }
 0x41d   :  { %6894 = vmatpush1.bf16.msra.mxu0 %v9893_v4  ;;  %6980 = vmatpush1.bf16.msra.mxu1 %v9896_v5 }
 0x41e   :  { %6895 = vmatprep.subr.bf16.mxu0 %v9901_v6  ;;  %6981 = vmatprep.subr.bf16.mxu1 %v9904_v7 }
 0x421   :  { %6896 = vmatpush1.bf16.msra.mxu0 %v9899_v8  ;;  %6982 = vmatpush1.bf16.msra.mxu1 %v9902_v9 }
 0x422   :  { %6897 = vmatprep.subr.bf16.mxu0 %v9907_v10  ;;  %6983 = vmatprep.subr.bf16.mxu1 %v9910_v11 }
 0x425   :  { %6898 = vmatpush1.bf16.msra.mxu0 %v9905_v12  ;;  %6984 = vmatpush1.bf16.msra.mxu1 %v9908_v13 }
 0x426   :  { %6899 = vmatprep.subr.bf16.mxu0 %v9913_v14  ;;  %6985 = vmatprep.subr.bf16.mxu1 %v9916_v15 }
 0x429   :  { %6900 = vmatpush1.bf16.msra.mxu0 %v9911_v17  ;;  %6986 = vmatpush1.bf16.msra.mxu1 %v9914_v18 }
 0x42a   :  { %6901 = vmatprep.subr.bf16.mxu0 %v9919_v19  ;;  %6987 = vmatprep.subr.bf16.mxu1 %v9922_v20 }
 0x42d   :  { %6902 = vmatpush1.bf16.msra.mxu0 %v9917_v21  ;;  %6988 = vmatpush1.bf16.msra.mxu1 %v9920_v22 }
 0x42e   :  { %8353 = vmatprep.subr.bf16.mxu0 %v9923_v23  ;;  %8375 = vmatprep.subr.bf16.mxu1 %v9924_v24 }
 0x430   :  { %6904 = vmatmul.mubr.bf16.vlgmr.msra.gmra.mrb[4].mxu0 %v12646_v16  ;;  %6990 = vmatmul.mubr.bf16.vlgmr.msra.gmra.mrb[4].mxu1 %v12646_v16  ;;  %v9932_v16 = vld [vmem:[%s12955_s5 + $0xd0] sm:$0xff]  }
 0x431   :  { %8354 = vmatpush3.bf16.msra.mxu0 %v9925_v25  ;;  %8376 = vmatpush3.bf16.msra.mxu1 %v9926_v26  ;;  %v8320_v26 = vld [vmem:[%s12958_s6] ss:$0 sm:$0xff] }
 0x432   :  { %8355 = vmatprep.subr.bf16.mxu0 %v9927_v27  ;;  %8377 = vmatprep.subr.bf16.mxu1 %v9928_v28 }
 0x435   :  { %8356 = vmatpush3.bf16.msra.mxu0 %v9929_v29  ;;  %8378 = vmatpush3.bf16.msra.mxu1 %v9930_v30 }
 0x436   :  { %8357 = vmatprep.subr.bf16.mxu0 %v9931_v31  ;;  %8379 = vmatprep.subr.bf16.mxu1 %v9932_v16 }
 0x439   :  { %8358 = vmatpush3.bf16.msra.mxu0 %v9933_v32  ;;  %8380 = vmatpush3.bf16.msra.mxu1 %v9934_v33 }
 0x43a   :  { %8359 = vmatprep.subr.bf16.mxu0 %v9935_v34  ;;  %8381 = vmatprep.subr.bf16.mxu1 %v9936_v35 }
 0x43d   :  { %8360 = vmatpush3.bf16.msra.mxu0 %v9937_v36  ;;  %8382 = vmatpush3.bf16.msra.mxu1 %v9938_v37 }
 0x43e   :  { %8361 = vmatprep.subr.bf16.mxu0 %v9939_v38  ;;  %8383 = vmatprep.subr.bf16.mxu1 %v9940_v39 }
 0x441   :  { %8362 = vmatpush3.bf16.msra.mxu0 %v9941_v40  ;;  %8384 = vmatpush3.bf16.msra.mxu1 %v9942_v41 }
 0x442   :  { %8363 = vmatprep.subr.bf16.mxu0 %v9943_v42  ;;  %8385 = vmatprep.subr.bf16.mxu1 %v9944_v43 }
 0x445   :  { %8364 = vmatpush3.bf16.msra.mxu0 %v9945_v44  ;;  %8386 = vmatpush3.bf16.msra.mxu1 %v9946_v48 }
 0x446   :  { %8365 = vmatprep.subr.bf16.mxu0 %v9947_v51  ;;  %8387 = vmatprep.subr.bf16.mxu1 %v9948_v52 }
 0x449   :  { %8366 = vmatpush3.bf16.msra.mxu0 %v9949_v53  ;;  %8388 = vmatpush3.bf16.msra.mxu1 %v9950_v54 }
 0x44a   :  { %8367 = vmatprep.subr.bf16.mxu0 %v9951_v55  ;;  %8389 = vmatprep.subr.bf16.mxu1 %v9952_v56 }
 0x44d   :  { %8368 = vmatpush3.bf16.msra.mxu0 %v9953_v57  ;;  %8390 = vmatpush3.bf16.msra.mxu1 %v9954_v58 }
 0x503   :  { %v6905_v0 = vpop.f32.mrb[4].mxu0  ;;  %v6991_v1 = vpop.f32.mrb[4].mxu1 }
 0x504   :  { %v8405_v2 = vadd.f32 %v6905_v0, %v6171_v60  ;;  %v8409_v3 = vadd.f32 %v6991_v1, %v6179_v61  ;;  %v6907_v4 = vpop.f32.mrb[5].mxu0  ;;  %v6993_v5 = vpop.f32.mrb[5].mxu1 }
 0x505   :  { %v8406_v6 = vadd.f32 %v6907_v4, %v6175_v62  ;;  %v8410_v7 = vadd.f32 %v6993_v5, %v6183_v63  ;;  %v6909_v8 = vpop.f32.mrb[6].mxu0  ;;  %v6995_v9 = vpop.f32.mrb[6].mxu1 }
 0x506   :  { %v8407_v46 = vadd.f32 %v6909_v8, %v6171_v60  ;;  %v8411_v10 = vadd.f32 %v6995_v9, %v6179_v61  ;;  %v6911_v11 = vpop.f32.mrb[7].mxu0  ;;  %v6997_v47 = vpop.f32.mrb[7].mxu1  ;;  %v7000_v49 = vmax.f32 %v8405_v2, 0.0  ;;  %v7002_v14 = vmax.f32 %v8409_v3, 0.0 }
 0x507   :  { %v8408_v12 = vadd.f32 %v6911_v11, %v6175_v62  ;;  %v8412_v13 = vadd.f32 %v6997_v47, %v6183_v63  ;;  %v7001_v15 = vmax.f32 %v8406_v6, 0.0  ;;  %v7003_v17 = vmax.f32 %v8410_v7, 0.0 }
 0x508   :  { %v7004_v45 = vmax.f32 %v8407_v46, 0.0  ;;  %v7006_v50 = vmax.f32 %v8411_v10, 0.0 }
 0x509   :  { %v7005_v18 = vmax.f32 %v8408_v12, 0.0  ;;  %v7007_v19 = vmax.f32 %v8412_v13, 0.0 }
 0x50a   :  { %v7008_v20 = vpack.c.bf16 %v7004_v45, %v7000_v49  ;;  %v7010_v21 = vpack.c.bf16 %v7006_v50, %v7002_v14 }
 0x50b   :  { %v7009_v22 = vpack.c.bf16 %v7005_v18, %v7001_v15  ;;  %v7011_v23 = vpack.c.bf16 %v7007_v19, %v7003_v17 }
 0x50d   :  { %7307 = vmatprep.mubr.bf16.mxu0 %v7009_v22  ;;  %7348 = vmatprep.mubr.bf16.mxu1 %v7011_v23 }
 0x50e   :  { %7308 = vmatmul.mubr.bf16.vlgmr.msra.gmra.mrb[8].mxu0 %v7008_v20  ;;  %7349 = vmatmul.mubr.bf16.vlgmr.msra.gmra.mrb[8].mxu1 %v7010_v21 }
 0x5e1   :  { %v8369_v24 = vpop.f32.mrb[8].mxu0  ;;  %v8391_v25 = vpop.f32.mrb[8].mxu1 }
 0x5e2   :  { %v8370_v27 = vpop.f32.mrb[9].mxu0  ;;  %v8392_v28 = vpop.f32.mrb[9].mxu1 }
 0x5e3   :  { %v8371_v29 = vadd.f32 %v8370_v27, %v8369_v24  ;;  %v8393_v30 = vadd.f32 %v8392_v28, %v8391_v25  ;;  %v8372_v31 = vpop.f32.mrb[10].mxu0  ;;  %v8394_v16 = vpop.f32.mrb[10].mxu1 }
 0x5e4   :  { %v8373_v32 = vpop.f32.mrb[11].mxu0  ;;  %v8395_v33 = vpop.f32.mrb[11].mxu1 }
 0x5e5   :  { %v7310_v34 = vadd.f32 %v8371_v29, %v8320_v26  ;;  %v8374_v35 = vadd.f32 %v8373_v32, %v8372_v31  ;;  %v8396_v36 = vadd.f32 %v8395_v33, %v8394_v16 }
 0x5e7   :  { %v7313_v37 = vadd.f32 %v8374_v35, %v8320_v26  ;;  %v7351_v38 = vadd.f32 %v8393_v30, %v7310_v34 }
 0x5e9   :  { %7357 = vmax.xlane.f32.xlu0 %v7351_v38  ;;  %v7354_v39 = vadd.f32 %v8396_v36, %v7313_v37 }
 0x5ed   :  { %7359 = vmax.xlane.f32.xlu0 %v7354_v39 }
 0x676   :  { %v7358_v40 = vpop.xlane.xlu0 %7357 }
 0x677   :  { %v7361_v41 = vsub.f32 %v7351_v38, %v7358_v40 }
 0x679   :  { %v7363_v42 = vmul.f32 1.442695, %v7361_v41 }
 0x67a   :  { %v7360_v43 = vpop.xlane.xlu0 %7359 }
 0x67b   :  { %9955 = vpow2.f32 %v7363_v42  ;;  %v7362_v44 = vsub.f32 %v7354_v39, %v7360_v43 }
 0x67d   :  { %v7365_v48 = vmul.f32 1.442695, %v7362_v44 }
 0x67f   :  { %9957 = vpow2.f32 %v7365_v48 }
 0x685   :  { %v9956_v51 = vpop.eup %9955 }
 0x686   :  { %7367 = vadd.xlane.f32.xlu1 %v9956_v51 }
 0x689   :  { %v9958_v52 = vpop.eup %9957 }
 0x68a   :  { %7369 = vadd.xlane.f32.xlu1 %v9958_v52 }
 0x713   :  { %v7368_v53 = vpop.xlane.xlu1 %7367 }
 0x714   :  { %9959 = vrcp.f32 %v7368_v53 }
 0x717   :  { %v7370_v54 = vpop.xlane.xlu1 %7369 }
 0x718   :  { %9961 = vrcp.f32 %v7370_v54 }
 0x71e   :  { %v9960_v55 = vpop.eup %9959 }
 0x71f   :  { %v7373_v56 = vmul.f32 %v9960_v55, %v9956_v51 }
 0x721   :  { %7375 = vst [vmem:[%s12959_s7] sm:$0xff] %v7373_v56 }
 0x722   :  { %v9962_v57 = vpop.eup %9961 }
 0x723   :  { %v7374_v58 = vmul.f32 %v9962_v57, %v9958_v52 }
 0x725   :  { %7376 = vst [vmem:[%s12959_s7 + $0x8] sm:$0xff] %v7374_v58 }

</bundles_post_ra>
